<compile_context>
chip_gen: v7x
topology: tpu7x:2x2x1
jax: 0.10.0
libtpu: 0.0.40
codegen_flags: <defaults>
</compile_context>

<pallas_src>
import functools

import jax
import jax.numpy as jnp
from jax.experimental import pallas as pl
from jax.experimental.pallas import tpu as pltpu


def _round_up(x, m):
    return (x + m - 1) // m * m


def _pick_tile(n, candidates):
    for c in candidates:
        if n % c == 0:
            return c
    return n


# ------------------------------------------------------------------ #
# Pallas kernel 1: fused relu?((X @ W) * scale + shift)
# Primary path: tk == K (single dot, no accumulation), 1-D parallel grid
# over the N axis.  Output dtype is chosen per layer (bf16 between layers).
# ------------------------------------------------------------------ #
def _fc_kernel(x_ref, w_ref, scale_ref, shift_ref, o_ref, *, relu):
    z = jnp.dot(x_ref[...], w_ref[...], preferred_element_type=jnp.float32)
    z = z * scale_ref[...] + shift_ref[...]
    if relu:
        z = jnp.maximum(z, 0.0)
    o_ref[...] = z.astype(o_ref.dtype)


def _fc_accum_kernel(x_ref, w_ref, scale_ref, shift_ref, o_ref, acc_ref, *, relu):
    # Fallback for K > 4096.  Correctness relies on the K axis being the LAST
    # (innermost) grid axis so acc_ref stays resident across it.
    k = pl.program_id(1)

    @pl.when(k == 0)
    def _():
        acc_ref[...] = jnp.zeros_like(acc_ref)

    acc_ref[...] += jnp.dot(
        x_ref[...], w_ref[...], preferred_element_type=jnp.float32
    )

    @pl.when(k == pl.num_programs(1) - 1)
    def _():
        z = acc_ref[...] * scale_ref[...] + shift_ref[...]
        if relu:
            z = jnp.maximum(z, 0.0)
        o_ref[...] = z.astype(o_ref.dtype)


_MAX_SINGLE_K = 4096  # 8x4096 bf16 x-block = 64 KiB; 4096x512 bf16 w-tile = 4 MiB.


def fused_linear(x_pad, w, scale, shift, *, relu, out_dtype=jnp.float32):
    """relu?((x_pad @ w) * scale + shift).

    x_pad: (Mp, K) bf16, Mp multiple of 8, K multiple of 128 (or K <= 4096 full).
    w:     (K, Np) bf16, Np multiple of 128 (pre-padded at prep time).
    scale/shift: (1, Np) f32.  Returns (Mp, Np) in out_dtype.
    """
    Mp, K = x_pad.shape
    Kw, Np = w.shape
    assert K == Kw and Mp % 8 == 0 and Np % 128 == 0

    tn = _pick_tile(Np, (512, 256, 128))

    if K <= _MAX_SINGLE_K:
        kernel = functools.partial(_fc_kernel, relu=relu)
        return pl.pallas_call(
            kernel,
            out_shape=jax.ShapeDtypeStruct((Mp, Np), out_dtype),
            grid_spec=pltpu.PrefetchScalarGridSpec(
                num_scalar_prefetch=0,
                grid=(Np // tn,),
                in_specs=[
                    pl.BlockSpec((Mp, K), lambda j: (0, 0)),
                    pl.BlockSpec((K, tn), lambda j: (0, j)),
                    pl.BlockSpec((1, tn), lambda j: (0, j)),
                    pl.BlockSpec((1, tn), lambda j: (0, j)),
                ],
                out_specs=pl.BlockSpec((Mp, tn), lambda j: (0, j)),
            ),
            compiler_params=pltpu.CompilerParams(
                dimension_semantics=("parallel",)
            ),
        )(x_pad, w, scale, shift)

    # K > 4096: tiled reduction fallback (f32 VMEM accumulator scratch).
    tk = _pick_tile(K, (2048, 1024, 512, 256, 128))
    kernel = functools.partial(_fc_accum_kernel, relu=relu)
    return pl.pallas_call(
        kernel,
        out_shape=jax.ShapeDtypeStruct((Mp, Np), out_dtype),
        grid_spec=pltpu.PrefetchScalarGridSpec(
            num_scalar_prefetch=0,
            grid=(Np // tn, K // tk),  # K reduction axis last (innermost).
            in_specs=[
                pl.BlockSpec((Mp, tk), lambda j, k: (0, k)),
                pl.BlockSpec((tk, tn), lambda j, k: (k, j)),
                pl.BlockSpec((1, tn), lambda j, k: (0, j)),
                pl.BlockSpec((1, tn), lambda j, k: (0, j)),
            ],
            out_specs=pl.BlockSpec((Mp, tn), lambda j, k: (0, j)),
            scratch_shapes=[pltpu.VMEM((Mp, tn), jnp.float32)],
        ),
        compiler_params=pltpu.CompilerParams(
            dimension_semantics=("parallel", "arbitrary")
        ),
    )(x_pad, w, scale, shift)


# ------------------------------------------------------------------ #
# Pallas kernel 2: ALL conv branches fused in one call.
# Per branch: im2col-matmul -> BN+ReLU -> 1x1-conv matmul -> BN+ReLU ->
# global max-pool over T.  Pooled features from every branch are assembled
# in registers into one lane-dense (rows_pad, cols_pad) bf16 slab (padded
# with zeros) and written as a single unmasked full-block store; the slab
# feeds fc1 directly (fc1's K is pre-padded to cols_pad).
# ------------------------------------------------------------------ #
def _conv_head_kernel(*refs, num_branches, batch, t_outs):
    o_ref = refs[-1]
    rows_pad, cols_pad = o_ref.shape

    parts = []
    for bi in range(num_branches):
        p_ref, w1, s1, h1, w2, s2, h2 = refs[7 * bi : 7 * bi + 7]
        z1 = jnp.dot(p_ref[...], w1[...], preferred_element_type=jnp.float32)
        z1 = jnp.maximum(z1 * s1[...] + h1[...], 0.0)                 # (B*T, FN)
        z2 = jnp.dot(z1.astype(w2.dtype), w2[...],
                     preferred_element_type=jnp.float32)
        z2 = jnp.maximum(z2 * s2[...] + h2[...], 0.0)                 # (B*T, 4FN)

        # Global max-pool over the T rows of each batch element (rows are
        # batch-major).  -inf mask keeps this exact even without ReLU.
        t = t_outs[bi]
        rows = jax.lax.broadcasted_iota(jnp.int32, z2.shape, 0)
        neg_inf = jnp.full_like(z2, -jnp.inf)
        pooled = jnp.concatenate(
            [
                jnp.max(
                    jnp.where((rows >= b * t) & (rows < (b + 1) * t), z2, neg_inf),
                    axis=0,
                    keepdims=True,
                )
                for b in range(batch)
            ],
            axis=0,
        )                                                             # (B, 4FN)
        parts.append(pooled)

    slab = jnp.concatenate(parts, axis=1) if len(parts) > 1 else parts[0]
    c = slab.shape[1]
    if cols_pad > c:
        slab = jnp.concatenate(
            [slab, jnp.zeros((batch, cols_pad - c), jnp.float32)], axis=1
        )
    if rows_pad > batch:
        slab = jnp.concatenate(
            [slab, jnp.zeros((rows_pad - batch, cols_pad), jnp.float32)], axis=0
        )
    o_ref[...] = slab.astype(o_ref.dtype)                             # one full store


def conv_head(branch_inputs, *, batch, rows_pad, cols_pad, out_dtype=jnp.bfloat16):
    """branch_inputs: list of (patches, w1, s1, h1, w2, s2, h2, t_out) tuples.

    Returns the pooled feature slab (rows_pad, cols_pad) in out_dtype, ready
    to be fed to fc1 without any further pad / cast / concat.
    """
    operands = []
    in_specs = []
    t_outs = []
    for patches, w1, s1, h1, w2, s2, h2, t_out in branch_inputs:
        for a in (patches, w1, s1, h1, w2, s2, h2):
            operands.append(a)
            in_specs.append(pl.BlockSpec(a.shape, lambda: (0, 0)))
        t_outs.append(t_out)

    kernel = functools.partial(
        _conv_head_kernel,
        num_branches=len(branch_inputs),
        batch=batch,
        t_outs=tuple(t_outs),
    )
    return pl.pallas_call(
        kernel,
        out_shape=jax.ShapeDtypeStruct((rows_pad, cols_pad), out_dtype),
        in_specs=in_specs,
        out_specs=pl.BlockSpec((rows_pad, cols_pad), lambda: (0, 0)),
    )(*operands)


# ------------------------------------------------------------------ #
# Parameter setup (deterministic, synthetic), BN folding, and one-time
# inference repacking (transpose / pad / bf16 cast happens here, NOT per call).
# ------------------------------------------------------------------ #
def _bn_fold(gamma, beta, mean, var, bias, eps=1e-5):
    scale = gamma / jnp.sqrt(var + eps)
    shift = beta + (bias - mean) * scale
    return scale, shift


def init_params(key, vocab, word_dim, filters, filter_num, feat_dims):
    keys = list(jax.random.split(key, 128))
    kit = iter(keys)

    def nrm(shape, s=0.1):
        return jax.random.normal(next(kit), shape, jnp.float32) * s

    def bn(c):
        gamma = 1.0 + nrm((c,), 0.05)
        beta = nrm((c,), 0.05)
        mean = nrm((c,), 0.05)
        var = 1.0 + jnp.abs(nrm((c,), 0.05))
        return (gamma, beta, mean, var)

    params = {}
    # Embeddings (padding_idx == vocab row zeroed, matching nn.Embedding).
    word_matrix = nrm((vocab, word_dim), 0.5)
    params["emb_static"] = jnp.concatenate(
        [word_matrix, jnp.zeros((1, word_dim), jnp.float32)], axis=0
    )
    emb_u = nrm((vocab + 1, word_dim), 0.5)
    params["emb_unstatic"] = emb_u.at[vocab].set(0.0)

    convs = []
    for fh, fn in zip(filters, filter_num):
        convs.append(
            {
                "w1": nrm((fn, 2, fh, word_dim)),
                "b1": nrm((fn,)),
                "bn1": bn(fn),
                "w2": nrm((4 * fn, fn, 1, 1)),
                "b2": nrm((4 * fn,)),
                "bn2": bn(4 * fn),
            }
        )
    params["convs"] = convs

    c_fc = 4 * sum(filter_num)
    params["fc1_w"] = nrm((4096, c_fc), 0.02)
    params["fc1_b"] = nrm((4096,), 0.02)
    params["bn_fc1"] = bn(4096)
    params["fc2_w"] = nrm((4096, 4096), 0.02)
    params["fc2_b"] = nrm((4096,), 0.02)
    params["bn_fc2"] = bn(4096)
    params["fc3_w"] = nrm((feat_dims, 4096), 0.02)
    params["fc3_b"] = nrm((feat_dims,), 0.02)
    return params


def prepare_inference_params(params, filters, filter_num, word_dim):
    """One-time repack: fold BN, transpose, pad to 128, cast matmul weights to bf16."""
    prep = {
        "emb_unstatic": params["emb_unstatic"],
        "emb_static": params["emb_static"],
    }

    convs = []
    for (fh, fn), c in zip(zip(filters, filter_num), params["convs"]):
        s1, h1 = _bn_fold(*c["bn1"], c["b1"])
        s2, h2 = _bn_fold(*c["bn2"], c["b2"])
        convs.append(
            {
                "w1": c["w1"].reshape(fn, 2 * fh * word_dim).T.astype(jnp.bfloat16),
                "s1": s1.reshape(1, -1).astype(jnp.float32),
                "h1": h1.reshape(1, -1).astype(jnp.float32),
                "w2": c["w2"].reshape(4 * fn, fn).T.astype(jnp.bfloat16),
                "s2": s2.reshape(1, -1).astype(jnp.float32),
                "h2": h2.reshape(1, -1).astype(jnp.float32),
            }
        )
    prep["convs"] = convs

    def pack_fc(w_out_in, bias, bn_stats, k_pad=None):
        n, k = w_out_in.shape
        n_pad = _round_up(n, 128)
        kp = k if k_pad is None else k_pad
        if bn_stats is not None:
            scale, shift = _bn_fold(*bn_stats, bias)
        else:
            # Padded output columns stay exactly 0 because scale/shift pad with 0.
            scale, shift = jnp.ones((n,), jnp.float32), bias
        wp = (
            jnp.zeros((kp, n_pad), jnp.bfloat16)
            .at[:k, :n]
            .set(w_out_in.T.astype(jnp.bfloat16))
        )
        sp = jnp.zeros((1, n_pad), jnp.float32).at[0, :n].set(scale)
        hp = jnp.zeros((1, n_pad), jnp.float32).at[0, :n].set(shift)
        return wp, sp, hp

    c_fc = 4 * sum(filter_num)
    c_pad = _round_up(c_fc, 128)  # fc1 K padded to match the lane-dense conv slab.
    prep["fc1_w"], prep["fc1_s"], prep["fc1_h"] = pack_fc(
        params["fc1_w"], params["fc1_b"], params["bn_fc1"], k_pad=c_pad
    )
    prep["fc2_w"], prep["fc2_s"], prep["fc2_h"] = pack_fc(
        params["fc2_w"], params["fc2_b"], params["bn_fc2"]
    )
    prep["fc3_w"], prep["fc3_s"], prep["fc3_h"] = pack_fc(
        params["fc3_w"], params["fc3_b"], None
    )
    return prep


# ------------------------------------------------------------------ #
# Forward pass (glue in JAX, hot paths in Pallas).
# ------------------------------------------------------------------ #
def forward(prep, index_list, *, filters, filter_num, max_length, word_dim,
            feature_dims):
    B = index_list.shape[0]
    eu = prep["emb_unstatic"][index_list]  # (B, L, D)
    es = prep["emb_static"][index_list]    # (B, L, D)
    x = jnp.stack([eu, es], axis=1)        # (B, 2, L, D)  (NCHW)

    rows_pad = _round_up(B, 8)
    c_feat = 4 * sum(filter_num)
    cols_pad = _round_up(c_feat, 128)

    branch_inputs = []
    for i, (fh, fn) in enumerate(zip(filters, filter_num)):
        br = prep["convs"][i]
        t_out = max_length - fh + 1
        # TODO(synk): im2col via Python-loop slicing; negligible at max_length=8
        # (use lax.conv_general_dilated_patches / in-kernel pl.ds windows for
        # large sequences).
        patches = (
            jnp.stack([x[:, :, t : t + fh, :] for t in range(t_out)], axis=1)
            .reshape(B * t_out, 2 * fh * word_dim)
            .astype(jnp.bfloat16)
        )  # rows are batch-major: (b * t_out + t)
        branch_inputs.append(
            (patches, br["w1"], br["s1"], br["h1"], br["w2"], br["s2"], br["h2"],
             t_out)
        )

    # One fused pallas_call for every branch -> lane-dense bf16 slab for fc1.
    feat = conv_head(
        branch_inputs, batch=B, rows_pad=rows_pad, cols_pad=cols_pad,
        out_dtype=jnp.bfloat16,
    )  # (rows_pad, cols_pad) bf16

    # FC head (Dropout == identity in eval mode; BN1d folded into scale/shift).
    # Intermediate activations stay bf16 inside the kernels; padded rows/cols
    # are cropped at the very end.
    h1 = fused_linear(feat, prep["fc1_w"], prep["fc1_s"], prep["fc1_h"],
                      relu=True, out_dtype=jnp.bfloat16)
    h2 = fused_linear(h1, prep["fc2_w"], prep["fc2_s"], prep["fc2_h"],
                      relu=True, out_dtype=jnp.bfloat16)
    h3 = fused_linear(h2, prep["fc3_w"], prep["fc3_s"], prep["fc3_h"],
                      relu=False, out_dtype=jnp.float32)
    out = h3[:B, :feature_dims]

    # F.normalize(out): L2 over dim 1 with eps=1e-12
    norm = jnp.sqrt(jnp.sum(out * out, axis=1, keepdims=True))
    return out / jnp.maximum(norm, 1e-12)


if __name__ == "__main__":
    # Small, module-consistent configuration (DEPTH = 2 branch implemented).
    VOCAB_SIZE = 20
    WORD_DIM = 32
    MAX_LENGTH = 8
    BATCH = 2
    FILTERS = [3, 4]
    FILTER_NUM = [8, 8]
    FEATURE_DIMS = 16

    key = jax.random.PRNGKey(0)
    pkey, ikey = jax.random.split(key)
    params = init_params(pkey, VOCAB_SIZE, WORD_DIM, FILTERS, FILTER_NUM, FEATURE_DIMS)
    prep = prepare_inference_params(params, FILTERS, FILTER_NUM, WORD_DIM)

    index_list = jax.random.randint(
        ikey, (BATCH, MAX_LENGTH), 0, VOCAB_SIZE + 1, dtype=jnp.int32
    )

    fwd = jax.jit(
        functools.partial(
            forward,
            filters=tuple(FILTERS),
            filter_num=tuple(FILTER_NUM),
            max_length=MAX_LENGTH,
            word_dim=WORD_DIM,
            feature_dims=FEATURE_DIMS,
        )
    )
    out = fwd(prep, index_list)
    out = jax.block_until_ready(out)
    assert out.shape == (BATCH, FEATURE_DIMS), out.shape
    assert bool(jnp.all(jnp.isfinite(out)))
    print("KERNEL_OK")
</pallas_src>

<mosaic_0001>
module attributes {stable_mosaic.version = 11 : i64} {
  func.func @_fc_kernel(%arg0: i32, %arg1: memref<8x4096xbf16, #tpu.memory_space<vmem>>, %arg2: memref<4096x512xbf16, #tpu.memory_space<vmem>>, %arg3: memref<1x512xf32, #tpu.memory_space<vmem>>, %arg4: memref<1x512xf32, #tpu.memory_space<vmem>>, %arg5: memref<8x512xbf16, #tpu.memory_space<vmem>>) attributes {dimension_semantics = [#tpu.dimension_semantics<parallel>], iteration_bounds = array<i64: 8>, scalar_prefetch = 0 : i64, scratch_operands = 0 : i64, tpu.core_type = #tpu.core_type<tc>, window_params = [{pipeline_mode = #tpu.pipeline_mode<synchronous>, transform_indices = @transform_0, window_bounds = array<i64: 8, 4096>}, {transform_indices = @transform_1, window_bounds = array<i64: 4096, 512>}, {transform_indices = @transform_2, window_bounds = array<i64: 1, 512>}, {transform_indices = @transform_3, window_bounds = array<i64: 1, 512>}, {transform_indices = @transform_4, window_bounds = array<i64: 8, 512>}]} {
    %c0 = arith.constant 0 : index
    %c0_0 = arith.constant 0 : index
    %0 = vector.load %arg1[%c0, %c0_0] : memref<8x4096xbf16, #tpu.memory_space<vmem>>, vector<8x4096xbf16>
    %c0_1 = arith.constant 0 : index
    %c0_2 = arith.constant 0 : index
    %1 = vector.load %arg2[%c0_1, %c0_2] : memref<4096x512xbf16, #tpu.memory_space<vmem>>, vector<4096x512xbf16>
    %cst = arith.constant dense<0.000000e+00> : vector<8x512xf32>
    %2 = tpu.matmul %0, %1, %cst {dimension_numbers = #tpu.dot_dimension_numbers<[1], [0], [0], [1], [0, 0, 1, 1], [], []>} : vector<8x4096xbf16>, vector<4096x512xbf16>, vector<8x512xf32> -> vector<8x512xf32>
    %c0_3 = arith.constant 0 : index
    %c0_4 = arith.constant 0 : index
    %3 = vector.load %arg3[%c0_3, %c0_4] : memref<1x512xf32, #tpu.memory_space<vmem>>, vector<1x512xf32>
    %4 = vector.broadcast %3 : vector<1x512xf32> to vector<8x512xf32>
    %5 = arith.mulf %2, %4 : vector<8x512xf32>
    %c0_5 = arith.constant 0 : index
    %c0_6 = arith.constant 0 : index
    %6 = vector.load %arg4[%c0_5, %c0_6] : memref<1x512xf32, #tpu.memory_space<vmem>>, vector<1x512xf32>
    %7 = vector.broadcast %6 : vector<1x512xf32> to vector<8x512xf32>
    %8 = arith.addf %5, %7 : vector<8x512xf32>
    %cst_7 = arith.constant 0.000000e+00 : f32
    %9 = vector.broadcast %cst_7 : f32 to vector<8x512xf32>
    %10 = arith.maximumf %8, %9 : vector<8x512xf32>
    %11 = arith.truncf %10 : vector<8x512xf32> to vector<8x512xbf16>
    %c0_8 = arith.constant 0 : index
    %c0_9 = arith.constant 0 : index
    %12 = vector.load %arg5[%c0_8, %c0_9] : memref<8x512xbf16, #tpu.memory_space<vmem>>, vector<8x512xbf16>
    tpu.vector_store %arg5[%c0_8, %c0_9], %11 {strides = array<i32>} : memref<8x512xbf16, #tpu.memory_space<vmem>>, vector<8x512xbf16>,
    return
  }
  func.func @transform_0(%arg0: i32) -> (i32, i32) {
    %c0_i32 = arith.constant 0 : i32
    %c0_i32_0 = arith.constant 0 : i32
    %c0_i32_1 = arith.constant 0 : i32
    return %c0_i32, %c0_i32_0 : i32, i32
  }
  func.func @transform_1(%arg0: i32) -> (i32, i32) {
    %c0_i32 = arith.constant 0 : i32
    %c0_i32_0 = arith.constant 0 : i32
    return %c0_i32, %arg0 : i32, i32
  }
  func.func @transform_2(%arg0: i32) -> (i32, i32) {
    %c0_i32 = arith.constant 0 : i32
    %c0_i32_0 = arith.constant 0 : i32
    return %c0_i32, %arg0 : i32, i32
  }
  func.func @transform_3(%arg0: i32) -> (i32, i32) {
    %c0_i32 = arith.constant 0 : i32
    %c0_i32_0 = arith.constant 0 : i32
    return %c0_i32, %arg0 : i32, i32
  }
  func.func @transform_4(%arg0: i32) -> (i32, i32) {
    %c0_i32 = arith.constant 0 : i32
    %c0_i32_0 = arith.constant 0 : i32
    return %c0_i32, %arg0 : i32, i32
  }
}

module attributes {stable_mosaic.version = 11 : i64} {
  func.func @_fc_kernel(%arg0: i32, %arg1: memref<8x4096xbf16, #tpu.memory_space<vmem>>, %arg2: memref<4096x128xbf16, #tpu.memory_space<vmem>>, %arg3: memref<1x128xf32, #tpu.memory_space<vmem>>, %arg4: memref<1x128xf32, #tpu.memory_space<vmem>>, %arg5: memref<8x128xf32, #tpu.memory_space<vmem>>) attributes {dimension_semantics = [#tpu.dimension_semantics<parallel>], iteration_bounds = array<i64: 1>, scalar_prefetch = 0 : i64, scratch_operands = 0 : i64, tpu.core_type = #tpu.core_type<tc>, window_params = [{pipeline_mode = #tpu.pipeline_mode<synchronous>, transform_indices = @transform_0, window_bounds = array<i64: 8, 4096>}, {transform_indices = @transform_1, window_bounds = array<i64: 4096, 128>}, {transform_indices = @transform_2, window_bounds = array<i64: 1, 128>}, {transform_indices = @transform_3, window_bounds = array<i64: 1, 128>}, {transform_indices = @transform_4, window_bounds = array<i64: 8, 128>}]} {
    %c0 = arith.constant 0 : index
    %c0_0 = arith.constant 0 : index
    %0 = vector.load %arg1[%c0, %c0_0] : memref<8x4096xbf16, #tpu.memory_space<vmem>>, vector<8x4096xbf16>
    %c0_1 = arith.constant 0 : index
    %c0_2 = arith.constant 0 : index
    %1 = vector.load %arg2[%c0_1, %c0_2] : memref<4096x128xbf16, #tpu.memory_space<vmem>>, vector<4096x128xbf16>
    %cst = arith.constant dense<0.000000e+00> : vector<8x128xf32>
    %2 = tpu.matmul %0, %1, %cst {dimension_numbers = #tpu.dot_dimension_numbers<[1], [0], [0], [1], [0, 0, 1, 1], [], []>} : vector<8x4096xbf16>, vector<4096x128xbf16>, vector<8x128xf32> -> vector<8x128xf32>
    %c0_3 = arith.constant 0 : index
    %c0_4 = arith.constant 0 : index
    %3 = vector.load %arg3[%c0_3, %c0_4] : memref<1x128xf32, #tpu.memory_space<vmem>>, vector<1x128xf32>
    %4 = vector.broadcast %3 : vector<1x128xf32> to vector<8x128xf32>
    %5 = arith.mulf %2, %4 : vector<8x128xf32>
    %c0_5 = arith.constant 0 : index
    %c0_6 = arith.constant 0 : index
    %6 = vector.load %arg4[%c0_5, %c0_6] : memref<1x128xf32, #tpu.memory_space<vmem>>, vector<1x128xf32>
    %7 = vector.broadcast %6 : vector<1x128xf32> to vector<8x128xf32>
    %8 = arith.addf %5, %7 : vector<8x128xf32>
    %c0_7 = arith.constant 0 : index
    %c0_8 = arith.constant 0 : index
    %9 = vector.load %arg5[%c0_7, %c0_8] : memref<8x128xf32, #tpu.memory_space<vmem>>, vector<8x128xf32>
    tpu.vector_store %arg5[%c0_7, %c0_8], %8 {strides = array<i32>} : memref<8x128xf32, #tpu.memory_space<vmem>>, vector<8x128xf32>,
    return
  }
  func.func @transform_0(%arg0: i32) -> (i32, i32) {
    %c0_i32 = arith.constant 0 : i32
    %c0_i32_0 = arith.constant 0 : i32
    %c0_i32_1 = arith.constant 0 : i32
    return %c0_i32, %c0_i32_0 : i32, i32
  }
  func.func @transform_1(%arg0: i32) -> (i32, i32) {
    %c0_i32 = arith.constant 0 : i32
    %c0_i32_0 = arith.constant 0 : i32
    return %c0_i32, %arg0 : i32, i32
  }
  func.func @transform_2(%arg0: i32) -> (i32, i32) {
    %c0_i32 = arith.constant 0 : i32
    %c0_i32_0 = arith.constant 0 : i32
    return %c0_i32, %arg0 : i32, i32
  }
  func.func @transform_3(%arg0: i32) -> (i32, i32) {
    %c0_i32 = arith.constant 0 : i32
    %c0_i32_0 = arith.constant 0 : i32
    return %c0_i32, %arg0 : i32, i32
  }
  func.func @transform_4(%arg0: i32) -> (i32, i32) {
    %c0_i32 = arith.constant 0 : i32
    %c0_i32_0 = arith.constant 0 : i32
    return %c0_i32, %arg0 : i32, i32
  }
}

module attributes {stable_mosaic.version = 11 : i64} {
  func.func @_fc_kernel(%arg0: i32, %arg1: memref<8x128xbf16, #tpu.memory_space<vmem>>, %arg2: memref<128x512xbf16, #tpu.memory_space<vmem>>, %arg3: memref<1x512xf32, #tpu.memory_space<vmem>>, %arg4: memref<1x512xf32, #tpu.memory_space<vmem>>, %arg5: memref<8x512xbf16, #tpu.memory_space<vmem>>) attributes {dimension_semantics = [#tpu.dimension_semantics<parallel>], iteration_bounds = array<i64: 8>, scalar_prefetch = 0 : i64, scratch_operands = 0 : i64, tpu.core_type = #tpu.core_type<tc>, window_params = [{pipeline_mode = #tpu.pipeline_mode<synchronous>, transform_indices = @transform_0, window_bounds = array<i64: 8, 128>}, {transform_indices = @transform_1, window_bounds = array<i64: 128, 512>}, {transform_indices = @transform_2, window_bounds = array<i64: 1, 512>}, {transform_indices = @transform_3, window_bounds = array<i64: 1, 512>}, {transform_indices = @transform_4, window_bounds = array<i64: 8, 512>}]} {
    %c0 = arith.constant 0 : index
    %c0_0 = arith.constant 0 : index
    %0 = vector.load %arg1[%c0, %c0_0] : memref<8x128xbf16, #tpu.memory_space<vmem>>, vector<8x128xbf16>
    %c0_1 = arith.constant 0 : index
    %c0_2 = arith.constant 0 : index
    %1 = vector.load %arg2[%c0_1, %c0_2] : memref<128x512xbf16, #tpu.memory_space<vmem>>, vector<128x512xbf16>
    %cst = arith.constant dense<0.000000e+00> : vector<8x512xf32>
    %2 = tpu.matmul %0, %1, %cst {dimension_numbers = #tpu.dot_dimension_numbers<[1], [0], [0], [1], [0, 0, 1, 1], [], []>} : vector<8x128xbf16>, vector<128x512xbf16>, vector<8x512xf32> -> vector<8x512xf32>
    %c0_3 = arith.constant 0 : index
    %c0_4 = arith.constant 0 : index
    %3 = vector.load %arg3[%c0_3, %c0_4] : memref<1x512xf32, #tpu.memory_space<vmem>>, vector<1x512xf32>
    %4 = vector.broadcast %3 : vector<1x512xf32> to vector<8x512xf32>
    %5 = arith.mulf %2, %4 : vector<8x512xf32>
    %c0_5 = arith.constant 0 : index
    %c0_6 = arith.constant 0 : index
    %6 = vector.load %arg4[%c0_5, %c0_6] : memref<1x512xf32, #tpu.memory_space<vmem>>, vector<1x512xf32>
    %7 = vector.broadcast %6 : vector<1x512xf32> to vector<8x512xf32>
    %8 = arith.addf %5, %7 : vector<8x512xf32>
    %cst_7 = arith.constant 0.000000e+00 : f32
    %9 = vector.broadcast %cst_7 : f32 to vector<8x512xf32>
    %10 = arith.maximumf %8, %9 : vector<8x512xf32>
    %11 = arith.truncf %10 : vector<8x512xf32> to vector<8x512xbf16>
    %c0_8 = arith.constant 0 : index
    %c0_9 = arith.constant 0 : index
    %12 = vector.load %arg5[%c0_8, %c0_9] : memref<8x512xbf16, #tpu.memory_space<vmem>>, vector<8x512xbf16>
    tpu.vector_store %arg5[%c0_8, %c0_9], %11 {strides = array<i32>} : memref<8x512xbf16, #tpu.memory_space<vmem>>, vector<8x512xbf16>,
    return
  }
  func.func @transform_0(%arg0: i32) -> (i32, i32) {
    %c0_i32 = arith.constant 0 : i32
    %c0_i32_0 = arith.constant 0 : i32
    %c0_i32_1 = arith.constant 0 : i32
    return %c0_i32, %c0_i32_0 : i32, i32
  }
  func.func @transform_1(%arg0: i32) -> (i32, i32) {
    %c0_i32 = arith.constant 0 : i32
    %c0_i32_0 = arith.constant 0 : i32
    return %c0_i32, %arg0 : i32, i32
  }
  func.func @transform_2(%arg0: i32) -> (i32, i32) {
    %c0_i32 = arith.constant 0 : i32
    %c0_i32_0 = arith.constant 0 : i32
    return %c0_i32, %arg0 : i32, i32
  }
  func.func @transform_3(%arg0: i32) -> (i32, i32) {
    %c0_i32 = arith.constant 0 : i32
    %c0_i32_0 = arith.constant 0 : i32
    return %c0_i32, %arg0 : i32, i32
  }
  func.func @transform_4(%arg0: i32) -> (i32, i32) {
    %c0_i32 = arith.constant 0 : i32
    %c0_i32_0 = arith.constant 0 : i32
    return %c0_i32, %arg0 : i32, i32
  }
}

module attributes {stable_mosaic.version = 11 : i64} {
  func.func @_conv_head_kernel(%arg0: memref<12x192xbf16, #tpu.memory_space<vmem>>, %arg1: memref<192x8xbf16, #tpu.memory_space<vmem>>, %arg2: memref<1x8xf32, #tpu.memory_space<vmem>>, %arg3: memref<1x8xf32, #tpu.memory_space<vmem>>, %arg4: memref<8x32xbf16, #tpu.memory_space<vmem>>, %arg5: memref<1x32xf32, #tpu.memory_space<vmem>>, %arg6: memref<1x32xf32, #tpu.memory_space<vmem>>, %arg7: memref<10x256xbf16, #tpu.memory_space<vmem>>, %arg8: memref<256x8xbf16, #tpu.memory_space<vmem>>, %arg9: memref<1x8xf32, #tpu.memory_space<vmem>>, %arg10: memref<1x8xf32, #tpu.memory_space<vmem>>, %arg11: memref<8x32xbf16, #tpu.memory_space<vmem>>, %arg12: memref<1x32xf32, #tpu.memory_space<vmem>>, %arg13: memref<1x32xf32, #tpu.memory_space<vmem>>, %arg14: memref<8x128xbf16, #tpu.memory_space<vmem>>) attributes {dimension_semantics = [], scalar_prefetch = 0 : i64, scratch_operands = 0 : i64, tpu.core_type = #tpu.core_type<tc>} {
    %c0 = arith.constant 0 : index
    %c0_0 = arith.constant 0 : index
    %0 = vector.load %arg0[%c0, %c0_0] : memref<12x192xbf16, #tpu.memory_space<vmem>>, vector<12x192xbf16>
    %c0_1 = arith.constant 0 : index
    %c0_2 = arith.constant 0 : index
    %1 = vector.load %arg1[%c0_1, %c0_2] : memref<192x8xbf16, #tpu.memory_space<vmem>>, vector<192x8xbf16>
    %cst = arith.constant dense<0.000000e+00> : vector<12x8xf32>
    %2 = tpu.matmul %0, %1, %cst {dimension_numbers = #tpu.dot_dimension_numbers<[1], [0], [0], [1], [0, 0, 1, 1], [], []>} : vector<12x192xbf16>, vector<192x8xbf16>, vector<12x8xf32> -> vector<12x8xf32>
    %c0_3 = arith.constant 0 : index
    %c0_4 = arith.constant 0 : index
    %3 = vector.load %arg2[%c0_3, %c0_4] : memref<1x8xf32, #tpu.memory_space<vmem>>, vector<1x8xf32>
    %4 = vector.broadcast %3 : vector<1x8xf32> to vector<12x8xf32>
    %5 = arith.mulf %2, %4 : vector<12x8xf32>
    %c0_5 = arith.constant 0 : index
    %c0_6 = arith.constant 0 : index
    %6 = vector.load %arg3[%c0_5, %c0_6] : memref<1x8xf32, #tpu.memory_space<vmem>>, vector<1x8xf32>
    %7 = vector.broadcast %6 : vector<1x8xf32> to vector<12x8xf32>
    %8 = arith.addf %5, %7 : vector<12x8xf32>
    %cst_7 = arith.constant 0.000000e+00 : f32
    %9 = vector.broadcast %cst_7 : f32 to vector<12x8xf32>
    %10 = arith.maximumf %8, %9 : vector<12x8xf32>
    %11 = arith.truncf %10 : vector<12x8xf32> to vector<12x8xbf16>
    %c0_8 = arith.constant 0 : index
    %c0_9 = arith.constant 0 : index
    %12 = vector.load %arg4[%c0_8, %c0_9] : memref<8x32xbf16, #tpu.memory_space<vmem>>, vector<8x32xbf16>
    %cst_10 = arith.constant dense<0.000000e+00> : vector<12x32xf32>
    %13 = tpu.matmul %11, %12, %cst_10 {dimension_numbers = #tpu.dot_dimension_numbers<[1], [0], [0], [1], [0, 0, 1, 1], [], []>} : vector<12x8xbf16>, vector<8x32xbf16>, vector<12x32xf32> -> vector<12x32xf32>
    %c0_11 = arith.constant 0 : index
    %c0_12 = arith.constant 0 : index
    %14 = vector.load %arg5[%c0_11, %c0_12] : memref<1x32xf32, #tpu.memory_space<vmem>>, vector<1x32xf32>
    %15 = vector.broadcast %14 : vector<1x32xf32> to vector<12x32xf32>
    %16 = arith.mulf %13, %15 : vector<12x32xf32>
    %c0_13 = arith.constant 0 : index
    %c0_14 = arith.constant 0 : index
    %17 = vector.load %arg6[%c0_13, %c0_14] : memref<1x32xf32, #tpu.memory_space<vmem>>, vector<1x32xf32>
    %18 = vector.broadcast %17 : vector<1x32xf32> to vector<12x32xf32>
    %19 = arith.addf %16, %18 : vector<12x32xf32>
    %cst_15 = arith.constant 0.000000e+00 : f32
    %20 = vector.broadcast %cst_15 : f32 to vector<12x32xf32>
    %21 = arith.maximumf %19, %20 : vector<12x32xf32>
    %22 = tpu.iota {dimensions = array<i32: 0>} : vector<12x32xi32>
    %cst_16 = arith.constant 0xFF800000 : f32
    %23 = vector.broadcast %cst_16 : f32 to vector<12x32xf32>
    %c0_i32 = arith.constant 0 : i32
    %24 = vector.broadcast %c0_i32 : i32 to vector<12x32xi32>
    %25 = arith.cmpi sge, %22, %24 : vector<12x32xi32>
    %c6_i32 = arith.constant 6 : i32
    %26 = vector.broadcast %c6_i32 : i32 to vector<12x32xi32>
    %27 = arith.cmpi slt, %22, %26 : vector<12x32xi32>
    %28 = arith.andi %25, %27 : vector<12x32xi1>
    %29 = arith.select %28, %21, %23 : vector<12x32xi1>, vector<12x32xf32>
    %cst_17 = arith.constant dense<0xFF800000> : vector<32xf32>
    %30 = vector.multi_reduction <maximumf>, %29, %cst_17 [0] : vector<12x32xf32> to vector<32xf32>
    %31 = vector.shape_cast %30 : vector<32xf32> to vector<1x32xf32>
    %c6_i32_18 = arith.constant 6 : i32
    %32 = vector.broadcast %c6_i32_18 : i32 to vector<12x32xi32>
    %33 = arith.cmpi sge, %22, %32 : vector<12x32xi32>
    %c12_i32 = arith.constant 12 : i32
    %34 = vector.broadcast %c12_i32 : i32 to vector<12x32xi32>
    %35 = arith.cmpi slt, %22, %34 : vector<12x32xi32>
    %36 = arith.andi %33, %35 : vector<12x32xi1>
    %37 = arith.select %36, %21, %23 : vector<12x32xi1>, vector<12x32xf32>
    %cst_19 = arith.constant dense<0xFF800000> : vector<32xf32>
    %38 = vector.multi_reduction <maximumf>, %37, %cst_19 [0] : vector<12x32xf32> to vector<32xf32>
    %39 = vector.shape_cast %38 : vector<32xf32> to vector<1x32xf32>
    %40 = tpu.concatenate %31, %39 in 0 : vector<1x32xf32>, vector<1x32xf32> -> vector<2x32xf32>
    %c0_20 = arith.constant 0 : index
    %c0_21 = arith.constant 0 : index
    %41 = vector.load %arg7[%c0_20, %c0_21] : memref<10x256xbf16, #tpu.memory_space<vmem>>, vector<10x256xbf16>
    %c0_22 = arith.constant 0 : index
    %c0_23 = arith.constant 0 : index
    %42 = vector.load %arg8[%c0_22, %c0_23] : memref<256x8xbf16, #tpu.memory_space<vmem>>, vector<256x8xbf16>
    %cst_24 = arith.constant dense<0.000000e+00> : vector<10x8xf32>
    %43 = tpu.matmul %41, %42, %cst_24 {dimension_numbers = #tpu.dot_dimension_numbers<[1], [0], [0], [1], [0, 0, 1, 1], [], []>} : vector<10x256xbf16>, vector<256x8xbf16>, vector<10x8xf32> -> vector<10x8xf32>
    %c0_25 = arith.constant 0 : index
    %c0_26 = arith.constant 0 : index
    %44 = vector.load %arg9[%c0_25, %c0_26] : memref<1x8xf32, #tpu.memory_space<vmem>>, vector<1x8xf32>
    %45 = vector.broadcast %44 : vector<1x8xf32> to vector<10x8xf32>
    %46 = arith.mulf %43, %45 : vector<10x8xf32>
    %c0_27 = arith.constant 0 : index
    %c0_28 = arith.constant 0 : index
    %47 = vector.load %arg10[%c0_27, %c0_28] : memref<1x8xf32, #tpu.memory_space<vmem>>, vector<1x8xf32>
    %48 = vector.broadcast %47 : vector<1x8xf32> to vector<10x8xf32>
    %49 = arith.addf %46, %48 : vector<10x8xf32>
    %cst_29 = arith.constant 0.000000e+00 : f32
    %50 = vector.broadcast %cst_29 : f32 to vector<10x8xf32>
    %51 = arith.maximumf %49, %50 : vector<10x8xf32>
    %52 = arith.truncf %51 : vector<10x8xf32> to vector<10x8xbf16>
    %c0_30 = arith.constant 0 : index
    %c0_31 = arith.constant 0 : index
    %53 = vector.load %arg11[%c0_30, %c0_31] : memref<8x32xbf16, #tpu.memory_space<vmem>>, vector<8x32xbf16>
    %cst_32 = arith.constant dense<0.000000e+00> : vector<10x32xf32>
    %54 = tpu.matmul %52, %53, %cst_32 {dimension_numbers = #tpu.dot_dimension_numbers<[1], [0], [0], [1], [0, 0, 1, 1], [], []>} : vector<10x8xbf16>, vector<8x32xbf16>, vector<10x32xf32> -> vector<10x32xf32>
    %c0_33 = arith.constant 0 : index
    %c0_34 = arith.constant 0 : index
    %55 = vector.load %arg12[%c0_33, %c0_34] : memref<1x32xf32, #tpu.memory_space<vmem>>, vector<1x32xf32>
    %56 = vector.broadcast %55 : vector<1x32xf32> to vector<10x32xf32>
    %57 = arith.mulf %54, %56 : vector<10x32xf32>
    %c0_35 = arith.constant 0 : index
    %c0_36 = arith.constant 0 : index
    %58 = vector.load %arg13[%c0_35, %c0_36] : memref<1x32xf32, #tpu.memory_space<vmem>>, vector<1x32xf32>
    %59 = vector.broadcast %58 : vector<1x32xf32> to vector<10x32xf32>
    %60 = arith.addf %57, %59 : vector<10x32xf32>
    %cst_37 = arith.constant 0.000000e+00 : f32
    %61 = vector.broadcast %cst_37 : f32 to vector<10x32xf32>
    %62 = arith.maximumf %60, %61 : vector<10x32xf32>
    %63 = tpu.iota {dimensions = array<i32: 0>} : vector<10x32xi32>
    %cst_38 = arith.constant 0xFF800000 : f32
    %64 = vector.broadcast %cst_38 : f32 to vector<10x32xf32>
    %c0_i32_39 = arith.constant 0 : i32
    %65 = vector.broadcast %c0_i32_39 : i32 to vector<10x32xi32>
    %66 = arith.cmpi sge, %63, %65 : vector<10x32xi32>
    %c5_i32 = arith.constant 5 : i32
    %67 = vector.broadcast %c5_i32 : i32 to vector<10x32xi32>
    %68 = arith.cmpi slt, %63, %67 : vector<10x32xi32>
    %69 = arith.andi %66, %68 : vector<10x32xi1>
    %70 = arith.select %69, %62, %64 : vector<10x32xi1>, vector<10x32xf32>
    %cst_40 = arith.constant dense<0xFF800000> : vector<32xf32>
    %71 = vector.multi_reduction <maximumf>, %70, %cst_40 [0] : vector<10x32xf32> to vector<32xf32>
    %72 = vector.shape_cast %71 : vector<32xf32> to vector<1x32xf32>
    %c5_i32_41 = arith.constant 5 : i32
    %73 = vector.broadcast %c5_i32_41 : i32 to vector<10x32xi32>
    %74 = arith.cmpi sge, %63, %73 : vector<10x32xi32>
    %c10_i32 = arith.constant 10 : i32
    %75 = vector.broadcast %c10_i32 : i32 to vector<10x32xi32>
    %76 = arith.cmpi slt, %63, %75 : vector<10x32xi32>
    %77 = arith.andi %74, %76 : vector<10x32xi1>
    %78 = arith.select %77, %62, %64 : vector<10x32xi1>, vector<10x32xf32>
    %cst_42 = arith.constant dense<0xFF800000> : vector<32xf32>
    %79 = vector.multi_reduction <maximumf>, %78, %cst_42 [0] : vector<10x32xf32> to vector<32xf32>
    %80 = vector.shape_cast %79 : vector<32xf32> to vector<1x32xf32>
    %81 = tpu.concatenate %72, %80 in 0 : vector<1x32xf32>, vector<1x32xf32> -> vector<2x32xf32>
    %82 = tpu.concatenate %40, %81 in 1 : vector<2x32xf32>, vector<2x32xf32> -> vector<2x64xf32>
    %cst_43 = arith.constant 0.000000e+00 : f32
    %83 = vector.broadcast %cst_43 : f32 to vector<2x64xf32>
    %84 = tpu.concatenate %82, %83 in 1 : vector<2x64xf32>, vector<2x64xf32> -> vector<2x128xf32>
    %cst_44 = arith.constant 0.000000e+00 : f32
    %85 = vector.broadcast %cst_44 : f32 to vector<6x128xf32>
    %86 = tpu.concatenate %84, %85 in 0 : vector<2x128xf32>, vector<6x128xf32> -> vector<8x128xf32>
    %87 = arith.truncf %86 : vector<8x128xf32> to vector<8x128xbf16>
    %c0_45 = arith.constant 0 : index
    %c0_46 = arith.constant 0 : index
    %88 = vector.load %arg14[%c0_45, %c0_46] : memref<8x128xbf16, #tpu.memory_space<vmem>>, vector<8x128xbf16>
    tpu.vector_store %arg14[%c0_45, %c0_46], %87 {strides = array<i32>} : memref<8x128xbf16, #tpu.memory_space<vmem>>, vector<8x128xbf16>,
    return
  }
}

</mosaic_0001>

<bundles_post_ra>
// kernel: forward.5
= control target key start
LH: loop header
LB: loop body
LE: loop exit
PB: predicated region body
PF: predicated region fallthrough
CT: control target
= control target key end

     0   :  { %9 = vsyncpa [#allocation3], 0  ;;  %s1318_s0 = inlined_call_operand.vmem [shape: bf16[8,128], index: 0, kind: input, shape index: {}]   ;;  %s1319_s1 = inlined_call_operand.hbm [shape: bf16[128,4096], index: 1, kind: input, shape index: {}]   ;;  %s1320_s2 = inlined_call_operand.hbm [shape: f32[1,4096], index: 2, kind: input, shape index: {}]   ;;  %s1321_s3 = inlined_call_operand.hbm [shape: f32[1,4096], index: 3, kind: input, shape index: {}]   ;;  %s1322_s4 = inlined_call_operand.vmem [shape: bf16[8,4096], index: 4, kind: output, shape index: {}]  }
   0x1   :  { %11 = vsyncpa [#allocation3 + $0x1], 0 }
   0x2   :  { %12 = vsyncpa [#allocation5], 0 }
   0x3   :  { %14 = vsyncpa [#allocation5 + $0x1], 0  ;;  %s1078_s15 = smov 0   ;;  %s1080_s16 = smov 0  }
   0x4   :  { %s1082_s17 = smov 0   ;;  %s1084_s18 = smov 0  }
   0x5 LB: > { %s1097_s19 = sadd.s32 4294967295, %s1044_s18   ;;  %s1100_s20 = sadd.s32 1, %s1044_s18   ;;  %s1044_s18 = sphi %s1084_s18, %s1335_s18   ;;  %s1040_s17 = sphi %s1082_s17, %s1334_s17   ;;  %s1036_s16 = sphi %s1080_s16, %s1333_s16   ;;  %s1032_s15 = sphi %s1078_s15, %s1332_s15  }
   0x6   : > { %s45_s21 = ssub.s32 %s1044_s18, %s1100_s20  ;;  %s48_s22 = sadd.s32 1, %s1040_s17 }
   0x7   : > { %p46_p0 = scmp.eq.s32.totalorder %s45_s21, 0  ;;  %p55_p1 = scmp.ne.s32.totalorder %s1040_s17, %s1036_s16 }
   0x8   : > { %p56_p2 = scmp.eq.s32.totalorder %s1044_s18, 0  ;;  %p61_p3 = scmp.ne.s32.totalorder %s1036_s16, %s1032_s15 }
   0x9   : > { %s1110_s23 = scalar_select %p46_p0, %s1040_s17, %s48_s22  }
   0xa   : > { %p57_p4 = por %p56_p2, %p55_p1  ;;  %p62_p5 = scmp.eq.s32.totalorder %s1097_s19, 0 }
   0xb   : > { %p831_p6 = scmp.lt.s32.totalorder %s1044_s18, 8  ;;  %s1119_s25 = sand.u32 1, %s1040_s17  }
   0xc   : > { %p1114_p7 = por %p62_p5, %p61_p3  ;;  %s759_s26 = sshll.u32 %s1119_s25, 8 }
   0xd   : > { %p1122_p8 = pnand %p831_p6, %p57_p4  ;;  %s170_s28 = scalar_lea.vmem [#allocation2], %s759_s26 }
   0xe   : > { %s1325_s24 = scalar_select %p1114_p7, 1, 0 }
   0xf   : > { %s1326_s27 = scalar_select %p1122_p8, 1, 0 }
  0x10   : > { %s177_s29 = sshll.u32 %s170_s28, 4  ;;  %s187_s30 = sand.u32 1, %s1044_s18   ;;  %s1127_s29 = int_to_ptr.vmem [resolvable:$true] %s177_s29 }
  0x11   : > { %s762_s5 = sshll.u32 %s1119_s25, 2  ;;  %s811_s6 = sshll.u32 %s1044_s18, 6 }
  0x12   : > { %s1136_s9 = scalar_lea.hbm %s1320_s2, %s811_s6  ;;  %s191_s10 = scalar_lea.vmem [#allocation4], %s762_s5 }
  0x13   : > { %s199_s11 = sshll.u32 %s191_s10, 4  ;;  %s1142_s12 = scalar_lea.sflag [#allocation5], %s187_s30  ;;  %s1140_s11 = int_to_ptr.vmem [resolvable:$true] %s199_s11 }
  0x14   : > { %s916_s13 = scalar_lea.hbm %s1136_s9, 64  ;;  %p1148_p10 = pneg %p1122_p8 }
  0x15   : > { %p917_p9 = scmp.ne.s32.totalorder %s1136_s9, %s916_s13  ;;  %s921_s22 = scalar_lea.hbm %s1320_s2, 512 }
  0x16   : > { %p922_p13 = scmp.lt.u32.totalorder %s1136_s9, %s1320_s2  ;;  %p923_p0 = scmp.lt.u32.totalorder %s921_s22, %s916_s13 }
  0x17   : > { %p919_p11 = pnand %p1148_p10, %p917_p9  ;;  %p925_p2 = scmp.lt.u32.totalorder %s916_s13, %s1136_s9 }
  0x18   : > { %p924_p1 = por %p923_p0, %p922_p13 }
  0x19   : > { %p920_p12 = pneg %p919_p11 }
  0x1a   : > { %p926_p3 = por %p925_p2, %p924_p1 }
  0x1c   : > { %p927_p4 = pnand %p926_p3, %p920_p12 }
  0x1e   : > { %930 = shalt.err (!%p927_p4)
}
  0x1f   : > { %s931_s30 = scalar_lea.vmem %s1140_s11, 64  ;;  %s1046_s7 = smov [#allocation4]  }
  0x20   : > { %p932_p5 = scmp.ne.s32.totalorder %s1140_s11, %s931_s30  ;;  %s936_s8 = sshll.u32 %s1046_s7, 4  ;;  %s937_s8 = int_to_ptr.vmem [resolvable:$false] %s936_s8 }
  0x21   : > { %s938_s10 = scalar_lea.vmem %s937_s8, 128  ;;  %p939_p11 = scmp.lt.s32.totalorder %s1140_s11, %s937_s8 }
  0x22   : > { %p934_p6 = pnand %p932_p5, %p1148_p10  ;;  %p940_p7 = scmp.lt.s32.totalorder %s938_s10, %s931_s30 }
  0x24   : > { %p935_p9 = pneg %p934_p6  ;;  %p941_p13 = por %p940_p7, %p939_p11 }
  0x26   : > { %p942_p0 = pnand %p941_p13, %p935_p9 }
  0x28   : > { %945 = shalt.err (!%p942_p0)
}
  0x29   : > { %827 = dma.hbm_to_vmem [thread:$0]  (!%p1122_p8), %s1136_s9, 64, %s1140_s11, %s1142_s12  }
  0x2a   : > { %s1177_s21 = scalar_lea.hbm %s1321_s3, %s811_s6  ;;  %p768_p7 = scmp.ge.s32.totalorder %s1044_s18, 1 }
  0x2b   : > { %p223_p12 = scmp.lt.s32.totalorder %s1044_s18, 9  ;;  %s810_s22 = sshll.u32 %s1044_s18, 8 }
  0x2c   : > { %s1185_s30 = scalar_lea.hbm %s1319_s1, %s810_s22  ;;  %s1193_s11 = scalar_lea.vmem [#allocation6], %s762_s5 }
  0x2d   : > { %p1187_p1 = pnand %p768_p7, %p223_p12  ;;  %s218_s6 = sshll.u32 %s1193_s11, 4  ;;  %s219_s6 = int_to_ptr.vmem [resolvable:$true] %s218_s6 }
  0x2e   : > { %s167_s7 = scalar_lea.sflag [#allocation3], %s1119_s25  ;;  %s946_s18 = scalar_lea.hbm %s1185_s30, 4096 }
  0x2f   : > { %s1328_s9 = scalar_select %p1187_p1, 1, 0 }
  0x30   : > { %p947_p2 = scmp.ne.s32.totalorder %s1185_s30, %s946_s18  ;;  %s951_s13 = scalar_lea.hbm %s1319_s1, 32768 }
  0x31   : > { %p952_p5 = scmp.lt.u32.totalorder %s1185_s30, %s1319_s1  ;;  %p953_p6 = scmp.lt.u32.totalorder %s951_s13, %s946_s18 }
  0x32   : > { %p949_p3 = pnand %p947_p2, %p1148_p10  ;;  %p955_p11 = scmp.lt.u32.totalorder %s946_s18, %s1185_s30 }
  0x33   : > { %p954_p9 = por %p953_p6, %p952_p5 }
  0x34   : > { %p950_p4 = pneg %p949_p3 }
  0x35   : > { %p956_p13 = por %p955_p11, %p954_p9 }
  0x37   : > { %p957_p0 = pnand %p956_p13, %p950_p4 }
  0x39   : > { %960 = shalt.err (!%p957_p0)
}
  0x3a   : > { %s961_s5 = scalar_lea.vmem %s1127_s29, 4096  ;;  %s1047_s26 = smov [#allocation2]  }
  0x3b   : > { %p962_p7 = scmp.ne.s32.totalorder %s1127_s29, %s961_s5  ;;  %s966_s28 = sshll.u32 %s1047_s26, 4  ;;  %s967_s28 = int_to_ptr.vmem [resolvable:$false] %s966_s28 }
  0x3c   : > { %s968_s8 = scalar_lea.vmem %s967_s28, 8192  ;;  %p969_p3 = scmp.lt.s32.totalorder %s1127_s29, %s967_s28 }
  0x3d   : > { %p964_p12 = pnand %p962_p7, %p1148_p10  ;;  %p970_p1 = scmp.lt.s32.totalorder %s968_s8, %s961_s5 }
  0x3f   : > { %p965_p2 = pneg %p964_p12  ;;  %p971_p5 = por %p970_p1, %p969_p3 }
  0x41   : > { %p972_p6 = pnand %p971_p5, %p965_p2 }
  0x43   : > { %975 = shalt.err (!%p972_p6)
}
  0x44   : > { %s1048_s18 = smov 2048   ;;  %s1049_s10 = smov 256  }
  0x45   : > { %s1050_s13 = smov 16   ;;  %s976_s15 = scalar_lea.hbm %s1177_s21, 64 }
  0x46   : > { %824 = dma.hbm_to_vmem [thread:$0]  (!%p1122_p8), %s1185_s30, 4096, %s1127_s29, %s167_s7, %s1048_s18, %s1049_s10, %s1050_s13  }
  0x47   : > { %p977_p1 = scmp.ne.s32.totalorder %s1177_s21, %s976_s15  ;;  %s981_s26 = scalar_lea.hbm %s1321_s3, 512 }
  0x48   : > { %p982_p11 = scmp.lt.u32.totalorder %s1177_s21, %s1321_s3  ;;  %p983_p13 = scmp.lt.u32.totalorder %s981_s26, %s976_s15 }
  0x49   : > { %p979_p4 = pnand %p977_p1, %p1148_p10  ;;  %p985_p7 = scmp.lt.u32.totalorder %s976_s15, %s1177_s21 }
  0x4a   : > { %p984_p0 = por %p983_p13, %p982_p11 }
  0x4b   : > { %p980_p9 = pneg %p979_p4 }
  0x4c   : > { %p986_p12 = por %p985_p7, %p984_p0 }
  0x4e   : > { %p987_p2 = pnand %p986_p12, %p980_p9 }
  0x50   : > { %990 = shalt.err (!%p987_p2)
}
  0x51   : > { %s991_s25 = scalar_lea.vmem %s219_s6, 64  ;;  %s1051_s29 = smov [#allocation6]  }
  0x52   : > { %p992_p3 = scmp.ne.s32.totalorder %s219_s6, %s991_s25  ;;  %s996_s30 = sshll.u32 %s1051_s29, 4  ;;  %s997_s30 = int_to_ptr.vmem [resolvable:$false] %s996_s30 }
  0x53   : > { %s998_s11 = scalar_lea.vmem %s997_s30, 128  ;;  %p999_p1 = scmp.lt.s32.totalorder %s219_s6, %s997_s30 }
  0x54   : > { %p994_p5 = pnand %p992_p3, %p1148_p10  ;;  %p1000_p4 = scmp.lt.s32.totalorder %s998_s11, %s991_s25 }
  0x56   : > { %p995_p6 = pneg %p994_p5  ;;  %p1001_p8 = por %p1000_p4, %p999_p1 }
  0x58   : > { %p1002_p11 = pnand %p1001_p8, %p995_p6 }
  0x5a   : > { %1005 = shalt.err (!%p1002_p11)
}
  0x5b   : > { %p1329_p13 = scmp.ne.s32.totalorder %s1326_s27, 0  ;;  %p1330_p9 = scmp.ne.s32.totalorder %s1328_s9, 0 }
  0x5c   : > { %s1243_s14 = sand.u32 (!%p1330_p9), 1, %s1036_s16   ;;  %p1331_p8 = scmp.ne.s32.totalorder (!%p1330_p9), %s1325_s24, 0 }
  0x5d   : > { %830 = dma.hbm_to_vmem [thread:$0]  (!%p1329_p13), %s1177_s21, 64, %s219_s6, %s1142_s12  }
  0x5e   : > { %227 = sbr.rel (%p1330_p9) target bundleno = 361 (0x169), region = 36  ;;  %s769_s7 = sshll.u32 (!%p1330_p9), %s1243_s14, 8 }
  0x5f   : > { %s230_s18 = scalar_lea.sflag (!%p1330_p9), [#allocation3], %s1243_s14  ;;  %s1247_s10 = scalar_lea.vmem (!%p1330_p9), [#allocation2], %s769_s7 }
  0x65   : > { %1023 = dma.done.wait (%p1331_p8), %s230_s18, 4096  }
  0x66   : > { %1025 = vsyncadd (%p1331_p8), %s230_s18, 4294963200  ;;  %s238_s27 = sand.u32 1, %s1097_s19   ;;  %s770_s12 = sshll.u32 %s1243_s14, 2 }
  0x67   : > { %s239_s21 = scalar_lea.sflag [#allocation5], %s238_s27  ;;  %s1257_s9 = scalar_lea.vmem [#allocation4], %s770_s12 }
  0x68   : > { %1027 = dma.done.wait (%p1331_p8), %s239_s21, 128  }
  0x69   : > { %1029 = vsyncadd (%p1331_p8), %s239_s21, 4294967168  ;;  %v1052_v0 = vmov 0   ;;  %v868_v1 = vld [vmem:[%s1247_s10 + $0x4] ss:$16 sps:$4 sm:$0xff]   ;;  %v870_v2 = vld [vmem:[%s1247_s10 + $0xc] ss:$16 sps:$4 sm:$0xff]   ;;  %v573_v34 = vlaneseq }
  0x6a   : > { %521 = vmatprep.mubr.bf16.mxu0 %v1052_v0  ;;  %562 = vmatprep.mubr.bf16.mxu1 %v1052_v0  ;;  %v872_v3 = vld [vmem:[%s1247_s10] ss:$16 sps:$4 sm:$0xff]   ;;  %v873_v4 = vld [vmem:[%s1247_s10 + $0x8] ss:$16 sps:$4 sm:$0xff]   ;;  %v874_v5 = vld [vmem:[%s1247_s10 + $0x24] ss:$16 sps:$4 sm:$0xff]  }
  0x6b   : > { %489 = vmatprep.subr.bf16.mxu0 %v868_v1  ;;  %530 = vmatprep.subr.bf16.mxu1 %v870_v2  ;;  %v876_v6 = vld [vmem:[%s1247_s10 + $0x2c] ss:$16 sps:$4 sm:$0xff]   ;;  %v878_v7 = vld [vmem:[%s1247_s10 + $0x20] ss:$16 sps:$4 sm:$0xff]   ;;  %v879_v8 = vld [vmem:[%s1247_s10 + $0x28] ss:$16 sps:$4 sm:$0xff]  }
  0x6c   : > { %490 = vmatpush1.bf16.msra.mxu0 %v872_v3  ;;  %531 = vmatpush1.bf16.msra.mxu1 %v873_v4  ;;  %v880_v9 = vld [vmem:[%s1247_s10 + $0x44] ss:$16 sps:$4 sm:$0xff]   ;;  %v882_v10 = vld [vmem:[%s1247_s10 + $0x4c] ss:$16 sps:$4 sm:$0xff]   ;;  %v884_v11 = vld [vmem:[%s1247_s10 + $0x40] ss:$16 sps:$4 sm:$0xff]  }
  0x6d   : > { %491 = vmatprep.subr.bf16.mxu0 %v874_v5  ;;  %532 = vmatprep.subr.bf16.mxu1 %v876_v6  ;;  %v885_v12 = vld [vmem:[%s1247_s10 + $0x48] ss:$16 sps:$4 sm:$0xff]   ;;  %v886_v13 = vld [vmem:[%s1247_s10 + $0x64] ss:$16 sps:$4 sm:$0xff]   ;;  %v888_v14 = vld [vmem:[%s1247_s10 + $0x6c] ss:$16 sps:$4 sm:$0xff]  }
  0x6e   : > { %v890_v15 = vld [vmem:[%s1247_s10 + $0x60] ss:$16 sps:$4 sm:$0xff]   ;;  %v891_v16 = vld [vmem:[%s1247_s10 + $0x68] ss:$16 sps:$4 sm:$0xff]   ;;  %v892_v17 = vld [vmem:[%s1247_s10 + $0x84] ss:$16 sps:$4 sm:$0xff]  }
  0x6f   : > { %v894_v18 = vld [vmem:[%s1247_s10 + $0x8c] ss:$16 sps:$4 sm:$0xff]   ;;  %v896_v19 = vld [vmem:[%s1247_s10 + $0x80] ss:$16 sps:$4 sm:$0xff]   ;;  %v897_v20 = vld [vmem:[%s1247_s10 + $0x88] ss:$16 sps:$4 sm:$0xff]  }
  0x70   : > { %492 = vmatpush1.bf16.msra.mxu0 %v878_v7  ;;  %533 = vmatpush1.bf16.msra.mxu1 %v879_v8  ;;  %v898_v21 = vld [vmem:[%s1247_s10 + $0xa4] ss:$16 sps:$4 sm:$0xff]   ;;  %v900_v22 = vld [vmem:[%s1247_s10 + $0xac] ss:$16 sps:$4 sm:$0xff]   ;;  %v902_v23 = vld [vmem:[%s1247_s10 + $0xa0] ss:$16 sps:$4 sm:$0xff]  }
  0x71   : > { %493 = vmatprep.subr.bf16.mxu0 %v880_v9  ;;  %534 = vmatprep.subr.bf16.mxu1 %v882_v10  ;;  %v903_v24 = vld [vmem:[%s1247_s10 + $0xa8] ss:$16 sps:$4 sm:$0xff]   ;;  %v904_v25 = vld [vmem:[%s1247_s10 + $0xc4] ss:$16 sps:$4 sm:$0xff]   ;;  %v906_v26 = vld [vmem:[%s1247_s10 + $0xcc] ss:$16 sps:$4 sm:$0xff]  }
  0x72   : > { %v908_v27 = vld [vmem:[%s1247_s10 + $0xc0] ss:$16 sps:$4 sm:$0xff]   ;;  %v909_v28 = vld [vmem:[%s1247_s10 + $0xc8] ss:$16 sps:$4 sm:$0xff]   ;;  %v910_v29 = vld [vmem:[%s1247_s10 + $0xe4] ss:$16 sps:$4 sm:$0xff]  }
  0x73   : > { %v912_v30 = vld [vmem:[%s1247_s10 + $0xec] ss:$16 sps:$4 sm:$0xff]   ;;  %v914_v31 = vld [vmem:[%s1247_s10 + $0xe0] ss:$16 sps:$4 sm:$0xff]   ;;  %v915_v32 = vld [vmem:[%s1247_s10 + $0xe8] ss:$16 sps:$4 sm:$0xff]  }
  0x74   : > { %494 = vmatpush1.bf16.msra.mxu0 %v884_v11  ;;  %535 = vmatpush1.bf16.msra.mxu1 %v885_v12  ;;  %v296_v33 = vld [vmem:[%s1318_s0] sm:$0xf]  ;;  %v574_v35 = vshrl.u32 %v573_v34, 7  ;;  %s772_s13 = sshll.u32 %s1097_s19, 2  ;;  %v571_v38 = vld [vmem:[%s1257_s9] sm:$0xf] }
  0x75   : > { %495 = vmatprep.subr.bf16.mxu0 %v886_v13  ;;  %536 = vmatprep.subr.bf16.mxu1 %v888_v14  ;;  %s251_s15 = scalar_lea.vmem [#allocation6], %s770_s12  ;;  %p290_p10 = scmp.lt.s32.totalorder %s772_s13, 31 }
  0x76   : > { %v575_v36 = vsub.s32 0, %v574_v35  ;;  %v583_v37 = vsub.s32 2, %v574_v35  ;;  %v579_v39 = vsub.s32 1, %v574_v35  ;;  %v587_v40 = vsub.s32 3, %v574_v35  ;;  %v597_v41 = vld [vmem:[%s251_s15] sm:$0xf] }
  0x77   : > { %s1337_s13 = smov (!%p290_p10, %s772_s13), 31 }
  0x78   : > { %496 = vmatpush1.bf16.msra.mxu0 %v890_v15  ;;  %537 = vmatpush1.bf16.msra.mxu1 %v891_v16  ;;  %v576_v42 = vrot.slane %v571_v38, %v575_v36  ;;  %v584_v43 = vrot.slane %v571_v38, %v583_v37  ;;  %v580_v44 = vrot.slane %v571_v38, %v579_v39  ;;  %s773_s19 = sshll.u32 %s1337_s13, 2 }
  0x79   : > { %497 = vmatprep.subr.bf16.mxu0 %v892_v17  ;;  %538 = vmatprep.subr.bf16.mxu1 %v894_v18  ;;  %v588_v45 = vrot.slane %v571_v38, %v587_v40  ;;  %v602_v46 = vrot.slane %v597_v41, %v575_v36  ;;  %v610_v47 = vrot.slane %v597_v41, %v583_v37  ;;  %s293_s26 = scalar_lea.vmem %s1322_s4, %s773_s19 }
  0x7a   : > { %v606_v50 = vrot.slane %v597_v41, %v579_v39  ;;  %v614_v51 = vrot.slane %v597_v41, %v587_v40 }
  0x7c   : > { %498 = vmatpush1.bf16.msra.mxu0 %v896_v19  ;;  %539 = vmatpush1.bf16.msra.mxu1 %v897_v20 }
  0x7d   : > { %499 = vmatprep.subr.bf16.mxu0 %v898_v21  ;;  %540 = vmatprep.subr.bf16.mxu1 %v900_v22 }
  0x80   : > { %500 = vmatpush1.bf16.msra.mxu0 %v902_v23  ;;  %541 = vmatpush1.bf16.msra.mxu1 %v903_v24 }
  0x81   : > { %501 = vmatprep.subr.bf16.mxu0 %v904_v25  ;;  %542 = vmatprep.subr.bf16.mxu1 %v906_v26 }
  0x84   : > { %502 = vmatpush1.bf16.msra.mxu0 %v908_v27  ;;  %543 = vmatpush1.bf16.msra.mxu1 %v909_v28 }
  0x85   : > { %503 = vmatprep.subr.bf16.mxu0 %v910_v29  ;;  %544 = vmatprep.subr.bf16.mxu1 %v912_v30 }
  0x88   : > { %504 = vmatpush1.bf16.msra.mxu0 %v914_v31  ;;  %545 = vmatpush1.bf16.msra.mxu1 %v915_v32 }
  0x8b   : > { %522 = vmatmul.mubr.bf16.vlgmr.msra.gmra.mrb[0].mxu0 %v296_v33  ;;  %563 = vmatmul.mubr.bf16.vlgmr.msra.gmra.mrb[0].mxu1 %v296_v33 }
 0x15e   : > { %v523_v48 = vpop.f32.mrb[0].mxu0  ;;  %v564_v49 = vpop.f32.mrb[0].mxu1 }
 0x15f   : > { %v593_v52 = vmul.f32 %v576_v42, %v523_v48  ;;  %v595_v53 = vmul.f32 %v584_v43, %v564_v49  ;;  %v525_v54 = vpop.f32.mrb[1].mxu0  ;;  %v566_v55 = vpop.f32.mrb[1].mxu1 }
 0x160   : > { %v594_v56 = vmul.f32 %v580_v44, %v525_v54  ;;  %v596_v57 = vmul.f32 %v588_v45, %v566_v55  ;;  %v527_v58 = vpop.f32.mrb[2].mxu0  ;;  %v568_v59 = vpop.f32.mrb[2].mxu1 }
 0x161   : > { %v619_v60 = vadd.f32 %v602_v46, %v593_v52  ;;  %v621_v61 = vadd.f32 %v610_v47, %v595_v53  ;;  %v528_v62 = vpop.f32.mrb[3].mxu0  ;;  %v569_v63 = vpop.f32.mrb[3].mxu1 }
 0x162   : > { %v620_v0 = vadd.f32 %v606_v50, %v594_v56  ;;  %v622_v1 = vadd.f32 %v614_v51, %v596_v57 }
 0x163   : > { %v623_v2 = vmax.f32 %v619_v60, 0.0  ;;  %v625_v3 = vmax.f32 %v621_v61, 0.0 }
 0x164   : > { %v624_v4 = vmax.f32 %v620_v0, 0.0  ;;  %v626_v5 = vmax.f32 %v622_v1, 0.0 }
 0x166   : > { %v813_v6 = vpack.c.bf16 %v624_v4, %v623_v2  ;;  %v814_v7 = vpack.c.bf16 %v626_v5, %v625_v3 }
 0x168   : > { %643 = vst [vmem:[%s293_s26] sm:$0xff] %v813_v6  ;;  %644 = vst [vmem:[%s293_s26 + $0x8] sm:$0xff] %v814_v7 }
 0x169 PF: > { %p17_p0 = scmp.ge.s32.totalorder %s1100_s20, 10   ;;  %s1332_s15 = smov %s1036_s16 }
 0x16a   : > { %s1333_s16 = smov %s1040_s17  ;;  %s1334_s17 = smov %s1110_s23 }
 0x16b   : > { %s1335_s18 = smov %s1100_s20  ;;  %19 = sbr.rel (!%p17_p0) target bundleno = 5 (0x5), region = 100 }
 0x172   :  { %667 = vsyncpa [#allocation3], 1 }
 0x173   :  { %669 = vsyncpa [#allocation3 + $0x1], 1 }
 0x174   :  { %670 = vsyncpa [#allocation5], 1 }
 0x175   :  { %672 = vsyncpa [#allocation5 + $0x1], 1 }

// kernel: forward.4
= control target key start
LH: loop header
LB: loop body
LE: loop exit
PB: predicated region body
PF: predicated region fallthrough
CT: control target
= control target key end

     0   :  { %19 = vsyncpa [#allocation3], 0  ;;  %s1467_s0 = inlined_call_operand.vmem [shape: bf16[12,192], index: 0, kind: input, shape index: {}]   ;;  %s1468_s1 = inlined_call_operand.vmem [shape: bf16[192,8], index: 1, kind: input, shape index: {}]   ;;  %s1469_s2 = inlined_call_operand.hbm [shape: f32[1,8], index: 2, kind: input, shape index: {}]   ;;  %s1470_s3 = inlined_call_operand.hbm [shape: f32[1,8], index: 3, kind: input, shape index: {}]   ;;  %s1471_s4 = inlined_call_operand.hbm [shape: bf16[8,32], index: 4, kind: input, shape index: {}]   ;;  %s1472_s5 = inlined_call_operand.hbm [shape: f32[1,32], index: 5, kind: input, shape index: {}]   ;;  %s1473_s6 = inlined_call_operand.hbm [shape: f32[1,32], index: 6, kind: input, shape index: {}]   ;;  %s1474_s7 = inlined_call_operand.vmem [shape: bf16[10,256], index: 7, kind: input, shape index: {}]   ;;  %s1475_s8 = inlined_call_operand.vmem [shape: bf16[256,8], index: 8, kind: input, shape index: {}]   ;;  %s1476_s9 = inlined_call_operand.hbm [shape: f32[1,8], index: 9, kind: input, shape index: {}]   ;;  %s1477_s10 = inlined_call_operand.hbm [shape: f32[1,8], index: 10, kind: input, shape index: {}]   ;;  %s1478_s11 = inlined_call_operand.hbm [shape: bf16[8,32], index: 11, kind: input, shape index: {}]   ;;  %s1479_s12 = inlined_call_operand.hbm [shape: f32[1,32], index: 12, kind: input, shape index: {}]   ;;  %s1480_s13 = inlined_call_operand.hbm [shape: f32[1,32], index: 13, kind: input, shape index: {}]   ;;  %s1481_s14 = inlined_call_operand.vmem [shape: bf16[8,128], index: 14, kind: output, shape index: {}]  }
   0x1   :  { %20 = vsyncpa [#allocation5], 0 }
   0x2   :  { %21 = vsyncpa [#allocation8], 0 }
   0x3   :  { %22 = vsyncpa [#allocation11], 0 }
   0x4   :  { %23 = vsyncpa [#allocation14], 0 }
   0x5   :  { %24 = vsyncpa [#allocation17], 0  ;;  %s1133_s29 = smov [#allocation4]   ;;  %s1134_s15 = smov [#allocation7]  }
   0x6   :  { %s45_s30 = sshll.u32 %s1133_s29, 4  ;;  %s65_s16 = sshll.u32 %s1134_s15, 4  ;;  %s46_s30 = int_to_ptr.vmem [resolvable:$true] %s45_s30  ;;  %s66_s16 = int_to_ptr.vmem [resolvable:$true] %s65_s16 }
   0x7   :  { %s901_s19 = scalar_lea.hbm %s1470_s3, 16 }
   0x8   :  { %p902_p0 = scmp.ne.s32.totalorder %s1470_s3, %s901_s19  ;;  %p905_p1 = scmp.lt.u32.totalorder %s901_s19, %s1470_s3 }
   0xa   :  { %p907_p2 = pnand %p905_p1, %p902_p0 }
   0xc   :  { %910 = shalt.err (!%p907_p2)
}
   0xd   :  { %s911_s24 = scalar_lea.vmem %s46_s30, 16  ;;  %s915_s25 = scalar_lea.vmem %s46_s30, 32 }
   0xe   :  { %p912_p3 = scmp.ne.s32.totalorder %s46_s30, %s911_s24  ;;  %p916_p4 = scmp.lt.s32.totalorder %s46_s30, %s46_s30 }
   0xf   :  { %p917_p5 = scmp.lt.s32.totalorder %s915_s25, %s911_s24 }
  0x11   :  { %p918_p6 = por %p917_p5, %p916_p4 }
  0x13   :  { %p919_p7 = pnand %p918_p6, %p912_p3 }
  0x15   :  { %922 = shalt.err (!%p919_p7)
}
  0x16   :  { %48 = dma.hbm_to_vmem [thread:$0]  %s1470_s3, 16, %s46_s30, [#allocation5]  }
  0x17   :  { %s923_s15 = scalar_lea.hbm %s1472_s5, 16 }
  0x18   :  { %p924_p8 = scmp.ne.s32.totalorder %s1472_s5, %s923_s15  ;;  %p927_p9 = scmp.lt.u32.totalorder %s923_s15, %s1472_s5 }
  0x1a   :  { %p929_p10 = pnand %p927_p9, %p924_p8 }
  0x1c   :  { %932 = shalt.err (!%p929_p10)
}
  0x1d   :  { %s933_s21 = scalar_lea.vmem %s66_s16, 16  ;;  %s937_s22 = scalar_lea.vmem %s66_s16, 32 }
  0x1e   :  { %p934_p11 = scmp.ne.s32.totalorder %s66_s16, %s933_s21  ;;  %p938_p12 = scmp.lt.s32.totalorder %s66_s16, %s66_s16 }
  0x1f   :  { %p939_p13 = scmp.lt.s32.totalorder %s937_s22, %s933_s21 }
  0x21   :  { %p940_p0 = por %p939_p13, %p938_p12 }
  0x23   :  { %p941_p1 = pnand %p940_p0, %p934_p11 }
  0x25   :  { %944 = shalt.err (!%p941_p1)
}
  0x26   :  { %68 = dma.hbm_to_vmem [thread:$0]  %s1472_s5, 16, %s66_s16, [#allocation8]  }
  0x27   :  { %s1135_s23 = smov [#allocation10]   ;;  %s1136_s25 = smov [#allocation13]  }
  0x28   :  { %s89_s24 = sshll.u32 %s1135_s23, 4  ;;  %s109_s26 = sshll.u32 %s1136_s25, 4  ;;  %s90_s24 = int_to_ptr.vmem [resolvable:$true] %s89_s24  ;;  %s110_s26 = int_to_ptr.vmem [resolvable:$true] %s109_s26 }
  0x29   :  { %s945_s29 = scalar_lea.hbm %s1476_s9, 16 }
  0x2a   :  { %p946_p2 = scmp.ne.s32.totalorder %s1476_s9, %s945_s29  ;;  %p949_p3 = scmp.lt.u32.totalorder %s945_s29, %s1476_s9 }
  0x2c   :  { %p951_p4 = pnand %p949_p3, %p946_p2 }
  0x2e   :  { %954 = shalt.err (!%p951_p4)
}
  0x2f   :  { %s955_s5 = scalar_lea.vmem %s90_s24, 16  ;;  %s959_s16 = scalar_lea.vmem %s90_s24, 32 }
  0x30   :  { %p956_p5 = scmp.ne.s32.totalorder %s90_s24, %s955_s5  ;;  %p960_p6 = scmp.lt.s32.totalorder %s90_s24, %s90_s24 }
  0x31   :  { %p961_p7 = scmp.lt.s32.totalorder %s959_s16, %s955_s5 }
  0x33   :  { %p962_p8 = por %p961_p7, %p960_p6 }
  0x35   :  { %p963_p9 = pnand %p962_p8, %p956_p5 }
  0x37   :  { %966 = shalt.err (!%p963_p9)
}
  0x38   :  { %92 = dma.hbm_to_vmem [thread:$0]  %s1476_s9, 16, %s90_s24, [#allocation11]  }
  0x39   :  { %s967_s30 = scalar_lea.hbm %s1478_s11, 64 }
  0x3a   :  { %p968_p10 = scmp.ne.s32.totalorder %s1478_s11, %s967_s30  ;;  %p971_p11 = scmp.lt.u32.totalorder %s967_s30, %s1478_s11 }
  0x3c   :  { %p973_p12 = pnand %p971_p11, %p968_p10 }
  0x3e   :  { %976 = shalt.err (!%p973_p12)
}
  0x3f   :  { %s977_s29 = scalar_lea.vmem %s110_s26, 64  ;;  %p982_p0 = scmp.lt.s32.totalorder %s110_s26, %s110_s26 }
  0x40   :  { %p978_p13 = scmp.ne.s32.totalorder %s110_s26, %s977_s29  ;;  %p983_p1 = scmp.lt.s32.totalorder %s977_s29, %s977_s29 }
  0x42   :  { %p984_p2 = por %p983_p1, %p982_p0 }
  0x44   :  { %p985_p3 = pnand %p984_p2, %p978_p13 }
  0x46   :  { %988 = shalt.err (!%p985_p3)
}
  0x47   :  { %112 = dma.hbm_to_vmem [thread:$0]  %s1478_s11, 64, %s110_s26, [#allocation14]  }
  0x48   :  { %s1137_s15 = smov [#allocation2]   ;;  %s1138_s18 = smov [#allocation6]  }
  0x49   :  { %s35_s17 = sshll.u32 %s1137_s15, 4  ;;  %s55_s19 = sshll.u32 %s1138_s18, 4  ;;  %s36_s17 = int_to_ptr.vmem [resolvable:$true] %s35_s17  ;;  %s56_s19 = int_to_ptr.vmem [resolvable:$true] %s55_s19 }
  0x4a   :  { %s989_s20 = scalar_lea.hbm %s1469_s2, 16 }
  0x4b   :  { %p990_p4 = scmp.ne.s32.totalorder %s1469_s2, %s989_s20  ;;  %p993_p5 = scmp.lt.u32.totalorder %s989_s20, %s1469_s2 }
  0x4d   :  { %p995_p6 = pnand %p993_p5, %p990_p4 }
  0x4f   :  { %998 = shalt.err (!%p995_p6)
}
  0x50   :  { %s999_s11 = scalar_lea.vmem %s36_s17, 16  ;;  %s1003_s26 = scalar_lea.vmem %s36_s17, 32 }
  0x51   :  { %p1000_p7 = scmp.ne.s32.totalorder %s36_s17, %s999_s11  ;;  %p1004_p8 = scmp.lt.s32.totalorder %s36_s17, %s36_s17 }
  0x52   :  { %p1005_p9 = scmp.lt.s32.totalorder %s1003_s26, %s999_s11 }
  0x54   :  { %p1006_p10 = por %p1005_p9, %p1004_p8 }
  0x56   :  { %p1007_p11 = pnand %p1006_p10, %p1000_p7 }
  0x58   :  { %1010 = shalt.err (!%p1007_p11)
}
  0x59   :  { %38 = dma.hbm_to_vmem [thread:$0]  %s1469_s2, 16, %s36_s17, [#allocation3]  }
  0x5a   :  { %s1011_s29 = scalar_lea.hbm %s1471_s4, 64 }
  0x5b   :  { %p1012_p12 = scmp.ne.s32.totalorder %s1471_s4, %s1011_s29  ;;  %p1015_p13 = scmp.lt.u32.totalorder %s1011_s29, %s1471_s4 }
  0x5d   :  { %p1017_p0 = pnand %p1015_p13, %p1012_p12 }
  0x5f   :  { %1020 = shalt.err (!%p1017_p0)
}
  0x60   :  { %s1021_s5 = scalar_lea.vmem %s56_s19, 64  ;;  %p1026_p2 = scmp.lt.s32.totalorder %s56_s19, %s56_s19 }
  0x61   :  { %p1022_p1 = scmp.ne.s32.totalorder %s56_s19, %s1021_s5  ;;  %p1027_p3 = scmp.lt.s32.totalorder %s1021_s5, %s1021_s5 }
  0x63   :  { %p1028_p4 = por %p1027_p3, %p1026_p2 }
  0x65   :  { %p1029_p5 = pnand %p1028_p4, %p1022_p1 }
  0x67   :  { %1032 = shalt.err (!%p1029_p5)
}
  0x68   :  { %58 = dma.hbm_to_vmem [thread:$0]  %s1471_s4, 64, %s56_s19, [#allocation5]  }
  0x69   :  { %s1139_s16 = smov [#allocation9]   ;;  %s1140_s21 = smov [#allocation12]  }
  0x6a   :  { %s75_s20 = sshll.u32 %s1139_s16, 4  ;;  %s99_s22 = sshll.u32 %s1140_s21, 4  ;;  %s76_s20 = int_to_ptr.vmem [resolvable:$true] %s75_s20  ;;  %s100_s22 = int_to_ptr.vmem [resolvable:$true] %s99_s22 }
  0x6b   :  { %s1033_s11 = scalar_lea.hbm %s1473_s6, 16 }
  0x6c   :  { %p1034_p6 = scmp.ne.s32.totalorder %s1473_s6, %s1033_s11  ;;  %p1037_p7 = scmp.lt.u32.totalorder %s1033_s11, %s1473_s6 }
  0x6e   :  { %p1039_p8 = pnand %p1037_p7, %p1034_p6 }
  0x70   :  { %1042 = shalt.err (!%p1039_p8)
}
  0x71   :  { %s1043_s4 = scalar_lea.vmem %s76_s20, 16  ;;  %s1047_s19 = scalar_lea.vmem %s76_s20, 32 }
  0x72   :  { %p1044_p9 = scmp.ne.s32.totalorder %s76_s20, %s1043_s4  ;;  %p1048_p10 = scmp.lt.s32.totalorder %s76_s20, %s76_s20 }
  0x73   :  { %p1049_p11 = scmp.lt.s32.totalorder %s1047_s19, %s1043_s4 }
  0x75   :  { %p1050_p12 = por %p1049_p11, %p1048_p10 }
  0x77   :  { %p1051_p13 = pnand %p1050_p12, %p1044_p9 }
  0x79   :  { %1054 = shalt.err (!%p1051_p13)
}
  0x7a   :  { %78 = dma.hbm_to_vmem [thread:$0]  %s1473_s6, 16, %s76_s20, [#allocation8]  }
  0x7b   :  { %s1055_s15 = scalar_lea.hbm %s1477_s10, 16 }
  0x7c   :  { %p1056_p0 = scmp.ne.s32.totalorder %s1477_s10, %s1055_s15  ;;  %p1059_p1 = scmp.lt.u32.totalorder %s1055_s15, %s1477_s10 }
  0x7e   :  { %p1061_p2 = pnand %p1059_p1, %p1056_p0 }
  0x80   :  { %1064 = shalt.err (!%p1061_p2)
}
  0x81   :  { %s1065_s16 = scalar_lea.vmem %s100_s22, 16  ;;  %s1069_s21 = scalar_lea.vmem %s100_s22, 32 }
  0x82   :  { %p1066_p3 = scmp.ne.s32.totalorder %s100_s22, %s1065_s16  ;;  %p1070_p4 = scmp.lt.s32.totalorder %s100_s22, %s100_s22 }
  0x83   :  { %p1071_p5 = scmp.lt.s32.totalorder %s1069_s21, %s1065_s16 }
  0x85   :  { %p1072_p6 = por %p1071_p5, %p1070_p4 }
  0x87   :  { %p1073_p7 = pnand %p1072_p6, %p1066_p3 }
  0x89   :  { %1076 = shalt.err (!%p1073_p7)
}
  0x8a   :  { %102 = dma.hbm_to_vmem [thread:$0]  %s1477_s10, 16, %s100_s22, [#allocation11]  }
  0x8b   :  { %s1141_s3 = smov [#allocation15]   ;;  %s1142_s11 = smov [#allocation16]  }
  0x8c   :  { %s119_s30 = sshll.u32 %s1141_s3, 4  ;;  %s129_s26 = sshll.u32 %s1142_s11, 4  ;;  %s120_s30 = int_to_ptr.vmem [resolvable:$true] %s119_s30  ;;  %s130_s26 = int_to_ptr.vmem [resolvable:$true] %s129_s26 }
  0x8d   :  { %s1077_s27 = scalar_lea.hbm %s1479_s12, 16 }
  0x8e   :  { %p1078_p8 = scmp.ne.s32.totalorder %s1479_s12, %s1077_s27  ;;  %p1081_p9 = scmp.lt.u32.totalorder %s1077_s27, %s1479_s12 }
  0x90   :  { %p1083_p10 = pnand %p1081_p9, %p1078_p8 }
  0x92   :  { %1086 = shalt.err (!%p1083_p10)
}
  0x93   :  { %s1087_s10 = scalar_lea.vmem %s120_s30, 16  ;;  %s1091_s22 = scalar_lea.vmem %s120_s30, 32 }
  0x94   :  { %p1088_p11 = scmp.ne.s32.totalorder %s120_s30, %s1087_s10  ;;  %p1092_p12 = scmp.lt.s32.totalorder %s120_s30, %s120_s30 }
  0x95   :  { %p1093_p13 = scmp.lt.s32.totalorder %s1091_s22, %s1087_s10 }
  0x97   :  { %p1094_p0 = por %p1093_p13, %p1092_p12 }
  0x99   :  { %p1095_p1 = pnand %p1094_p0, %p1088_p11 }
  0x9b   :  { %1098 = shalt.err (!%p1095_p1)
}
  0x9c   :  { %122 = dma.hbm_to_vmem [thread:$0]  %s1479_s12, 16, %s120_s30, [#allocation14]  }
  0x9d   :  { %s1099_s5 = scalar_lea.hbm %s1480_s13, 16 }
  0x9e   :  { %p1100_p2 = scmp.ne.s32.totalorder %s1480_s13, %s1099_s5  ;;  %p1103_p3 = scmp.lt.u32.totalorder %s1099_s5, %s1480_s13 }
  0xa0   :  { %p1105_p4 = pnand %p1103_p3, %p1100_p2 }
  0xa2   :  { %1108 = shalt.err (!%p1105_p4)
}
  0xa3   :  { %s1109_s6 = scalar_lea.vmem %s130_s26, 16  ;;  %s1113_s20 = scalar_lea.vmem %s130_s26, 32 }
  0xa4   :  { %p1110_p5 = scmp.ne.s32.totalorder %s130_s26, %s1109_s6  ;;  %p1114_p6 = scmp.lt.s32.totalorder %s130_s26, %s130_s26 }
  0xa5   :  { %p1115_p7 = scmp.lt.s32.totalorder %s1113_s20, %s1109_s6 }
  0xa7   :  { %p1116_p8 = por %p1115_p7, %p1114_p6 }
  0xa9   :  { %p1117_p9 = pnand %p1116_p8, %p1110_p5 }
  0xab   :  { %1120 = shalt.err (!%p1117_p9)
}
  0xac   :  { %132 = dma.hbm_to_vmem [thread:$0]  %s1480_s13, 16, %s130_s26, [#allocation17]  }
  0xad   :  { %1121 = dma.done.wait [#allocation3], 16  }
  0xae   :  { %1122 = vsyncadd [#allocation3], 4294967280 }
  0xaf   :  { %1123 = dma.done.wait [#allocation5], 80  }
  0xb0   :  { %1124 = vsyncadd [#allocation5], 4294967216 }
  0xb1   :  { %1125 = dma.done.wait [#allocation8], 32  }
  0xb2   :  { %1126 = vsyncadd [#allocation8], 4294967264 }
  0xb3   :  { %1127 = dma.done.wait [#allocation11], 32  }
  0xb4   :  { %1128 = vsyncadd [#allocation11], 4294967264 }
  0xb5   :  { %1129 = dma.done.wait [#allocation14], 80  }
  0xb6   :  { %1130 = vsyncadd [#allocation14], 4294967216 }
  0xb7   :  { %1131 = dma.done.wait [#allocation17], 16  }
  0xb8   :  { %1132 = vsyncadd [#allocation17], 4294967280  ;;  %v1143_v0 = vmov 0   ;;  %v867_v1 = vld [vmem:[%s1468_s1] sm:$0xff]   ;;  %v868_v2 = vld [vmem:[%s1468_s1 + $0x8] sm:$0xff]   ;;  %vm271_vm0 = vcmask 523264   ;;  %v407_v51 = vlaneseq }
  0xb9   :  { %275 = vmatprep.subr.bf16.mxu0 %v1143_v0  ;;  %v869_v3 = vld [vmem:[%s1468_s1 + $0x10] sm:$0xff]   ;;  %v870_v4 = vld [vmem:[%s1468_s1 + $0x18] sm:$0xff]   ;;  %v871_v5 = vld [vmem:[%s1468_s1 + $0x20] sm:$0xff]   ;;  %vm342_vm1 = vcmask 1043456   ;;  %v1144_v16 = vmov 0.0   ;;  %vm1145_vm2 = vmmov 0  }
  0xba   :  { %276 = vmatpush1.bf16.msra.mxu0 %v867_v1  ;;  %v881_v6 = vld [vmem:[%s1467_s0 + $0x4] ss:$8 sps:$4 sm:$0x3f]   ;;  %v873_v8 = vld [vmem:[%s1468_s1 + $0x30] sm:$0xff]   ;;  %v874_v9 = vld [vmem:[%s1468_s1 + $0x38] sm:$0xff]   ;;  %841 = vmatprep.subr.bf16.mxu1 %v1144_v16  ;;  %vm338_vm3 = vcmask 64512  }
  0xbb   :  { %277 = vmatprep.subr.bf16.mxu0 %v1143_v0  ;;  %786 = vmatprep.mubr.msk.bf16.mxu0 %vm271_vm0, %v881_v6  ;;  %v872_v7 = vld [vmem:[%s1468_s1 + $0x28] sm:$0xff]   ;;  %v875_v10 = vld [vmem:[%s1468_s1 + $0x40] sm:$0xff]   ;;  %v877_v12 = vld [vmem:[%s1468_s1 + $0x50] sm:$0xff]   ;;  %v1444_v53 = vshrl.u32 %v407_v51, 7  ;;  %vm418_vm6 = vcmask 261120   ;;  %vm420_vm8 = vcmask 257024  }
  0xbc   :  { %v876_v11 = vld [vmem:[%s1468_s1 + $0x48] sm:$0xff]   ;;  %v878_v13 = vld [vmem:[%s1468_s1 + $0x58] sm:$0xff]   ;;  %v882_v18 = vld [vmem:[%s1475_s8 + $0x40] sm:$0xff]   ;;  %843 = vmatprep.mubr.msk.bf16.mxu1 %vm1145_vm2, %v1144_v16  ;;  %vm446_vm9 = vcmask 1040384   ;;  %vm725_vm13 = vcmask 254976   ;;  %vm758_vm14 = vcmask 1041408  }
  0xbd   :  { %v879_v14 = vld [vmem:[%s1467_s0] ss:$8 sps:$4 sm:$0x3f]   ;;  %v337_v15 = vld [vmem:[#allocation6] sm:$0xf]  ;;  %v886_v36 = vld [vmem:[%s1475_s8 + $0x50] sm:$0xff]  }
  0xbe   :  { %278 = vmatpush1.bf16.msra.mxu0 %v868_v2  ;;  %v344_v17 = vsel %vm342_vm1, %v337_v15, 0  ;;  %v787_v19 = vld [vmem:[#allocation2] ss:$0 sm:$0xff]  ;;  %v788_v21 = vld [vmem:[#allocation4] ss:$0 sm:$0xff]  ;;  %v883_v31 = vld [vmem:[%s1475_s8] sm:$0xff]  }
  0xbf   :  { %279 = vmatprep.subr.bf16.mxu0 %v1143_v0  ;;  %842 = vmatpush3.bf16.msra.mxu1 %v344_v17  ;;  %v900_v32 = vld [vmem:[%s1474_s7 + $0x4] ss:$8 sps:$4 sm:$0x1f]   ;;  %v887_v37 = vld [vmem:[%s1475_s8 + $0x10] sm:$0xff]   ;;  %v888_v38 = vld [vmem:[%s1475_s8 + $0x58] sm:$0xff]   ;;  %v1447_v59 = vadd.s32 8, %v1444_v53 }
  0xc0   :  { %817 = vmatprep.subr.bf16.mxu1 %v882_v18  ;;  %v884_v34 = vld [vmem:[%s1475_s8 + $0x48] sm:$0xff]   ;;  %v889_v39 = vld [vmem:[%s1475_s8 + $0x18] sm:$0xff]   ;;  %v890_v40 = vld [vmem:[%s1475_s8 + $0x60] sm:$0xff]   ;;  %vm412_vm4 = vcmp.lt.s32.totalorder %v1444_v53, 6  ;;  %vm429_vm5 = vcmp.ge.s32.totalorder %v1444_v53, 6  ;;  %vm718_vm10 = vcmp.lt.s32.totalorder %v1444_v53, 5 }
  0xc1   :  { %v885_v35 = vld [vmem:[%s1475_s8 + $0x8] sm:$0xff]   ;;  %v891_v41 = vld [vmem:[%s1475_s8 + $0x20] sm:$0xff]   ;;  %v894_v44 = vld [vmem:[%s1475_s8 + $0x70] sm:$0xff]   ;;  %vm432_vm7 = vcmp.lt.s32.totalorder %v1447_v59, 12  ;;  %vm734_vm11 = vcmp.ge.s32.totalorder %v1444_v53, 5  ;;  %vm737_vm12 = vcmp.lt.s32.totalorder %v1447_v59, 10 }
  0xc2   :  { %280 = vmatpush1.bf16.msra.mxu0 %v869_v3  ;;  %v892_v42 = vld [vmem:[%s1475_s8 + $0x68] sm:$0xff]   ;;  %v895_v45 = vld [vmem:[%s1475_s8 + $0x30] sm:$0xff]   ;;  %v896_v46 = vld [vmem:[%s1475_s8 + $0x78] sm:$0xff]  }
  0xc3   :  { %281 = vmatprep.subr.bf16.mxu0 %v1143_v0  ;;  %v893_v43 = vld [vmem:[%s1475_s8 + $0x28] sm:$0xff]   ;;  %v897_v47 = vld [vmem:[%s1475_s8 + $0x38] sm:$0xff]   ;;  %v790_v52 = vld [vmem:[#allocation7] ss:$0 sm:$0xff] }
  0xc4   :  { %v650_v48 = vld [vmem:[#allocation13] sm:$0xf]  ;;  %v791_v55 = vld [vmem:[#allocation9] ss:$0 sm:$0xff] }
  0xc5   :  { %v898_v49 = vld [vmem:[%s1474_s7] ss:$8 sps:$4 sm:$0x1f]   ;;  %v655_v50 = vsel %vm342_vm1, %v650_v48, 0  ;;  %s1146_s7 = smov 32  }
  0xc6   :  { %282 = vmatpush1.bf16.msra.mxu0 %v870_v4 }
  0xc7   :  { %283 = vmatprep.subr.bf16.mxu0 %v1143_v0 }
  0xca   :  { %284 = vmatpush1.bf16.msra.mxu0 %v871_v5 }
  0xcb   :  { %285 = vmatprep.subr.bf16.mxu0 %v1143_v0 }
  0xce   :  { %286 = vmatpush1.bf16.msra.mxu0 %v872_v7 }
  0xcf   :  { %287 = vmatprep.subr.bf16.mxu0 %v1143_v0 }
  0xd2   :  { %288 = vmatpush1.bf16.msra.mxu0 %v873_v8 }
  0xd3   :  { %289 = vmatprep.subr.bf16.mxu0 %v1143_v0 }
  0xd6   :  { %290 = vmatpush1.bf16.msra.mxu0 %v874_v9 }
  0xd7   :  { %291 = vmatprep.subr.bf16.mxu0 %v1143_v0 }
  0xda   :  { %292 = vmatpush1.bf16.msra.mxu0 %v875_v10 }
  0xdb   :  { %293 = vmatprep.subr.bf16.mxu0 %v1143_v0 }
  0xde   :  { %294 = vmatpush1.bf16.msra.mxu0 %v876_v11 }
  0xdf   :  { %295 = vmatprep.subr.bf16.mxu0 %v1143_v0 }
  0xe2   :  { %296 = vmatpush1.bf16.msra.mxu0 %v877_v12 }
  0xe3   :  { %297 = vmatprep.subr.bf16.mxu0 %v1143_v0 }
  0xe6   :  { %298 = vmatpush1.bf16.msra.mxu0 %v878_v13 }
  0xe9   :  { %308 = vmatmul.mubr.bf16.vlgmr.msra.gmra.mrb[0].mxu0 %v879_v14 }
 0x1bc   :  { %v309_v20 = vpop.f32.mrb[0].mxu0 }
 0x1bd   :  { %v323_v22 = vmul.f32 %v787_v19, %v309_v20  ;;  %v311_v23 = vpop.f32.mrb[1].mxu0 }
 0x1be   :  { %v312_v24 = vpop.f32.mrb[2].mxu0 }
 0x1bf   :  { %v332_v25 = vadd.f32 %v788_v21, %v323_v22  ;;  %v324_v26 = vmul.f32 %v787_v19, %v312_v24  ;;  %v314_v27 = vpop.f32.mrb[3].mxu0  ;;  %v810_v24 = vld [vmem:[#allocation10] ss:$0 sm:$0xff] }
 0x1c0   :  { %v811_v27 = vld [vmem:[#allocation12] ss:$0 sm:$0xff] }
 0x1c1   :  { %v333_v28 = vadd.f32 %v788_v21, %v324_v26  ;;  %v334_v29 = vmax.f32 %v332_v25, 0.0 }
 0x1c3   :  { %v335_v30 = vmax.f32 %v333_v28, 0.0 }
 0x1c5   :  { %v336_v33 = vpack.c.bf16 %v335_v30, %v334_v29 }
 0x1c7   :  { %844 = vmatmul.mubr.msk.bf16.vlgmr.msra.gmra.mrb[0].mxu1 %vm338_vm3, %v336_v33 }
 0x1c8   :  { %818 = vmatpush3.bf16.msra.mxu1 %v883_v31  ;;  %620 = vmatprep.mubr.bf16.mxu1 %v900_v32 }
 0x1c9   :  { %819 = vmatprep.subr.bf16.mxu1 %v884_v34 }
 0x1cc   :  { %820 = vmatpush3.bf16.msra.mxu1 %v885_v35 }
 0x1cd   :  { %821 = vmatprep.subr.bf16.mxu1 %v886_v36 }
 0x1d0   :  { %822 = vmatpush3.bf16.msra.mxu1 %v887_v37  ;;  %v813_v37 = vld [vmem:[#allocation15] ss:$0 sm:$0xff] }
 0x1d1   :  { %823 = vmatprep.subr.bf16.mxu1 %v888_v38 }
 0x1d4   :  { %824 = vmatpush3.bf16.msra.mxu1 %v889_v39  ;;  %v814_v39 = vld [vmem:[#allocation16] ss:$0 sm:$0xff] }
 0x1d5   :  { %825 = vmatprep.subr.bf16.mxu1 %v890_v40 }
 0x1d8   :  { %826 = vmatpush3.bf16.msra.mxu1 %v891_v41 }
 0x1d9   :  { %827 = vmatprep.subr.bf16.mxu1 %v892_v42 }
 0x1dc   :  { %828 = vmatpush3.bf16.msra.mxu1 %v893_v43 }
 0x1dd   :  { %829 = vmatprep.subr.bf16.mxu1 %v894_v44 }
 0x1e0   :  { %830 = vmatpush3.bf16.msra.mxu1 %v895_v45 }
 0x1e1   :  { %831 = vmatprep.subr.bf16.mxu1 %v896_v46 }
 0x1e4   :  { %832 = vmatpush3.bf16.msra.mxu1 %v897_v47 }
 0x1e5   :  { %847 = vmatprep.subr.bf16.mxu1 %v1144_v16 }
 0x1e7   :  { %621 = vmatmul.mubr.bf16.vlgmr.msra.gmra.mrb[4].mxu1 %v898_v49 }
 0x1e8   :  { %848 = vmatpush3.bf16.msra.mxu1 %v655_v50  ;;  %849 = vmatprep.mubr.msk.bf16.mxu1 %vm1145_vm2, %v1144_v16 }
 0x29a   :  { %v380_v54 = vpop.f32.mrb[0].mxu1 }
 0x29b   :  { %v394_v56 = vmul.f32 %v790_v52, %v380_v54  ;;  %v845_v57 = vpop.f32.mrb[1].mxu1 }
 0x29c   :  { %v383_v58 = vpop.f32.mrb[2].mxu1 }
 0x29d   :  { %v403_v60 = vadd.f32 %v791_v55, %v394_v56  ;;  %v395_v61 = vmul.f32 %v790_v52, %v383_v58  ;;  %v846_v62 = vpop.f32.mrb[3].mxu1 }
 0x29f   :  { %v405_v63 = vmax.f32 %v403_v60, 0.0  ;;  %v404_v0 = vadd.f32 %v791_v55, %v395_v61 }
 0x2a1   :  { %v416_v1 = vsel %vm412_vm4, %v405_v63, -inf  ;;  %v435_v2 = vsel %vm429_vm5, %v405_v63, -inf  ;;  %v406_v3 = vmax.f32 %v404_v0, 0.0 }
 0x2a2   :  { %v419_v4 = vsel %vm418_vm6, %v416_v1, -inf  ;;  %v437_v7 = vsel %vm418_vm6, %v435_v2, -inf }
 0x2a3   :  { %v423_v5 = vrot.slane %v419_v4, 4  ;;  %v436_v6 = vsel %vm432_vm7, %v406_v3, -inf }
 0x2a4   :  { %v438_v8 = vsel %vm420_vm8, %v436_v6, -inf }
 0x2a5   :  { %v424_v9 = vmax.f32 %v419_v4, %v423_v5  ;;  %v439_v10 = vmax.f32 %v437_v7, %v438_v8 }
 0x2a7   :  { %v425_v11 = vrot.slane %v424_v9, 2  ;;  %v440_v12 = vrot.slane %v439_v10, 4 }
 0x2a9   :  { %v426_v13 = vmax.f32 %v424_v9, %v425_v11  ;;  %v441_v14 = vmax.f32 %v439_v10, %v440_v12 }
 0x2ab   :  { %v442_v15 = vrot.slane %v441_v14, 2  ;;  %v427_v16 = vrot.slane %v426_v13, 1 }
 0x2ad   :  { %v443_v17 = vmax.f32 %v441_v14, %v442_v15  ;;  %v428_v19 = vmax.f32 %v426_v13, %v427_v16 }
 0x2af   :  { %v444_v18 = vrot.slane %v443_v17, 1 }
 0x2b1   :  { %v445_v20 = vmax.f32 %v443_v17, %v444_v18 }
 0x2b3   :  { %v447_v21 = vsel %vm446_vm9, %v428_v19, %v445_v20 }
 0x2ba   :  { %v833_v22 = vpop.f32.mrb[4].mxu1 }
 0x2bb   :  { %v834_v23 = vpop.f32.mrb[5].mxu1 }
 0x2bc   :  { %v835_v25 = vadd.f32 %v834_v23, %v833_v22  ;;  %v836_v26 = vpop.f32.mrb[6].mxu1 }
 0x2bd   :  { %v837_v28 = vpop.f32.mrb[7].mxu1 }
 0x2be   :  { %v636_v29 = vmul.f32 %v835_v25, %v810_v24  ;;  %v838_v30 = vadd.f32 %v837_v28, %v836_v26 }
 0x2c0   :  { %v645_v31 = vadd.f32 %v811_v27, %v636_v29  ;;  %v637_v32 = vmul.f32 %v838_v30, %v810_v24 }
 0x2c2   :  { %v646_v33 = vadd.f32 %v811_v27, %v637_v32  ;;  %v647_v34 = vmax.f32 %v645_v31, 0.0 }
 0x2c4   :  { %v648_v35 = vmax.f32 %v646_v33, 0.0 }
 0x2c6   :  { %v649_v36 = vpack.c.bf16 %v648_v35, %v647_v34 }
 0x2c8   :  { %850 = vmatmul.mubr.msk.bf16.vlgmr.msra.gmra.mrb[8].mxu1 %vm338_vm3, %v649_v36 }
 0x39b   :  { %v691_v38 = vpop.f32.mrb[8].mxu1 }
 0x39c   :  { %v705_v40 = vmul.f32 %v813_v37, %v691_v38  ;;  %v851_v41 = vpop.f32.mrb[9].mxu1 }
 0x39d   :  { %v694_v42 = vpop.f32.mrb[10].mxu1 }
 0x39e   :  { %v714_v43 = vadd.f32 %v814_v39, %v705_v40  ;;  %v706_v44 = vmul.f32 %v813_v37, %v694_v42  ;;  %v852_v45 = vpop.f32.mrb[11].mxu1 }
 0x3a0   :  { %v716_v46 = vmax.f32 %v714_v43, 0.0  ;;  %v715_v47 = vadd.f32 %v814_v39, %v706_v44 }
 0x3a2   :  { %v722_v48 = vsel %vm718_vm10, %v716_v46, -inf  ;;  %v740_v49 = vsel %vm734_vm11, %v716_v46, -inf  ;;  %v717_v50 = vmax.f32 %v715_v47, 0.0 }
 0x3a3   :  { %v724_v51 = vsel %vm418_vm6, %v722_v48, -inf  ;;  %v742_v55 = vsel %vm418_vm6, %v740_v49, -inf }
 0x3a4   :  { %v728_v52 = vrot.slane %v724_v51, 4  ;;  %v741_v54 = vsel %vm737_vm12, %v717_v50, -inf }
 0x3a5   :  { %v743_v56 = vsel %vm725_vm13, %v741_v54, -inf }
 0x3a6   :  { %v729_v57 = vmax.f32 %v724_v51, %v728_v52  ;;  %v744_v58 = vmax.f32 %v742_v55, %v743_v56 }
 0x3a8   :  { %v745_v60 = vrot.slane %v744_v58, 4  ;;  %v730_v61 = vrot.slane %v729_v57, 2 }
 0x3aa   :  { %v731_v53 = vmax.f32 %v729_v57, %v730_v61  ;;  %v746_v62 = vmax.f32 %v744_v58, %v745_v60 }
 0x3ac   :  { %v747_v63 = vrot.slane %v746_v62, 2  ;;  %v732_v0 = vrot.slane %v731_v53, 1 }
 0x3ae   :  { %v748_v59 = vmax.f32 %v746_v62, %v747_v63  ;;  %v733_v2 = vmax.f32 %v731_v53, %v732_v0 }
 0x3b0   :  { %v749_v1 = vrot.slane %v748_v59, 1 }
 0x3b2   :  { %v750_v3 = vmax.f32 %v748_v59, %v749_v1 }
 0x3b4   :  { %v751_v4 = vsel %vm446_vm9, %v733_v2, %v750_v3 }
 0x3b5   :  { %753 = vrot.lane.b32.xlu0 %v751_v4, %s1146_s7 }
 0x427   :  { %v754_v5 = vpop.permute.xlu0 %753 }
 0x428   :  { %v756_v6 = vsel %vm418_vm6, %v447_v21, %v754_v5 }
 0x429   :  { %v757_v7 = vsel %vm271_vm0, %v756_v6, 0.0 }
 0x42a   :  { %v759_v8 = vsel %vm758_vm14, %v757_v7, 0.0 }
 0x42b   :  { %v760_v9 = vpack.c.bf16 %v759_v8, %v759_v8 }
 0x42d   :  { %761 = vst [vmem:[%s1481_s14] sm:$0xf] %v760_v9 }
 0x42e   :  { %766 = vsyncpa [#allocation3], 1 }
 0x42f   :  { %767 = vsyncpa [#allocation5], 1 }
 0x430   :  { %768 = vsyncpa [#allocation8], 1 }
 0x431   :  { %769 = vsyncpa [#allocation11], 1 }
 0x432   :  { %770 = vsyncpa [#allocation14], 1 }
 0x433   :  { %771 = vsyncpa [#allocation17], 1 }

// kernel: forward.7
= control target key start
LH: loop header
LB: loop body
LE: loop exit
PB: predicated region body
PF: predicated region fallthrough
CT: control target
= control target key end

     0   :  { %s4635_s1 = inlined_call_operand.vmem [shape: bf16[4096,128], index: 1, kind: input, shape index: {}]   ;;  %s4636_s0 = inlined_call_operand.vmem [shape: bf16[8,4096], index: 0, kind: input, shape index: {}]   ;;  %s4637_s2 = inlined_call_operand.vmem [shape: f32[1,128], index: 2, kind: input, shape index: {}]   ;;  %s4638_s3 = inlined_call_operand.vmem [shape: f32[1,128], index: 3, kind: input, shape index: {}]   ;;  %s4639_s4 = inlined_call_operand.vmem [shape: f32[8,128], index: 4, kind: output, shape index: {}]  }
   0x1   :  { %v3497_v0 = vld [vmem:[%s4635_s1 + $0x40] sm:$0xff]   ;;  %v3501_v4 = vld [vmem:[%s4635_s1 + $0x48] sm:$0xff]   ;;  %v3505_v8 = vld [vmem:[%s4635_s1 + $0x50] sm:$0xff]  }
   0x2   :  { %v3498_v1 = vld [vmem:[%s4635_s1 + $0xc0] sm:$0xff]   ;;  %3145 = vmatprep.subr.bf16.mxu0 %v3497_v0  ;;  %v3502_v5 = vld [vmem:[%s4635_s1 + $0xc8] sm:$0xff]   ;;  %v3506_v9 = vld [vmem:[%s4635_s1 + $0xd0] sm:$0xff]  }
   0x3   :  { %v3499_v2 = vld [vmem:[%s4635_s1] sm:$0xff]   ;;  %3167 = vmatprep.subr.bf16.mxu1 %v3498_v1  ;;  %v3503_v6 = vld [vmem:[%s4635_s1 + $0x8] sm:$0xff]   ;;  %v3507_v10 = vld [vmem:[%s4635_s1 + $0x10] sm:$0xff]  }
   0x4   :  { %v3500_v3 = vld [vmem:[%s4635_s1 + $0x80] sm:$0xff]   ;;  %3146 = vmatpush3.bf16.msra.mxu0 %v3499_v2  ;;  %v3504_v7 = vld [vmem:[%s4635_s1 + $0x88] sm:$0xff]   ;;  %v3508_v11 = vld [vmem:[%s4635_s1 + $0x90] sm:$0xff]  }
   0x5   :  { %3168 = vmatpush3.bf16.msra.mxu1 %v3500_v3  ;;  %3147 = vmatprep.subr.bf16.mxu0 %v3501_v4  ;;  %v3509_v12 = vld [vmem:[%s4635_s1 + $0x58] sm:$0xff]   ;;  %v3513_v16 = vld [vmem:[%s4635_s1 + $0x60] sm:$0xff]   ;;  %v3517_v20 = vld [vmem:[%s4635_s1 + $0x68] sm:$0xff]  }
   0x6   :  { %3169 = vmatprep.subr.bf16.mxu1 %v3502_v5  ;;  %v3510_v13 = vld [vmem:[%s4635_s1 + $0xd8] sm:$0xff]   ;;  %v3514_v17 = vld [vmem:[%s4635_s1 + $0xe0] sm:$0xff]   ;;  %v3518_v21 = vld [vmem:[%s4635_s1 + $0xe8] sm:$0xff]  }
   0x7   :  { %v3511_v14 = vld [vmem:[%s4635_s1 + $0x18] sm:$0xff]   ;;  %v3515_v18 = vld [vmem:[%s4635_s1 + $0x20] sm:$0xff]   ;;  %v3519_v22 = vld [vmem:[%s4635_s1 + $0x28] sm:$0xff]  }
   0x8   :  { %3148 = vmatpush3.bf16.msra.mxu0 %v3503_v6  ;;  %v3512_v15 = vld [vmem:[%s4635_s1 + $0x98] sm:$0xff]   ;;  %v3516_v19 = vld [vmem:[%s4635_s1 + $0xa0] sm:$0xff]   ;;  %v3520_v23 = vld [vmem:[%s4635_s1 + $0xa8] sm:$0xff]  }
   0x9   :  { %3170 = vmatpush3.bf16.msra.mxu1 %v3504_v7  ;;  %3149 = vmatprep.subr.bf16.mxu0 %v3505_v8  ;;  %v3521_v24 = vld [vmem:[%s4635_s1 + $0x70] sm:$0xff]   ;;  %v3525_v28 = vld [vmem:[%s4635_s1 + $0x78] sm:$0xff]   ;;  %v18_v32 = vld [vmem:[%s4636_s0] sm:$0xff] }
   0xa   :  { %3171 = vmatprep.subr.bf16.mxu1 %v3506_v9  ;;  %v3522_v25 = vld [vmem:[%s4635_s1 + $0xf0] sm:$0xff]   ;;  %v3526_v29 = vld [vmem:[%s4635_s1 + $0xf8] sm:$0xff]   ;;  %v19_v33 = vld [vmem:[%s4636_s0 + $0x8] sm:$0xff]  ;;  %v2855_v34 = vcombine.low %v18_v32, %v18_v32  ;;  %v2856_v35 = vcombine.high %v18_v32, %v18_v32 }
   0xb   :  { %v3523_v26 = vld [vmem:[%s4635_s1 + $0x30] sm:$0xff]   ;;  %v3527_v30 = vld [vmem:[%s4635_s1 + $0x38] sm:$0xff]   ;;  %v2857_v36 = vcombine.low %v19_v33, %v19_v33  ;;  %v2858_v37 = vcombine.high %v19_v33, %v19_v33  ;;  %v3533_v38 = vld [vmem:[%s4635_s1 + $0x140] sm:$0xff]  }
   0xc   :  { %3150 = vmatpush3.bf16.msra.mxu0 %v3507_v10  ;;  %v3524_v27 = vld [vmem:[%s4635_s1 + $0xb0] sm:$0xff]   ;;  %v3528_v31 = vld [vmem:[%s4635_s1 + $0xb8] sm:$0xff]   ;;  %v3534_v39 = vld [vmem:[%s4635_s1 + $0x1c0] sm:$0xff]   ;;  %2226 = vmatprep.mubr.bf16.mxu0 %v2856_v35 }
   0xd   :  { %3172 = vmatpush3.bf16.msra.mxu1 %v3508_v11  ;;  %3151 = vmatprep.subr.bf16.mxu0 %v3509_v12  ;;  %v3535_v40 = vld [vmem:[%s4635_s1 + $0x100] sm:$0xff]   ;;  %v3537_v42 = vld [vmem:[%s4635_s1 + $0x148] sm:$0xff]   ;;  %v3541_v46 = vld [vmem:[%s4635_s1 + $0x150] sm:$0xff]  }
   0xe   :  { %3173 = vmatprep.subr.bf16.mxu1 %v3510_v13  ;;  %2266 = vmatprep.mubr.bf16.mxu1 %v2858_v37  ;;  %v3536_v41 = vld [vmem:[%s4635_s1 + $0x180] sm:$0xff]   ;;  %v3538_v43 = vld [vmem:[%s4635_s1 + $0x1c8] sm:$0xff]   ;;  %v3542_v47 = vld [vmem:[%s4635_s1 + $0x1d0] sm:$0xff]  }
   0xf   :  { %v3539_v44 = vld [vmem:[%s4635_s1 + $0x108] sm:$0xff]   ;;  %v3543_v48 = vld [vmem:[%s4635_s1 + $0x110] sm:$0xff]   ;;  %v3545_v50 = vld [vmem:[%s4635_s1 + $0x158] sm:$0xff]  }
  0x10   :  { %3152 = vmatpush3.bf16.msra.mxu0 %v3511_v14  ;;  %v3540_v45 = vld [vmem:[%s4635_s1 + $0x188] sm:$0xff]   ;;  %v3544_v49 = vld [vmem:[%s4635_s1 + $0x190] sm:$0xff]   ;;  %v3546_v51 = vld [vmem:[%s4635_s1 + $0x1d8] sm:$0xff]  }
  0x11   :  { %3174 = vmatpush3.bf16.msra.mxu1 %v3512_v15  ;;  %3153 = vmatprep.subr.bf16.mxu0 %v3513_v16  ;;  %v3547_v52 = vld [vmem:[%s4635_s1 + $0x118] sm:$0xff]   ;;  %v3549_v54 = vld [vmem:[%s4635_s1 + $0x160] sm:$0xff]   ;;  %v3553_v58 = vld [vmem:[%s4635_s1 + $0x168] sm:$0xff]  }
  0x12   :  { %3175 = vmatprep.subr.bf16.mxu1 %v3514_v17  ;;  %v3548_v53 = vld [vmem:[%s4635_s1 + $0x198] sm:$0xff]   ;;  %v3550_v55 = vld [vmem:[%s4635_s1 + $0x1e0] sm:$0xff]   ;;  %v3554_v59 = vld [vmem:[%s4635_s1 + $0x1e8] sm:$0xff]  }
  0x13   :  { %v3551_v56 = vld [vmem:[%s4635_s1 + $0x120] sm:$0xff]   ;;  %v3555_v60 = vld [vmem:[%s4635_s1 + $0x128] sm:$0xff]   ;;  %v3557_v62 = vld [vmem:[%s4635_s1 + $0x170] sm:$0xff]  }
  0x14   :  { %3154 = vmatpush3.bf16.msra.mxu0 %v3515_v18  ;;  %v3552_v57 = vld [vmem:[%s4635_s1 + $0x1a0] sm:$0xff]   ;;  %v3556_v61 = vld [vmem:[%s4635_s1 + $0x1a8] sm:$0xff]   ;;  %v3558_v63 = vld [vmem:[%s4635_s1 + $0x1f0] sm:$0xff]  }
  0x15   :  { %3176 = vmatpush3.bf16.msra.mxu1 %v3516_v19  ;;  %3155 = vmatprep.subr.bf16.mxu0 %v3517_v20  ;;  %v3559_v0 = vld [vmem:[%s4635_s1 + $0x130] sm:$0xff]   ;;  %v3561_v2 = vld [vmem:[%s4635_s1 + $0x178] sm:$0xff]   ;;  %v3569_v12 = vld [vmem:[%s4635_s1 + $0x240] sm:$0xff]  }
  0x16   :  { %3177 = vmatprep.subr.bf16.mxu1 %v3518_v21  ;;  %v3560_v1 = vld [vmem:[%s4635_s1 + $0x1b0] sm:$0xff]   ;;  %v3562_v3 = vld [vmem:[%s4635_s1 + $0x1f8] sm:$0xff]   ;;  %v3570_v13 = vld [vmem:[%s4635_s1 + $0x2c0] sm:$0xff]  }
  0x17   :  { %v3563_v4 = vld [vmem:[%s4635_s1 + $0x138] sm:$0xff]   ;;  %v20_v6 = vld [vmem:[%s4636_s0 + $0x10] sm:$0xff]  ;;  %v3571_v14 = vld [vmem:[%s4635_s1 + $0x200] sm:$0xff]  }
  0x18   :  { %3156 = vmatpush3.bf16.msra.mxu0 %v3519_v22  ;;  %v3564_v5 = vld [vmem:[%s4635_s1 + $0x1b8] sm:$0xff]   ;;  %v2859_v7 = vcombine.low %v20_v6, %v20_v6  ;;  %v2860_v8 = vcombine.high %v20_v6, %v20_v6  ;;  %v3572_v15 = vld [vmem:[%s4635_s1 + $0x280] sm:$0xff]   ;;  %v3573_v16 = vld [vmem:[%s4635_s1 + $0x248] sm:$0xff]  }
  0x19   :  { %3178 = vmatpush3.bf16.msra.mxu1 %v3520_v23  ;;  %3157 = vmatprep.subr.bf16.mxu0 %v3521_v24  ;;  %v21_v9 = vld [vmem:[%s4636_s0 + $0x18] sm:$0xff]  ;;  %v3574_v17 = vld [vmem:[%s4635_s1 + $0x2c8] sm:$0xff]   ;;  %v3577_v20 = vld [vmem:[%s4635_s1 + $0x250] sm:$0xff]  }
  0x1a   :  { %3179 = vmatprep.subr.bf16.mxu1 %v3522_v25  ;;  %v2861_v10 = vcombine.low %v21_v9, %v21_v9  ;;  %v2862_v11 = vcombine.high %v21_v9, %v21_v9  ;;  %v3575_v18 = vld [vmem:[%s4635_s1 + $0x208] sm:$0xff]   ;;  %v3578_v21 = vld [vmem:[%s4635_s1 + $0x2d0] sm:$0xff]   ;;  %v3581_v24 = vld [vmem:[%s4635_s1 + $0x258] sm:$0xff]  }
  0x1b   :  { %v3576_v19 = vld [vmem:[%s4635_s1 + $0x288] sm:$0xff]   ;;  %v3579_v22 = vld [vmem:[%s4635_s1 + $0x210] sm:$0xff]   ;;  %v3582_v25 = vld [vmem:[%s4635_s1 + $0x2d8] sm:$0xff]  }
  0x1c   :  { %3158 = vmatpush3.bf16.msra.mxu0 %v3523_v26  ;;  %v3580_v23 = vld [vmem:[%s4635_s1 + $0x290] sm:$0xff]   ;;  %v3583_v26 = vld [vmem:[%s4635_s1 + $0x218] sm:$0xff]   ;;  %v3589_v32 = vld [vmem:[%s4635_s1 + $0x268] sm:$0xff]  }
  0x1d   :  { %3180 = vmatpush3.bf16.msra.mxu1 %v3524_v27  ;;  %3159 = vmatprep.subr.bf16.mxu0 %v3525_v28  ;;  %v3584_v27 = vld [vmem:[%s4635_s1 + $0x298] sm:$0xff]   ;;  %v3585_v28 = vld [vmem:[%s4635_s1 + $0x260] sm:$0xff]   ;;  %v3590_v33 = vld [vmem:[%s4635_s1 + $0x2e8] sm:$0xff]  }
  0x1e   :  { %3181 = vmatprep.subr.bf16.mxu1 %v3526_v29  ;;  %v3586_v29 = vld [vmem:[%s4635_s1 + $0x2e0] sm:$0xff]   ;;  %v3592_v35 = vld [vmem:[%s4635_s1 + $0x2a8] sm:$0xff]   ;;  %v3594_v37 = vld [vmem:[%s4635_s1 + $0x2f0] sm:$0xff]  }
  0x1f   :  { %v3625_v6 = vld [vmem:[%s4635_s1 + $0x368] sm:$0xff]  }
  0x20   :  { %3160 = vmatpush3.bf16.msra.mxu0 %v3527_v30  ;;  %v3587_v30 = vld [vmem:[%s4635_s1 + $0x220] sm:$0xff]   ;;  %v3628_v9 = vld [vmem:[%s4635_s1 + $0x3a8] sm:$0xff]  }
  0x21   :  { %3182 = vmatpush3.bf16.msra.mxu1 %v3528_v31  ;;  %3189 = vmatprep.subr.bf16.mxu0 %v3533_v38  ;;  %v3588_v31 = vld [vmem:[%s4635_s1 + $0x2a0] sm:$0xff]   ;;  %v3595_v38 = vld [vmem:[%s4635_s1 + $0x230] sm:$0xff]  }
  0x22   :  { %3211 = vmatprep.subr.bf16.mxu1 %v3534_v39  ;;  %v3596_v39 = vld [vmem:[%s4635_s1 + $0x2b0] sm:$0xff]  }
  0x23   :  { %2227 = vmatmul.mubr.bf16.vlgmr.msra.gmra.mrb[0].mxu0 %v2855_v34  ;;  %v3591_v34 = vld [vmem:[%s4635_s1 + $0x228] sm:$0xff]  }
  0x24   :  { %2267 = vmatmul.mubr.bf16.vlgmr.msra.gmra.mrb[0].mxu1 %v2857_v36  ;;  %3190 = vmatpush3.bf16.msra.mxu0 %v3535_v40  ;;  %v3593_v36 = vld [vmem:[%s4635_s1 + $0x270] sm:$0xff]   ;;  %v3597_v40 = vld [vmem:[%s4635_s1 + $0x278] sm:$0xff]  }
  0x25   :  { %3212 = vmatpush3.bf16.msra.mxu1 %v3536_v41  ;;  %3191 = vmatprep.subr.bf16.mxu0 %v3537_v42  ;;  %v3598_v41 = vld [vmem:[%s4635_s1 + $0x2f8] sm:$0xff]  }
  0x26   :  { %3213 = vmatprep.subr.bf16.mxu1 %v3538_v43  ;;  %2306 = vmatprep.mubr.bf16.mxu0 %v2860_v8  ;;  %v3599_v42 = vld [vmem:[%s4635_s1 + $0x238] sm:$0xff]   ;;  %v3627_v8 = vld [vmem:[%s4635_s1 + $0x328] sm:$0xff]  }
  0x27   :  { %2346 = vmatprep.mubr.bf16.mxu1 %v2862_v11  ;;  %v3600_v43 = vld [vmem:[%s4635_s1 + $0x2b8] sm:$0xff]   ;;  %v3630_v11 = vld [vmem:[%s4635_s1 + $0x3f0] sm:$0xff]  }
  0x28   :  { %3192 = vmatpush3.bf16.msra.mxu0 %v3539_v44  ;;  %v22_v44 = vld [vmem:[%s4636_s0 + $0x20] sm:$0xff] }
  0x29   :  { %3214 = vmatpush3.bf16.msra.mxu1 %v3540_v45  ;;  %3193 = vmatprep.subr.bf16.mxu0 %v3541_v46  ;;  %v23_v45 = vld [vmem:[%s4636_s0 + $0x28] sm:$0xff]  ;;  %v2863_v46 = vcombine.low %v22_v44, %v22_v44 }
  0x2a   :  { %3215 = vmatprep.subr.bf16.mxu1 %v3542_v47  ;;  %v2864_v47 = vcombine.high %v22_v44, %v22_v44  ;;  %v3661_v44 = vld [vmem:[%s4635_s1 + $0x468] sm:$0xff]  }
  0x2c   :  { %3194 = vmatpush3.bf16.msra.mxu0 %v3543_v48  ;;  %v2865_v48 = vcombine.low %v23_v45, %v23_v45 }
  0x2d   :  { %3216 = vmatpush3.bf16.msra.mxu1 %v3544_v49  ;;  %3195 = vmatprep.subr.bf16.mxu0 %v3545_v50  ;;  %v2866_v49 = vcombine.high %v23_v45, %v23_v45  ;;  %v3605_v50 = vld [vmem:[%s4635_s1 + $0x340] sm:$0xff]   ;;  %v3662_v45 = vld [vmem:[%s4635_s1 + $0x4e8] sm:$0xff]  }
  0x2e   :  { %3217 = vmatprep.subr.bf16.mxu1 %v3546_v51  ;;  %v3606_v51 = vld [vmem:[%s4635_s1 + $0x3c0] sm:$0xff]  }
  0x30   :  { %3196 = vmatpush3.bf16.msra.mxu0 %v3547_v52  ;;  %v3607_v52 = vld [vmem:[%s4635_s1 + $0x300] sm:$0xff]  }
  0x31   :  { %3218 = vmatpush3.bf16.msra.mxu1 %v3548_v53  ;;  %3197 = vmatprep.subr.bf16.mxu0 %v3549_v54  ;;  %v3608_v53 = vld [vmem:[%s4635_s1 + $0x380] sm:$0xff]   ;;  %v3609_v54 = vld [vmem:[%s4635_s1 + $0x348] sm:$0xff]  }
  0x32   :  { %3219 = vmatprep.subr.bf16.mxu1 %v3550_v55  ;;  %v3610_v55 = vld [vmem:[%s4635_s1 + $0x3c8] sm:$0xff]  }
  0x34   :  { %3198 = vmatpush3.bf16.msra.mxu0 %v3551_v56  ;;  %v3611_v56 = vld [vmem:[%s4635_s1 + $0x308] sm:$0xff]  }
  0x35   :  { %3220 = vmatpush3.bf16.msra.mxu1 %v3552_v57  ;;  %3199 = vmatprep.subr.bf16.mxu0 %v3553_v58  ;;  %v3612_v57 = vld [vmem:[%s4635_s1 + $0x388] sm:$0xff]   ;;  %v3613_v58 = vld [vmem:[%s4635_s1 + $0x350] sm:$0xff]  }
  0x36   :  { %3221 = vmatprep.subr.bf16.mxu1 %v3554_v59  ;;  %v3614_v59 = vld [vmem:[%s4635_s1 + $0x3d0] sm:$0xff]  }
  0x38   :  { %3200 = vmatpush3.bf16.msra.mxu0 %v3555_v60  ;;  %v3615_v60 = vld [vmem:[%s4635_s1 + $0x310] sm:$0xff]  }
  0x39   :  { %3222 = vmatpush3.bf16.msra.mxu1 %v3556_v61  ;;  %3201 = vmatprep.subr.bf16.mxu0 %v3557_v62  ;;  %v3616_v61 = vld [vmem:[%s4635_s1 + $0x390] sm:$0xff]   ;;  %v3617_v62 = vld [vmem:[%s4635_s1 + $0x358] sm:$0xff]  }
  0x3a   :  { %3223 = vmatprep.subr.bf16.mxu1 %v3558_v63  ;;  %v3618_v63 = vld [vmem:[%s4635_s1 + $0x3d8] sm:$0xff]  }
  0x3c   :  { %3202 = vmatpush3.bf16.msra.mxu0 %v3559_v0  ;;  %v3619_v0 = vld [vmem:[%s4635_s1 + $0x318] sm:$0xff]  }
  0x3d   :  { %3224 = vmatpush3.bf16.msra.mxu1 %v3560_v1  ;;  %3203 = vmatprep.subr.bf16.mxu0 %v3561_v2  ;;  %v3620_v1 = vld [vmem:[%s4635_s1 + $0x398] sm:$0xff]   ;;  %v3621_v2 = vld [vmem:[%s4635_s1 + $0x360] sm:$0xff]  }
  0x3e   :  { %3225 = vmatprep.subr.bf16.mxu1 %v3562_v3  ;;  %v3622_v3 = vld [vmem:[%s4635_s1 + $0x3e0] sm:$0xff]  }
  0x40   :  { %3204 = vmatpush3.bf16.msra.mxu0 %v3563_v4  ;;  %v3623_v4 = vld [vmem:[%s4635_s1 + $0x320] sm:$0xff]  }
  0x41   :  { %3226 = vmatpush3.bf16.msra.mxu1 %v3564_v5  ;;  %3233 = vmatprep.subr.bf16.mxu0 %v3569_v12  ;;  %v3624_v5 = vld [vmem:[%s4635_s1 + $0x3a0] sm:$0xff]   ;;  %v3631_v12 = vld [vmem:[%s4635_s1 + $0x330] sm:$0xff]  }
  0x42   :  { %3255 = vmatprep.subr.bf16.mxu1 %v3570_v13  ;;  %v3632_v13 = vld [vmem:[%s4635_s1 + $0x3b0] sm:$0xff]  }
  0x43   :  { %2307 = vmatmul.mubr.bf16.vlgmr.msra.gmra.mrb[4].mxu0 %v2859_v7  ;;  %v3626_v7 = vld [vmem:[%s4635_s1 + $0x3e8] sm:$0xff]  }
  0x44   :  { %2347 = vmatmul.mubr.bf16.vlgmr.msra.gmra.mrb[4].mxu1 %v2861_v10  ;;  %3234 = vmatpush3.bf16.msra.mxu0 %v3571_v14  ;;  %v3629_v10 = vld [vmem:[%s4635_s1 + $0x370] sm:$0xff]   ;;  %v3633_v14 = vld [vmem:[%s4635_s1 + $0x378] sm:$0xff]  }
  0x45   :  { %3256 = vmatpush3.bf16.msra.mxu1 %v3572_v15  ;;  %3235 = vmatprep.subr.bf16.mxu0 %v3573_v16  ;;  %v3634_v15 = vld [vmem:[%s4635_s1 + $0x3f8] sm:$0xff]  }
  0x46   :  { %3257 = vmatprep.subr.bf16.mxu1 %v3574_v17  ;;  %2386 = vmatprep.mubr.bf16.mxu0 %v2864_v47  ;;  %v3635_v16 = vld [vmem:[%s4635_s1 + $0x338] sm:$0xff]   ;;  %v3664_v47 = vld [vmem:[%s4635_s1 + $0x4a8] sm:$0xff]  }
  0x47   :  { %2426 = vmatprep.mubr.bf16.mxu1 %v2866_v49  ;;  %v3636_v17 = vld [vmem:[%s4635_s1 + $0x3b8] sm:$0xff]   ;;  %v3666_v49 = vld [vmem:[%s4635_s1 + $0x4f0] sm:$0xff]  }
  0x48   :  { %3236 = vmatpush3.bf16.msra.mxu0 %v3575_v18  ;;  %v24_v18 = vld [vmem:[%s4636_s0 + $0x30] sm:$0xff] }
  0x49   :  { %3258 = vmatpush3.bf16.msra.mxu1 %v3576_v19  ;;  %3237 = vmatprep.subr.bf16.mxu0 %v3577_v20  ;;  %v25_v19 = vld [vmem:[%s4636_s0 + $0x38] sm:$0xff]  ;;  %v2867_v20 = vcombine.low %v24_v18, %v24_v18 }
  0x4a   :  { %3259 = vmatprep.subr.bf16.mxu1 %v3578_v21  ;;  %v2868_v21 = vcombine.high %v24_v18, %v24_v18  ;;  %v3697_v18 = vld [vmem:[%s4635_s1 + $0x568] sm:$0xff]  }
  0x4c   :  { %3238 = vmatpush3.bf16.msra.mxu0 %v3579_v22  ;;  %v2869_v22 = vcombine.low %v25_v19, %v25_v19 }
  0x4d   :  { %3260 = vmatpush3.bf16.msra.mxu1 %v3580_v23  ;;  %3239 = vmatprep.subr.bf16.mxu0 %v3581_v24  ;;  %v3641_v23 = vld [vmem:[%s4635_s1 + $0x440] sm:$0xff]   ;;  %v2870_v24 = vcombine.high %v25_v19, %v25_v19  ;;  %v3698_v19 = vld [vmem:[%s4635_s1 + $0x5e8] sm:$0xff]  }
  0x4e   :  { %3261 = vmatprep.subr.bf16.mxu1 %v3582_v25  ;;  %v3642_v25 = vld [vmem:[%s4635_s1 + $0x4c0] sm:$0xff]  }
  0x50   :  { %3240 = vmatpush3.bf16.msra.mxu0 %v3583_v26  ;;  %v3643_v26 = vld [vmem:[%s4635_s1 + $0x400] sm:$0xff]  }
  0x51   :  { %3262 = vmatpush3.bf16.msra.mxu1 %v3584_v27  ;;  %3241 = vmatprep.subr.bf16.mxu0 %v3585_v28  ;;  %v3644_v27 = vld [vmem:[%s4635_s1 + $0x480] sm:$0xff]   ;;  %v3645_v28 = vld [vmem:[%s4635_s1 + $0x448] sm:$0xff]  }
  0x52   :  { %3263 = vmatprep.subr.bf16.mxu1 %v3586_v29  ;;  %v3646_v29 = vld [vmem:[%s4635_s1 + $0x4c8] sm:$0xff]  }
  0x54   :  { %3242 = vmatpush3.bf16.msra.mxu0 %v3587_v30  ;;  %v3647_v30 = vld [vmem:[%s4635_s1 + $0x408] sm:$0xff]  }
  0x55   :  { %3264 = vmatpush3.bf16.msra.mxu1 %v3588_v31  ;;  %3243 = vmatprep.subr.bf16.mxu0 %v3589_v32  ;;  %v3648_v31 = vld [vmem:[%s4635_s1 + $0x488] sm:$0xff]   ;;  %v3649_v32 = vld [vmem:[%s4635_s1 + $0x450] sm:$0xff]  }
  0x56   :  { %3265 = vmatprep.subr.bf16.mxu1 %v3590_v33  ;;  %v3650_v33 = vld [vmem:[%s4635_s1 + $0x4d0] sm:$0xff]  }
  0x58   :  { %3244 = vmatpush3.bf16.msra.mxu0 %v3591_v34  ;;  %v3651_v34 = vld [vmem:[%s4635_s1 + $0x410] sm:$0xff]  }
  0x59   :  { %3266 = vmatpush3.bf16.msra.mxu1 %v3592_v35  ;;  %3245 = vmatprep.subr.bf16.mxu0 %v3593_v36  ;;  %v3652_v35 = vld [vmem:[%s4635_s1 + $0x490] sm:$0xff]   ;;  %v3653_v36 = vld [vmem:[%s4635_s1 + $0x458] sm:$0xff]  }
  0x5a   :  { %3267 = vmatprep.subr.bf16.mxu1 %v3594_v37  ;;  %v3654_v37 = vld [vmem:[%s4635_s1 + $0x4d8] sm:$0xff]  }
  0x5c   :  { %3246 = vmatpush3.bf16.msra.mxu0 %v3595_v38  ;;  %v3655_v38 = vld [vmem:[%s4635_s1 + $0x418] sm:$0xff]  }
  0x5d   :  { %3268 = vmatpush3.bf16.msra.mxu1 %v3596_v39  ;;  %3247 = vmatprep.subr.bf16.mxu0 %v3597_v40  ;;  %v3656_v39 = vld [vmem:[%s4635_s1 + $0x498] sm:$0xff]   ;;  %v3657_v40 = vld [vmem:[%s4635_s1 + $0x460] sm:$0xff]  }
  0x5e   :  { %3269 = vmatprep.subr.bf16.mxu1 %v3598_v41  ;;  %v3658_v41 = vld [vmem:[%s4635_s1 + $0x4e0] sm:$0xff]  }
  0x60   :  { %3248 = vmatpush3.bf16.msra.mxu0 %v3599_v42  ;;  %v3659_v42 = vld [vmem:[%s4635_s1 + $0x420] sm:$0xff]  }
  0x61   :  { %3270 = vmatpush3.bf16.msra.mxu1 %v3600_v43  ;;  %3277 = vmatprep.subr.bf16.mxu0 %v3605_v50  ;;  %v3660_v43 = vld [vmem:[%s4635_s1 + $0x4a0] sm:$0xff]   ;;  %v3667_v50 = vld [vmem:[%s4635_s1 + $0x430] sm:$0xff]  }
  0x62   :  { %3299 = vmatprep.subr.bf16.mxu1 %v3606_v51  ;;  %v3668_v51 = vld [vmem:[%s4635_s1 + $0x4b0] sm:$0xff]  }
  0x63   :  { %2387 = vmatmul.mubr.bf16.vlgmr.msra.gmra.mrb[8].mxu0 %v2863_v46  ;;  %v3663_v46 = vld [vmem:[%s4635_s1 + $0x428] sm:$0xff]  }
  0x64   :  { %2427 = vmatmul.mubr.bf16.vlgmr.msra.gmra.mrb[8].mxu1 %v2865_v48  ;;  %3278 = vmatpush3.bf16.msra.mxu0 %v3607_v52  ;;  %v3665_v48 = vld [vmem:[%s4635_s1 + $0x470] sm:$0xff]   ;;  %v3669_v52 = vld [vmem:[%s4635_s1 + $0x478] sm:$0xff]  }
  0x65   :  { %3300 = vmatpush3.bf16.msra.mxu1 %v3608_v53  ;;  %3279 = vmatprep.subr.bf16.mxu0 %v3609_v54  ;;  %v3670_v53 = vld [vmem:[%s4635_s1 + $0x4f8] sm:$0xff]  }
  0x66   :  { %3301 = vmatprep.subr.bf16.mxu1 %v3610_v55  ;;  %2466 = vmatprep.mubr.bf16.mxu0 %v2868_v21  ;;  %v3671_v54 = vld [vmem:[%s4635_s1 + $0x438] sm:$0xff]   ;;  %v3700_v21 = vld [vmem:[%s4635_s1 + $0x5a8] sm:$0xff]  }
  0x67   :  { %2506 = vmatprep.mubr.bf16.mxu1 %v2870_v24  ;;  %v3672_v55 = vld [vmem:[%s4635_s1 + $0x4b8] sm:$0xff]   ;;  %v3703_v24 = vld [vmem:[%s4635_s1 + $0x530] sm:$0xff]  }
  0x68   :  { %3280 = vmatpush3.bf16.msra.mxu0 %v3611_v56  ;;  %v26_v56 = vld [vmem:[%s4636_s0 + $0x40] sm:$0xff] }
  0x69   :  { %3302 = vmatpush3.bf16.msra.mxu1 %v3612_v57  ;;  %3281 = vmatprep.subr.bf16.mxu0 %v3613_v58  ;;  %v2871_v57 = vcombine.low %v26_v56, %v26_v56  ;;  %v2872_v58 = vcombine.high %v26_v56, %v26_v56  ;;  %v3733_v56 = vld [vmem:[%s4635_s1 + $0x668] sm:$0xff]  }
  0x6a   :  { %3303 = vmatprep.subr.bf16.mxu1 %v3614_v59  ;;  %v27_v59 = vld [vmem:[%s4636_s0 + $0x48] sm:$0xff] }
  0x6c   :  { %3282 = vmatpush3.bf16.msra.mxu0 %v3615_v60  ;;  %v2873_v60 = vcombine.low %v27_v59, %v27_v59 }
  0x6d   :  { %3304 = vmatpush3.bf16.msra.mxu1 %v3616_v61  ;;  %3283 = vmatprep.subr.bf16.mxu0 %v3617_v62  ;;  %v2874_v61 = vcombine.high %v27_v59, %v27_v59  ;;  %v3677_v62 = vld [vmem:[%s4635_s1 + $0x540] sm:$0xff]   ;;  %v3736_v59 = vld [vmem:[%s4635_s1 + $0x6a8] sm:$0xff]  }
  0x6e   :  { %3305 = vmatprep.subr.bf16.mxu1 %v3618_v63  ;;  %v3678_v63 = vld [vmem:[%s4635_s1 + $0x5c0] sm:$0xff]  }
  0x70   :  { %3284 = vmatpush3.bf16.msra.mxu0 %v3619_v0  ;;  %v3679_v0 = vld [vmem:[%s4635_s1 + $0x500] sm:$0xff]  }
  0x71   :  { %3306 = vmatpush3.bf16.msra.mxu1 %v3620_v1  ;;  %3285 = vmatprep.subr.bf16.mxu0 %v3621_v2  ;;  %v3680_v1 = vld [vmem:[%s4635_s1 + $0x580] sm:$0xff]   ;;  %v3681_v2 = vld [vmem:[%s4635_s1 + $0x548] sm:$0xff]  }
  0x72   :  { %3307 = vmatprep.subr.bf16.mxu1 %v3622_v3  ;;  %v3682_v3 = vld [vmem:[%s4635_s1 + $0x5c8] sm:$0xff]  }
  0x74   :  { %3286 = vmatpush3.bf16.msra.mxu0 %v3623_v4  ;;  %v3683_v4 = vld [vmem:[%s4635_s1 + $0x508] sm:$0xff]  }
  0x75   :  { %3308 = vmatpush3.bf16.msra.mxu1 %v3624_v5  ;;  %3287 = vmatprep.subr.bf16.mxu0 %v3625_v6  ;;  %v3684_v5 = vld [vmem:[%s4635_s1 + $0x588] sm:$0xff]   ;;  %v3685_v6 = vld [vmem:[%s4635_s1 + $0x550] sm:$0xff]  }
  0x76   :  { %3309 = vmatprep.subr.bf16.mxu1 %v3626_v7  ;;  %v3686_v7 = vld [vmem:[%s4635_s1 + $0x5d0] sm:$0xff]  }
  0x78   :  { %3288 = vmatpush3.bf16.msra.mxu0 %v3627_v8  ;;  %v3687_v8 = vld [vmem:[%s4635_s1 + $0x510] sm:$0xff]  }
  0x79   :  { %3310 = vmatpush3.bf16.msra.mxu1 %v3628_v9  ;;  %3289 = vmatprep.subr.bf16.mxu0 %v3629_v10  ;;  %v3688_v9 = vld [vmem:[%s4635_s1 + $0x590] sm:$0xff]   ;;  %v3689_v10 = vld [vmem:[%s4635_s1 + $0x558] sm:$0xff]  }
  0x7a   :  { %3311 = vmatprep.subr.bf16.mxu1 %v3630_v11  ;;  %v3690_v11 = vld [vmem:[%s4635_s1 + $0x5d8] sm:$0xff]  }
  0x7c   :  { %3290 = vmatpush3.bf16.msra.mxu0 %v3631_v12  ;;  %v3691_v12 = vld [vmem:[%s4635_s1 + $0x518] sm:$0xff]  }
  0x7d   :  { %3312 = vmatpush3.bf16.msra.mxu1 %v3632_v13  ;;  %3291 = vmatprep.subr.bf16.mxu0 %v3633_v14  ;;  %v3692_v13 = vld [vmem:[%s4635_s1 + $0x598] sm:$0xff]   ;;  %v3693_v14 = vld [vmem:[%s4635_s1 + $0x560] sm:$0xff]  }
  0x7e   :  { %3313 = vmatprep.subr.bf16.mxu1 %v3634_v15  ;;  %v3694_v15 = vld [vmem:[%s4635_s1 + $0x5e0] sm:$0xff]  }
  0x80   :  { %3292 = vmatpush3.bf16.msra.mxu0 %v3635_v16  ;;  %v3695_v16 = vld [vmem:[%s4635_s1 + $0x520] sm:$0xff]  }
  0x81   :  { %3314 = vmatpush3.bf16.msra.mxu1 %v3636_v17  ;;  %3321 = vmatprep.subr.bf16.mxu0 %v3641_v23  ;;  %v3696_v17 = vld [vmem:[%s4635_s1 + $0x5a0] sm:$0xff]   ;;  %v3702_v23 = vld [vmem:[%s4635_s1 + $0x5f0] sm:$0xff]  }
  0x82   :  { %3343 = vmatprep.subr.bf16.mxu1 %v3642_v25  ;;  %v3704_v25 = vld [vmem:[%s4635_s1 + $0x5b0] sm:$0xff]  }
  0x83   :  { %2467 = vmatmul.mubr.bf16.vlgmr.msra.gmra.mrb[12].mxu0 %v2867_v20  ;;  %v3699_v20 = vld [vmem:[%s4635_s1 + $0x528] sm:$0xff]  }
  0x84   :  { %2507 = vmatmul.mubr.bf16.vlgmr.msra.gmra.mrb[12].mxu1 %v2869_v22  ;;  %3322 = vmatpush3.bf16.msra.mxu0 %v3643_v26  ;;  %v3701_v22 = vld [vmem:[%s4635_s1 + $0x570] sm:$0xff]   ;;  %v3705_v26 = vld [vmem:[%s4635_s1 + $0x578] sm:$0xff]  }
  0x85   :  { %3344 = vmatpush3.bf16.msra.mxu1 %v3644_v27  ;;  %3323 = vmatprep.subr.bf16.mxu0 %v3645_v28  ;;  %v3706_v27 = vld [vmem:[%s4635_s1 + $0x5f8] sm:$0xff]  }
  0x86   :  { %3345 = vmatprep.subr.bf16.mxu1 %v3646_v29  ;;  %2546 = vmatprep.mubr.bf16.mxu0 %v2872_v58  ;;  %v3707_v28 = vld [vmem:[%s4635_s1 + $0x538] sm:$0xff]   ;;  %v3735_v58 = vld [vmem:[%s4635_s1 + $0x628] sm:$0xff]  }
  0x87   :  { %2586 = vmatprep.mubr.bf16.mxu1 %v2874_v61  ;;  %v3708_v29 = vld [vmem:[%s4635_s1 + $0x5b8] sm:$0xff]   ;;  %v3738_v61 = vld [vmem:[%s4635_s1 + $0x6f0] sm:$0xff]  }
  0x88   :  { %3324 = vmatpush3.bf16.msra.mxu0 %v3647_v30  ;;  %v28_v30 = vld [vmem:[%s4636_s0 + $0x50] sm:$0xff] }
  0x89   :  { %3346 = vmatpush3.bf16.msra.mxu1 %v3648_v31  ;;  %3325 = vmatprep.subr.bf16.mxu0 %v3649_v32  ;;  %v29_v31 = vld [vmem:[%s4636_s0 + $0x58] sm:$0xff]  ;;  %v2875_v32 = vcombine.low %v28_v30, %v28_v30 }
  0x8a   :  { %3347 = vmatprep.subr.bf16.mxu1 %v3650_v33  ;;  %v2876_v33 = vcombine.high %v28_v30, %v28_v30  ;;  %v3768_v30 = vld [vmem:[%s4635_s1 + $0x7a0] sm:$0xff]  }
  0x8c   :  { %3326 = vmatpush3.bf16.msra.mxu0 %v3651_v34  ;;  %v2877_v34 = vcombine.low %v29_v31, %v29_v31 }
  0x8d   :  { %3348 = vmatpush3.bf16.msra.mxu1 %v3652_v35  ;;  %3327 = vmatprep.subr.bf16.mxu0 %v3653_v36  ;;  %v2878_v35 = vcombine.high %v29_v31, %v29_v31  ;;  %v3713_v36 = vld [vmem:[%s4635_s1 + $0x640] sm:$0xff]  }
  0x8e   :  { %3349 = vmatprep.subr.bf16.mxu1 %v3654_v37  ;;  %v3714_v37 = vld [vmem:[%s4635_s1 + $0x6c0] sm:$0xff]  }
  0x90   :  { %3328 = vmatpush3.bf16.msra.mxu0 %v3655_v38  ;;  %v3715_v38 = vld [vmem:[%s4635_s1 + $0x600] sm:$0xff]  }
  0x91   :  { %3350 = vmatpush3.bf16.msra.mxu1 %v3656_v39  ;;  %3329 = vmatprep.subr.bf16.mxu0 %v3657_v40  ;;  %v3716_v39 = vld [vmem:[%s4635_s1 + $0x680] sm:$0xff]   ;;  %v3717_v40 = vld [vmem:[%s4635_s1 + $0x648] sm:$0xff]  }
  0x92   :  { %3351 = vmatprep.subr.bf16.mxu1 %v3658_v41  ;;  %v3718_v41 = vld [vmem:[%s4635_s1 + $0x6c8] sm:$0xff]  }
  0x94   :  { %3330 = vmatpush3.bf16.msra.mxu0 %v3659_v42  ;;  %v3719_v42 = vld [vmem:[%s4635_s1 + $0x608] sm:$0xff]  }
  0x95   :  { %3352 = vmatpush3.bf16.msra.mxu1 %v3660_v43  ;;  %3331 = vmatprep.subr.bf16.mxu0 %v3661_v44  ;;  %v3720_v43 = vld [vmem:[%s4635_s1 + $0x688] sm:$0xff]   ;;  %v3721_v44 = vld [vmem:[%s4635_s1 + $0x650] sm:$0xff]  }
  0x96   :  { %3353 = vmatprep.subr.bf16.mxu1 %v3662_v45  ;;  %v3722_v45 = vld [vmem:[%s4635_s1 + $0x6d0] sm:$0xff]  }
  0x98   :  { %3332 = vmatpush3.bf16.msra.mxu0 %v3663_v46  ;;  %v3723_v46 = vld [vmem:[%s4635_s1 + $0x610] sm:$0xff]  }
  0x99   :  { %3354 = vmatpush3.bf16.msra.mxu1 %v3664_v47  ;;  %3333 = vmatprep.subr.bf16.mxu0 %v3665_v48  ;;  %v3724_v47 = vld [vmem:[%s4635_s1 + $0x690] sm:$0xff]   ;;  %v3725_v48 = vld [vmem:[%s4635_s1 + $0x658] sm:$0xff]  }
  0x9a   :  { %3355 = vmatprep.subr.bf16.mxu1 %v3666_v49  ;;  %v3726_v49 = vld [vmem:[%s4635_s1 + $0x6d8] sm:$0xff]  }
  0x9c   :  { %3334 = vmatpush3.bf16.msra.mxu0 %v3667_v50  ;;  %v3727_v50 = vld [vmem:[%s4635_s1 + $0x618] sm:$0xff]  }
  0x9d   :  { %3356 = vmatpush3.bf16.msra.mxu1 %v3668_v51  ;;  %3335 = vmatprep.subr.bf16.mxu0 %v3669_v52  ;;  %v3728_v51 = vld [vmem:[%s4635_s1 + $0x698] sm:$0xff]   ;;  %v3729_v52 = vld [vmem:[%s4635_s1 + $0x660] sm:$0xff]  }
  0x9e   :  { %3357 = vmatprep.subr.bf16.mxu1 %v3670_v53  ;;  %v3730_v53 = vld [vmem:[%s4635_s1 + $0x6e0] sm:$0xff]  }
  0xa0   :  { %3336 = vmatpush3.bf16.msra.mxu0 %v3671_v54  ;;  %v3731_v54 = vld [vmem:[%s4635_s1 + $0x620] sm:$0xff]  }
  0xa1   :  { %3358 = vmatpush3.bf16.msra.mxu1 %v3672_v55  ;;  %3365 = vmatprep.subr.bf16.mxu0 %v3677_v62  ;;  %v3732_v55 = vld [vmem:[%s4635_s1 + $0x6a0] sm:$0xff]   ;;  %v3739_v62 = vld [vmem:[%s4635_s1 + $0x630] sm:$0xff]  }
  0xa2   :  { %3387 = vmatprep.subr.bf16.mxu1 %v3678_v63  ;;  %v3740_v63 = vld [vmem:[%s4635_s1 + $0x6b0] sm:$0xff]  }
  0xa3   :  { %2547 = vmatmul.mubr.bf16.vlgmr.msra.gmra.mrb[16].mxu0 %v2871_v57  ;;  %v3734_v57 = vld [vmem:[%s4635_s1 + $0x6e8] sm:$0xff]  }
  0xa4   :  { %2587 = vmatmul.mubr.bf16.vlgmr.msra.gmra.mrb[16].mxu1 %v2873_v60  ;;  %3366 = vmatpush3.bf16.msra.mxu0 %v3679_v0  ;;  %v3737_v60 = vld [vmem:[%s4635_s1 + $0x670] sm:$0xff]   ;;  %v3741_v0 = vld [vmem:[%s4635_s1 + $0x678] sm:$0xff]  }
  0xa5   :  { %3388 = vmatpush3.bf16.msra.mxu1 %v3680_v1  ;;  %3367 = vmatprep.subr.bf16.mxu0 %v3681_v2  ;;  %v3742_v1 = vld [vmem:[%s4635_s1 + $0x6f8] sm:$0xff]  }
  0xa6   :  { %3389 = vmatprep.subr.bf16.mxu1 %v3682_v3  ;;  %2626 = vmatprep.mubr.bf16.mxu0 %v2876_v33  ;;  %v3743_v2 = vld [vmem:[%s4635_s1 + $0x638] sm:$0xff]   ;;  %v3769_v33 = vld [vmem:[%s4635_s1 + $0x768] sm:$0xff]  }
  0xa7   :  { %2666 = vmatprep.mubr.bf16.mxu1 %v2878_v35  ;;  %v3744_v3 = vld [vmem:[%s4635_s1 + $0x6b8] sm:$0xff]  }
  0xa8   :  { %3368 = vmatpush3.bf16.msra.mxu0 %v3683_v4  ;;  %v30_v4 = vld [vmem:[%s4636_s0 + $0x60] sm:$0xff] }
  0xa9   :  { %3390 = vmatpush3.bf16.msra.mxu1 %v3684_v5  ;;  %3369 = vmatprep.subr.bf16.mxu0 %v3685_v6  ;;  %v31_v5 = vld [vmem:[%s4636_s0 + $0x68] sm:$0xff]  ;;  %v2879_v6 = vcombine.low %v30_v4, %v30_v4 }
  0xaa   :  { %3391 = vmatprep.subr.bf16.mxu1 %v3686_v7  ;;  %v2880_v7 = vcombine.high %v30_v4, %v30_v4 }
  0xac   :  { %3370 = vmatpush3.bf16.msra.mxu0 %v3687_v8  ;;  %v2881_v8 = vcombine.low %v31_v5, %v31_v5 }
  0xad   :  { %3392 = vmatpush3.bf16.msra.mxu1 %v3688_v9  ;;  %3371 = vmatprep.subr.bf16.mxu0 %v3689_v10  ;;  %v3749_v9 = vld [vmem:[%s4635_s1 + $0x740] sm:$0xff]   ;;  %v2882_v10 = vcombine.high %v31_v5, %v31_v5 }
  0xae   :  { %3393 = vmatprep.subr.bf16.mxu1 %v3690_v11  ;;  %v3750_v11 = vld [vmem:[%s4635_s1 + $0x7c0] sm:$0xff]  }
  0xb0   :  { %3372 = vmatpush3.bf16.msra.mxu0 %v3691_v12  ;;  %v3751_v12 = vld [vmem:[%s4635_s1 + $0x700] sm:$0xff]  }
  0xb1   :  { %3394 = vmatpush3.bf16.msra.mxu1 %v3692_v13  ;;  %3373 = vmatprep.subr.bf16.mxu0 %v3693_v14  ;;  %v3752_v13 = vld [vmem:[%s4635_s1 + $0x780] sm:$0xff]   ;;  %v3753_v14 = vld [vmem:[%s4635_s1 + $0x748] sm:$0xff]  }
  0xb2   :  { %3395 = vmatprep.subr.bf16.mxu1 %v3694_v15  ;;  %v3754_v15 = vld [vmem:[%s4635_s1 + $0x7c8] sm:$0xff]  }
  0xb4   :  { %3374 = vmatpush3.bf16.msra.mxu0 %v3695_v16  ;;  %v3755_v16 = vld [vmem:[%s4635_s1 + $0x708] sm:$0xff]  }
  0xb5   :  { %3396 = vmatpush3.bf16.msra.mxu1 %v3696_v17  ;;  %3375 = vmatprep.subr.bf16.mxu0 %v3697_v18  ;;  %v3756_v17 = vld [vmem:[%s4635_s1 + $0x788] sm:$0xff]   ;;  %v3757_v18 = vld [vmem:[%s4635_s1 + $0x750] sm:$0xff]  }
  0xb6   :  { %3397 = vmatprep.subr.bf16.mxu1 %v3698_v19  ;;  %v3758_v19 = vld [vmem:[%s4635_s1 + $0x7d0] sm:$0xff]  }
  0xb8   :  { %3376 = vmatpush3.bf16.msra.mxu0 %v3699_v20  ;;  %v3759_v20 = vld [vmem:[%s4635_s1 + $0x710] sm:$0xff]  }
  0xb9   :  { %3398 = vmatpush3.bf16.msra.mxu1 %v3700_v21  ;;  %3377 = vmatprep.subr.bf16.mxu0 %v3701_v22  ;;  %v3760_v21 = vld [vmem:[%s4635_s1 + $0x790] sm:$0xff]   ;;  %v3761_v22 = vld [vmem:[%s4635_s1 + $0x758] sm:$0xff]  }
  0xba   :  { %3399 = vmatprep.subr.bf16.mxu1 %v3702_v23  ;;  %v3762_v23 = vld [vmem:[%s4635_s1 + $0x7d8] sm:$0xff]  }
  0xbc   :  { %3378 = vmatpush3.bf16.msra.mxu0 %v3703_v24  ;;  %v3763_v24 = vld [vmem:[%s4635_s1 + $0x718] sm:$0xff]  }
  0xbd   :  { %3400 = vmatpush3.bf16.msra.mxu1 %v3704_v25  ;;  %3379 = vmatprep.subr.bf16.mxu0 %v3705_v26  ;;  %v3764_v25 = vld [vmem:[%s4635_s1 + $0x798] sm:$0xff]   ;;  %v3765_v26 = vld [vmem:[%s4635_s1 + $0x760] sm:$0xff]  }
  0xbe   :  { %3401 = vmatprep.subr.bf16.mxu1 %v3706_v27  ;;  %v3766_v27 = vld [vmem:[%s4635_s1 + $0x7e0] sm:$0xff]  }
  0xc0   :  { %3380 = vmatpush3.bf16.msra.mxu0 %v3707_v28  ;;  %v3767_v28 = vld [vmem:[%s4635_s1 + $0x720] sm:$0xff]  }
  0xc1   :  { %3402 = vmatpush3.bf16.msra.mxu1 %v3708_v29  ;;  %3409 = vmatprep.subr.bf16.mxu0 %v3713_v36  ;;  %v3770_v36 = vld [vmem:[%s4635_s1 + $0x7e8] sm:$0xff]  }
  0xc2   :  { %3431 = vmatprep.subr.bf16.mxu1 %v3714_v37 }
  0xc3   :  { %2627 = vmatmul.mubr.bf16.vlgmr.msra.gmra.mrb[20].mxu0 %v2875_v32 }
  0xc4   :  { %2667 = vmatmul.mubr.bf16.vlgmr.msra.gmra.mrb[20].mxu1 %v2877_v34  ;;  %3410 = vmatpush3.bf16.msra.mxu0 %v3715_v38 }
  0xc5   :  { %3432 = vmatpush3.bf16.msra.mxu1 %v3716_v39  ;;  %3411 = vmatprep.subr.bf16.mxu0 %v3717_v40  ;;  %v3771_v40 = vld [vmem:[%s4635_s1 + $0x728] sm:$0xff]  }
  0xc6   :  { %3433 = vmatprep.subr.bf16.mxu1 %v3718_v41  ;;  %2706 = vmatprep.mubr.bf16.mxu0 %v2880_v7 }
  0xc7   :  { %2746 = vmatprep.mubr.bf16.mxu1 %v2882_v10 }
  0xc8   :  { %3412 = vmatpush3.bf16.msra.mxu0 %v3719_v42 }
  0xc9   :  { %3434 = vmatpush3.bf16.msra.mxu1 %v3720_v43  ;;  %3413 = vmatprep.subr.bf16.mxu0 %v3721_v44  ;;  %v3772_v43 = vld [vmem:[%s4635_s1 + $0x7a8] sm:$0xff]  }
  0xca   :  { %3435 = vmatprep.subr.bf16.mxu1 %v3722_v45  ;;  %v3773_v45 = vld [vmem:[%s4635_s1 + $0x770] sm:$0xff]  }
  0xcc   :  { %3414 = vmatpush3.bf16.msra.mxu0 %v3723_v46  ;;  %v3774_v46 = vld [vmem:[%s4635_s1 + $0x7f0] sm:$0xff]  }
  0xcd   :  { %3436 = vmatpush3.bf16.msra.mxu1 %v3724_v47  ;;  %3415 = vmatprep.subr.bf16.mxu0 %v3725_v48  ;;  %v3775_v47 = vld [vmem:[%s4635_s1 + $0x730] sm:$0xff]  }
  0xce   :  { %3437 = vmatprep.subr.bf16.mxu1 %v3726_v49  ;;  %v3776_v48 = vld [vmem:[%s4635_s1 + $0x7b0] sm:$0xff]   ;;  %v3777_v49 = vld [vmem:[%s4635_s1 + $0x778] sm:$0xff]  }
  0xd0   :  { %3416 = vmatpush3.bf16.msra.mxu0 %v3727_v50  ;;  %v3778_v50 = vld [vmem:[%s4635_s1 + $0x7f8] sm:$0xff]  }
  0xd1   :  { %3438 = vmatpush3.bf16.msra.mxu1 %v3728_v51  ;;  %3417 = vmatprep.subr.bf16.mxu0 %v3729_v52  ;;  %v3779_v51 = vld [vmem:[%s4635_s1 + $0x738] sm:$0xff]  }
  0xd2   :  { %3439 = vmatprep.subr.bf16.mxu1 %v3730_v53  ;;  %v3780_v52 = vld [vmem:[%s4635_s1 + $0x7b8] sm:$0xff]   ;;  %v32_v53 = vld [vmem:[%s4636_s0 + $0x70] sm:$0xff] }
  0xd4   :  { %3418 = vmatpush3.bf16.msra.mxu0 %v3731_v54  ;;  %v33_v54 = vld [vmem:[%s4636_s0 + $0x78] sm:$0xff] }
  0xd5   :  { %3440 = vmatpush3.bf16.msra.mxu1 %v3732_v55  ;;  %3419 = vmatprep.subr.bf16.mxu0 %v3733_v56  ;;  %v2883_v55 = vcombine.low %v32_v53, %v32_v53  ;;  %v2884_v56 = vcombine.high %v32_v53, %v32_v53 }
  0xd6   :  { %3441 = vmatprep.subr.bf16.mxu1 %v3734_v57  ;;  %v2885_v57 = vcombine.low %v33_v54, %v33_v54 }
  0xd8   :  { %3420 = vmatpush3.bf16.msra.mxu0 %v3735_v58  ;;  %v2886_v58 = vcombine.high %v33_v54, %v33_v54 }
  0xd9   :  { %3442 = vmatpush3.bf16.msra.mxu1 %v3736_v59  ;;  %3421 = vmatprep.subr.bf16.mxu0 %v3737_v60 }
  0xda   :  { %3443 = vmatprep.subr.bf16.mxu1 %v3738_v61 }
  0xdc   :  { %3422 = vmatpush3.bf16.msra.mxu0 %v3739_v62 }
  0xdd   :  { %3444 = vmatpush3.bf16.msra.mxu1 %v3740_v63  ;;  %3423 = vmatprep.subr.bf16.mxu0 %v3741_v0 }
  0xde   :  { %3445 = vmatprep.subr.bf16.mxu1 %v3742_v1 }
  0xe0   :  { %3424 = vmatpush3.bf16.msra.mxu0 %v3743_v2 }
  0xe1   :  { %3446 = vmatpush3.bf16.msra.mxu1 %v3744_v3  ;;  %3453 = vmatprep.subr.bf16.mxu0 %v3749_v9 }
  0xe2   :  { %3475 = vmatprep.subr.bf16.mxu1 %v3750_v11 }
  0xe3   :  { %2707 = vmatmul.mubr.bf16.vlgmr.msra.gmra.mrb[24].mxu0 %v2879_v6 }
  0xe4   :  { %2747 = vmatmul.mubr.bf16.vlgmr.msra.gmra.mrb[24].mxu1 %v2881_v8  ;;  %3454 = vmatpush3.bf16.msra.mxu0 %v3751_v12 }
  0xe5   :  { %3476 = vmatpush3.bf16.msra.mxu1 %v3752_v13  ;;  %3455 = vmatprep.subr.bf16.mxu0 %v3753_v14 }
  0xe6   :  { %3477 = vmatprep.subr.bf16.mxu1 %v3754_v15  ;;  %2786 = vmatprep.mubr.bf16.mxu0 %v2884_v56 }
  0xe7   :  { %2826 = vmatprep.mubr.bf16.mxu1 %v2886_v58 }
  0xe8   :  { %3456 = vmatpush3.bf16.msra.mxu0 %v3755_v16 }
  0xe9   :  { %3478 = vmatpush3.bf16.msra.mxu1 %v3756_v17  ;;  %3457 = vmatprep.subr.bf16.mxu0 %v3757_v18 }
  0xea   :  { %3479 = vmatprep.subr.bf16.mxu1 %v3758_v19 }
  0xec   :  { %3458 = vmatpush3.bf16.msra.mxu0 %v3759_v20 }
  0xed   :  { %3480 = vmatpush3.bf16.msra.mxu1 %v3760_v21  ;;  %3459 = vmatprep.subr.bf16.mxu0 %v3761_v22 }
  0xee   :  { %3481 = vmatprep.subr.bf16.mxu1 %v3762_v23 }
  0xf0   :  { %3460 = vmatpush3.bf16.msra.mxu0 %v3763_v24 }
  0xf1   :  { %3482 = vmatpush3.bf16.msra.mxu1 %v3764_v25  ;;  %3461 = vmatprep.subr.bf16.mxu0 %v3765_v26 }
  0xf2   :  { %3483 = vmatprep.subr.bf16.mxu1 %v3766_v27 }
  0xf4   :  { %3462 = vmatpush3.bf16.msra.mxu0 %v3767_v28 }
  0xf5   :  { %3484 = vmatpush3.bf16.msra.mxu1 %v3768_v30  ;;  %3463 = vmatprep.subr.bf16.mxu0 %v3769_v33 }
  0xf6   :  { %v3161_v29 = vpop.f32.mrb[0].mxu0  ;;  %3485 = vmatprep.subr.bf16.mxu1 %v3770_v36 }
  0xf7   :  { %v3183_v31 = vpop.f32.mrb[0].mxu1  ;;  %v3162_v32 = vpop.f32.mrb[1].mxu0 }
  0xf8   :  { %v3163_v34 = vadd.f32 %v3162_v32, %v3161_v29  ;;  %v3184_v35 = vpop.f32.mrb[1].mxu1  ;;  %v3164_v38 = vpop.f32.mrb[2].mxu0  ;;  %3464 = vmatpush3.bf16.msra.mxu0 %v3771_v40 }
  0xf9   :  { %v3185_v37 = vadd.f32 %v3184_v35, %v3183_v31  ;;  %v3186_v39 = vpop.f32.mrb[2].mxu1  ;;  %v3165_v41 = vpop.f32.mrb[3].mxu0  ;;  %3486 = vmatpush3.bf16.msra.mxu1 %v3772_v43  ;;  %3465 = vmatprep.subr.bf16.mxu0 %v3773_v45 }
  0xfa   :  { %v3187_v44 = vpop.f32.mrb[3].mxu1  ;;  %3487 = vmatprep.subr.bf16.mxu1 %v3774_v46 }
  0xfb   :  { %v2269_v42 = vadd.f32 %v3185_v37, %v3163_v34 }
  0xfc   :  { %3466 = vmatpush3.bf16.msra.mxu0 %v3775_v47 }
  0xfd   :  { %3488 = vmatpush3.bf16.msra.mxu1 %v3776_v48  ;;  %3467 = vmatprep.subr.bf16.mxu0 %v3777_v49 }
  0xfe   :  { %3489 = vmatprep.subr.bf16.mxu1 %v3778_v50 }
 0x100   :  { %3468 = vmatpush3.bf16.msra.mxu0 %v3779_v51 }
 0x101   :  { %3490 = vmatpush3.bf16.msra.mxu1 %v3780_v52 }
 0x103   :  { %2787 = vmatmul.mubr.bf16.vlgmr.msra.gmra.mrb[28].mxu0 %v2883_v55 }
 0x104   :  { %2827 = vmatmul.mubr.bf16.vlgmr.msra.gmra.mrb[28].mxu1 %v2885_v57 }
 0x116   :  { %v3205_v59 = vpop.f32.mrb[4].mxu0 }
 0x117   :  { %v3227_v60 = vpop.f32.mrb[4].mxu1  ;;  %v3206_v61 = vpop.f32.mrb[5].mxu0 }
 0x118   :  { %v3228_v62 = vpop.f32.mrb[5].mxu1  ;;  %v3207_v63 = vadd.f32 %v3206_v61, %v3205_v59  ;;  %v3208_v1 = vpop.f32.mrb[6].mxu0 }
 0x119   :  { %v3229_v0 = vadd.f32 %v3228_v62, %v3227_v60  ;;  %v3230_v2 = vpop.f32.mrb[6].mxu1  ;;  %v3209_v3 = vpop.f32.mrb[7].mxu0 }
 0x11a   :  { %v3231_v4 = vpop.f32.mrb[7].mxu1  ;;  %v2309_v5 = vadd.f32 %v3207_v63, %v2269_v42 }
 0x11c   :  { %v2349_v6 = vadd.f32 %v3229_v0, %v2309_v5 }
 0x136   :  { %v3249_v7 = vpop.f32.mrb[8].mxu0 }
 0x137   :  { %v3271_v8 = vpop.f32.mrb[8].mxu1  ;;  %v3250_v9 = vpop.f32.mrb[9].mxu0 }
 0x138   :  { %v3251_v10 = vadd.f32 %v3250_v9, %v3249_v7  ;;  %v3272_v11 = vpop.f32.mrb[9].mxu1  ;;  %v3252_v12 = vpop.f32.mrb[10].mxu0 }
 0x139   :  { %v3273_v13 = vadd.f32 %v3272_v11, %v3271_v8  ;;  %v3274_v14 = vpop.f32.mrb[10].mxu1  ;;  %v3253_v15 = vpop.f32.mrb[11].mxu0 }
 0x13a   :  { %v2389_v16 = vadd.f32 %v3251_v10, %v2349_v6  ;;  %v3275_v17 = vpop.f32.mrb[11].mxu1  ;;  %v3143_v14 = vld [vmem:[%s4637_s2] ss:$0 sm:$0xff] }
 0x13c   :  { %v2429_v18 = vadd.f32 %v3273_v13, %v2389_v16  ;;  %v3144_v16 = vld [vmem:[%s4638_s3] ss:$0 sm:$0xff] }
 0x156   :  { %v3293_v19 = vpop.f32.mrb[12].mxu0 }
 0x157   :  { %v3315_v20 = vpop.f32.mrb[12].mxu1  ;;  %v3294_v21 = vpop.f32.mrb[13].mxu0 }
 0x158   :  { %v3295_v22 = vadd.f32 %v3294_v21, %v3293_v19  ;;  %v3316_v23 = vpop.f32.mrb[13].mxu1  ;;  %v3296_v24 = vpop.f32.mrb[14].mxu0 }
 0x159   :  { %v3317_v25 = vadd.f32 %v3316_v23, %v3315_v20  ;;  %v3318_v26 = vpop.f32.mrb[14].mxu1  ;;  %v3297_v27 = vpop.f32.mrb[15].mxu0 }
 0x15a   :  { %v2469_v28 = vadd.f32 %v3295_v22, %v2429_v18  ;;  %v3319_v29 = vpop.f32.mrb[15].mxu1 }
 0x15c   :  { %v2509_v30 = vadd.f32 %v3317_v25, %v2469_v28 }
 0x176   :  { %v3337_v31 = vpop.f32.mrb[16].mxu0 }
 0x177   :  { %v3359_v32 = vpop.f32.mrb[16].mxu1  ;;  %v3338_v33 = vpop.f32.mrb[17].mxu0 }
 0x178   :  { %v3360_v34 = vpop.f32.mrb[17].mxu1  ;;  %v3339_v35 = vadd.f32 %v3338_v33, %v3337_v31  ;;  %v3340_v37 = vpop.f32.mrb[18].mxu0 }
 0x179   :  { %v3361_v36 = vadd.f32 %v3360_v34, %v3359_v32  ;;  %v3362_v38 = vpop.f32.mrb[18].mxu1  ;;  %v3341_v39 = vpop.f32.mrb[19].mxu0 }
 0x17a   :  { %v3363_v40 = vpop.f32.mrb[19].mxu1  ;;  %v2549_v41 = vadd.f32 %v3339_v35, %v2509_v30 }
 0x17c   :  { %v2589_v42 = vadd.f32 %v3361_v36, %v2549_v41 }
 0x196   :  { %v3381_v43 = vpop.f32.mrb[20].mxu0 }
 0x197   :  { %v3403_v44 = vpop.f32.mrb[20].mxu1  ;;  %v3382_v45 = vpop.f32.mrb[21].mxu0 }
 0x198   :  { %v3383_v46 = vadd.f32 %v3382_v45, %v3381_v43  ;;  %v3404_v47 = vpop.f32.mrb[21].mxu1  ;;  %v3384_v48 = vpop.f32.mrb[22].mxu0 }
 0x199   :  { %v3405_v49 = vadd.f32 %v3404_v47, %v3403_v44  ;;  %v3406_v50 = vpop.f32.mrb[22].mxu1  ;;  %v3385_v51 = vpop.f32.mrb[23].mxu0 }
 0x19a   :  { %v2629_v52 = vadd.f32 %v3383_v46, %v2589_v42  ;;  %v3407_v53 = vpop.f32.mrb[23].mxu1 }
 0x19c   :  { %v2669_v54 = vadd.f32 %v3405_v49, %v2629_v52 }
 0x1b6   :  { %v3425_v55 = vpop.f32.mrb[24].mxu0 }
 0x1b7   :  { %v3447_v56 = vpop.f32.mrb[24].mxu1  ;;  %v3426_v57 = vpop.f32.mrb[25].mxu0 }
 0x1b8   :  { %v3427_v58 = vadd.f32 %v3426_v57, %v3425_v55  ;;  %v3448_v59 = vpop.f32.mrb[25].mxu1  ;;  %v3428_v60 = vpop.f32.mrb[26].mxu0 }
 0x1b9   :  { %v3449_v61 = vadd.f32 %v3448_v59, %v3447_v56  ;;  %v3450_v62 = vpop.f32.mrb[26].mxu1  ;;  %v3429_v63 = vpop.f32.mrb[27].mxu0 }
 0x1ba   :  { %v2709_v0 = vadd.f32 %v3427_v58, %v2669_v54  ;;  %v3451_v1 = vpop.f32.mrb[27].mxu1 }
 0x1bc   :  { %v2749_v2 = vadd.f32 %v3449_v61, %v2709_v0 }
 0x1d6   :  { %v3469_v3 = vpop.f32.mrb[28].mxu0 }
 0x1d7   :  { %v3491_v4 = vpop.f32.mrb[28].mxu1  ;;  %v3470_v5 = vpop.f32.mrb[29].mxu0 }
 0x1d8   :  { %v3471_v6 = vadd.f32 %v3470_v5, %v3469_v3  ;;  %v3492_v7 = vpop.f32.mrb[29].mxu1  ;;  %v3472_v8 = vpop.f32.mrb[30].mxu0 }
 0x1d9   :  { %v3493_v9 = vadd.f32 %v3492_v7, %v3491_v4  ;;  %v3494_v10 = vpop.f32.mrb[30].mxu1  ;;  %v3473_v11 = vpop.f32.mrb[31].mxu0 }
 0x1da   :  { %v2789_v12 = vadd.f32 %v3471_v6, %v2749_v2  ;;  %v3495_v13 = vpop.f32.mrb[31].mxu1 }
 0x1dc   :  { %v2829_v15 = vadd.f32 %v3493_v9, %v2789_v12 }
 0x1de   :  { %v2841_v17 = vmul.f32 %v3143_v14, %v2829_v15 }
 0x1e0   :  { %v2849_v18 = vadd.f32 %v3144_v16, %v2841_v17 }
 0x1e2   :  { %2850 = vst [vmem:[%s4639_s4] sm:$0xff] %v2849_v18 }

// kernel: forward.6
= control target key start
LH: loop header
LB: loop body
LE: loop exit
PB: predicated region body
PF: predicated region fallthrough
CT: control target
= control target key end

     0   :  { %9 = vsyncpa [#allocation3], 0  ;;  %s12415_s0 = inlined_call_operand.vmem [shape: bf16[8,4096], index: 0, kind: input, shape index: {}]   ;;  %s12416_s1 = inlined_call_operand.hbm [shape: bf16[4096,4096], index: 1, kind: input, shape index: {}]   ;;  %s12417_s2 = inlined_call_operand.hbm [shape: f32[1,4096], index: 2, kind: input, shape index: {}]   ;;  %s12418_s3 = inlined_call_operand.hbm [shape: f32[1,4096], index: 3, kind: input, shape index: {}]   ;;  %s12419_s4 = inlined_call_operand.vmem [shape: bf16[8,4096], index: 4, kind: output, shape index: {}]  }
   0x1   :  { %11 = vsyncpa [#allocation3 + $0x1], 0 }
   0x2   :  { %12 = vsyncpa [#allocation5], 0 }
   0x3   :  { %14 = vsyncpa [#allocation5 + $0x1], 0  ;;  %s11048_s15 = smov 0   ;;  %s11050_s16 = smov 0  }
   0x4   :  { %s11052_s17 = smov 0   ;;  %s11054_s18 = smov 0  }
   0x5 LB: > { %s11067_s19 = sadd.s32 4294967295, %s11015_s18   ;;  %s11070_s20 = sadd.s32 1, %s11015_s18   ;;  %s11015_s18 = sphi %s11054_s18, %s12432_s18   ;;  %s11011_s17 = sphi %s11052_s17, %s12431_s17   ;;  %s11007_s16 = sphi %s11050_s16, %s12430_s16   ;;  %s11003_s15 = sphi %s11048_s15, %s12429_s15  }
   0x6   : > { %s45_s21 = ssub.s32 %s11015_s18, %s11070_s20  ;;  %s48_s22 = sadd.s32 1, %s11011_s17 }
   0x7   : > { %p46_p0 = scmp.eq.s32.totalorder %s45_s21, 0  ;;  %p55_p1 = scmp.ne.s32.totalorder %s11011_s17, %s11007_s16 }
   0x8   : > { %p56_p2 = scmp.eq.s32.totalorder %s11015_s18, 0  ;;  %p61_p3 = scmp.ne.s32.totalorder %s11007_s16, %s11003_s15 }
   0x9   : > { %s11080_s23 = scalar_select %p46_p0, %s11011_s17, %s48_s22  }
   0xa   : > { %p57_p4 = por %p56_p2, %p55_p1  ;;  %p62_p5 = scmp.eq.s32.totalorder %s11067_s19, 0 }
   0xb   : > { %p9283_p6 = scmp.lt.s32.totalorder %s11015_s18, 8  ;;  %s11089_s25 = sand.u32 1, %s11011_s17  }
   0xc   : > { %p11084_p7 = por %p62_p5, %p61_p3  ;;  %s8067_s26 = sshll.u32 %s11089_s25, 13 }
   0xd   : > { %p11092_p8 = pnand %p9283_p6, %p57_p4  ;;  %s170_s28 = scalar_lea.vmem [#allocation2], %s8067_s26 }
   0xe   : > { %s12422_s24 = scalar_select %p11084_p7, 1, 0 }
   0xf   : > { %s12423_s27 = scalar_select %p11092_p8, 1, 0 }
  0x10   : > { %s177_s29 = sshll.u32 %s170_s28, 4  ;;  %s187_s30 = sand.u32 1, %s11015_s18   ;;  %s11097_s29 = int_to_ptr.vmem [resolvable:$true] %s177_s29 }
  0x11   : > { %s8070_s5 = sshll.u32 %s11089_s25, 2  ;;  %s9143_s6 = sshll.u32 %s11015_s18, 6 }
  0x12   : > { %s11106_s9 = scalar_lea.hbm %s12417_s2, %s9143_s6  ;;  %s191_s10 = scalar_lea.vmem [#allocation4], %s8070_s5 }
  0x13   : > { %s199_s11 = sshll.u32 %s191_s10, 4  ;;  %s11112_s12 = scalar_lea.sflag [#allocation5], %s187_s30  ;;  %s11110_s11 = int_to_ptr.vmem [resolvable:$true] %s199_s11 }
  0x14   : > { %s10887_s13 = scalar_lea.hbm %s11106_s9, 64  ;;  %p11118_p10 = pneg %p11092_p8 }
  0x15   : > { %p10888_p9 = scmp.ne.s32.totalorder %s11106_s9, %s10887_s13  ;;  %s10892_s22 = scalar_lea.hbm %s12417_s2, 512 }
  0x16   : > { %p10893_p13 = scmp.lt.u32.totalorder %s11106_s9, %s12417_s2  ;;  %p10894_p0 = scmp.lt.u32.totalorder %s10892_s22, %s10887_s13 }
  0x17   : > { %p10890_p11 = pnand %p11118_p10, %p10888_p9  ;;  %p10896_p2 = scmp.lt.u32.totalorder %s10887_s13, %s11106_s9 }
  0x18   : > { %p10895_p1 = por %p10894_p0, %p10893_p13 }
  0x19   : > { %p10891_p12 = pneg %p10890_p11 }
  0x1a   : > { %p10897_p3 = por %p10896_p2, %p10895_p1 }
  0x1c   : > { %p10898_p4 = pnand %p10897_p3, %p10891_p12 }
  0x1e   : > { %10901 = shalt.err (!%p10898_p4)
}
  0x1f   : > { %s10902_s30 = scalar_lea.vmem %s11110_s11, 64  ;;  %s11017_s7 = smov [#allocation4]  }
  0x20   : > { %p10903_p5 = scmp.ne.s32.totalorder %s11110_s11, %s10902_s30  ;;  %s10907_s8 = sshll.u32 %s11017_s7, 4  ;;  %s10908_s8 = int_to_ptr.vmem [resolvable:$false] %s10907_s8 }
  0x21   : > { %s10909_s10 = scalar_lea.vmem %s10908_s8, 128  ;;  %p10910_p11 = scmp.lt.s32.totalorder %s11110_s11, %s10908_s8 }
  0x22   : > { %p10905_p6 = pnand %p10903_p5, %p11118_p10  ;;  %p10911_p7 = scmp.lt.s32.totalorder %s10909_s10, %s10902_s30 }
  0x24   : > { %p10906_p9 = pneg %p10905_p6  ;;  %p10912_p13 = por %p10911_p7, %p10910_p11 }
  0x26   : > { %p10913_p0 = pnand %p10912_p13, %p10906_p9 }
  0x28   : > { %10916 = shalt.err (!%p10913_p0)
}
  0x29   : > { %9279 = dma.hbm_to_vmem [thread:$0]  (!%p11092_p8), %s11106_s9, 64, %s11110_s11, %s11112_s12  }
  0x2a   : > { %s11147_s21 = scalar_lea.hbm %s12418_s3, %s9143_s6  ;;  %p8076_p7 = scmp.ge.s32.totalorder %s11015_s18, 1 }
  0x2b   : > { %p223_p12 = scmp.lt.s32.totalorder %s11015_s18, 9  ;;  %s9142_s22 = sshll.u32 %s11015_s18, 8 }
  0x2c   : > { %s11155_s30 = scalar_lea.hbm %s12416_s1, %s9142_s22  ;;  %s11163_s11 = scalar_lea.vmem [#allocation6], %s8070_s5 }
  0x2d   : > { %p11157_p1 = pnand %p8076_p7, %p223_p12  ;;  %s218_s6 = sshll.u32 %s11163_s11, 4  ;;  %s219_s6 = int_to_ptr.vmem [resolvable:$true] %s218_s6 }
  0x2e   : > { %s167_s7 = scalar_lea.sflag [#allocation3], %s11089_s25  ;;  %s10917_s18 = scalar_lea.hbm %s11155_s30, 131072 }
  0x2f   : > { %s12425_s9 = scalar_select %p11157_p1, 1, 0 }
  0x30   : > { %p10918_p2 = scmp.ne.s32.totalorder %s11155_s30, %s10917_s18  ;;  %s10922_s13 = scalar_lea.hbm %s12416_s1, 1048576 }
  0x31   : > { %p10923_p5 = scmp.lt.u32.totalorder %s11155_s30, %s12416_s1  ;;  %p10924_p6 = scmp.lt.u32.totalorder %s10922_s13, %s10917_s18 }
  0x32   : > { %p10920_p3 = pnand %p10918_p2, %p11118_p10  ;;  %p10926_p11 = scmp.lt.u32.totalorder %s10917_s18, %s11155_s30 }
  0x33   : > { %p10925_p9 = por %p10924_p6, %p10923_p5 }
  0x34   : > { %p10921_p4 = pneg %p10920_p3 }
  0x35   : > { %p10927_p13 = por %p10926_p11, %p10925_p9 }
  0x37   : > { %p10928_p0 = pnand %p10927_p13, %p10921_p4 }
  0x39   : > { %10931 = shalt.err (!%p10928_p0)
}
  0x3a   : > { %s10932_s5 = scalar_lea.vmem %s11097_s29, 131072  ;;  %s11018_s26 = smov [#allocation2]  }
  0x3b   : > { %p10933_p7 = scmp.ne.s32.totalorder %s11097_s29, %s10932_s5  ;;  %s10937_s28 = sshll.u32 %s11018_s26, 4  ;;  %s10938_s28 = int_to_ptr.vmem [resolvable:$false] %s10937_s28 }
  0x3c   : > { %s10939_s8 = scalar_lea.vmem %s10938_s28, 262144  ;;  %p10940_p3 = scmp.lt.s32.totalorder %s11097_s29, %s10938_s28 }
  0x3d   : > { %p10935_p12 = pnand %p10933_p7, %p11118_p10  ;;  %p10941_p1 = scmp.lt.s32.totalorder %s10939_s8, %s10932_s5 }
  0x3f   : > { %p10936_p2 = pneg %p10935_p12  ;;  %p10942_p5 = por %p10941_p1, %p10940_p3 }
  0x41   : > { %p10943_p6 = pnand %p10942_p5, %p10936_p2 }
  0x43   : > { %10946 = shalt.err (!%p10943_p6)
}
  0x44   : > { %s11019_s18 = smov 2048   ;;  %s11020_s10 = smov 256  }
  0x45   : > { %s11021_s13 = smov 16   ;;  %s10947_s15 = scalar_lea.hbm %s11147_s21, 64 }
  0x46   : > { %9276 = dma.hbm_to_vmem [thread:$0]  (!%p11092_p8), %s11155_s30, 131072, %s11097_s29, %s167_s7, %s11019_s18, %s11020_s10, %s11021_s13  }
  0x47   : > { %p10948_p1 = scmp.ne.s32.totalorder %s11147_s21, %s10947_s15  ;;  %s10952_s26 = scalar_lea.hbm %s12418_s3, 512 }
  0x48   : > { %p10953_p11 = scmp.lt.u32.totalorder %s11147_s21, %s12418_s3  ;;  %p10954_p13 = scmp.lt.u32.totalorder %s10952_s26, %s10947_s15 }
  0x49   : > { %p10950_p4 = pnand %p10948_p1, %p11118_p10  ;;  %p10956_p7 = scmp.lt.u32.totalorder %s10947_s15, %s11147_s21 }
  0x4a   : > { %p10955_p0 = por %p10954_p13, %p10953_p11 }
  0x4b   : > { %p10951_p9 = pneg %p10950_p4 }
  0x4c   : > { %p10957_p12 = por %p10956_p7, %p10955_p0 }
  0x4e   : > { %p10958_p2 = pnand %p10957_p12, %p10951_p9 }
  0x50   : > { %10961 = shalt.err (!%p10958_p2)
}
  0x51   : > { %s10962_s25 = scalar_lea.vmem %s219_s6, 64  ;;  %s11022_s29 = smov [#allocation6]  }
  0x52   : > { %p10963_p3 = scmp.ne.s32.totalorder %s219_s6, %s10962_s25  ;;  %s10967_s30 = sshll.u32 %s11022_s29, 4  ;;  %s10968_s30 = int_to_ptr.vmem [resolvable:$false] %s10967_s30 }
  0x53   : > { %s10969_s11 = scalar_lea.vmem %s10968_s30, 128  ;;  %p10970_p1 = scmp.lt.s32.totalorder %s219_s6, %s10968_s30 }
  0x54   : > { %p10965_p5 = pnand %p10963_p3, %p11118_p10  ;;  %p10971_p4 = scmp.lt.s32.totalorder %s10969_s11, %s10962_s25 }
  0x56   : > { %p10966_p6 = pneg %p10965_p5  ;;  %p10972_p8 = por %p10971_p4, %p10970_p1 }
  0x58   : > { %p10973_p11 = pnand %p10972_p8, %p10966_p6 }
  0x5a   : > { %10976 = shalt.err (!%p10973_p11)
}
  0x5b   : > { %p12426_p13 = scmp.ne.s32.totalorder %s12423_s27, 0  ;;  %p12427_p9 = scmp.ne.s32.totalorder %s12425_s9, 0 }
  0x5c   : > { %s11213_s14 = sand.u32 (!%p12427_p9), 1, %s11007_s16   ;;  %p12428_p8 = scmp.ne.s32.totalorder (!%p12427_p9), %s12422_s24, 0 }
  0x5d   : > { %9282 = dma.hbm_to_vmem [thread:$0]  (!%p12426_p13), %s11147_s21, 64, %s219_s6, %s11112_s12  }
  0x5e   : > { %227 = sbr.rel (%p12427_p9) target bundleno = 1352 (0x548), region = 36  ;;  %s8077_s7 = sshll.u32 (!%p12427_p9), %s11213_s14, 13 }
  0x5f   : > { %s230_s18 = scalar_lea.sflag (!%p12427_p9), [#allocation3], %s11213_s14  ;;  %s11217_s10 = scalar_lea.vmem (!%p12427_p9), [#allocation2], %s8077_s7 }
  0x65   : > { %10994 = dma.done.wait (%p12428_p8), %s230_s18, 131072  }
  0x66   : > { %10996 = vsyncadd (%p12428_p8), %s230_s18, 4294836224  ;;  %s238_s27 = sand.u32 1, %s11067_s19   ;;  %s8078_s12 = sshll.u32 %s11213_s14, 2 }
  0x67   : > { %s239_s21 = scalar_lea.sflag [#allocation5], %s238_s27  ;;  %s11227_s9 = scalar_lea.vmem [#allocation4], %s8078_s12 }
  0x68   : > { %10998 = dma.done.wait (%p12428_p8), %s239_s21, 128  }
  0x69   : > { %11000 = vsyncadd (%p12428_p8), %s239_s21, 4294967168  ;;  %v9319_v0 = vld [vmem:[%s11217_s10 + $0x4] ss:$16 sps:$4 sm:$0xff]   ;;  %v9321_v1 = vld [vmem:[%s11217_s10 + $0xc] ss:$16 sps:$4 sm:$0xff]   ;;  %s8080_s27 = sshll.u32 %s11067_s19, 2 }
  0x6a   : > { %6567 = vmatprep.subr.bf16.mxu0 %v9319_v0  ;;  %v9323_v2 = vld [vmem:[%s11217_s10] ss:$16 sps:$4 sm:$0xff]   ;;  %v9324_v3 = vld [vmem:[%s11217_s10 + $0x8] ss:$16 sps:$4 sm:$0xff]   ;;  %7223 = vmatprep.subr.bf16.mxu1 %v9321_v1  ;;  %v9325_v4 = vld [vmem:[%s11217_s10 + $0x24] ss:$16 sps:$4 sm:$0xff]  }
  0x6b   : > { %6568 = vmatpush1.bf16.msra.mxu0 %v9323_v2  ;;  %7224 = vmatpush1.bf16.msra.mxu1 %v9324_v3  ;;  %v9327_v5 = vld [vmem:[%s11217_s10 + $0x2c] ss:$16 sps:$4 sm:$0xff]   ;;  %v9329_v6 = vld [vmem:[%s11217_s10 + $0x20] ss:$16 sps:$4 sm:$0xff]   ;;  %v9330_v7 = vld [vmem:[%s11217_s10 + $0x28] ss:$16 sps:$4 sm:$0xff]  }
  0x6c   : > { %6569 = vmatprep.subr.bf16.mxu0 %v9325_v4  ;;  %7225 = vmatprep.subr.bf16.mxu1 %v9327_v5  ;;  %v9331_v8 = vld [vmem:[%s11217_s10 + $0x44] ss:$16 sps:$4 sm:$0xff]   ;;  %v9333_v9 = vld [vmem:[%s11217_s10 + $0x4c] ss:$16 sps:$4 sm:$0xff]   ;;  %v9335_v10 = vld [vmem:[%s11217_s10 + $0x40] ss:$16 sps:$4 sm:$0xff]  }
  0x6d   : > { %v9336_v11 = vld [vmem:[%s11217_s10 + $0x48] ss:$16 sps:$4 sm:$0xff]   ;;  %v9337_v12 = vld [vmem:[%s11217_s10 + $0x64] ss:$16 sps:$4 sm:$0xff]   ;;  %v9339_v13 = vld [vmem:[%s11217_s10 + $0x6c] ss:$16 sps:$4 sm:$0xff]  }
  0x6e   : > { %v9341_v14 = vld [vmem:[%s11217_s10 + $0x60] ss:$16 sps:$4 sm:$0xff]   ;;  %v9342_v15 = vld [vmem:[%s11217_s10 + $0x68] ss:$16 sps:$4 sm:$0xff]   ;;  %v9343_v16 = vld [vmem:[%s11217_s10 + $0x84] ss:$16 sps:$4 sm:$0xff]  }
  0x6f   : > { %6570 = vmatpush1.bf16.msra.mxu0 %v9329_v6  ;;  %7226 = vmatpush1.bf16.msra.mxu1 %v9330_v7  ;;  %v9345_v17 = vld [vmem:[%s11217_s10 + $0x8c] ss:$16 sps:$4 sm:$0xff]   ;;  %v9347_v18 = vld [vmem:[%s11217_s10 + $0x80] ss:$16 sps:$4 sm:$0xff]   ;;  %v9348_v19 = vld [vmem:[%s11217_s10 + $0x88] ss:$16 sps:$4 sm:$0xff]  }
  0x70   : > { %6571 = vmatprep.subr.bf16.mxu0 %v9331_v8  ;;  %7227 = vmatprep.subr.bf16.mxu1 %v9333_v9  ;;  %v9349_v20 = vld [vmem:[%s11217_s10 + $0xa4] ss:$16 sps:$4 sm:$0xff]   ;;  %v9351_v21 = vld [vmem:[%s11217_s10 + $0xac] ss:$16 sps:$4 sm:$0xff]   ;;  %v9353_v22 = vld [vmem:[%s11217_s10 + $0xa0] ss:$16 sps:$4 sm:$0xff]  }
  0x71   : > { %v9354_v23 = vld [vmem:[%s11217_s10 + $0xa8] ss:$16 sps:$4 sm:$0xff]   ;;  %v9355_v24 = vld [vmem:[%s11217_s10 + $0xc4] ss:$16 sps:$4 sm:$0xff]   ;;  %v9357_v25 = vld [vmem:[%s11217_s10 + $0xcc] ss:$16 sps:$4 sm:$0xff]  }
  0x72   : > { %v9359_v26 = vld [vmem:[%s11217_s10 + $0xc0] ss:$16 sps:$4 sm:$0xff]   ;;  %v9360_v27 = vld [vmem:[%s11217_s10 + $0xc8] ss:$16 sps:$4 sm:$0xff]   ;;  %v9361_v28 = vld [vmem:[%s11217_s10 + $0xe4] ss:$16 sps:$4 sm:$0xff]  }
  0x73   : > { %6572 = vmatpush1.bf16.msra.mxu0 %v9335_v10  ;;  %7228 = vmatpush1.bf16.msra.mxu1 %v9336_v11  ;;  %v9363_v29 = vld [vmem:[%s11217_s10 + $0xec] ss:$16 sps:$4 sm:$0xff]   ;;  %v9365_v30 = vld [vmem:[%s11217_s10 + $0xe0] ss:$16 sps:$4 sm:$0xff]   ;;  %v9366_v31 = vld [vmem:[%s11217_s10 + $0xe8] ss:$16 sps:$4 sm:$0xff]  }
  0x74   : > { %6573 = vmatprep.subr.bf16.mxu0 %v9337_v12  ;;  %7229 = vmatprep.subr.bf16.mxu1 %v9339_v13  ;;  %v9367_v32 = vld [vmem:[%s11217_s10 + $0x104] ss:$16 sps:$4 sm:$0xff]   ;;  %v9369_v33 = vld [vmem:[%s11217_s10 + $0x10c] ss:$16 sps:$4 sm:$0xff]   ;;  %v9371_v34 = vld [vmem:[%s11217_s10 + $0x100] ss:$16 sps:$4 sm:$0xff]  }
  0x75   : > { %v9372_v35 = vld [vmem:[%s11217_s10 + $0x108] ss:$16 sps:$4 sm:$0xff]   ;;  %v9373_v36 = vld [vmem:[%s11217_s10 + $0x124] ss:$16 sps:$4 sm:$0xff]   ;;  %v9375_v37 = vld [vmem:[%s11217_s10 + $0x12c] ss:$16 sps:$4 sm:$0xff]  }
  0x76   : > { %v9377_v38 = vld [vmem:[%s11217_s10 + $0x120] ss:$16 sps:$4 sm:$0xff]   ;;  %v9378_v39 = vld [vmem:[%s11217_s10 + $0x128] ss:$16 sps:$4 sm:$0xff]   ;;  %v9379_v40 = vld [vmem:[%s11217_s10 + $0x144] ss:$16 sps:$4 sm:$0xff]  }
  0x77   : > { %6574 = vmatpush1.bf16.msra.mxu0 %v9341_v14  ;;  %7230 = vmatpush1.bf16.msra.mxu1 %v9342_v15  ;;  %v9381_v41 = vld [vmem:[%s11217_s10 + $0x14c] ss:$16 sps:$4 sm:$0xff]   ;;  %v9383_v42 = vld [vmem:[%s11217_s10 + $0x140] ss:$16 sps:$4 sm:$0xff]   ;;  %v9384_v43 = vld [vmem:[%s11217_s10 + $0x148] ss:$16 sps:$4 sm:$0xff]  }
  0x78   : > { %6575 = vmatprep.subr.bf16.mxu0 %v9343_v16  ;;  %7231 = vmatprep.subr.bf16.mxu1 %v9345_v17  ;;  %v9385_v44 = vld [vmem:[%s11217_s10 + $0x164] ss:$16 sps:$4 sm:$0xff]   ;;  %v9387_v45 = vld [vmem:[%s11217_s10 + $0x16c] ss:$16 sps:$4 sm:$0xff]   ;;  %v9389_v47 = vld [vmem:[%s11217_s10 + $0x160] ss:$16 sps:$4 sm:$0xff]  }
  0x79   : > { %v295_v46 = vld [vmem:[%s12415_s0] sm:$0xff]  ;;  %v9391_v50 = vld [vmem:[%s11217_s10 + $0x184] ss:$16 sps:$4 sm:$0xff]   ;;  %v9395_v52 = vld [vmem:[%s11217_s10 + $0x180] ss:$16 sps:$4 sm:$0xff]   ;;  %p290_p10 = scmp.lt.s32.totalorder %s8080_s27, 31 }
  0x7a   : > { %v8083_v48 = vcombine.high %v295_v46, %v295_v46  ;;  %v9390_v49 = vld [vmem:[%s11217_s10 + $0x168] ss:$16 sps:$4 sm:$0xff]   ;;  %v9393_v51 = vld [vmem:[%s11217_s10 + $0x18c] ss:$16 sps:$4 sm:$0xff]   ;;  %v9397_v54 = vld [vmem:[%s11217_s10 + $0x1a4] ss:$16 sps:$4 sm:$0xff]   ;;  %v8082_v4 = vcombine.low %v295_v46, %v295_v46 }
  0x7b   : > { %6576 = vmatpush1.bf16.msra.mxu0 %v9347_v18  ;;  %7232 = vmatpush1.bf16.msra.mxu1 %v9348_v19  ;;  %v9396_v53 = vld [vmem:[%s11217_s10 + $0x188] ss:$16 sps:$4 sm:$0xff]   ;;  %v9399_v55 = vld [vmem:[%s11217_s10 + $0x1ac] ss:$16 sps:$4 sm:$0xff]   ;;  %v9401_v56 = vld [vmem:[%s11217_s10 + $0x1a0] ss:$16 sps:$4 sm:$0xff]  }
  0x7c   : > { %6577 = vmatprep.subr.bf16.mxu0 %v9349_v20  ;;  %7233 = vmatprep.subr.bf16.mxu1 %v9351_v21  ;;  %v9402_v57 = vld [vmem:[%s11217_s10 + $0x1a8] ss:$16 sps:$4 sm:$0xff]   ;;  %v9403_v58 = vld [vmem:[%s11217_s10 + $0x1c4] ss:$16 sps:$4 sm:$0xff]   ;;  %v9405_v59 = vld [vmem:[%s11217_s10 + $0x1cc] ss:$16 sps:$4 sm:$0xff]  }
  0x7d   : > { %6599 = vmatprep.mubr.bf16.mxu0 %v8083_v48  ;;  %7255 = vmatprep.mubr.bf16.mxu1 %v8083_v48  ;;  %v9407_v60 = vld [vmem:[%s11217_s10 + $0x1c0] ss:$16 sps:$4 sm:$0xff]   ;;  %v9408_v61 = vld [vmem:[%s11217_s10 + $0x1c8] ss:$16 sps:$4 sm:$0xff]   ;;  %v9409_v62 = vld [vmem:[%s11217_s10 + $0x1e4] ss:$16 sps:$4 sm:$0xff]  }
  0x7e   : > { %v9411_v63 = vld [vmem:[%s11217_s10 + $0x1ec] ss:$16 sps:$4 sm:$0xff]   ;;  %v9413_v0 = vld [vmem:[%s11217_s10 + $0x1e0] ss:$16 sps:$4 sm:$0xff]   ;;  %v9414_v1 = vld [vmem:[%s11217_s10 + $0x1e8] ss:$16 sps:$4 sm:$0xff]  }
  0x7f   : > { %6578 = vmatpush1.bf16.msra.mxu0 %v9353_v22  ;;  %7234 = vmatpush1.bf16.msra.mxu1 %v9354_v23  ;;  %v9419_v2 = vld [vmem:[%s11217_s10 + $0x204] ss:$16 sps:$4 sm:$0xff]   ;;  %v9422_v3 = vld [vmem:[%s11217_s10 + $0x20c] ss:$16 sps:$4 sm:$0xff]   ;;  %v9417_v5 = vld [vmem:[%s11217_s10 + $0x200] ss:$16 sps:$4 sm:$0xff]  }
  0x80   : > { %6579 = vmatprep.subr.bf16.mxu0 %v9355_v24  ;;  %7235 = vmatprep.subr.bf16.mxu1 %v9357_v25  ;;  %v9420_v6 = vld [vmem:[%s11217_s10 + $0x208] ss:$16 sps:$4 sm:$0xff]   ;;  %v9425_v7 = vld [vmem:[%s11217_s10 + $0x224] ss:$16 sps:$4 sm:$0xff]   ;;  %v9428_v8 = vld [vmem:[%s11217_s10 + $0x22c] ss:$16 sps:$4 sm:$0xff]  }
  0x81   : > { %v9423_v9 = vld [vmem:[%s11217_s10 + $0x220] ss:$16 sps:$4 sm:$0xff]   ;;  %v9426_v10 = vld [vmem:[%s11217_s10 + $0x228] ss:$16 sps:$4 sm:$0xff]   ;;  %v9431_v11 = vld [vmem:[%s11217_s10 + $0x244] ss:$16 sps:$4 sm:$0xff]  }
  0x82   : > { %v9434_v12 = vld [vmem:[%s11217_s10 + $0x24c] ss:$16 sps:$4 sm:$0xff]   ;;  %v9429_v13 = vld [vmem:[%s11217_s10 + $0x240] ss:$16 sps:$4 sm:$0xff]   ;;  %v9432_v14 = vld [vmem:[%s11217_s10 + $0x248] ss:$16 sps:$4 sm:$0xff]  }
  0x83   : > { %6580 = vmatpush1.bf16.msra.mxu0 %v9359_v26  ;;  %7236 = vmatpush1.bf16.msra.mxu1 %v9360_v27  ;;  %v9437_v15 = vld [vmem:[%s11217_s10 + $0x264] ss:$16 sps:$4 sm:$0xff]   ;;  %v9440_v16 = vld [vmem:[%s11217_s10 + $0x26c] ss:$16 sps:$4 sm:$0xff]   ;;  %v9435_v17 = vld [vmem:[%s11217_s10 + $0x260] ss:$16 sps:$4 sm:$0xff]  }
  0x84   : > { %6581 = vmatprep.subr.bf16.mxu0 %v9361_v28  ;;  %7237 = vmatprep.subr.bf16.mxu1 %v9363_v29  ;;  %v9438_v18 = vld [vmem:[%s11217_s10 + $0x268] ss:$16 sps:$4 sm:$0xff]   ;;  %v9443_v19 = vld [vmem:[%s11217_s10 + $0x284] ss:$16 sps:$4 sm:$0xff]   ;;  %v9446_v20 = vld [vmem:[%s11217_s10 + $0x28c] ss:$16 sps:$4 sm:$0xff]  }
  0x85   : > { %v9441_v21 = vld [vmem:[%s11217_s10 + $0x280] ss:$16 sps:$4 sm:$0xff]   ;;  %v9444_v22 = vld [vmem:[%s11217_s10 + $0x288] ss:$16 sps:$4 sm:$0xff]   ;;  %v9449_v23 = vld [vmem:[%s11217_s10 + $0x2a4] ss:$16 sps:$4 sm:$0xff]  }
  0x86   : > { %v9452_v24 = vld [vmem:[%s11217_s10 + $0x2ac] ss:$16 sps:$4 sm:$0xff]   ;;  %v9447_v25 = vld [vmem:[%s11217_s10 + $0x2a0] ss:$16 sps:$4 sm:$0xff]   ;;  %v9450_v26 = vld [vmem:[%s11217_s10 + $0x2a8] ss:$16 sps:$4 sm:$0xff]  }
  0x87   : > { %6582 = vmatpush1.bf16.msra.mxu0 %v9365_v30  ;;  %7238 = vmatpush1.bf16.msra.mxu1 %v9366_v31  ;;  %v9455_v27 = vld [vmem:[%s11217_s10 + $0x2c4] ss:$16 sps:$4 sm:$0xff]   ;;  %v9458_v28 = vld [vmem:[%s11217_s10 + $0x2cc] ss:$16 sps:$4 sm:$0xff]   ;;  %v9453_v31 = vld [vmem:[%s11217_s10 + $0x2c0] ss:$16 sps:$4 sm:$0xff]  }
  0x88   : > { %6583 = vmatprep.subr.bf16.mxu0 %v9367_v32  ;;  %7239 = vmatprep.subr.bf16.mxu1 %v9369_v33  ;;  %v11329_v29 = vld [vmem:[%s12415_s0 + $0x8] sm:$0xff]  ;;  %v9456_v32 = vld [vmem:[%s11217_s10 + $0x2c8] ss:$16 sps:$4 sm:$0xff]   ;;  %v9482_v46 = vld [vmem:[%s11217_s10 + $0x34c] ss:$16 sps:$4 sm:$0xff]   ;;  %s12434_s27 = smov (!%p290_p10, %s8080_s27), 31 }
  0x89   : > { %v8085_v30 = vcombine.high %v11329_v29, %v11329_v29  ;;  %v9461_v33 = vld [vmem:[%s11217_s10 + $0x2e4] ss:$16 sps:$4 sm:$0xff]   ;;  %v9480_v48 = vld [vmem:[%s11217_s10 + $0x348] ss:$16 sps:$4 sm:$0xff]   ;;  %s8081_s19 = sshll.u32 %s12434_s27, 2 }
  0x8b   : > { %6584 = vmatpush1.bf16.msra.mxu0 %v9371_v34  ;;  %7240 = vmatpush1.bf16.msra.mxu1 %v9372_v35  ;;  %v9464_v34 = vld [vmem:[%s11217_s10 + $0x2ec] ss:$16 sps:$4 sm:$0xff]   ;;  %v9459_v35 = vld [vmem:[%s11217_s10 + $0x2e0] ss:$16 sps:$4 sm:$0xff]  }
  0x8c   : > { %6585 = vmatprep.subr.bf16.mxu0 %v9373_v36  ;;  %7241 = vmatprep.subr.bf16.mxu1 %v9375_v37  ;;  %v9462_v36 = vld [vmem:[%s11217_s10 + $0x2e8] ss:$16 sps:$4 sm:$0xff]   ;;  %v9467_v37 = vld [vmem:[%s11217_s10 + $0x304] ss:$16 sps:$4 sm:$0xff]  }
  0x8f   : > { %6586 = vmatpush1.bf16.msra.mxu0 %v9377_v38  ;;  %7242 = vmatpush1.bf16.msra.mxu1 %v9378_v39  ;;  %v9470_v38 = vld [vmem:[%s11217_s10 + $0x30c] ss:$16 sps:$4 sm:$0xff]   ;;  %v9465_v39 = vld [vmem:[%s11217_s10 + $0x300] ss:$16 sps:$4 sm:$0xff]  }
  0x90   : > { %6587 = vmatprep.subr.bf16.mxu0 %v9379_v40  ;;  %7243 = vmatprep.subr.bf16.mxu1 %v9381_v41  ;;  %v9468_v40 = vld [vmem:[%s11217_s10 + $0x308] ss:$16 sps:$4 sm:$0xff]   ;;  %v9473_v41 = vld [vmem:[%s11217_s10 + $0x324] ss:$16 sps:$4 sm:$0xff]  }
  0x93   : > { %6588 = vmatpush1.bf16.msra.mxu0 %v9383_v42  ;;  %7244 = vmatpush1.bf16.msra.mxu1 %v9384_v43  ;;  %v9476_v42 = vld [vmem:[%s11217_s10 + $0x32c] ss:$16 sps:$4 sm:$0xff]   ;;  %v9471_v43 = vld [vmem:[%s11217_s10 + $0x320] ss:$16 sps:$4 sm:$0xff]  }
  0x94   : > { %6589 = vmatprep.subr.bf16.mxu0 %v9385_v44  ;;  %7245 = vmatprep.subr.bf16.mxu1 %v9387_v45  ;;  %v9474_v44 = vld [vmem:[%s11217_s10 + $0x328] ss:$16 sps:$4 sm:$0xff]   ;;  %v9479_v45 = vld [vmem:[%s11217_s10 + $0x344] ss:$16 sps:$4 sm:$0xff]  }
  0x97   : > { %6590 = vmatpush1.bf16.msra.mxu0 %v9389_v47  ;;  %7246 = vmatpush1.bf16.msra.mxu1 %v9390_v49  ;;  %v9477_v47 = vld [vmem:[%s11217_s10 + $0x340] ss:$16 sps:$4 sm:$0xff]   ;;  %v9485_v49 = vld [vmem:[%s11217_s10 + $0x364] ss:$16 sps:$4 sm:$0xff]  }
  0x98   : > { %6591 = vmatprep.subr.bf16.mxu0 %v9391_v50  ;;  %7247 = vmatprep.subr.bf16.mxu1 %v9393_v51  ;;  %v9488_v50 = vld [vmem:[%s11217_s10 + $0x36c] ss:$16 sps:$4 sm:$0xff]   ;;  %v9483_v51 = vld [vmem:[%s11217_s10 + $0x360] ss:$16 sps:$4 sm:$0xff]  }
  0x9b   : > { %6592 = vmatpush1.bf16.msra.mxu0 %v9395_v52  ;;  %7248 = vmatpush1.bf16.msra.mxu1 %v9396_v53  ;;  %v9486_v52 = vld [vmem:[%s11217_s10 + $0x368] ss:$16 sps:$4 sm:$0xff]   ;;  %v9491_v53 = vld [vmem:[%s11217_s10 + $0x384] ss:$16 sps:$4 sm:$0xff]  }
  0x9c   : > { %6593 = vmatprep.subr.bf16.mxu0 %v9397_v54  ;;  %7249 = vmatprep.subr.bf16.mxu1 %v9399_v55  ;;  %v9494_v54 = vld [vmem:[%s11217_s10 + $0x38c] ss:$16 sps:$4 sm:$0xff]   ;;  %v9489_v55 = vld [vmem:[%s11217_s10 + $0x380] ss:$16 sps:$4 sm:$0xff]  }
  0x9f   : > { %6594 = vmatpush1.bf16.msra.mxu0 %v9401_v56  ;;  %7250 = vmatpush1.bf16.msra.mxu1 %v9402_v57  ;;  %v9492_v56 = vld [vmem:[%s11217_s10 + $0x388] ss:$16 sps:$4 sm:$0xff]   ;;  %v9497_v57 = vld [vmem:[%s11217_s10 + $0x3a4] ss:$16 sps:$4 sm:$0xff]  }
  0xa0   : > { %6595 = vmatprep.subr.bf16.mxu0 %v9403_v58  ;;  %7251 = vmatprep.subr.bf16.mxu1 %v9405_v59  ;;  %v9500_v58 = vld [vmem:[%s11217_s10 + $0x3ac] ss:$16 sps:$4 sm:$0xff]   ;;  %v9495_v59 = vld [vmem:[%s11217_s10 + $0x3a0] ss:$16 sps:$4 sm:$0xff]  }
  0xa3   : > { %6596 = vmatpush1.bf16.msra.mxu0 %v9407_v60  ;;  %7252 = vmatpush1.bf16.msra.mxu1 %v9408_v61  ;;  %v9498_v60 = vld [vmem:[%s11217_s10 + $0x3a8] ss:$16 sps:$4 sm:$0xff]   ;;  %v9503_v61 = vld [vmem:[%s11217_s10 + $0x3c4] ss:$16 sps:$4 sm:$0xff]  }
  0xa4   : > { %6597 = vmatprep.subr.bf16.mxu0 %v9409_v62  ;;  %7253 = vmatprep.subr.bf16.mxu1 %v9411_v63  ;;  %v9506_v62 = vld [vmem:[%s11217_s10 + $0x3cc] ss:$16 sps:$4 sm:$0xff]   ;;  %v9501_v63 = vld [vmem:[%s11217_s10 + $0x3c0] ss:$16 sps:$4 sm:$0xff]  }
  0xa7   : > { %6598 = vmatpush1.bf16.msra.mxu0 %v9413_v0  ;;  %7254 = vmatpush1.bf16.msra.mxu1 %v9414_v1  ;;  %v9504_v0 = vld [vmem:[%s11217_s10 + $0x3c8] ss:$16 sps:$4 sm:$0xff]   ;;  %v9509_v1 = vld [vmem:[%s11217_s10 + $0x3e4] ss:$16 sps:$4 sm:$0xff]  }
  0xa8   : > { %6608 = vmatprep.subr.bf16.mxu0 %v9419_v2  ;;  %7264 = vmatprep.subr.bf16.mxu1 %v9422_v3  ;;  %v9512_v2 = vld [vmem:[%s11217_s10 + $0x3ec] ss:$16 sps:$4 sm:$0xff]   ;;  %v9507_v3 = vld [vmem:[%s11217_s10 + $0x3e0] ss:$16 sps:$4 sm:$0xff]  }
  0xaa   : > { %6600 = vmatmul.mubr.bf16.vlgmr.msra.gmra.mrb[0].mxu0 %v8082_v4  ;;  %7256 = vmatmul.mubr.bf16.vlgmr.msra.gmra.mrb[0].mxu1 %v8082_v4  ;;  %v9510_v4 = vld [vmem:[%s11217_s10 + $0x3e8] ss:$16 sps:$4 sm:$0xff]  }
  0xab   : > { %6609 = vmatpush1.bf16.msra.mxu0 %v9417_v5  ;;  %7265 = vmatpush1.bf16.msra.mxu1 %v9420_v6  ;;  %v9517_v5 = vld [vmem:[%s11217_s10 + $0x404] ss:$16 sps:$4 sm:$0xff]   ;;  %v9520_v6 = vld [vmem:[%s11217_s10 + $0x40c] ss:$16 sps:$4 sm:$0xff]  }
  0xac   : > { %6610 = vmatprep.subr.bf16.mxu0 %v9425_v7  ;;  %7266 = vmatprep.subr.bf16.mxu1 %v9428_v8  ;;  %v8084_v7 = vcombine.low %v11329_v29, %v11329_v29  ;;  %v9515_v8 = vld [vmem:[%s11217_s10 + $0x400] ss:$16 sps:$4 sm:$0xff]   ;;  %v9550_v29 = vld [vmem:[%s11217_s10 + $0x4ac] ss:$16 sps:$4 sm:$0xff]  }
  0xad   : > { %6640 = vmatprep.mubr.bf16.mxu0 %v8085_v30  ;;  %7296 = vmatprep.mubr.bf16.mxu1 %v8085_v30  ;;  %v9545_v30 = vld [vmem:[%s11217_s10 + $0x4a0] ss:$16 sps:$4 sm:$0xff]  }
  0xaf   : > { %6611 = vmatpush1.bf16.msra.mxu0 %v9423_v9  ;;  %7267 = vmatpush1.bf16.msra.mxu1 %v9426_v10  ;;  %v9518_v9 = vld [vmem:[%s11217_s10 + $0x408] ss:$16 sps:$4 sm:$0xff]   ;;  %v9523_v10 = vld [vmem:[%s11217_s10 + $0x424] ss:$16 sps:$4 sm:$0xff]  }
  0xb0   : > { %6612 = vmatprep.subr.bf16.mxu0 %v9431_v11  ;;  %7268 = vmatprep.subr.bf16.mxu1 %v9434_v12  ;;  %v11381_v11 = vld [vmem:[%s12415_s0 + $0x10] sm:$0xff] }
  0xb1   : > { %v9526_v12 = vld [vmem:[%s11217_s10 + $0x42c] ss:$16 sps:$4 sm:$0xff]  }
  0xb3   : > { %6613 = vmatpush1.bf16.msra.mxu0 %v9429_v13  ;;  %7269 = vmatpush1.bf16.msra.mxu1 %v9432_v14  ;;  %v8087_v13 = vcombine.high %v11381_v11, %v11381_v11  ;;  %v9521_v14 = vld [vmem:[%s11217_s10 + $0x420] ss:$16 sps:$4 sm:$0xff]  }
  0xb4   : > { %6614 = vmatprep.subr.bf16.mxu0 %v9437_v15  ;;  %7270 = vmatprep.subr.bf16.mxu1 %v9440_v16  ;;  %v9524_v15 = vld [vmem:[%s11217_s10 + $0x428] ss:$16 sps:$4 sm:$0xff]   ;;  %v9529_v16 = vld [vmem:[%s11217_s10 + $0x444] ss:$16 sps:$4 sm:$0xff]  }
  0xb7   : > { %6615 = vmatpush1.bf16.msra.mxu0 %v9435_v17  ;;  %7271 = vmatpush1.bf16.msra.mxu1 %v9438_v18  ;;  %v9532_v17 = vld [vmem:[%s11217_s10 + $0x44c] ss:$16 sps:$4 sm:$0xff]   ;;  %v9527_v18 = vld [vmem:[%s11217_s10 + $0x440] ss:$16 sps:$4 sm:$0xff]  }
  0xb8   : > { %6616 = vmatprep.subr.bf16.mxu0 %v9443_v19  ;;  %7272 = vmatprep.subr.bf16.mxu1 %v9446_v20  ;;  %v9530_v19 = vld [vmem:[%s11217_s10 + $0x448] ss:$16 sps:$4 sm:$0xff]   ;;  %v9535_v20 = vld [vmem:[%s11217_s10 + $0x464] ss:$16 sps:$4 sm:$0xff]  }
  0xbb   : > { %6617 = vmatpush1.bf16.msra.mxu0 %v9441_v21  ;;  %7273 = vmatpush1.bf16.msra.mxu1 %v9444_v22  ;;  %v9538_v21 = vld [vmem:[%s11217_s10 + $0x46c] ss:$16 sps:$4 sm:$0xff]   ;;  %v9533_v22 = vld [vmem:[%s11217_s10 + $0x460] ss:$16 sps:$4 sm:$0xff]  }
  0xbc   : > { %6618 = vmatprep.subr.bf16.mxu0 %v9449_v23  ;;  %7274 = vmatprep.subr.bf16.mxu1 %v9452_v24  ;;  %v9536_v23 = vld [vmem:[%s11217_s10 + $0x468] ss:$16 sps:$4 sm:$0xff]   ;;  %v9541_v24 = vld [vmem:[%s11217_s10 + $0x484] ss:$16 sps:$4 sm:$0xff]  }
  0xbf   : > { %6619 = vmatpush1.bf16.msra.mxu0 %v9447_v25  ;;  %7275 = vmatpush1.bf16.msra.mxu1 %v9450_v26  ;;  %v9544_v25 = vld [vmem:[%s11217_s10 + $0x48c] ss:$16 sps:$4 sm:$0xff]   ;;  %v9539_v26 = vld [vmem:[%s11217_s10 + $0x480] ss:$16 sps:$4 sm:$0xff]  }
  0xc0   : > { %6620 = vmatprep.subr.bf16.mxu0 %v9455_v27  ;;  %7276 = vmatprep.subr.bf16.mxu1 %v9458_v28  ;;  %v9542_v27 = vld [vmem:[%s11217_s10 + $0x488] ss:$16 sps:$4 sm:$0xff]   ;;  %v9547_v28 = vld [vmem:[%s11217_s10 + $0x4a4] ss:$16 sps:$4 sm:$0xff]  }
  0xc3   : > { %6621 = vmatpush1.bf16.msra.mxu0 %v9453_v31  ;;  %7277 = vmatpush1.bf16.msra.mxu1 %v9456_v32  ;;  %v9548_v31 = vld [vmem:[%s11217_s10 + $0x4a8] ss:$16 sps:$4 sm:$0xff]   ;;  %v9553_v32 = vld [vmem:[%s11217_s10 + $0x4c4] ss:$16 sps:$4 sm:$0xff]  }
  0xc4   : > { %6622 = vmatprep.subr.bf16.mxu0 %v9461_v33  ;;  %7278 = vmatprep.subr.bf16.mxu1 %v9464_v34  ;;  %v9556_v33 = vld [vmem:[%s11217_s10 + $0x4cc] ss:$16 sps:$4 sm:$0xff]   ;;  %v9551_v34 = vld [vmem:[%s11217_s10 + $0x4c0] ss:$16 sps:$4 sm:$0xff]  }
  0xc7   : > { %6623 = vmatpush1.bf16.msra.mxu0 %v9459_v35  ;;  %7279 = vmatpush1.bf16.msra.mxu1 %v9462_v36  ;;  %v9554_v35 = vld [vmem:[%s11217_s10 + $0x4c8] ss:$16 sps:$4 sm:$0xff]   ;;  %v9559_v36 = vld [vmem:[%s11217_s10 + $0x4e4] ss:$16 sps:$4 sm:$0xff]  }
  0xc8   : > { %6624 = vmatprep.subr.bf16.mxu0 %v9467_v37  ;;  %7280 = vmatprep.subr.bf16.mxu1 %v9470_v38  ;;  %v9562_v37 = vld [vmem:[%s11217_s10 + $0x4ec] ss:$16 sps:$4 sm:$0xff]   ;;  %v9557_v38 = vld [vmem:[%s11217_s10 + $0x4e0] ss:$16 sps:$4 sm:$0xff]  }
  0xcb   : > { %6625 = vmatpush1.bf16.msra.mxu0 %v9465_v39  ;;  %7281 = vmatpush1.bf16.msra.mxu1 %v9468_v40  ;;  %v9560_v39 = vld [vmem:[%s11217_s10 + $0x4e8] ss:$16 sps:$4 sm:$0xff]   ;;  %v9565_v40 = vld [vmem:[%s11217_s10 + $0x504] ss:$16 sps:$4 sm:$0xff]  }
  0xcc   : > { %6626 = vmatprep.subr.bf16.mxu0 %v9473_v41  ;;  %7282 = vmatprep.subr.bf16.mxu1 %v9476_v42  ;;  %v9568_v41 = vld [vmem:[%s11217_s10 + $0x50c] ss:$16 sps:$4 sm:$0xff]   ;;  %v9563_v42 = vld [vmem:[%s11217_s10 + $0x500] ss:$16 sps:$4 sm:$0xff]  }
  0xcf   : > { %6627 = vmatpush1.bf16.msra.mxu0 %v9471_v43  ;;  %7283 = vmatpush1.bf16.msra.mxu1 %v9474_v44  ;;  %v9566_v43 = vld [vmem:[%s11217_s10 + $0x508] ss:$16 sps:$4 sm:$0xff]   ;;  %v9571_v44 = vld [vmem:[%s11217_s10 + $0x524] ss:$16 sps:$4 sm:$0xff]  }
  0xd0   : > { %6628 = vmatprep.subr.bf16.mxu0 %v9479_v45  ;;  %7284 = vmatprep.subr.bf16.mxu1 %v9482_v46  ;;  %v9574_v45 = vld [vmem:[%s11217_s10 + $0x52c] ss:$16 sps:$4 sm:$0xff]   ;;  %v9569_v46 = vld [vmem:[%s11217_s10 + $0x520] ss:$16 sps:$4 sm:$0xff]  }
  0xd3   : > { %6629 = vmatpush1.bf16.msra.mxu0 %v9477_v47  ;;  %7285 = vmatpush1.bf16.msra.mxu1 %v9480_v48  ;;  %v9572_v47 = vld [vmem:[%s11217_s10 + $0x528] ss:$16 sps:$4 sm:$0xff]   ;;  %v9577_v48 = vld [vmem:[%s11217_s10 + $0x544] ss:$16 sps:$4 sm:$0xff]  }
  0xd4   : > { %6630 = vmatprep.subr.bf16.mxu0 %v9485_v49  ;;  %7286 = vmatprep.subr.bf16.mxu1 %v9488_v50  ;;  %v9580_v49 = vld [vmem:[%s11217_s10 + $0x54c] ss:$16 sps:$4 sm:$0xff]   ;;  %v9575_v50 = vld [vmem:[%s11217_s10 + $0x540] ss:$16 sps:$4 sm:$0xff]  }
  0xd7   : > { %6631 = vmatpush1.bf16.msra.mxu0 %v9483_v51  ;;  %7287 = vmatpush1.bf16.msra.mxu1 %v9486_v52  ;;  %v9578_v51 = vld [vmem:[%s11217_s10 + $0x548] ss:$16 sps:$4 sm:$0xff]   ;;  %v9583_v52 = vld [vmem:[%s11217_s10 + $0x564] ss:$16 sps:$4 sm:$0xff]  }
  0xd8   : > { %6632 = vmatprep.subr.bf16.mxu0 %v9491_v53  ;;  %7288 = vmatprep.subr.bf16.mxu1 %v9494_v54  ;;  %v9586_v53 = vld [vmem:[%s11217_s10 + $0x56c] ss:$16 sps:$4 sm:$0xff]   ;;  %v9581_v54 = vld [vmem:[%s11217_s10 + $0x560] ss:$16 sps:$4 sm:$0xff]  }
  0xdb   : > { %6633 = vmatpush1.bf16.msra.mxu0 %v9489_v55  ;;  %7289 = vmatpush1.bf16.msra.mxu1 %v9492_v56  ;;  %v9584_v55 = vld [vmem:[%s11217_s10 + $0x568] ss:$16 sps:$4 sm:$0xff]   ;;  %v9589_v56 = vld [vmem:[%s11217_s10 + $0x584] ss:$16 sps:$4 sm:$0xff]  }
  0xdc   : > { %6634 = vmatprep.subr.bf16.mxu0 %v9497_v57  ;;  %7290 = vmatprep.subr.bf16.mxu1 %v9500_v58  ;;  %v9592_v57 = vld [vmem:[%s11217_s10 + $0x58c] ss:$16 sps:$4 sm:$0xff]   ;;  %v9587_v58 = vld [vmem:[%s11217_s10 + $0x580] ss:$16 sps:$4 sm:$0xff]  }
  0xdf   : > { %6635 = vmatpush1.bf16.msra.mxu0 %v9495_v59  ;;  %7291 = vmatpush1.bf16.msra.mxu1 %v9498_v60  ;;  %v9590_v59 = vld [vmem:[%s11217_s10 + $0x588] ss:$16 sps:$4 sm:$0xff]   ;;  %v9595_v60 = vld [vmem:[%s11217_s10 + $0x5a4] ss:$16 sps:$4 sm:$0xff]  }
  0xe0   : > { %6636 = vmatprep.subr.bf16.mxu0 %v9503_v61  ;;  %7292 = vmatprep.subr.bf16.mxu1 %v9506_v62  ;;  %v9598_v61 = vld [vmem:[%s11217_s10 + $0x5ac] ss:$16 sps:$4 sm:$0xff]   ;;  %v9593_v62 = vld [vmem:[%s11217_s10 + $0x5a0] ss:$16 sps:$4 sm:$0xff]  }
  0xe3   : > { %6637 = vmatpush1.bf16.msra.mxu0 %v9501_v63  ;;  %7293 = vmatpush1.bf16.msra.mxu1 %v9504_v0  ;;  %v9596_v63 = vld [vmem:[%s11217_s10 + $0x5a8] ss:$16 sps:$4 sm:$0xff]   ;;  %v9601_v0 = vld [vmem:[%s11217_s10 + $0x5c4] ss:$16 sps:$4 sm:$0xff]  }
  0xe4   : > { %6638 = vmatprep.subr.bf16.mxu0 %v9509_v1  ;;  %7294 = vmatprep.subr.bf16.mxu1 %v9512_v2  ;;  %v9604_v1 = vld [vmem:[%s11217_s10 + $0x5cc] ss:$16 sps:$4 sm:$0xff]   ;;  %v9599_v2 = vld [vmem:[%s11217_s10 + $0x5c0] ss:$16 sps:$4 sm:$0xff]  }
  0xe7   : > { %6639 = vmatpush1.bf16.msra.mxu0 %v9507_v3  ;;  %7295 = vmatpush1.bf16.msra.mxu1 %v9510_v4  ;;  %v9602_v3 = vld [vmem:[%s11217_s10 + $0x5c8] ss:$16 sps:$4 sm:$0xff]   ;;  %v9607_v4 = vld [vmem:[%s11217_s10 + $0x5e4] ss:$16 sps:$4 sm:$0xff]  }
  0xe8   : > { %6649 = vmatprep.subr.bf16.mxu0 %v9517_v5  ;;  %7305 = vmatprep.subr.bf16.mxu1 %v9520_v6  ;;  %v9610_v5 = vld [vmem:[%s11217_s10 + $0x5ec] ss:$16 sps:$4 sm:$0xff]   ;;  %v9605_v6 = vld [vmem:[%s11217_s10 + $0x5e0] ss:$16 sps:$4 sm:$0xff]  }
  0xea   : > { %6641 = vmatmul.mubr.bf16.vlgmr.msra.gmra.mrb[0].mxu0 %v8084_v7  ;;  %7297 = vmatmul.mubr.bf16.vlgmr.msra.gmra.mrb[0].mxu1 %v8084_v7  ;;  %v9608_v7 = vld [vmem:[%s11217_s10 + $0x5e8] ss:$16 sps:$4 sm:$0xff]  }
  0xeb   : > { %6650 = vmatpush1.bf16.msra.mxu0 %v9515_v8  ;;  %7306 = vmatpush1.bf16.msra.mxu1 %v9518_v9  ;;  %v9615_v8 = vld [vmem:[%s11217_s10 + $0x604] ss:$16 sps:$4 sm:$0xff]   ;;  %v9618_v9 = vld [vmem:[%s11217_s10 + $0x60c] ss:$16 sps:$4 sm:$0xff]  }
  0xec   : > { %6651 = vmatprep.subr.bf16.mxu0 %v9523_v10  ;;  %7307 = vmatprep.subr.bf16.mxu1 %v9526_v12  ;;  %v9613_v10 = vld [vmem:[%s11217_s10 + $0x600] ss:$16 sps:$4 sm:$0xff]   ;;  %v8086_v12 = vcombine.low %v11381_v11, %v11381_v11 }
  0xed   : > { %6681 = vmatprep.mubr.bf16.mxu0 %v8087_v13  ;;  %7337 = vmatprep.mubr.bf16.mxu1 %v8087_v13  ;;  %v9616_v13 = vld [vmem:[%s11217_s10 + $0x608] ss:$16 sps:$4 sm:$0xff]   ;;  %v9619_v11 = vld [vmem:[%s11217_s10 + $0x620] ss:$16 sps:$4 sm:$0xff]  }
  0xef   : > { %6652 = vmatpush1.bf16.msra.mxu0 %v9521_v14  ;;  %7308 = vmatpush1.bf16.msra.mxu1 %v9524_v15  ;;  %v11453_v14 = vld [vmem:[%s12415_s0 + $0x18] sm:$0xff] }
  0xf0   : > { %6653 = vmatprep.subr.bf16.mxu0 %v9529_v16  ;;  %7309 = vmatprep.subr.bf16.mxu1 %v9532_v17  ;;  %v9621_v15 = vld [vmem:[%s11217_s10 + $0x624] ss:$16 sps:$4 sm:$0xff]   ;;  %v9624_v16 = vld [vmem:[%s11217_s10 + $0x62c] ss:$16 sps:$4 sm:$0xff]   ;;  %v8089_v17 = vcombine.high %v11453_v14, %v11453_v14 }
  0xf3   : > { %6654 = vmatpush1.bf16.msra.mxu0 %v9527_v18  ;;  %7310 = vmatpush1.bf16.msra.mxu1 %v9530_v19  ;;  %v9622_v18 = vld [vmem:[%s11217_s10 + $0x628] ss:$16 sps:$4 sm:$0xff]   ;;  %v9627_v19 = vld [vmem:[%s11217_s10 + $0x644] ss:$16 sps:$4 sm:$0xff]  }
  0xf4   : > { %6655 = vmatprep.subr.bf16.mxu0 %v9535_v20  ;;  %7311 = vmatprep.subr.bf16.mxu1 %v9538_v21  ;;  %v9630_v20 = vld [vmem:[%s11217_s10 + $0x64c] ss:$16 sps:$4 sm:$0xff]   ;;  %v9625_v21 = vld [vmem:[%s11217_s10 + $0x640] ss:$16 sps:$4 sm:$0xff]  }
  0xf7   : > { %6656 = vmatpush1.bf16.msra.mxu0 %v9533_v22  ;;  %7312 = vmatpush1.bf16.msra.mxu1 %v9536_v23  ;;  %v9628_v22 = vld [vmem:[%s11217_s10 + $0x648] ss:$16 sps:$4 sm:$0xff]   ;;  %v9633_v23 = vld [vmem:[%s11217_s10 + $0x664] ss:$16 sps:$4 sm:$0xff]  }
  0xf8   : > { %6657 = vmatprep.subr.bf16.mxu0 %v9541_v24  ;;  %7313 = vmatprep.subr.bf16.mxu1 %v9544_v25  ;;  %v9636_v24 = vld [vmem:[%s11217_s10 + $0x66c] ss:$16 sps:$4 sm:$0xff]   ;;  %v9631_v25 = vld [vmem:[%s11217_s10 + $0x660] ss:$16 sps:$4 sm:$0xff]  }
  0xfb   : > { %6658 = vmatpush1.bf16.msra.mxu0 %v9539_v26  ;;  %7314 = vmatpush1.bf16.msra.mxu1 %v9542_v27  ;;  %v9634_v26 = vld [vmem:[%s11217_s10 + $0x668] ss:$16 sps:$4 sm:$0xff]   ;;  %v9639_v27 = vld [vmem:[%s11217_s10 + $0x684] ss:$16 sps:$4 sm:$0xff]  }
  0xfc   : > { %6659 = vmatprep.subr.bf16.mxu0 %v9547_v28  ;;  %7315 = vmatprep.subr.bf16.mxu1 %v9550_v29  ;;  %v9642_v28 = vld [vmem:[%s11217_s10 + $0x68c] ss:$16 sps:$4 sm:$0xff]   ;;  %v9637_v29 = vld [vmem:[%s11217_s10 + $0x680] ss:$16 sps:$4 sm:$0xff]  }
  0xff   : > { %6660 = vmatpush1.bf16.msra.mxu0 %v9545_v30  ;;  %7316 = vmatpush1.bf16.msra.mxu1 %v9548_v31  ;;  %v9640_v30 = vld [vmem:[%s11217_s10 + $0x688] ss:$16 sps:$4 sm:$0xff]   ;;  %v9645_v31 = vld [vmem:[%s11217_s10 + $0x6a4] ss:$16 sps:$4 sm:$0xff]  }
 0x100   : > { %6661 = vmatprep.subr.bf16.mxu0 %v9553_v32  ;;  %7317 = vmatprep.subr.bf16.mxu1 %v9556_v33  ;;  %v9648_v32 = vld [vmem:[%s11217_s10 + $0x6ac] ss:$16 sps:$4 sm:$0xff]   ;;  %v9643_v33 = vld [vmem:[%s11217_s10 + $0x6a0] ss:$16 sps:$4 sm:$0xff]  }
 0x103   : > { %6662 = vmatpush1.bf16.msra.mxu0 %v9551_v34  ;;  %7318 = vmatpush1.bf16.msra.mxu1 %v9554_v35  ;;  %v9646_v34 = vld [vmem:[%s11217_s10 + $0x6a8] ss:$16 sps:$4 sm:$0xff]   ;;  %v9651_v35 = vld [vmem:[%s11217_s10 + $0x6c4] ss:$16 sps:$4 sm:$0xff]  }
 0x104   : > { %6663 = vmatprep.subr.bf16.mxu0 %v9559_v36  ;;  %7319 = vmatprep.subr.bf16.mxu1 %v9562_v37  ;;  %v9654_v36 = vld [vmem:[%s11217_s10 + $0x6cc] ss:$16 sps:$4 sm:$0xff]   ;;  %v9649_v37 = vld [vmem:[%s11217_s10 + $0x6c0] ss:$16 sps:$4 sm:$0xff]  }
 0x107   : > { %6664 = vmatpush1.bf16.msra.mxu0 %v9557_v38  ;;  %7320 = vmatpush1.bf16.msra.mxu1 %v9560_v39  ;;  %v9652_v38 = vld [vmem:[%s11217_s10 + $0x6c8] ss:$16 sps:$4 sm:$0xff]   ;;  %v9657_v39 = vld [vmem:[%s11217_s10 + $0x6e4] ss:$16 sps:$4 sm:$0xff]  }
 0x108   : > { %6665 = vmatprep.subr.bf16.mxu0 %v9565_v40  ;;  %7321 = vmatprep.subr.bf16.mxu1 %v9568_v41  ;;  %v9660_v40 = vld [vmem:[%s11217_s10 + $0x6ec] ss:$16 sps:$4 sm:$0xff]   ;;  %v9655_v41 = vld [vmem:[%s11217_s10 + $0x6e0] ss:$16 sps:$4 sm:$0xff]  }
 0x10b   : > { %6666 = vmatpush1.bf16.msra.mxu0 %v9563_v42  ;;  %7322 = vmatpush1.bf16.msra.mxu1 %v9566_v43  ;;  %v9658_v42 = vld [vmem:[%s11217_s10 + $0x6e8] ss:$16 sps:$4 sm:$0xff]   ;;  %v9663_v43 = vld [vmem:[%s11217_s10 + $0x704] ss:$16 sps:$4 sm:$0xff]  }
 0x10c   : > { %6667 = vmatprep.subr.bf16.mxu0 %v9571_v44  ;;  %7323 = vmatprep.subr.bf16.mxu1 %v9574_v45  ;;  %v9666_v44 = vld [vmem:[%s11217_s10 + $0x70c] ss:$16 sps:$4 sm:$0xff]   ;;  %v9661_v45 = vld [vmem:[%s11217_s10 + $0x700] ss:$16 sps:$4 sm:$0xff]  }
 0x10f   : > { %6668 = vmatpush1.bf16.msra.mxu0 %v9569_v46  ;;  %7324 = vmatpush1.bf16.msra.mxu1 %v9572_v47  ;;  %v9664_v46 = vld [vmem:[%s11217_s10 + $0x708] ss:$16 sps:$4 sm:$0xff]   ;;  %v9669_v47 = vld [vmem:[%s11217_s10 + $0x724] ss:$16 sps:$4 sm:$0xff]  }
 0x110   : > { %6669 = vmatprep.subr.bf16.mxu0 %v9577_v48  ;;  %7325 = vmatprep.subr.bf16.mxu1 %v9580_v49  ;;  %v9672_v48 = vld [vmem:[%s11217_s10 + $0x72c] ss:$16 sps:$4 sm:$0xff]   ;;  %v9667_v49 = vld [vmem:[%s11217_s10 + $0x720] ss:$16 sps:$4 sm:$0xff]  }
 0x113   : > { %6670 = vmatpush1.bf16.msra.mxu0 %v9575_v50  ;;  %7326 = vmatpush1.bf16.msra.mxu1 %v9578_v51  ;;  %v9670_v50 = vld [vmem:[%s11217_s10 + $0x728] ss:$16 sps:$4 sm:$0xff]   ;;  %v9675_v51 = vld [vmem:[%s11217_s10 + $0x744] ss:$16 sps:$4 sm:$0xff]  }
 0x114   : > { %6671 = vmatprep.subr.bf16.mxu0 %v9583_v52  ;;  %7327 = vmatprep.subr.bf16.mxu1 %v9586_v53  ;;  %v9678_v52 = vld [vmem:[%s11217_s10 + $0x74c] ss:$16 sps:$4 sm:$0xff]   ;;  %v9673_v53 = vld [vmem:[%s11217_s10 + $0x740] ss:$16 sps:$4 sm:$0xff]  }
 0x117   : > { %6672 = vmatpush1.bf16.msra.mxu0 %v9581_v54  ;;  %7328 = vmatpush1.bf16.msra.mxu1 %v9584_v55  ;;  %v9676_v54 = vld [vmem:[%s11217_s10 + $0x748] ss:$16 sps:$4 sm:$0xff]   ;;  %v9681_v55 = vld [vmem:[%s11217_s10 + $0x764] ss:$16 sps:$4 sm:$0xff]  }
 0x118   : > { %6673 = vmatprep.subr.bf16.mxu0 %v9589_v56  ;;  %7329 = vmatprep.subr.bf16.mxu1 %v9592_v57  ;;  %v9684_v56 = vld [vmem:[%s11217_s10 + $0x76c] ss:$16 sps:$4 sm:$0xff]   ;;  %v9679_v57 = vld [vmem:[%s11217_s10 + $0x760] ss:$16 sps:$4 sm:$0xff]  }
 0x11b   : > { %6674 = vmatpush1.bf16.msra.mxu0 %v9587_v58  ;;  %7330 = vmatpush1.bf16.msra.mxu1 %v9590_v59  ;;  %v9682_v58 = vld [vmem:[%s11217_s10 + $0x768] ss:$16 sps:$4 sm:$0xff]   ;;  %v9687_v59 = vld [vmem:[%s11217_s10 + $0x784] ss:$16 sps:$4 sm:$0xff]  }
 0x11c   : > { %6675 = vmatprep.subr.bf16.mxu0 %v9595_v60  ;;  %7331 = vmatprep.subr.bf16.mxu1 %v9598_v61  ;;  %v9690_v60 = vld [vmem:[%s11217_s10 + $0x78c] ss:$16 sps:$4 sm:$0xff]   ;;  %v9685_v61 = vld [vmem:[%s11217_s10 + $0x780] ss:$16 sps:$4 sm:$0xff]  }
 0x11f   : > { %6676 = vmatpush1.bf16.msra.mxu0 %v9593_v62  ;;  %7332 = vmatpush1.bf16.msra.mxu1 %v9596_v63  ;;  %v9688_v62 = vld [vmem:[%s11217_s10 + $0x788] ss:$16 sps:$4 sm:$0xff]   ;;  %v9693_v63 = vld [vmem:[%s11217_s10 + $0x7a4] ss:$16 sps:$4 sm:$0xff]  }
 0x120   : > { %6677 = vmatprep.subr.bf16.mxu0 %v9601_v0  ;;  %7333 = vmatprep.subr.bf16.mxu1 %v9604_v1  ;;  %v9696_v0 = vld [vmem:[%s11217_s10 + $0x7ac] ss:$16 sps:$4 sm:$0xff]   ;;  %v9691_v1 = vld [vmem:[%s11217_s10 + $0x7a0] ss:$16 sps:$4 sm:$0xff]  }
 0x123   : > { %6678 = vmatpush1.bf16.msra.mxu0 %v9599_v2  ;;  %7334 = vmatpush1.bf16.msra.mxu1 %v9602_v3  ;;  %v9694_v2 = vld [vmem:[%s11217_s10 + $0x7a8] ss:$16 sps:$4 sm:$0xff]   ;;  %v9699_v3 = vld [vmem:[%s11217_s10 + $0x7c4] ss:$16 sps:$4 sm:$0xff]  }
 0x124   : > { %6679 = vmatprep.subr.bf16.mxu0 %v9607_v4  ;;  %7335 = vmatprep.subr.bf16.mxu1 %v9610_v5  ;;  %v9702_v4 = vld [vmem:[%s11217_s10 + $0x7cc] ss:$16 sps:$4 sm:$0xff]   ;;  %v9697_v5 = vld [vmem:[%s11217_s10 + $0x7c0] ss:$16 sps:$4 sm:$0xff]  }
 0x127   : > { %6680 = vmatpush1.bf16.msra.mxu0 %v9605_v6  ;;  %7336 = vmatpush1.bf16.msra.mxu1 %v9608_v7  ;;  %v9700_v6 = vld [vmem:[%s11217_s10 + $0x7c8] ss:$16 sps:$4 sm:$0xff]   ;;  %v9705_v7 = vld [vmem:[%s11217_s10 + $0x7e4] ss:$16 sps:$4 sm:$0xff]  }
 0x128   : > { %6690 = vmatprep.subr.bf16.mxu0 %v9615_v8  ;;  %7346 = vmatprep.subr.bf16.mxu1 %v9618_v9  ;;  %v9708_v8 = vld [vmem:[%s11217_s10 + $0x7ec] ss:$16 sps:$4 sm:$0xff]   ;;  %v9703_v9 = vld [vmem:[%s11217_s10 + $0x7e0] ss:$16 sps:$4 sm:$0xff]  }
 0x12a   : > { %6682 = vmatmul.mubr.bf16.vlgmr.msra.gmra.mrb[0].mxu0 %v8086_v12  ;;  %7338 = vmatmul.mubr.bf16.vlgmr.msra.gmra.mrb[0].mxu1 %v8086_v12  ;;  %v9713_v12 = vld [vmem:[%s11217_s10 + $0x804] ss:$16 sps:$4 sm:$0xff]  }
 0x12b   : > { %6691 = vmatpush1.bf16.msra.mxu0 %v9613_v10  ;;  %7347 = vmatpush1.bf16.msra.mxu1 %v9616_v13  ;;  %v9706_v10 = vld [vmem:[%s11217_s10 + $0x7e8] ss:$16 sps:$4 sm:$0xff]   ;;  %v9716_v13 = vld [vmem:[%s11217_s10 + $0x80c] ss:$16 sps:$4 sm:$0xff]  }
 0x12c   : > { %6692 = vmatprep.subr.bf16.mxu0 %v9621_v15  ;;  %7348 = vmatprep.subr.bf16.mxu1 %v9624_v16  ;;  %v9711_v15 = vld [vmem:[%s11217_s10 + $0x800] ss:$16 sps:$4 sm:$0xff]   ;;  %v8088_v16 = vcombine.low %v11453_v14, %v11453_v14 }
 0x12d   : > { %6722 = vmatprep.mubr.bf16.mxu0 %v8089_v17  ;;  %7378 = vmatprep.mubr.bf16.mxu1 %v8089_v17  ;;  %v11525_v17 = vld [vmem:[%s12415_s0 + $0x20] sm:$0xff]  ;;  %v9717_v14 = vld [vmem:[%s11217_s10 + $0x820] ss:$16 sps:$4 sm:$0xff]  }
 0x12f   : > { %6693 = vmatpush1.bf16.msra.mxu0 %v9619_v11  ;;  %7349 = vmatpush1.bf16.msra.mxu1 %v9622_v18  ;;  %v9714_v11 = vld [vmem:[%s11217_s10 + $0x808] ss:$16 sps:$4 sm:$0xff]   ;;  %v9719_v18 = vld [vmem:[%s11217_s10 + $0x824] ss:$16 sps:$4 sm:$0xff]  }
 0x130   : > { %6694 = vmatprep.subr.bf16.mxu0 %v9627_v19  ;;  %7350 = vmatprep.subr.bf16.mxu1 %v9630_v20  ;;  %v9722_v19 = vld [vmem:[%s11217_s10 + $0x82c] ss:$16 sps:$4 sm:$0xff]   ;;  %v8091_v20 = vcombine.high %v11525_v17, %v11525_v17 }
 0x133   : > { %6695 = vmatpush1.bf16.msra.mxu0 %v9625_v21  ;;  %7351 = vmatpush1.bf16.msra.mxu1 %v9628_v22  ;;  %v9720_v21 = vld [vmem:[%s11217_s10 + $0x828] ss:$16 sps:$4 sm:$0xff]   ;;  %v9725_v22 = vld [vmem:[%s11217_s10 + $0x844] ss:$16 sps:$4 sm:$0xff]  }
 0x134   : > { %6696 = vmatprep.subr.bf16.mxu0 %v9633_v23  ;;  %7352 = vmatprep.subr.bf16.mxu1 %v9636_v24  ;;  %v9728_v23 = vld [vmem:[%s11217_s10 + $0x84c] ss:$16 sps:$4 sm:$0xff]   ;;  %v9723_v24 = vld [vmem:[%s11217_s10 + $0x840] ss:$16 sps:$4 sm:$0xff]  }
 0x137   : > { %6697 = vmatpush1.bf16.msra.mxu0 %v9631_v25  ;;  %7353 = vmatpush1.bf16.msra.mxu1 %v9634_v26  ;;  %v9726_v25 = vld [vmem:[%s11217_s10 + $0x848] ss:$16 sps:$4 sm:$0xff]   ;;  %v9731_v26 = vld [vmem:[%s11217_s10 + $0x864] ss:$16 sps:$4 sm:$0xff]  }
 0x138   : > { %6698 = vmatprep.subr.bf16.mxu0 %v9639_v27  ;;  %7354 = vmatprep.subr.bf16.mxu1 %v9642_v28  ;;  %v9734_v27 = vld [vmem:[%s11217_s10 + $0x86c] ss:$16 sps:$4 sm:$0xff]   ;;  %v9729_v28 = vld [vmem:[%s11217_s10 + $0x860] ss:$16 sps:$4 sm:$0xff]  }
 0x13b   : > { %6699 = vmatpush1.bf16.msra.mxu0 %v9637_v29  ;;  %7355 = vmatpush1.bf16.msra.mxu1 %v9640_v30  ;;  %v9732_v29 = vld [vmem:[%s11217_s10 + $0x868] ss:$16 sps:$4 sm:$0xff]   ;;  %v9737_v30 = vld [vmem:[%s11217_s10 + $0x884] ss:$16 sps:$4 sm:$0xff]  }
 0x13c   : > { %6700 = vmatprep.subr.bf16.mxu0 %v9645_v31  ;;  %7356 = vmatprep.subr.bf16.mxu1 %v9648_v32  ;;  %v9740_v31 = vld [vmem:[%s11217_s10 + $0x88c] ss:$16 sps:$4 sm:$0xff]   ;;  %v9735_v32 = vld [vmem:[%s11217_s10 + $0x880] ss:$16 sps:$4 sm:$0xff]  }
 0x13f   : > { %6701 = vmatpush1.bf16.msra.mxu0 %v9643_v33  ;;  %7357 = vmatpush1.bf16.msra.mxu1 %v9646_v34  ;;  %v9738_v33 = vld [vmem:[%s11217_s10 + $0x888] ss:$16 sps:$4 sm:$0xff]   ;;  %v9743_v34 = vld [vmem:[%s11217_s10 + $0x8a4] ss:$16 sps:$4 sm:$0xff]  }
 0x140   : > { %6702 = vmatprep.subr.bf16.mxu0 %v9651_v35  ;;  %7358 = vmatprep.subr.bf16.mxu1 %v9654_v36  ;;  %v9746_v35 = vld [vmem:[%s11217_s10 + $0x8ac] ss:$16 sps:$4 sm:$0xff]   ;;  %v9741_v36 = vld [vmem:[%s11217_s10 + $0x8a0] ss:$16 sps:$4 sm:$0xff]  }
 0x143   : > { %6703 = vmatpush1.bf16.msra.mxu0 %v9649_v37  ;;  %7359 = vmatpush1.bf16.msra.mxu1 %v9652_v38  ;;  %v9744_v37 = vld [vmem:[%s11217_s10 + $0x8a8] ss:$16 sps:$4 sm:$0xff]   ;;  %v9749_v38 = vld [vmem:[%s11217_s10 + $0x8c4] ss:$16 sps:$4 sm:$0xff]  }
 0x144   : > { %6704 = vmatprep.subr.bf16.mxu0 %v9657_v39  ;;  %7360 = vmatprep.subr.bf16.mxu1 %v9660_v40  ;;  %v9752_v39 = vld [vmem:[%s11217_s10 + $0x8cc] ss:$16 sps:$4 sm:$0xff]   ;;  %v9747_v40 = vld [vmem:[%s11217_s10 + $0x8c0] ss:$16 sps:$4 sm:$0xff]  }
 0x147   : > { %6705 = vmatpush1.bf16.msra.mxu0 %v9655_v41  ;;  %7361 = vmatpush1.bf16.msra.mxu1 %v9658_v42  ;;  %v9750_v41 = vld [vmem:[%s11217_s10 + $0x8c8] ss:$16 sps:$4 sm:$0xff]   ;;  %v9755_v42 = vld [vmem:[%s11217_s10 + $0x8e4] ss:$16 sps:$4 sm:$0xff]  }
 0x148   : > { %6706 = vmatprep.subr.bf16.mxu0 %v9663_v43  ;;  %7362 = vmatprep.subr.bf16.mxu1 %v9666_v44  ;;  %v9758_v43 = vld [vmem:[%s11217_s10 + $0x8ec] ss:$16 sps:$4 sm:$0xff]   ;;  %v9753_v44 = vld [vmem:[%s11217_s10 + $0x8e0] ss:$16 sps:$4 sm:$0xff]  }
 0x14b   : > { %6707 = vmatpush1.bf16.msra.mxu0 %v9661_v45  ;;  %7363 = vmatpush1.bf16.msra.mxu1 %v9664_v46  ;;  %v9756_v45 = vld [vmem:[%s11217_s10 + $0x8e8] ss:$16 sps:$4 sm:$0xff]   ;;  %v9761_v46 = vld [vmem:[%s11217_s10 + $0x904] ss:$16 sps:$4 sm:$0xff]  }
 0x14c   : > { %6708 = vmatprep.subr.bf16.mxu0 %v9669_v47  ;;  %7364 = vmatprep.subr.bf16.mxu1 %v9672_v48  ;;  %v9764_v47 = vld [vmem:[%s11217_s10 + $0x90c] ss:$16 sps:$4 sm:$0xff]   ;;  %v9759_v48 = vld [vmem:[%s11217_s10 + $0x900] ss:$16 sps:$4 sm:$0xff]  }
 0x14f   : > { %6709 = vmatpush1.bf16.msra.mxu0 %v9667_v49  ;;  %7365 = vmatpush1.bf16.msra.mxu1 %v9670_v50  ;;  %v9762_v49 = vld [vmem:[%s11217_s10 + $0x908] ss:$16 sps:$4 sm:$0xff]   ;;  %v9767_v50 = vld [vmem:[%s11217_s10 + $0x924] ss:$16 sps:$4 sm:$0xff]  }
 0x150   : > { %6710 = vmatprep.subr.bf16.mxu0 %v9675_v51  ;;  %7366 = vmatprep.subr.bf16.mxu1 %v9678_v52  ;;  %v9770_v51 = vld [vmem:[%s11217_s10 + $0x92c] ss:$16 sps:$4 sm:$0xff]   ;;  %v9765_v52 = vld [vmem:[%s11217_s10 + $0x920] ss:$16 sps:$4 sm:$0xff]  }
 0x153   : > { %6711 = vmatpush1.bf16.msra.mxu0 %v9673_v53  ;;  %7367 = vmatpush1.bf16.msra.mxu1 %v9676_v54  ;;  %v9768_v53 = vld [vmem:[%s11217_s10 + $0x928] ss:$16 sps:$4 sm:$0xff]   ;;  %v9773_v54 = vld [vmem:[%s11217_s10 + $0x944] ss:$16 sps:$4 sm:$0xff]  }
 0x154   : > { %6712 = vmatprep.subr.bf16.mxu0 %v9681_v55  ;;  %7368 = vmatprep.subr.bf16.mxu1 %v9684_v56  ;;  %v9776_v55 = vld [vmem:[%s11217_s10 + $0x94c] ss:$16 sps:$4 sm:$0xff]   ;;  %v9771_v56 = vld [vmem:[%s11217_s10 + $0x940] ss:$16 sps:$4 sm:$0xff]  }
 0x157   : > { %6713 = vmatpush1.bf16.msra.mxu0 %v9679_v57  ;;  %7369 = vmatpush1.bf16.msra.mxu1 %v9682_v58  ;;  %v9774_v57 = vld [vmem:[%s11217_s10 + $0x948] ss:$16 sps:$4 sm:$0xff]   ;;  %v9779_v58 = vld [vmem:[%s11217_s10 + $0x964] ss:$16 sps:$4 sm:$0xff]  }
 0x158   : > { %6714 = vmatprep.subr.bf16.mxu0 %v9687_v59  ;;  %7370 = vmatprep.subr.bf16.mxu1 %v9690_v60  ;;  %v9782_v59 = vld [vmem:[%s11217_s10 + $0x96c] ss:$16 sps:$4 sm:$0xff]   ;;  %v9777_v60 = vld [vmem:[%s11217_s10 + $0x960] ss:$16 sps:$4 sm:$0xff]  }
 0x15b   : > { %6715 = vmatpush1.bf16.msra.mxu0 %v9685_v61  ;;  %7371 = vmatpush1.bf16.msra.mxu1 %v9688_v62  ;;  %v9780_v61 = vld [vmem:[%s11217_s10 + $0x968] ss:$16 sps:$4 sm:$0xff]   ;;  %v9785_v62 = vld [vmem:[%s11217_s10 + $0x984] ss:$16 sps:$4 sm:$0xff]  }
 0x15c   : > { %6716 = vmatprep.subr.bf16.mxu0 %v9693_v63  ;;  %7372 = vmatprep.subr.bf16.mxu1 %v9696_v0  ;;  %v9788_v63 = vld [vmem:[%s11217_s10 + $0x98c] ss:$16 sps:$4 sm:$0xff]   ;;  %v9783_v0 = vld [vmem:[%s11217_s10 + $0x980] ss:$16 sps:$4 sm:$0xff]  }
 0x15f   : > { %6717 = vmatpush1.bf16.msra.mxu0 %v9691_v1  ;;  %7373 = vmatpush1.bf16.msra.mxu1 %v9694_v2  ;;  %v9786_v1 = vld [vmem:[%s11217_s10 + $0x988] ss:$16 sps:$4 sm:$0xff]   ;;  %v9791_v2 = vld [vmem:[%s11217_s10 + $0x9a4] ss:$16 sps:$4 sm:$0xff]  }
 0x160   : > { %6718 = vmatprep.subr.bf16.mxu0 %v9699_v3  ;;  %7374 = vmatprep.subr.bf16.mxu1 %v9702_v4  ;;  %v9794_v3 = vld [vmem:[%s11217_s10 + $0x9ac] ss:$16 sps:$4 sm:$0xff]   ;;  %v9789_v4 = vld [vmem:[%s11217_s10 + $0x9a0] ss:$16 sps:$4 sm:$0xff]  }
 0x163   : > { %6719 = vmatpush1.bf16.msra.mxu0 %v9697_v5  ;;  %7375 = vmatpush1.bf16.msra.mxu1 %v9700_v6  ;;  %v9792_v5 = vld [vmem:[%s11217_s10 + $0x9a8] ss:$16 sps:$4 sm:$0xff]   ;;  %v9797_v6 = vld [vmem:[%s11217_s10 + $0x9c4] ss:$16 sps:$4 sm:$0xff]  }
 0x164   : > { %6720 = vmatprep.subr.bf16.mxu0 %v9705_v7  ;;  %7376 = vmatprep.subr.bf16.mxu1 %v9708_v8  ;;  %v9800_v7 = vld [vmem:[%s11217_s10 + $0x9cc] ss:$16 sps:$4 sm:$0xff]   ;;  %v9795_v8 = vld [vmem:[%s11217_s10 + $0x9c0] ss:$16 sps:$4 sm:$0xff]  }
 0x167   : > { %6721 = vmatpush1.bf16.msra.mxu0 %v9703_v9  ;;  %7377 = vmatpush1.bf16.msra.mxu1 %v9706_v10  ;;  %v9798_v9 = vld [vmem:[%s11217_s10 + $0x9c8] ss:$16 sps:$4 sm:$0xff]   ;;  %v9803_v10 = vld [vmem:[%s11217_s10 + $0x9e4] ss:$16 sps:$4 sm:$0xff]  }
 0x168   : > { %6731 = vmatprep.subr.bf16.mxu0 %v9713_v12  ;;  %7387 = vmatprep.subr.bf16.mxu1 %v9716_v13  ;;  %v9806_v12 = vld [vmem:[%s11217_s10 + $0x9ec] ss:$16 sps:$4 sm:$0xff]   ;;  %v9801_v13 = vld [vmem:[%s11217_s10 + $0x9e0] ss:$16 sps:$4 sm:$0xff]  }
 0x16a   : > { %6723 = vmatmul.mubr.bf16.vlgmr.msra.gmra.mrb[0].mxu0 %v8088_v16  ;;  %7379 = vmatmul.mubr.bf16.vlgmr.msra.gmra.mrb[0].mxu1 %v8088_v16  ;;  %v9811_v16 = vld [vmem:[%s11217_s10 + $0xa04] ss:$16 sps:$4 sm:$0xff]  }
 0x16b   : > { %6732 = vmatpush1.bf16.msra.mxu0 %v9711_v15  ;;  %7388 = vmatpush1.bf16.msra.mxu1 %v9714_v11  ;;  %v9804_v15 = vld [vmem:[%s11217_s10 + $0x9e8] ss:$16 sps:$4 sm:$0xff]   ;;  %v9814_v11 = vld [vmem:[%s11217_s10 + $0xa0c] ss:$16 sps:$4 sm:$0xff]  }
 0x16c   : > { %6733 = vmatprep.subr.bf16.mxu0 %v9719_v18  ;;  %7389 = vmatprep.subr.bf16.mxu1 %v9722_v19  ;;  %v11595_v18 = vld [vmem:[%s12415_s0 + $0x28] sm:$0xff]  ;;  %v8090_v19 = vcombine.low %v11525_v17, %v11525_v17 }
 0x16d   : > { %6763 = vmatprep.mubr.bf16.mxu0 %v8091_v20  ;;  %7419 = vmatprep.mubr.bf16.mxu1 %v8091_v20  ;;  %v9809_v20 = vld [vmem:[%s11217_s10 + $0xa00] ss:$16 sps:$4 sm:$0xff]  }
 0x16e   : > { %v9815_v17 = vld [vmem:[%s11217_s10 + $0xa20] ss:$16 sps:$4 sm:$0xff]  }
 0x16f   : > { %6734 = vmatpush1.bf16.msra.mxu0 %v9717_v14  ;;  %7390 = vmatpush1.bf16.msra.mxu1 %v9720_v21  ;;  %v9812_v14 = vld [vmem:[%s11217_s10 + $0xa08] ss:$16 sps:$4 sm:$0xff]   ;;  %v9817_v21 = vld [vmem:[%s11217_s10 + $0xa24] ss:$16 sps:$4 sm:$0xff]  }
 0x170   : > { %6735 = vmatprep.subr.bf16.mxu0 %v9725_v22  ;;  %7391 = vmatprep.subr.bf16.mxu1 %v9728_v23  ;;  %v9820_v22 = vld [vmem:[%s11217_s10 + $0xa2c] ss:$16 sps:$4 sm:$0xff]   ;;  %v8093_v23 = vcombine.high %v11595_v18, %v11595_v18 }
 0x173   : > { %6736 = vmatpush1.bf16.msra.mxu0 %v9723_v24  ;;  %7392 = vmatpush1.bf16.msra.mxu1 %v9726_v25  ;;  %v9818_v24 = vld [vmem:[%s11217_s10 + $0xa28] ss:$16 sps:$4 sm:$0xff]   ;;  %v9823_v25 = vld [vmem:[%s11217_s10 + $0xa44] ss:$16 sps:$4 sm:$0xff]  }
 0x174   : > { %6737 = vmatprep.subr.bf16.mxu0 %v9731_v26  ;;  %7393 = vmatprep.subr.bf16.mxu1 %v9734_v27  ;;  %v9826_v26 = vld [vmem:[%s11217_s10 + $0xa4c] ss:$16 sps:$4 sm:$0xff]   ;;  %v9821_v27 = vld [vmem:[%s11217_s10 + $0xa40] ss:$16 sps:$4 sm:$0xff]  }
 0x177   : > { %6738 = vmatpush1.bf16.msra.mxu0 %v9729_v28  ;;  %7394 = vmatpush1.bf16.msra.mxu1 %v9732_v29  ;;  %v9824_v28 = vld [vmem:[%s11217_s10 + $0xa48] ss:$16 sps:$4 sm:$0xff]   ;;  %v9829_v29 = vld [vmem:[%s11217_s10 + $0xa64] ss:$16 sps:$4 sm:$0xff]  }
 0x178   : > { %6739 = vmatprep.subr.bf16.mxu0 %v9737_v30  ;;  %7395 = vmatprep.subr.bf16.mxu1 %v9740_v31  ;;  %v9832_v30 = vld [vmem:[%s11217_s10 + $0xa6c] ss:$16 sps:$4 sm:$0xff]   ;;  %v9827_v31 = vld [vmem:[%s11217_s10 + $0xa60] ss:$16 sps:$4 sm:$0xff]  }
 0x17b   : > { %6740 = vmatpush1.bf16.msra.mxu0 %v9735_v32  ;;  %7396 = vmatpush1.bf16.msra.mxu1 %v9738_v33  ;;  %v9830_v32 = vld [vmem:[%s11217_s10 + $0xa68] ss:$16 sps:$4 sm:$0xff]   ;;  %v9835_v33 = vld [vmem:[%s11217_s10 + $0xa84] ss:$16 sps:$4 sm:$0xff]  }
 0x17c   : > { %6741 = vmatprep.subr.bf16.mxu0 %v9743_v34  ;;  %7397 = vmatprep.subr.bf16.mxu1 %v9746_v35  ;;  %v9838_v34 = vld [vmem:[%s11217_s10 + $0xa8c] ss:$16 sps:$4 sm:$0xff]   ;;  %v9833_v35 = vld [vmem:[%s11217_s10 + $0xa80] ss:$16 sps:$4 sm:$0xff]  }
 0x17f   : > { %6742 = vmatpush1.bf16.msra.mxu0 %v9741_v36  ;;  %7398 = vmatpush1.bf16.msra.mxu1 %v9744_v37  ;;  %v9836_v36 = vld [vmem:[%s11217_s10 + $0xa88] ss:$16 sps:$4 sm:$0xff]   ;;  %v9841_v37 = vld [vmem:[%s11217_s10 + $0xaa4] ss:$16 sps:$4 sm:$0xff]  }
 0x180   : > { %6743 = vmatprep.subr.bf16.mxu0 %v9749_v38  ;;  %7399 = vmatprep.subr.bf16.mxu1 %v9752_v39  ;;  %v9844_v38 = vld [vmem:[%s11217_s10 + $0xaac] ss:$16 sps:$4 sm:$0xff]   ;;  %v9839_v39 = vld [vmem:[%s11217_s10 + $0xaa0] ss:$16 sps:$4 sm:$0xff]  }
 0x183   : > { %6744 = vmatpush1.bf16.msra.mxu0 %v9747_v40  ;;  %7400 = vmatpush1.bf16.msra.mxu1 %v9750_v41  ;;  %v9842_v40 = vld [vmem:[%s11217_s10 + $0xaa8] ss:$16 sps:$4 sm:$0xff]   ;;  %v9847_v41 = vld [vmem:[%s11217_s10 + $0xac4] ss:$16 sps:$4 sm:$0xff]  }
 0x184   : > { %6745 = vmatprep.subr.bf16.mxu0 %v9755_v42  ;;  %7401 = vmatprep.subr.bf16.mxu1 %v9758_v43  ;;  %v9850_v42 = vld [vmem:[%s11217_s10 + $0xacc] ss:$16 sps:$4 sm:$0xff]   ;;  %v9845_v43 = vld [vmem:[%s11217_s10 + $0xac0] ss:$16 sps:$4 sm:$0xff]  }
 0x187   : > { %6746 = vmatpush1.bf16.msra.mxu0 %v9753_v44  ;;  %7402 = vmatpush1.bf16.msra.mxu1 %v9756_v45  ;;  %v9848_v44 = vld [vmem:[%s11217_s10 + $0xac8] ss:$16 sps:$4 sm:$0xff]   ;;  %v9853_v45 = vld [vmem:[%s11217_s10 + $0xae4] ss:$16 sps:$4 sm:$0xff]  }
 0x188   : > { %6747 = vmatprep.subr.bf16.mxu0 %v9761_v46  ;;  %7403 = vmatprep.subr.bf16.mxu1 %v9764_v47  ;;  %v9856_v46 = vld [vmem:[%s11217_s10 + $0xaec] ss:$16 sps:$4 sm:$0xff]   ;;  %v9851_v47 = vld [vmem:[%s11217_s10 + $0xae0] ss:$16 sps:$4 sm:$0xff]  }
 0x18b   : > { %6748 = vmatpush1.bf16.msra.mxu0 %v9759_v48  ;;  %7404 = vmatpush1.bf16.msra.mxu1 %v9762_v49  ;;  %v9854_v48 = vld [vmem:[%s11217_s10 + $0xae8] ss:$16 sps:$4 sm:$0xff]   ;;  %v9859_v49 = vld [vmem:[%s11217_s10 + $0xb04] ss:$16 sps:$4 sm:$0xff]  }
 0x18c   : > { %6749 = vmatprep.subr.bf16.mxu0 %v9767_v50  ;;  %7405 = vmatprep.subr.bf16.mxu1 %v9770_v51  ;;  %v9862_v50 = vld [vmem:[%s11217_s10 + $0xb0c] ss:$16 sps:$4 sm:$0xff]   ;;  %v9857_v51 = vld [vmem:[%s11217_s10 + $0xb00] ss:$16 sps:$4 sm:$0xff]  }
 0x18f   : > { %6750 = vmatpush1.bf16.msra.mxu0 %v9765_v52  ;;  %7406 = vmatpush1.bf16.msra.mxu1 %v9768_v53  ;;  %v9860_v52 = vld [vmem:[%s11217_s10 + $0xb08] ss:$16 sps:$4 sm:$0xff]   ;;  %v9865_v53 = vld [vmem:[%s11217_s10 + $0xb24] ss:$16 sps:$4 sm:$0xff]  }
 0x190   : > { %6751 = vmatprep.subr.bf16.mxu0 %v9773_v54  ;;  %7407 = vmatprep.subr.bf16.mxu1 %v9776_v55  ;;  %v9868_v54 = vld [vmem:[%s11217_s10 + $0xb2c] ss:$16 sps:$4 sm:$0xff]   ;;  %v9863_v55 = vld [vmem:[%s11217_s10 + $0xb20] ss:$16 sps:$4 sm:$0xff]  }
 0x193   : > { %6752 = vmatpush1.bf16.msra.mxu0 %v9771_v56  ;;  %7408 = vmatpush1.bf16.msra.mxu1 %v9774_v57  ;;  %v9866_v56 = vld [vmem:[%s11217_s10 + $0xb28] ss:$16 sps:$4 sm:$0xff]   ;;  %v9871_v57 = vld [vmem:[%s11217_s10 + $0xb44] ss:$16 sps:$4 sm:$0xff]  }
 0x194   : > { %6753 = vmatprep.subr.bf16.mxu0 %v9779_v58  ;;  %7409 = vmatprep.subr.bf16.mxu1 %v9782_v59  ;;  %v9874_v58 = vld [vmem:[%s11217_s10 + $0xb4c] ss:$16 sps:$4 sm:$0xff]   ;;  %v9869_v59 = vld [vmem:[%s11217_s10 + $0xb40] ss:$16 sps:$4 sm:$0xff]  }
 0x197   : > { %6754 = vmatpush1.bf16.msra.mxu0 %v9777_v60  ;;  %7410 = vmatpush1.bf16.msra.mxu1 %v9780_v61  ;;  %v9872_v60 = vld [vmem:[%s11217_s10 + $0xb48] ss:$16 sps:$4 sm:$0xff]   ;;  %v9877_v61 = vld [vmem:[%s11217_s10 + $0xb64] ss:$16 sps:$4 sm:$0xff]  }
 0x198   : > { %6755 = vmatprep.subr.bf16.mxu0 %v9785_v62  ;;  %7411 = vmatprep.subr.bf16.mxu1 %v9788_v63  ;;  %v9880_v62 = vld [vmem:[%s11217_s10 + $0xb6c] ss:$16 sps:$4 sm:$0xff]   ;;  %v9875_v63 = vld [vmem:[%s11217_s10 + $0xb60] ss:$16 sps:$4 sm:$0xff]  }
 0x19b   : > { %6756 = vmatpush1.bf16.msra.mxu0 %v9783_v0  ;;  %7412 = vmatpush1.bf16.msra.mxu1 %v9786_v1  ;;  %v9878_v0 = vld [vmem:[%s11217_s10 + $0xb68] ss:$16 sps:$4 sm:$0xff]   ;;  %v9883_v1 = vld [vmem:[%s11217_s10 + $0xb84] ss:$16 sps:$4 sm:$0xff]  }
 0x19c   : > { %6757 = vmatprep.subr.bf16.mxu0 %v9791_v2  ;;  %7413 = vmatprep.subr.bf16.mxu1 %v9794_v3  ;;  %v9886_v2 = vld [vmem:[%s11217_s10 + $0xb8c] ss:$16 sps:$4 sm:$0xff]   ;;  %v9881_v3 = vld [vmem:[%s11217_s10 + $0xb80] ss:$16 sps:$4 sm:$0xff]  }
 0x19f   : > { %6758 = vmatpush1.bf16.msra.mxu0 %v9789_v4  ;;  %7414 = vmatpush1.bf16.msra.mxu1 %v9792_v5  ;;  %v9884_v4 = vld [vmem:[%s11217_s10 + $0xb88] ss:$16 sps:$4 sm:$0xff]   ;;  %v9889_v5 = vld [vmem:[%s11217_s10 + $0xba4] ss:$16 sps:$4 sm:$0xff]  }
 0x1a0   : > { %6759 = vmatprep.subr.bf16.mxu0 %v9797_v6  ;;  %7415 = vmatprep.subr.bf16.mxu1 %v9800_v7  ;;  %v9892_v6 = vld [vmem:[%s11217_s10 + $0xbac] ss:$16 sps:$4 sm:$0xff]   ;;  %v9887_v7 = vld [vmem:[%s11217_s10 + $0xba0] ss:$16 sps:$4 sm:$0xff]  }
 0x1a3   : > { %6760 = vmatpush1.bf16.msra.mxu0 %v9795_v8  ;;  %7416 = vmatpush1.bf16.msra.mxu1 %v9798_v9  ;;  %v9890_v8 = vld [vmem:[%s11217_s10 + $0xba8] ss:$16 sps:$4 sm:$0xff]   ;;  %v9895_v9 = vld [vmem:[%s11217_s10 + $0xbc4] ss:$16 sps:$4 sm:$0xff]  }
 0x1a4   : > { %6761 = vmatprep.subr.bf16.mxu0 %v9803_v10  ;;  %7417 = vmatprep.subr.bf16.mxu1 %v9806_v12  ;;  %v9898_v10 = vld [vmem:[%s11217_s10 + $0xbcc] ss:$16 sps:$4 sm:$0xff]   ;;  %v9893_v12 = vld [vmem:[%s11217_s10 + $0xbc0] ss:$16 sps:$4 sm:$0xff]  }
 0x1a7   : > { %6762 = vmatpush1.bf16.msra.mxu0 %v9801_v13  ;;  %7418 = vmatpush1.bf16.msra.mxu1 %v9804_v15  ;;  %v9896_v13 = vld [vmem:[%s11217_s10 + $0xbc8] ss:$16 sps:$4 sm:$0xff]   ;;  %v9901_v15 = vld [vmem:[%s11217_s10 + $0xbe4] ss:$16 sps:$4 sm:$0xff]  }
 0x1a8   : > { %6772 = vmatprep.subr.bf16.mxu0 %v9811_v16  ;;  %7428 = vmatprep.subr.bf16.mxu1 %v9814_v11  ;;  %v9904_v16 = vld [vmem:[%s11217_s10 + $0xbec] ss:$16 sps:$4 sm:$0xff]   ;;  %v9899_v11 = vld [vmem:[%s11217_s10 + $0xbe0] ss:$16 sps:$4 sm:$0xff]  }
 0x1aa   : > { %6764 = vmatmul.mubr.bf16.vlgmr.msra.gmra.mrb[0].mxu0 %v8090_v19  ;;  %7420 = vmatmul.mubr.bf16.vlgmr.msra.gmra.mrb[0].mxu1 %v8090_v19  ;;  %v9902_v19 = vld [vmem:[%s11217_s10 + $0xbe8] ss:$16 sps:$4 sm:$0xff]  }
 0x1ab   : > { %6773 = vmatpush1.bf16.msra.mxu0 %v9809_v20  ;;  %7429 = vmatpush1.bf16.msra.mxu1 %v9812_v14  ;;  %v9909_v20 = vld [vmem:[%s11217_s10 + $0xc04] ss:$16 sps:$4 sm:$0xff]   ;;  %v9912_v14 = vld [vmem:[%s11217_s10 + $0xc0c] ss:$16 sps:$4 sm:$0xff]  }
 0x1ac   : > { %6774 = vmatprep.subr.bf16.mxu0 %v9817_v21  ;;  %7430 = vmatprep.subr.bf16.mxu1 %v9820_v22  ;;  %v11668_v21 = vld [vmem:[%s12415_s0 + $0x30] sm:$0xff]  ;;  %v8092_v22 = vcombine.low %v11595_v18, %v11595_v18  ;;  %v9913_v18 = vld [vmem:[%s11217_s10 + $0xc20] ss:$16 sps:$4 sm:$0xff]  }
 0x1ad   : > { %6804 = vmatprep.mubr.bf16.mxu0 %v8093_v23  ;;  %7460 = vmatprep.mubr.bf16.mxu1 %v8093_v23  ;;  %v9907_v23 = vld [vmem:[%s11217_s10 + $0xc00] ss:$16 sps:$4 sm:$0xff]  }
 0x1af   : > { %6775 = vmatpush1.bf16.msra.mxu0 %v9815_v17  ;;  %7431 = vmatpush1.bf16.msra.mxu1 %v9818_v24  ;;  %v9910_v17 = vld [vmem:[%s11217_s10 + $0xc08] ss:$16 sps:$4 sm:$0xff]   ;;  %v9915_v24 = vld [vmem:[%s11217_s10 + $0xc24] ss:$16 sps:$4 sm:$0xff]  }
 0x1b0   : > { %6776 = vmatprep.subr.bf16.mxu0 %v9823_v25  ;;  %7432 = vmatprep.subr.bf16.mxu1 %v9826_v26  ;;  %v9918_v25 = vld [vmem:[%s11217_s10 + $0xc2c] ss:$16 sps:$4 sm:$0xff]   ;;  %v8095_v26 = vcombine.high %v11668_v21, %v11668_v21 }
 0x1b3   : > { %6777 = vmatpush1.bf16.msra.mxu0 %v9821_v27  ;;  %7433 = vmatpush1.bf16.msra.mxu1 %v9824_v28  ;;  %v9916_v27 = vld [vmem:[%s11217_s10 + $0xc28] ss:$16 sps:$4 sm:$0xff]   ;;  %v9921_v28 = vld [vmem:[%s11217_s10 + $0xc44] ss:$16 sps:$4 sm:$0xff]  }
 0x1b4   : > { %6778 = vmatprep.subr.bf16.mxu0 %v9829_v29  ;;  %7434 = vmatprep.subr.bf16.mxu1 %v9832_v30  ;;  %v9924_v29 = vld [vmem:[%s11217_s10 + $0xc4c] ss:$16 sps:$4 sm:$0xff]   ;;  %v9919_v30 = vld [vmem:[%s11217_s10 + $0xc40] ss:$16 sps:$4 sm:$0xff]  }
 0x1b7   : > { %6779 = vmatpush1.bf16.msra.mxu0 %v9827_v31  ;;  %7435 = vmatpush1.bf16.msra.mxu1 %v9830_v32  ;;  %v9922_v31 = vld [vmem:[%s11217_s10 + $0xc48] ss:$16 sps:$4 sm:$0xff]   ;;  %v9927_v32 = vld [vmem:[%s11217_s10 + $0xc64] ss:$16 sps:$4 sm:$0xff]  }
 0x1b8   : > { %6780 = vmatprep.subr.bf16.mxu0 %v9835_v33  ;;  %7436 = vmatprep.subr.bf16.mxu1 %v9838_v34  ;;  %v9930_v33 = vld [vmem:[%s11217_s10 + $0xc6c] ss:$16 sps:$4 sm:$0xff]   ;;  %v9925_v34 = vld [vmem:[%s11217_s10 + $0xc60] ss:$16 sps:$4 sm:$0xff]  }
 0x1bb   : > { %6781 = vmatpush1.bf16.msra.mxu0 %v9833_v35  ;;  %7437 = vmatpush1.bf16.msra.mxu1 %v9836_v36  ;;  %v9928_v35 = vld [vmem:[%s11217_s10 + $0xc68] ss:$16 sps:$4 sm:$0xff]   ;;  %v9933_v36 = vld [vmem:[%s11217_s10 + $0xc84] ss:$16 sps:$4 sm:$0xff]  }
 0x1bc   : > { %6782 = vmatprep.subr.bf16.mxu0 %v9841_v37  ;;  %7438 = vmatprep.subr.bf16.mxu1 %v9844_v38  ;;  %v9936_v37 = vld [vmem:[%s11217_s10 + $0xc8c] ss:$16 sps:$4 sm:$0xff]   ;;  %v9931_v38 = vld [vmem:[%s11217_s10 + $0xc80] ss:$16 sps:$4 sm:$0xff]  }
 0x1bf   : > { %6783 = vmatpush1.bf16.msra.mxu0 %v9839_v39  ;;  %7439 = vmatpush1.bf16.msra.mxu1 %v9842_v40  ;;  %v9934_v39 = vld [vmem:[%s11217_s10 + $0xc88] ss:$16 sps:$4 sm:$0xff]   ;;  %v9939_v40 = vld [vmem:[%s11217_s10 + $0xca4] ss:$16 sps:$4 sm:$0xff]  }
 0x1c0   : > { %6784 = vmatprep.subr.bf16.mxu0 %v9847_v41  ;;  %7440 = vmatprep.subr.bf16.mxu1 %v9850_v42  ;;  %v9942_v41 = vld [vmem:[%s11217_s10 + $0xcac] ss:$16 sps:$4 sm:$0xff]   ;;  %v9937_v42 = vld [vmem:[%s11217_s10 + $0xca0] ss:$16 sps:$4 sm:$0xff]  }
 0x1c3   : > { %6785 = vmatpush1.bf16.msra.mxu0 %v9845_v43  ;;  %7441 = vmatpush1.bf16.msra.mxu1 %v9848_v44  ;;  %v9940_v43 = vld [vmem:[%s11217_s10 + $0xca8] ss:$16 sps:$4 sm:$0xff]   ;;  %v9945_v44 = vld [vmem:[%s11217_s10 + $0xcc4] ss:$16 sps:$4 sm:$0xff]  }
 0x1c4   : > { %6786 = vmatprep.subr.bf16.mxu0 %v9853_v45  ;;  %7442 = vmatprep.subr.bf16.mxu1 %v9856_v46  ;;  %v9948_v45 = vld [vmem:[%s11217_s10 + $0xccc] ss:$16 sps:$4 sm:$0xff]   ;;  %v9943_v46 = vld [vmem:[%s11217_s10 + $0xcc0] ss:$16 sps:$4 sm:$0xff]  }
 0x1c7   : > { %6787 = vmatpush1.bf16.msra.mxu0 %v9851_v47  ;;  %7443 = vmatpush1.bf16.msra.mxu1 %v9854_v48  ;;  %v9946_v47 = vld [vmem:[%s11217_s10 + $0xcc8] ss:$16 sps:$4 sm:$0xff]   ;;  %v9951_v48 = vld [vmem:[%s11217_s10 + $0xce4] ss:$16 sps:$4 sm:$0xff]  }
 0x1c8   : > { %6788 = vmatprep.subr.bf16.mxu0 %v9859_v49  ;;  %7444 = vmatprep.subr.bf16.mxu1 %v9862_v50  ;;  %v9954_v49 = vld [vmem:[%s11217_s10 + $0xcec] ss:$16 sps:$4 sm:$0xff]   ;;  %v9949_v50 = vld [vmem:[%s11217_s10 + $0xce0] ss:$16 sps:$4 sm:$0xff]  }
 0x1cb   : > { %6789 = vmatpush1.bf16.msra.mxu0 %v9857_v51  ;;  %7445 = vmatpush1.bf16.msra.mxu1 %v9860_v52  ;;  %v9952_v51 = vld [vmem:[%s11217_s10 + $0xce8] ss:$16 sps:$4 sm:$0xff]   ;;  %v9957_v52 = vld [vmem:[%s11217_s10 + $0xd04] ss:$16 sps:$4 sm:$0xff]  }
 0x1cc   : > { %6790 = vmatprep.subr.bf16.mxu0 %v9865_v53  ;;  %7446 = vmatprep.subr.bf16.mxu1 %v9868_v54  ;;  %v9960_v53 = vld [vmem:[%s11217_s10 + $0xd0c] ss:$16 sps:$4 sm:$0xff]   ;;  %v9955_v54 = vld [vmem:[%s11217_s10 + $0xd00] ss:$16 sps:$4 sm:$0xff]  }
 0x1cf   : > { %6791 = vmatpush1.bf16.msra.mxu0 %v9863_v55  ;;  %7447 = vmatpush1.bf16.msra.mxu1 %v9866_v56  ;;  %v9958_v55 = vld [vmem:[%s11217_s10 + $0xd08] ss:$16 sps:$4 sm:$0xff]   ;;  %v9963_v56 = vld [vmem:[%s11217_s10 + $0xd24] ss:$16 sps:$4 sm:$0xff]  }
 0x1d0   : > { %6792 = vmatprep.subr.bf16.mxu0 %v9871_v57  ;;  %7448 = vmatprep.subr.bf16.mxu1 %v9874_v58  ;;  %v9966_v57 = vld [vmem:[%s11217_s10 + $0xd2c] ss:$16 sps:$4 sm:$0xff]   ;;  %v9961_v58 = vld [vmem:[%s11217_s10 + $0xd20] ss:$16 sps:$4 sm:$0xff]  }
 0x1d3   : > { %6793 = vmatpush1.bf16.msra.mxu0 %v9869_v59  ;;  %7449 = vmatpush1.bf16.msra.mxu1 %v9872_v60  ;;  %v9964_v59 = vld [vmem:[%s11217_s10 + $0xd28] ss:$16 sps:$4 sm:$0xff]   ;;  %v9969_v60 = vld [vmem:[%s11217_s10 + $0xd44] ss:$16 sps:$4 sm:$0xff]  }
 0x1d4   : > { %6794 = vmatprep.subr.bf16.mxu0 %v9877_v61  ;;  %7450 = vmatprep.subr.bf16.mxu1 %v9880_v62  ;;  %v9972_v61 = vld [vmem:[%s11217_s10 + $0xd4c] ss:$16 sps:$4 sm:$0xff]   ;;  %v9967_v62 = vld [vmem:[%s11217_s10 + $0xd40] ss:$16 sps:$4 sm:$0xff]  }
 0x1d7   : > { %6795 = vmatpush1.bf16.msra.mxu0 %v9875_v63  ;;  %7451 = vmatpush1.bf16.msra.mxu1 %v9878_v0  ;;  %v9970_v63 = vld [vmem:[%s11217_s10 + $0xd48] ss:$16 sps:$4 sm:$0xff]   ;;  %v9975_v0 = vld [vmem:[%s11217_s10 + $0xd64] ss:$16 sps:$4 sm:$0xff]  }
 0x1d8   : > { %6796 = vmatprep.subr.bf16.mxu0 %v9883_v1  ;;  %7452 = vmatprep.subr.bf16.mxu1 %v9886_v2  ;;  %v9978_v1 = vld [vmem:[%s11217_s10 + $0xd6c] ss:$16 sps:$4 sm:$0xff]   ;;  %v9973_v2 = vld [vmem:[%s11217_s10 + $0xd60] ss:$16 sps:$4 sm:$0xff]  }
 0x1db   : > { %6797 = vmatpush1.bf16.msra.mxu0 %v9881_v3  ;;  %7453 = vmatpush1.bf16.msra.mxu1 %v9884_v4  ;;  %v9976_v3 = vld [vmem:[%s11217_s10 + $0xd68] ss:$16 sps:$4 sm:$0xff]   ;;  %v9981_v4 = vld [vmem:[%s11217_s10 + $0xd84] ss:$16 sps:$4 sm:$0xff]  }
 0x1dc   : > { %6798 = vmatprep.subr.bf16.mxu0 %v9889_v5  ;;  %7454 = vmatprep.subr.bf16.mxu1 %v9892_v6  ;;  %v9984_v5 = vld [vmem:[%s11217_s10 + $0xd8c] ss:$16 sps:$4 sm:$0xff]   ;;  %v9979_v6 = vld [vmem:[%s11217_s10 + $0xd80] ss:$16 sps:$4 sm:$0xff]  }
 0x1df   : > { %6799 = vmatpush1.bf16.msra.mxu0 %v9887_v7  ;;  %7455 = vmatpush1.bf16.msra.mxu1 %v9890_v8  ;;  %v9982_v7 = vld [vmem:[%s11217_s10 + $0xd88] ss:$16 sps:$4 sm:$0xff]   ;;  %v9987_v8 = vld [vmem:[%s11217_s10 + $0xda4] ss:$16 sps:$4 sm:$0xff]  }
 0x1e0   : > { %6800 = vmatprep.subr.bf16.mxu0 %v9895_v9  ;;  %7456 = vmatprep.subr.bf16.mxu1 %v9898_v10  ;;  %v9990_v9 = vld [vmem:[%s11217_s10 + $0xdac] ss:$16 sps:$4 sm:$0xff]   ;;  %v9985_v10 = vld [vmem:[%s11217_s10 + $0xda0] ss:$16 sps:$4 sm:$0xff]  }
 0x1e3   : > { %6801 = vmatpush1.bf16.msra.mxu0 %v9893_v12  ;;  %7457 = vmatpush1.bf16.msra.mxu1 %v9896_v13  ;;  %v9988_v12 = vld [vmem:[%s11217_s10 + $0xda8] ss:$16 sps:$4 sm:$0xff]   ;;  %v9993_v13 = vld [vmem:[%s11217_s10 + $0xdc4] ss:$16 sps:$4 sm:$0xff]  }
 0x1e4   : > { %6802 = vmatprep.subr.bf16.mxu0 %v9901_v15  ;;  %7458 = vmatprep.subr.bf16.mxu1 %v9904_v16  ;;  %v9996_v15 = vld [vmem:[%s11217_s10 + $0xdcc] ss:$16 sps:$4 sm:$0xff]   ;;  %v9991_v16 = vld [vmem:[%s11217_s10 + $0xdc0] ss:$16 sps:$4 sm:$0xff]  }
 0x1e7   : > { %6803 = vmatpush1.bf16.msra.mxu0 %v9899_v11  ;;  %7459 = vmatpush1.bf16.msra.mxu1 %v9902_v19  ;;  %v9994_v11 = vld [vmem:[%s11217_s10 + $0xdc8] ss:$16 sps:$4 sm:$0xff]   ;;  %v9999_v19 = vld [vmem:[%s11217_s10 + $0xde4] ss:$16 sps:$4 sm:$0xff]  }
 0x1e8   : > { %6813 = vmatprep.subr.bf16.mxu0 %v9909_v20  ;;  %7469 = vmatprep.subr.bf16.mxu1 %v9912_v14  ;;  %v10002_v20 = vld [vmem:[%s11217_s10 + $0xdec] ss:$16 sps:$4 sm:$0xff]   ;;  %v9997_v14 = vld [vmem:[%s11217_s10 + $0xde0] ss:$16 sps:$4 sm:$0xff]  }
 0x1ea   : > { %6805 = vmatmul.mubr.bf16.vlgmr.msra.gmra.mrb[0].mxu0 %v8092_v22  ;;  %7461 = vmatmul.mubr.bf16.vlgmr.msra.gmra.mrb[0].mxu1 %v8092_v22  ;;  %v10000_v22 = vld [vmem:[%s11217_s10 + $0xde8] ss:$16 sps:$4 sm:$0xff]  }
 0x1eb   : > { %6814 = vmatpush1.bf16.msra.mxu0 %v9907_v23  ;;  %7470 = vmatpush1.bf16.msra.mxu1 %v9910_v17  ;;  %v10007_v23 = vld [vmem:[%s11217_s10 + $0xe04] ss:$16 sps:$4 sm:$0xff]   ;;  %v10010_v17 = vld [vmem:[%s11217_s10 + $0xe0c] ss:$16 sps:$4 sm:$0xff]  }
 0x1ec   : > { %6815 = vmatprep.subr.bf16.mxu0 %v9915_v24  ;;  %7471 = vmatprep.subr.bf16.mxu1 %v9918_v25  ;;  %v11741_v24 = vld [vmem:[%s12415_s0 + $0x38] sm:$0xff]  ;;  %v8094_v25 = vcombine.low %v11668_v21, %v11668_v21 }
 0x1ed   : > { %6845 = vmatprep.mubr.bf16.mxu0 %v8095_v26  ;;  %7501 = vmatprep.mubr.bf16.mxu1 %v8095_v26  ;;  %v10005_v26 = vld [vmem:[%s11217_s10 + $0xe00] ss:$16 sps:$4 sm:$0xff]  }
 0x1ee   : > { %v10011_v21 = vld [vmem:[%s11217_s10 + $0xe20] ss:$16 sps:$4 sm:$0xff]  }
 0x1ef   : > { %6816 = vmatpush1.bf16.msra.mxu0 %v9913_v18  ;;  %7472 = vmatpush1.bf16.msra.mxu1 %v9916_v27  ;;  %v10008_v18 = vld [vmem:[%s11217_s10 + $0xe08] ss:$16 sps:$4 sm:$0xff]   ;;  %v10013_v27 = vld [vmem:[%s11217_s10 + $0xe24] ss:$16 sps:$4 sm:$0xff]  }
 0x1f0   : > { %6817 = vmatprep.subr.bf16.mxu0 %v9921_v28  ;;  %7473 = vmatprep.subr.bf16.mxu1 %v9924_v29  ;;  %v10016_v28 = vld [vmem:[%s11217_s10 + $0xe2c] ss:$16 sps:$4 sm:$0xff]   ;;  %v8097_v29 = vcombine.high %v11741_v24, %v11741_v24 }
 0x1f3   : > { %6818 = vmatpush1.bf16.msra.mxu0 %v9919_v30  ;;  %7474 = vmatpush1.bf16.msra.mxu1 %v9922_v31  ;;  %v10014_v30 = vld [vmem:[%s11217_s10 + $0xe28] ss:$16 sps:$4 sm:$0xff]   ;;  %v10019_v31 = vld [vmem:[%s11217_s10 + $0xe44] ss:$16 sps:$4 sm:$0xff]  }
 0x1f4   : > { %6819 = vmatprep.subr.bf16.mxu0 %v9927_v32  ;;  %7475 = vmatprep.subr.bf16.mxu1 %v9930_v33  ;;  %v10022_v32 = vld [vmem:[%s11217_s10 + $0xe4c] ss:$16 sps:$4 sm:$0xff]   ;;  %v10017_v33 = vld [vmem:[%s11217_s10 + $0xe40] ss:$16 sps:$4 sm:$0xff]  }
 0x1f7   : > { %6820 = vmatpush1.bf16.msra.mxu0 %v9925_v34  ;;  %7476 = vmatpush1.bf16.msra.mxu1 %v9928_v35  ;;  %v10020_v34 = vld [vmem:[%s11217_s10 + $0xe48] ss:$16 sps:$4 sm:$0xff]   ;;  %v10025_v35 = vld [vmem:[%s11217_s10 + $0xe64] ss:$16 sps:$4 sm:$0xff]  }
 0x1f8   : > { %6821 = vmatprep.subr.bf16.mxu0 %v9933_v36  ;;  %7477 = vmatprep.subr.bf16.mxu1 %v9936_v37  ;;  %v10028_v36 = vld [vmem:[%s11217_s10 + $0xe6c] ss:$16 sps:$4 sm:$0xff]   ;;  %v10023_v37 = vld [vmem:[%s11217_s10 + $0xe60] ss:$16 sps:$4 sm:$0xff]  }
 0x1fb   : > { %6822 = vmatpush1.bf16.msra.mxu0 %v9931_v38  ;;  %7478 = vmatpush1.bf16.msra.mxu1 %v9934_v39  ;;  %v10026_v38 = vld [vmem:[%s11217_s10 + $0xe68] ss:$16 sps:$4 sm:$0xff]   ;;  %v10031_v39 = vld [vmem:[%s11217_s10 + $0xe84] ss:$16 sps:$4 sm:$0xff]  }
 0x1fc   : > { %6823 = vmatprep.subr.bf16.mxu0 %v9939_v40  ;;  %7479 = vmatprep.subr.bf16.mxu1 %v9942_v41  ;;  %v10034_v40 = vld [vmem:[%s11217_s10 + $0xe8c] ss:$16 sps:$4 sm:$0xff]   ;;  %v10029_v41 = vld [vmem:[%s11217_s10 + $0xe80] ss:$16 sps:$4 sm:$0xff]  }
 0x1ff   : > { %6824 = vmatpush1.bf16.msra.mxu0 %v9937_v42  ;;  %7480 = vmatpush1.bf16.msra.mxu1 %v9940_v43  ;;  %v10032_v42 = vld [vmem:[%s11217_s10 + $0xe88] ss:$16 sps:$4 sm:$0xff]   ;;  %v10037_v43 = vld [vmem:[%s11217_s10 + $0xea4] ss:$16 sps:$4 sm:$0xff]  }
 0x200   : > { %6825 = vmatprep.subr.bf16.mxu0 %v9945_v44  ;;  %7481 = vmatprep.subr.bf16.mxu1 %v9948_v45  ;;  %v10040_v44 = vld [vmem:[%s11217_s10 + $0xeac] ss:$16 sps:$4 sm:$0xff]   ;;  %v10035_v45 = vld [vmem:[%s11217_s10 + $0xea0] ss:$16 sps:$4 sm:$0xff]  }
 0x203   : > { %6826 = vmatpush1.bf16.msra.mxu0 %v9943_v46  ;;  %7482 = vmatpush1.bf16.msra.mxu1 %v9946_v47  ;;  %v10038_v46 = vld [vmem:[%s11217_s10 + $0xea8] ss:$16 sps:$4 sm:$0xff]   ;;  %v10043_v47 = vld [vmem:[%s11217_s10 + $0xec4] ss:$16 sps:$4 sm:$0xff]  }
 0x204   : > { %6827 = vmatprep.subr.bf16.mxu0 %v9951_v48  ;;  %7483 = vmatprep.subr.bf16.mxu1 %v9954_v49  ;;  %v10046_v48 = vld [vmem:[%s11217_s10 + $0xecc] ss:$16 sps:$4 sm:$0xff]   ;;  %v10041_v49 = vld [vmem:[%s11217_s10 + $0xec0] ss:$16 sps:$4 sm:$0xff]  }
 0x207   : > { %6828 = vmatpush1.bf16.msra.mxu0 %v9949_v50  ;;  %7484 = vmatpush1.bf16.msra.mxu1 %v9952_v51  ;;  %v10044_v50 = vld [vmem:[%s11217_s10 + $0xec8] ss:$16 sps:$4 sm:$0xff]   ;;  %v10049_v51 = vld [vmem:[%s11217_s10 + $0xee4] ss:$16 sps:$4 sm:$0xff]  }
 0x208   : > { %6829 = vmatprep.subr.bf16.mxu0 %v9957_v52  ;;  %7485 = vmatprep.subr.bf16.mxu1 %v9960_v53  ;;  %v10052_v52 = vld [vmem:[%s11217_s10 + $0xeec] ss:$16 sps:$4 sm:$0xff]   ;;  %v10047_v53 = vld [vmem:[%s11217_s10 + $0xee0] ss:$16 sps:$4 sm:$0xff]  }
 0x20b   : > { %6830 = vmatpush1.bf16.msra.mxu0 %v9955_v54  ;;  %7486 = vmatpush1.bf16.msra.mxu1 %v9958_v55  ;;  %v10050_v54 = vld [vmem:[%s11217_s10 + $0xee8] ss:$16 sps:$4 sm:$0xff]   ;;  %v10055_v55 = vld [vmem:[%s11217_s10 + $0xf04] ss:$16 sps:$4 sm:$0xff]  }
 0x20c   : > { %6831 = vmatprep.subr.bf16.mxu0 %v9963_v56  ;;  %7487 = vmatprep.subr.bf16.mxu1 %v9966_v57  ;;  %v10058_v56 = vld [vmem:[%s11217_s10 + $0xf0c] ss:$16 sps:$4 sm:$0xff]   ;;  %v10053_v57 = vld [vmem:[%s11217_s10 + $0xf00] ss:$16 sps:$4 sm:$0xff]  }
 0x20f   : > { %6832 = vmatpush1.bf16.msra.mxu0 %v9961_v58  ;;  %7488 = vmatpush1.bf16.msra.mxu1 %v9964_v59  ;;  %v10056_v58 = vld [vmem:[%s11217_s10 + $0xf08] ss:$16 sps:$4 sm:$0xff]   ;;  %v10061_v59 = vld [vmem:[%s11217_s10 + $0xf24] ss:$16 sps:$4 sm:$0xff]  }
 0x210   : > { %6833 = vmatprep.subr.bf16.mxu0 %v9969_v60  ;;  %7489 = vmatprep.subr.bf16.mxu1 %v9972_v61  ;;  %v10064_v60 = vld [vmem:[%s11217_s10 + $0xf2c] ss:$16 sps:$4 sm:$0xff]   ;;  %v10059_v61 = vld [vmem:[%s11217_s10 + $0xf20] ss:$16 sps:$4 sm:$0xff]  }
 0x213   : > { %6834 = vmatpush1.bf16.msra.mxu0 %v9967_v62  ;;  %7490 = vmatpush1.bf16.msra.mxu1 %v9970_v63  ;;  %v10062_v62 = vld [vmem:[%s11217_s10 + $0xf28] ss:$16 sps:$4 sm:$0xff]   ;;  %v10067_v63 = vld [vmem:[%s11217_s10 + $0xf44] ss:$16 sps:$4 sm:$0xff]  }
 0x214   : > { %6835 = vmatprep.subr.bf16.mxu0 %v9975_v0  ;;  %7491 = vmatprep.subr.bf16.mxu1 %v9978_v1  ;;  %v10070_v0 = vld [vmem:[%s11217_s10 + $0xf4c] ss:$16 sps:$4 sm:$0xff]   ;;  %v10065_v1 = vld [vmem:[%s11217_s10 + $0xf40] ss:$16 sps:$4 sm:$0xff]  }
 0x217   : > { %6836 = vmatpush1.bf16.msra.mxu0 %v9973_v2  ;;  %7492 = vmatpush1.bf16.msra.mxu1 %v9976_v3  ;;  %v10068_v2 = vld [vmem:[%s11217_s10 + $0xf48] ss:$16 sps:$4 sm:$0xff]   ;;  %v10073_v3 = vld [vmem:[%s11217_s10 + $0xf64] ss:$16 sps:$4 sm:$0xff]  }
 0x218   : > { %6837 = vmatprep.subr.bf16.mxu0 %v9981_v4  ;;  %7493 = vmatprep.subr.bf16.mxu1 %v9984_v5  ;;  %v10076_v4 = vld [vmem:[%s11217_s10 + $0xf6c] ss:$16 sps:$4 sm:$0xff]   ;;  %v10071_v5 = vld [vmem:[%s11217_s10 + $0xf60] ss:$16 sps:$4 sm:$0xff]  }
 0x21b   : > { %6838 = vmatpush1.bf16.msra.mxu0 %v9979_v6  ;;  %7494 = vmatpush1.bf16.msra.mxu1 %v9982_v7  ;;  %v10074_v6 = vld [vmem:[%s11217_s10 + $0xf68] ss:$16 sps:$4 sm:$0xff]   ;;  %v10079_v7 = vld [vmem:[%s11217_s10 + $0xf84] ss:$16 sps:$4 sm:$0xff]  }
 0x21c   : > { %6839 = vmatprep.subr.bf16.mxu0 %v9987_v8  ;;  %7495 = vmatprep.subr.bf16.mxu1 %v9990_v9  ;;  %v10082_v8 = vld [vmem:[%s11217_s10 + $0xf8c] ss:$16 sps:$4 sm:$0xff]   ;;  %v10077_v9 = vld [vmem:[%s11217_s10 + $0xf80] ss:$16 sps:$4 sm:$0xff]  }
 0x21f   : > { %6840 = vmatpush1.bf16.msra.mxu0 %v9985_v10  ;;  %7496 = vmatpush1.bf16.msra.mxu1 %v9988_v12  ;;  %v10080_v10 = vld [vmem:[%s11217_s10 + $0xf88] ss:$16 sps:$4 sm:$0xff]   ;;  %v10085_v12 = vld [vmem:[%s11217_s10 + $0xfa4] ss:$16 sps:$4 sm:$0xff]  }
 0x220   : > { %6841 = vmatprep.subr.bf16.mxu0 %v9993_v13  ;;  %7497 = vmatprep.subr.bf16.mxu1 %v9996_v15  ;;  %v10088_v13 = vld [vmem:[%s11217_s10 + $0xfac] ss:$16 sps:$4 sm:$0xff]   ;;  %v10083_v15 = vld [vmem:[%s11217_s10 + $0xfa0] ss:$16 sps:$4 sm:$0xff]  }
 0x223   : > { %6842 = vmatpush1.bf16.msra.mxu0 %v9991_v16  ;;  %7498 = vmatpush1.bf16.msra.mxu1 %v9994_v11  ;;  %v10086_v16 = vld [vmem:[%s11217_s10 + $0xfa8] ss:$16 sps:$4 sm:$0xff]   ;;  %v10091_v11 = vld [vmem:[%s11217_s10 + $0xfc4] ss:$16 sps:$4 sm:$0xff]  }
 0x224   : > { %6843 = vmatprep.subr.bf16.mxu0 %v9999_v19  ;;  %7499 = vmatprep.subr.bf16.mxu1 %v10002_v20  ;;  %v10094_v19 = vld [vmem:[%s11217_s10 + $0xfcc] ss:$16 sps:$4 sm:$0xff]   ;;  %v10089_v20 = vld [vmem:[%s11217_s10 + $0xfc0] ss:$16 sps:$4 sm:$0xff]  }
 0x227   : > { %6844 = vmatpush1.bf16.msra.mxu0 %v9997_v14  ;;  %7500 = vmatpush1.bf16.msra.mxu1 %v10000_v22  ;;  %v10092_v14 = vld [vmem:[%s11217_s10 + $0xfc8] ss:$16 sps:$4 sm:$0xff]   ;;  %v10097_v22 = vld [vmem:[%s11217_s10 + $0xfe4] ss:$16 sps:$4 sm:$0xff]  }
 0x228   : > { %6854 = vmatprep.subr.bf16.mxu0 %v10007_v23  ;;  %7510 = vmatprep.subr.bf16.mxu1 %v10010_v17  ;;  %v10100_v23 = vld [vmem:[%s11217_s10 + $0xfec] ss:$16 sps:$4 sm:$0xff]   ;;  %v10095_v17 = vld [vmem:[%s11217_s10 + $0xfe0] ss:$16 sps:$4 sm:$0xff]  }
 0x22a   : > { %6846 = vmatmul.mubr.bf16.vlgmr.msra.gmra.mrb[0].mxu0 %v8094_v25  ;;  %7502 = vmatmul.mubr.bf16.vlgmr.msra.gmra.mrb[0].mxu1 %v8094_v25  ;;  %v10098_v25 = vld [vmem:[%s11217_s10 + $0xfe8] ss:$16 sps:$4 sm:$0xff]  }
 0x22b   : > { %6855 = vmatpush1.bf16.msra.mxu0 %v10005_v26  ;;  %7511 = vmatpush1.bf16.msra.mxu1 %v10008_v18  ;;  %v10105_v26 = vld [vmem:[%s11217_s10 + $0x1004] ss:$16 sps:$4 sm:$0xff]   ;;  %v10108_v18 = vld [vmem:[%s11217_s10 + $0x100c] ss:$16 sps:$4 sm:$0xff]  }
 0x22c   : > { %6856 = vmatprep.subr.bf16.mxu0 %v10013_v27  ;;  %7512 = vmatprep.subr.bf16.mxu1 %v10016_v28  ;;  %v11814_v27 = vld [vmem:[%s12415_s0 + $0x40] sm:$0xff]  ;;  %v8096_v28 = vcombine.low %v11741_v24, %v11741_v24  ;;  %v10109_v24 = vld [vmem:[%s11217_s10 + $0x1020] ss:$16 sps:$4 sm:$0xff]  }
 0x22d   : > { %6886 = vmatprep.mubr.bf16.mxu0 %v8097_v29  ;;  %7542 = vmatprep.mubr.bf16.mxu1 %v8097_v29  ;;  %v10103_v29 = vld [vmem:[%s11217_s10 + $0x1000] ss:$16 sps:$4 sm:$0xff]  }
 0x22f   : > { %6857 = vmatpush1.bf16.msra.mxu0 %v10011_v21  ;;  %7513 = vmatpush1.bf16.msra.mxu1 %v10014_v30  ;;  %v10106_v21 = vld [vmem:[%s11217_s10 + $0x1008] ss:$16 sps:$4 sm:$0xff]   ;;  %v10111_v30 = vld [vmem:[%s11217_s10 + $0x1024] ss:$16 sps:$4 sm:$0xff]  }
 0x230   : > { %6858 = vmatprep.subr.bf16.mxu0 %v10019_v31  ;;  %7514 = vmatprep.subr.bf16.mxu1 %v10022_v32  ;;  %v10114_v31 = vld [vmem:[%s11217_s10 + $0x102c] ss:$16 sps:$4 sm:$0xff]   ;;  %v8099_v32 = vcombine.high %v11814_v27, %v11814_v27 }
 0x233   : > { %6859 = vmatpush1.bf16.msra.mxu0 %v10017_v33  ;;  %7515 = vmatpush1.bf16.msra.mxu1 %v10020_v34  ;;  %v10112_v33 = vld [vmem:[%s11217_s10 + $0x1028] ss:$16 sps:$4 sm:$0xff]   ;;  %v10117_v34 = vld [vmem:[%s11217_s10 + $0x1044] ss:$16 sps:$4 sm:$0xff]  }
 0x234   : > { %6860 = vmatprep.subr.bf16.mxu0 %v10025_v35  ;;  %7516 = vmatprep.subr.bf16.mxu1 %v10028_v36  ;;  %v10120_v35 = vld [vmem:[%s11217_s10 + $0x104c] ss:$16 sps:$4 sm:$0xff]   ;;  %v10115_v36 = vld [vmem:[%s11217_s10 + $0x1040] ss:$16 sps:$4 sm:$0xff]  }
 0x237   : > { %6861 = vmatpush1.bf16.msra.mxu0 %v10023_v37  ;;  %7517 = vmatpush1.bf16.msra.mxu1 %v10026_v38  ;;  %v10118_v37 = vld [vmem:[%s11217_s10 + $0x1048] ss:$16 sps:$4 sm:$0xff]   ;;  %v10123_v38 = vld [vmem:[%s11217_s10 + $0x1064] ss:$16 sps:$4 sm:$0xff]  }
 0x238   : > { %6862 = vmatprep.subr.bf16.mxu0 %v10031_v39  ;;  %7518 = vmatprep.subr.bf16.mxu1 %v10034_v40  ;;  %v10126_v39 = vld [vmem:[%s11217_s10 + $0x106c] ss:$16 sps:$4 sm:$0xff]   ;;  %v10121_v40 = vld [vmem:[%s11217_s10 + $0x1060] ss:$16 sps:$4 sm:$0xff]  }
 0x23b   : > { %6863 = vmatpush1.bf16.msra.mxu0 %v10029_v41  ;;  %7519 = vmatpush1.bf16.msra.mxu1 %v10032_v42  ;;  %v10124_v41 = vld [vmem:[%s11217_s10 + $0x1068] ss:$16 sps:$4 sm:$0xff]   ;;  %v10129_v42 = vld [vmem:[%s11217_s10 + $0x1084] ss:$16 sps:$4 sm:$0xff]  }
 0x23c   : > { %6864 = vmatprep.subr.bf16.mxu0 %v10037_v43  ;;  %7520 = vmatprep.subr.bf16.mxu1 %v10040_v44  ;;  %v10132_v43 = vld [vmem:[%s11217_s10 + $0x108c] ss:$16 sps:$4 sm:$0xff]   ;;  %v10127_v44 = vld [vmem:[%s11217_s10 + $0x1080] ss:$16 sps:$4 sm:$0xff]  }
 0x23f   : > { %6865 = vmatpush1.bf16.msra.mxu0 %v10035_v45  ;;  %7521 = vmatpush1.bf16.msra.mxu1 %v10038_v46  ;;  %v10130_v45 = vld [vmem:[%s11217_s10 + $0x1088] ss:$16 sps:$4 sm:$0xff]   ;;  %v10135_v46 = vld [vmem:[%s11217_s10 + $0x10a4] ss:$16 sps:$4 sm:$0xff]  }
 0x240   : > { %6866 = vmatprep.subr.bf16.mxu0 %v10043_v47  ;;  %7522 = vmatprep.subr.bf16.mxu1 %v10046_v48  ;;  %v10138_v47 = vld [vmem:[%s11217_s10 + $0x10ac] ss:$16 sps:$4 sm:$0xff]   ;;  %v10133_v48 = vld [vmem:[%s11217_s10 + $0x10a0] ss:$16 sps:$4 sm:$0xff]  }
 0x243   : > { %6867 = vmatpush1.bf16.msra.mxu0 %v10041_v49  ;;  %7523 = vmatpush1.bf16.msra.mxu1 %v10044_v50  ;;  %v10136_v49 = vld [vmem:[%s11217_s10 + $0x10a8] ss:$16 sps:$4 sm:$0xff]   ;;  %v10141_v50 = vld [vmem:[%s11217_s10 + $0x10c4] ss:$16 sps:$4 sm:$0xff]  }
 0x244   : > { %6868 = vmatprep.subr.bf16.mxu0 %v10049_v51  ;;  %7524 = vmatprep.subr.bf16.mxu1 %v10052_v52  ;;  %v10144_v51 = vld [vmem:[%s11217_s10 + $0x10cc] ss:$16 sps:$4 sm:$0xff]   ;;  %v10139_v52 = vld [vmem:[%s11217_s10 + $0x10c0] ss:$16 sps:$4 sm:$0xff]  }
 0x247   : > { %6869 = vmatpush1.bf16.msra.mxu0 %v10047_v53  ;;  %7525 = vmatpush1.bf16.msra.mxu1 %v10050_v54  ;;  %v10142_v53 = vld [vmem:[%s11217_s10 + $0x10c8] ss:$16 sps:$4 sm:$0xff]   ;;  %v10147_v54 = vld [vmem:[%s11217_s10 + $0x10e4] ss:$16 sps:$4 sm:$0xff]  }
 0x248   : > { %6870 = vmatprep.subr.bf16.mxu0 %v10055_v55  ;;  %7526 = vmatprep.subr.bf16.mxu1 %v10058_v56  ;;  %v10150_v55 = vld [vmem:[%s11217_s10 + $0x10ec] ss:$16 sps:$4 sm:$0xff]   ;;  %v10145_v56 = vld [vmem:[%s11217_s10 + $0x10e0] ss:$16 sps:$4 sm:$0xff]  }
 0x24b   : > { %6871 = vmatpush1.bf16.msra.mxu0 %v10053_v57  ;;  %7527 = vmatpush1.bf16.msra.mxu1 %v10056_v58  ;;  %v10148_v57 = vld [vmem:[%s11217_s10 + $0x10e8] ss:$16 sps:$4 sm:$0xff]   ;;  %v10153_v58 = vld [vmem:[%s11217_s10 + $0x1104] ss:$16 sps:$4 sm:$0xff]  }
 0x24c   : > { %6872 = vmatprep.subr.bf16.mxu0 %v10061_v59  ;;  %7528 = vmatprep.subr.bf16.mxu1 %v10064_v60  ;;  %v10156_v59 = vld [vmem:[%s11217_s10 + $0x110c] ss:$16 sps:$4 sm:$0xff]   ;;  %v10151_v60 = vld [vmem:[%s11217_s10 + $0x1100] ss:$16 sps:$4 sm:$0xff]  }
 0x24f   : > { %6873 = vmatpush1.bf16.msra.mxu0 %v10059_v61  ;;  %7529 = vmatpush1.bf16.msra.mxu1 %v10062_v62  ;;  %v10154_v61 = vld [vmem:[%s11217_s10 + $0x1108] ss:$16 sps:$4 sm:$0xff]   ;;  %v10159_v62 = vld [vmem:[%s11217_s10 + $0x1124] ss:$16 sps:$4 sm:$0xff]  }
 0x250   : > { %6874 = vmatprep.subr.bf16.mxu0 %v10067_v63  ;;  %7530 = vmatprep.subr.bf16.mxu1 %v10070_v0  ;;  %v10162_v63 = vld [vmem:[%s11217_s10 + $0x112c] ss:$16 sps:$4 sm:$0xff]   ;;  %v10157_v0 = vld [vmem:[%s11217_s10 + $0x1120] ss:$16 sps:$4 sm:$0xff]  }
 0x253   : > { %6875 = vmatpush1.bf16.msra.mxu0 %v10065_v1  ;;  %7531 = vmatpush1.bf16.msra.mxu1 %v10068_v2  ;;  %v10160_v1 = vld [vmem:[%s11217_s10 + $0x1128] ss:$16 sps:$4 sm:$0xff]   ;;  %v10165_v2 = vld [vmem:[%s11217_s10 + $0x1144] ss:$16 sps:$4 sm:$0xff]  }
 0x254   : > { %6876 = vmatprep.subr.bf16.mxu0 %v10073_v3  ;;  %7532 = vmatprep.subr.bf16.mxu1 %v10076_v4  ;;  %v10168_v3 = vld [vmem:[%s11217_s10 + $0x114c] ss:$16 sps:$4 sm:$0xff]   ;;  %v10163_v4 = vld [vmem:[%s11217_s10 + $0x1140] ss:$16 sps:$4 sm:$0xff]  }
 0x257   : > { %6877 = vmatpush1.bf16.msra.mxu0 %v10071_v5  ;;  %7533 = vmatpush1.bf16.msra.mxu1 %v10074_v6  ;;  %v10166_v5 = vld [vmem:[%s11217_s10 + $0x1148] ss:$16 sps:$4 sm:$0xff]   ;;  %v10171_v6 = vld [vmem:[%s11217_s10 + $0x1164] ss:$16 sps:$4 sm:$0xff]  }
 0x258   : > { %6878 = vmatprep.subr.bf16.mxu0 %v10079_v7  ;;  %7534 = vmatprep.subr.bf16.mxu1 %v10082_v8  ;;  %v10174_v7 = vld [vmem:[%s11217_s10 + $0x116c] ss:$16 sps:$4 sm:$0xff]   ;;  %v10169_v8 = vld [vmem:[%s11217_s10 + $0x1160] ss:$16 sps:$4 sm:$0xff]  }
 0x25b   : > { %6879 = vmatpush1.bf16.msra.mxu0 %v10077_v9  ;;  %7535 = vmatpush1.bf16.msra.mxu1 %v10080_v10  ;;  %v10172_v9 = vld [vmem:[%s11217_s10 + $0x1168] ss:$16 sps:$4 sm:$0xff]   ;;  %v10177_v10 = vld [vmem:[%s11217_s10 + $0x1184] ss:$16 sps:$4 sm:$0xff]  }
 0x25c   : > { %6880 = vmatprep.subr.bf16.mxu0 %v10085_v12  ;;  %7536 = vmatprep.subr.bf16.mxu1 %v10088_v13  ;;  %v10180_v12 = vld [vmem:[%s11217_s10 + $0x118c] ss:$16 sps:$4 sm:$0xff]   ;;  %v10175_v13 = vld [vmem:[%s11217_s10 + $0x1180] ss:$16 sps:$4 sm:$0xff]  }
 0x25f   : > { %6881 = vmatpush1.bf16.msra.mxu0 %v10083_v15  ;;  %7537 = vmatpush1.bf16.msra.mxu1 %v10086_v16  ;;  %v10178_v15 = vld [vmem:[%s11217_s10 + $0x1188] ss:$16 sps:$4 sm:$0xff]   ;;  %v10183_v16 = vld [vmem:[%s11217_s10 + $0x11a4] ss:$16 sps:$4 sm:$0xff]  }
 0x260   : > { %6882 = vmatprep.subr.bf16.mxu0 %v10091_v11  ;;  %7538 = vmatprep.subr.bf16.mxu1 %v10094_v19  ;;  %v10186_v11 = vld [vmem:[%s11217_s10 + $0x11ac] ss:$16 sps:$4 sm:$0xff]   ;;  %v10181_v19 = vld [vmem:[%s11217_s10 + $0x11a0] ss:$16 sps:$4 sm:$0xff]  }
 0x263   : > { %6883 = vmatpush1.bf16.msra.mxu0 %v10089_v20  ;;  %7539 = vmatpush1.bf16.msra.mxu1 %v10092_v14  ;;  %v10184_v20 = vld [vmem:[%s11217_s10 + $0x11a8] ss:$16 sps:$4 sm:$0xff]   ;;  %v10189_v14 = vld [vmem:[%s11217_s10 + $0x11c4] ss:$16 sps:$4 sm:$0xff]  }
 0x264   : > { %6884 = vmatprep.subr.bf16.mxu0 %v10097_v22  ;;  %7540 = vmatprep.subr.bf16.mxu1 %v10100_v23  ;;  %v10192_v22 = vld [vmem:[%s11217_s10 + $0x11cc] ss:$16 sps:$4 sm:$0xff]   ;;  %v10187_v23 = vld [vmem:[%s11217_s10 + $0x11c0] ss:$16 sps:$4 sm:$0xff]  }
 0x267   : > { %6885 = vmatpush1.bf16.msra.mxu0 %v10095_v17  ;;  %7541 = vmatpush1.bf16.msra.mxu1 %v10098_v25  ;;  %v10190_v17 = vld [vmem:[%s11217_s10 + $0x11c8] ss:$16 sps:$4 sm:$0xff]   ;;  %v10195_v25 = vld [vmem:[%s11217_s10 + $0x11e4] ss:$16 sps:$4 sm:$0xff]  }
 0x268   : > { %6895 = vmatprep.subr.bf16.mxu0 %v10105_v26  ;;  %7551 = vmatprep.subr.bf16.mxu1 %v10108_v18  ;;  %v10198_v26 = vld [vmem:[%s11217_s10 + $0x11ec] ss:$16 sps:$4 sm:$0xff]   ;;  %v10193_v18 = vld [vmem:[%s11217_s10 + $0x11e0] ss:$16 sps:$4 sm:$0xff]  }
 0x26a   : > { %6887 = vmatmul.mubr.bf16.vlgmr.msra.gmra.mrb[0].mxu0 %v8096_v28  ;;  %7543 = vmatmul.mubr.bf16.vlgmr.msra.gmra.mrb[0].mxu1 %v8096_v28  ;;  %v10196_v28 = vld [vmem:[%s11217_s10 + $0x11e8] ss:$16 sps:$4 sm:$0xff]  }
 0x26b   : > { %6896 = vmatpush1.bf16.msra.mxu0 %v10103_v29  ;;  %7552 = vmatpush1.bf16.msra.mxu1 %v10106_v21  ;;  %v10203_v29 = vld [vmem:[%s11217_s10 + $0x1204] ss:$16 sps:$4 sm:$0xff]   ;;  %v10206_v21 = vld [vmem:[%s11217_s10 + $0x120c] ss:$16 sps:$4 sm:$0xff]  }
 0x26c   : > { %6897 = vmatprep.subr.bf16.mxu0 %v10111_v30  ;;  %7553 = vmatprep.subr.bf16.mxu1 %v10114_v31  ;;  %v11887_v30 = vld [vmem:[%s12415_s0 + $0x48] sm:$0xff]  ;;  %v8098_v31 = vcombine.low %v11814_v27, %v11814_v27 }
 0x26d   : > { %6927 = vmatprep.mubr.bf16.mxu0 %v8099_v32  ;;  %7583 = vmatprep.mubr.bf16.mxu1 %v8099_v32  ;;  %v10201_v32 = vld [vmem:[%s11217_s10 + $0x1200] ss:$16 sps:$4 sm:$0xff]  }
 0x26e   : > { %v10207_v27 = vld [vmem:[%s11217_s10 + $0x1220] ss:$16 sps:$4 sm:$0xff]  }
 0x26f   : > { %6898 = vmatpush1.bf16.msra.mxu0 %v10109_v24  ;;  %7554 = vmatpush1.bf16.msra.mxu1 %v10112_v33  ;;  %v10204_v24 = vld [vmem:[%s11217_s10 + $0x1208] ss:$16 sps:$4 sm:$0xff]   ;;  %v10209_v33 = vld [vmem:[%s11217_s10 + $0x1224] ss:$16 sps:$4 sm:$0xff]  }
 0x270   : > { %6899 = vmatprep.subr.bf16.mxu0 %v10117_v34  ;;  %7555 = vmatprep.subr.bf16.mxu1 %v10120_v35  ;;  %v10212_v34 = vld [vmem:[%s11217_s10 + $0x122c] ss:$16 sps:$4 sm:$0xff]   ;;  %v8101_v35 = vcombine.high %v11887_v30, %v11887_v30 }
 0x273   : > { %6900 = vmatpush1.bf16.msra.mxu0 %v10115_v36  ;;  %7556 = vmatpush1.bf16.msra.mxu1 %v10118_v37  ;;  %v10210_v36 = vld [vmem:[%s11217_s10 + $0x1228] ss:$16 sps:$4 sm:$0xff]   ;;  %v10215_v37 = vld [vmem:[%s11217_s10 + $0x1244] ss:$16 sps:$4 sm:$0xff]  }
 0x274   : > { %6901 = vmatprep.subr.bf16.mxu0 %v10123_v38  ;;  %7557 = vmatprep.subr.bf16.mxu1 %v10126_v39  ;;  %v10218_v38 = vld [vmem:[%s11217_s10 + $0x124c] ss:$16 sps:$4 sm:$0xff]   ;;  %v10213_v39 = vld [vmem:[%s11217_s10 + $0x1240] ss:$16 sps:$4 sm:$0xff]  }
 0x277   : > { %6902 = vmatpush1.bf16.msra.mxu0 %v10121_v40  ;;  %7558 = vmatpush1.bf16.msra.mxu1 %v10124_v41  ;;  %v10216_v40 = vld [vmem:[%s11217_s10 + $0x1248] ss:$16 sps:$4 sm:$0xff]   ;;  %v10221_v41 = vld [vmem:[%s11217_s10 + $0x1264] ss:$16 sps:$4 sm:$0xff]  }
 0x278   : > { %6903 = vmatprep.subr.bf16.mxu0 %v10129_v42  ;;  %7559 = vmatprep.subr.bf16.mxu1 %v10132_v43  ;;  %v10224_v42 = vld [vmem:[%s11217_s10 + $0x126c] ss:$16 sps:$4 sm:$0xff]   ;;  %v10219_v43 = vld [vmem:[%s11217_s10 + $0x1260] ss:$16 sps:$4 sm:$0xff]  }
 0x27b   : > { %6904 = vmatpush1.bf16.msra.mxu0 %v10127_v44  ;;  %7560 = vmatpush1.bf16.msra.mxu1 %v10130_v45  ;;  %v10222_v44 = vld [vmem:[%s11217_s10 + $0x1268] ss:$16 sps:$4 sm:$0xff]   ;;  %v10227_v45 = vld [vmem:[%s11217_s10 + $0x1284] ss:$16 sps:$4 sm:$0xff]  }
 0x27c   : > { %6905 = vmatprep.subr.bf16.mxu0 %v10135_v46  ;;  %7561 = vmatprep.subr.bf16.mxu1 %v10138_v47  ;;  %v10230_v46 = vld [vmem:[%s11217_s10 + $0x128c] ss:$16 sps:$4 sm:$0xff]   ;;  %v10225_v47 = vld [vmem:[%s11217_s10 + $0x1280] ss:$16 sps:$4 sm:$0xff]  }
 0x27f   : > { %6906 = vmatpush1.bf16.msra.mxu0 %v10133_v48  ;;  %7562 = vmatpush1.bf16.msra.mxu1 %v10136_v49  ;;  %v10228_v48 = vld [vmem:[%s11217_s10 + $0x1288] ss:$16 sps:$4 sm:$0xff]   ;;  %v10233_v49 = vld [vmem:[%s11217_s10 + $0x12a4] ss:$16 sps:$4 sm:$0xff]  }
 0x280   : > { %6907 = vmatprep.subr.bf16.mxu0 %v10141_v50  ;;  %7563 = vmatprep.subr.bf16.mxu1 %v10144_v51  ;;  %v10236_v50 = vld [vmem:[%s11217_s10 + $0x12ac] ss:$16 sps:$4 sm:$0xff]   ;;  %v10231_v51 = vld [vmem:[%s11217_s10 + $0x12a0] ss:$16 sps:$4 sm:$0xff]  }
 0x283   : > { %6908 = vmatpush1.bf16.msra.mxu0 %v10139_v52  ;;  %7564 = vmatpush1.bf16.msra.mxu1 %v10142_v53  ;;  %v10234_v52 = vld [vmem:[%s11217_s10 + $0x12a8] ss:$16 sps:$4 sm:$0xff]   ;;  %v10239_v53 = vld [vmem:[%s11217_s10 + $0x12c4] ss:$16 sps:$4 sm:$0xff]  }
 0x284   : > { %6909 = vmatprep.subr.bf16.mxu0 %v10147_v54  ;;  %7565 = vmatprep.subr.bf16.mxu1 %v10150_v55  ;;  %v10242_v54 = vld [vmem:[%s11217_s10 + $0x12cc] ss:$16 sps:$4 sm:$0xff]   ;;  %v10237_v55 = vld [vmem:[%s11217_s10 + $0x12c0] ss:$16 sps:$4 sm:$0xff]  }
 0x287   : > { %6910 = vmatpush1.bf16.msra.mxu0 %v10145_v56  ;;  %7566 = vmatpush1.bf16.msra.mxu1 %v10148_v57  ;;  %v10240_v56 = vld [vmem:[%s11217_s10 + $0x12c8] ss:$16 sps:$4 sm:$0xff]   ;;  %v10245_v57 = vld [vmem:[%s11217_s10 + $0x12e4] ss:$16 sps:$4 sm:$0xff]  }
 0x288   : > { %6911 = vmatprep.subr.bf16.mxu0 %v10153_v58  ;;  %7567 = vmatprep.subr.bf16.mxu1 %v10156_v59  ;;  %v10248_v58 = vld [vmem:[%s11217_s10 + $0x12ec] ss:$16 sps:$4 sm:$0xff]   ;;  %v10243_v59 = vld [vmem:[%s11217_s10 + $0x12e0] ss:$16 sps:$4 sm:$0xff]  }
 0x28b   : > { %6912 = vmatpush1.bf16.msra.mxu0 %v10151_v60  ;;  %7568 = vmatpush1.bf16.msra.mxu1 %v10154_v61  ;;  %v10246_v60 = vld [vmem:[%s11217_s10 + $0x12e8] ss:$16 sps:$4 sm:$0xff]   ;;  %v10251_v61 = vld [vmem:[%s11217_s10 + $0x1304] ss:$16 sps:$4 sm:$0xff]  }
 0x28c   : > { %6913 = vmatprep.subr.bf16.mxu0 %v10159_v62  ;;  %7569 = vmatprep.subr.bf16.mxu1 %v10162_v63  ;;  %v10254_v62 = vld [vmem:[%s11217_s10 + $0x130c] ss:$16 sps:$4 sm:$0xff]   ;;  %v10249_v63 = vld [vmem:[%s11217_s10 + $0x1300] ss:$16 sps:$4 sm:$0xff]  }
 0x28f   : > { %6914 = vmatpush1.bf16.msra.mxu0 %v10157_v0  ;;  %7570 = vmatpush1.bf16.msra.mxu1 %v10160_v1  ;;  %v10252_v0 = vld [vmem:[%s11217_s10 + $0x1308] ss:$16 sps:$4 sm:$0xff]   ;;  %v10257_v1 = vld [vmem:[%s11217_s10 + $0x1324] ss:$16 sps:$4 sm:$0xff]  }
 0x290   : > { %6915 = vmatprep.subr.bf16.mxu0 %v10165_v2  ;;  %7571 = vmatprep.subr.bf16.mxu1 %v10168_v3  ;;  %v10260_v2 = vld [vmem:[%s11217_s10 + $0x132c] ss:$16 sps:$4 sm:$0xff]   ;;  %v10255_v3 = vld [vmem:[%s11217_s10 + $0x1320] ss:$16 sps:$4 sm:$0xff]  }
 0x293   : > { %6916 = vmatpush1.bf16.msra.mxu0 %v10163_v4  ;;  %7572 = vmatpush1.bf16.msra.mxu1 %v10166_v5  ;;  %v10258_v4 = vld [vmem:[%s11217_s10 + $0x1328] ss:$16 sps:$4 sm:$0xff]   ;;  %v10263_v5 = vld [vmem:[%s11217_s10 + $0x1344] ss:$16 sps:$4 sm:$0xff]  }
 0x294   : > { %6917 = vmatprep.subr.bf16.mxu0 %v10171_v6  ;;  %7573 = vmatprep.subr.bf16.mxu1 %v10174_v7  ;;  %v10266_v6 = vld [vmem:[%s11217_s10 + $0x134c] ss:$16 sps:$4 sm:$0xff]   ;;  %v10261_v7 = vld [vmem:[%s11217_s10 + $0x1340] ss:$16 sps:$4 sm:$0xff]  }
 0x297   : > { %6918 = vmatpush1.bf16.msra.mxu0 %v10169_v8  ;;  %7574 = vmatpush1.bf16.msra.mxu1 %v10172_v9  ;;  %v10264_v8 = vld [vmem:[%s11217_s10 + $0x1348] ss:$16 sps:$4 sm:$0xff]   ;;  %v10269_v9 = vld [vmem:[%s11217_s10 + $0x1364] ss:$16 sps:$4 sm:$0xff]  }
 0x298   : > { %6919 = vmatprep.subr.bf16.mxu0 %v10177_v10  ;;  %7575 = vmatprep.subr.bf16.mxu1 %v10180_v12  ;;  %v10272_v10 = vld [vmem:[%s11217_s10 + $0x136c] ss:$16 sps:$4 sm:$0xff]   ;;  %v10267_v12 = vld [vmem:[%s11217_s10 + $0x1360] ss:$16 sps:$4 sm:$0xff]  }
 0x29b   : > { %6920 = vmatpush1.bf16.msra.mxu0 %v10175_v13  ;;  %7576 = vmatpush1.bf16.msra.mxu1 %v10178_v15  ;;  %v10270_v13 = vld [vmem:[%s11217_s10 + $0x1368] ss:$16 sps:$4 sm:$0xff]   ;;  %v10275_v15 = vld [vmem:[%s11217_s10 + $0x1384] ss:$16 sps:$4 sm:$0xff]  }
 0x29c   : > { %6921 = vmatprep.subr.bf16.mxu0 %v10183_v16  ;;  %7577 = vmatprep.subr.bf16.mxu1 %v10186_v11  ;;  %v10278_v16 = vld [vmem:[%s11217_s10 + $0x138c] ss:$16 sps:$4 sm:$0xff]   ;;  %v10273_v11 = vld [vmem:[%s11217_s10 + $0x1380] ss:$16 sps:$4 sm:$0xff]  }
 0x29f   : > { %6922 = vmatpush1.bf16.msra.mxu0 %v10181_v19  ;;  %7578 = vmatpush1.bf16.msra.mxu1 %v10184_v20  ;;  %v10276_v19 = vld [vmem:[%s11217_s10 + $0x1388] ss:$16 sps:$4 sm:$0xff]   ;;  %v10281_v20 = vld [vmem:[%s11217_s10 + $0x13a4] ss:$16 sps:$4 sm:$0xff]  }
 0x2a0   : > { %6923 = vmatprep.subr.bf16.mxu0 %v10189_v14  ;;  %7579 = vmatprep.subr.bf16.mxu1 %v10192_v22  ;;  %v10284_v14 = vld [vmem:[%s11217_s10 + $0x13ac] ss:$16 sps:$4 sm:$0xff]   ;;  %v10279_v22 = vld [vmem:[%s11217_s10 + $0x13a0] ss:$16 sps:$4 sm:$0xff]  }
 0x2a3   : > { %6924 = vmatpush1.bf16.msra.mxu0 %v10187_v23  ;;  %7580 = vmatpush1.bf16.msra.mxu1 %v10190_v17  ;;  %v10282_v23 = vld [vmem:[%s11217_s10 + $0x13a8] ss:$16 sps:$4 sm:$0xff]   ;;  %v10287_v17 = vld [vmem:[%s11217_s10 + $0x13c4] ss:$16 sps:$4 sm:$0xff]  }
 0x2a4   : > { %6925 = vmatprep.subr.bf16.mxu0 %v10195_v25  ;;  %7581 = vmatprep.subr.bf16.mxu1 %v10198_v26  ;;  %v10290_v25 = vld [vmem:[%s11217_s10 + $0x13cc] ss:$16 sps:$4 sm:$0xff]   ;;  %v10285_v26 = vld [vmem:[%s11217_s10 + $0x13c0] ss:$16 sps:$4 sm:$0xff]  }
 0x2a7   : > { %6926 = vmatpush1.bf16.msra.mxu0 %v10193_v18  ;;  %7582 = vmatpush1.bf16.msra.mxu1 %v10196_v28  ;;  %v10288_v18 = vld [vmem:[%s11217_s10 + $0x13c8] ss:$16 sps:$4 sm:$0xff]   ;;  %v10293_v28 = vld [vmem:[%s11217_s10 + $0x13e4] ss:$16 sps:$4 sm:$0xff]  }
 0x2a8   : > { %6936 = vmatprep.subr.bf16.mxu0 %v10203_v29  ;;  %7592 = vmatprep.subr.bf16.mxu1 %v10206_v21  ;;  %v10296_v29 = vld [vmem:[%s11217_s10 + $0x13ec] ss:$16 sps:$4 sm:$0xff]   ;;  %v10291_v21 = vld [vmem:[%s11217_s10 + $0x13e0] ss:$16 sps:$4 sm:$0xff]  }
 0x2aa   : > { %6928 = vmatmul.mubr.bf16.vlgmr.msra.gmra.mrb[0].mxu0 %v8098_v31  ;;  %7584 = vmatmul.mubr.bf16.vlgmr.msra.gmra.mrb[0].mxu1 %v8098_v31  ;;  %v10294_v31 = vld [vmem:[%s11217_s10 + $0x13e8] ss:$16 sps:$4 sm:$0xff]  }
 0x2ab   : > { %6937 = vmatpush1.bf16.msra.mxu0 %v10201_v32  ;;  %7593 = vmatpush1.bf16.msra.mxu1 %v10204_v24  ;;  %v10301_v32 = vld [vmem:[%s11217_s10 + $0x1404] ss:$16 sps:$4 sm:$0xff]   ;;  %v10304_v24 = vld [vmem:[%s11217_s10 + $0x140c] ss:$16 sps:$4 sm:$0xff]  }
 0x2ac   : > { %6938 = vmatprep.subr.bf16.mxu0 %v10209_v33  ;;  %7594 = vmatprep.subr.bf16.mxu1 %v10212_v34  ;;  %v8100_v33 = vcombine.low %v11887_v30, %v11887_v30  ;;  %v11962_v34 = vld [vmem:[%s12415_s0 + $0x50] sm:$0xff] }
 0x2ad   : > { %6968 = vmatprep.mubr.bf16.mxu0 %v8101_v35  ;;  %7624 = vmatprep.mubr.bf16.mxu1 %v8101_v35  ;;  %v10299_v35 = vld [vmem:[%s11217_s10 + $0x1400] ss:$16 sps:$4 sm:$0xff]   ;;  %v8103_v30 = vcombine.high %v11962_v34, %v11962_v34 }
 0x2af   : > { %6939 = vmatpush1.bf16.msra.mxu0 %v10207_v27  ;;  %7595 = vmatpush1.bf16.msra.mxu1 %v10210_v36  ;;  %v10302_v27 = vld [vmem:[%s11217_s10 + $0x1408] ss:$16 sps:$4 sm:$0xff]   ;;  %v10307_v36 = vld [vmem:[%s11217_s10 + $0x1424] ss:$16 sps:$4 sm:$0xff]  }
 0x2b0   : > { %6940 = vmatprep.subr.bf16.mxu0 %v10215_v37  ;;  %7596 = vmatprep.subr.bf16.mxu1 %v10218_v38  ;;  %v10310_v37 = vld [vmem:[%s11217_s10 + $0x142c] ss:$16 sps:$4 sm:$0xff]   ;;  %v10305_v38 = vld [vmem:[%s11217_s10 + $0x1420] ss:$16 sps:$4 sm:$0xff]  }
 0x2b3   : > { %6941 = vmatpush1.bf16.msra.mxu0 %v10213_v39  ;;  %7597 = vmatpush1.bf16.msra.mxu1 %v10216_v40  ;;  %v10308_v39 = vld [vmem:[%s11217_s10 + $0x1428] ss:$16 sps:$4 sm:$0xff]   ;;  %v10313_v40 = vld [vmem:[%s11217_s10 + $0x1444] ss:$16 sps:$4 sm:$0xff]  }
 0x2b4   : > { %6942 = vmatprep.subr.bf16.mxu0 %v10221_v41  ;;  %7598 = vmatprep.subr.bf16.mxu1 %v10224_v42  ;;  %v10316_v41 = vld [vmem:[%s11217_s10 + $0x144c] ss:$16 sps:$4 sm:$0xff]   ;;  %v10311_v42 = vld [vmem:[%s11217_s10 + $0x1440] ss:$16 sps:$4 sm:$0xff]  }
 0x2b7   : > { %6943 = vmatpush1.bf16.msra.mxu0 %v10219_v43  ;;  %7599 = vmatpush1.bf16.msra.mxu1 %v10222_v44  ;;  %v10314_v43 = vld [vmem:[%s11217_s10 + $0x1448] ss:$16 sps:$4 sm:$0xff]   ;;  %v10319_v44 = vld [vmem:[%s11217_s10 + $0x1464] ss:$16 sps:$4 sm:$0xff]  }
 0x2b8   : > { %6944 = vmatprep.subr.bf16.mxu0 %v10227_v45  ;;  %7600 = vmatprep.subr.bf16.mxu1 %v10230_v46  ;;  %v10322_v45 = vld [vmem:[%s11217_s10 + $0x146c] ss:$16 sps:$4 sm:$0xff]   ;;  %v10317_v46 = vld [vmem:[%s11217_s10 + $0x1460] ss:$16 sps:$4 sm:$0xff]  }
 0x2bb   : > { %6945 = vmatpush1.bf16.msra.mxu0 %v10225_v47  ;;  %7601 = vmatpush1.bf16.msra.mxu1 %v10228_v48  ;;  %v10320_v47 = vld [vmem:[%s11217_s10 + $0x1468] ss:$16 sps:$4 sm:$0xff]   ;;  %v10325_v48 = vld [vmem:[%s11217_s10 + $0x1484] ss:$16 sps:$4 sm:$0xff]  }
 0x2bc   : > { %6946 = vmatprep.subr.bf16.mxu0 %v10233_v49  ;;  %7602 = vmatprep.subr.bf16.mxu1 %v10236_v50  ;;  %v10328_v49 = vld [vmem:[%s11217_s10 + $0x148c] ss:$16 sps:$4 sm:$0xff]   ;;  %v10323_v50 = vld [vmem:[%s11217_s10 + $0x1480] ss:$16 sps:$4 sm:$0xff]  }
 0x2bf   : > { %6947 = vmatpush1.bf16.msra.mxu0 %v10231_v51  ;;  %7603 = vmatpush1.bf16.msra.mxu1 %v10234_v52  ;;  %v10326_v51 = vld [vmem:[%s11217_s10 + $0x1488] ss:$16 sps:$4 sm:$0xff]   ;;  %v10331_v52 = vld [vmem:[%s11217_s10 + $0x14a4] ss:$16 sps:$4 sm:$0xff]  }
 0x2c0   : > { %6948 = vmatprep.subr.bf16.mxu0 %v10239_v53  ;;  %7604 = vmatprep.subr.bf16.mxu1 %v10242_v54  ;;  %v10334_v53 = vld [vmem:[%s11217_s10 + $0x14ac] ss:$16 sps:$4 sm:$0xff]   ;;  %v10329_v54 = vld [vmem:[%s11217_s10 + $0x14a0] ss:$16 sps:$4 sm:$0xff]  }
 0x2c3   : > { %6949 = vmatpush1.bf16.msra.mxu0 %v10237_v55  ;;  %7605 = vmatpush1.bf16.msra.mxu1 %v10240_v56  ;;  %v10332_v55 = vld [vmem:[%s11217_s10 + $0x14a8] ss:$16 sps:$4 sm:$0xff]   ;;  %v10337_v56 = vld [vmem:[%s11217_s10 + $0x14c4] ss:$16 sps:$4 sm:$0xff]  }
 0x2c4   : > { %6950 = vmatprep.subr.bf16.mxu0 %v10245_v57  ;;  %7606 = vmatprep.subr.bf16.mxu1 %v10248_v58  ;;  %v10340_v57 = vld [vmem:[%s11217_s10 + $0x14cc] ss:$16 sps:$4 sm:$0xff]   ;;  %v10335_v58 = vld [vmem:[%s11217_s10 + $0x14c0] ss:$16 sps:$4 sm:$0xff]  }
 0x2c7   : > { %6951 = vmatpush1.bf16.msra.mxu0 %v10243_v59  ;;  %7607 = vmatpush1.bf16.msra.mxu1 %v10246_v60  ;;  %v10338_v59 = vld [vmem:[%s11217_s10 + $0x14c8] ss:$16 sps:$4 sm:$0xff]   ;;  %v10343_v60 = vld [vmem:[%s11217_s10 + $0x14e4] ss:$16 sps:$4 sm:$0xff]  }
 0x2c8   : > { %6952 = vmatprep.subr.bf16.mxu0 %v10251_v61  ;;  %7608 = vmatprep.subr.bf16.mxu1 %v10254_v62  ;;  %v10346_v61 = vld [vmem:[%s11217_s10 + $0x14ec] ss:$16 sps:$4 sm:$0xff]   ;;  %v10341_v62 = vld [vmem:[%s11217_s10 + $0x14e0] ss:$16 sps:$4 sm:$0xff]  }
 0x2cb   : > { %6953 = vmatpush1.bf16.msra.mxu0 %v10249_v63  ;;  %7609 = vmatpush1.bf16.msra.mxu1 %v10252_v0  ;;  %v10344_v63 = vld [vmem:[%s11217_s10 + $0x14e8] ss:$16 sps:$4 sm:$0xff]   ;;  %v10349_v0 = vld [vmem:[%s11217_s10 + $0x1504] ss:$16 sps:$4 sm:$0xff]  }
 0x2cc   : > { %6954 = vmatprep.subr.bf16.mxu0 %v10257_v1  ;;  %7610 = vmatprep.subr.bf16.mxu1 %v10260_v2  ;;  %v10352_v1 = vld [vmem:[%s11217_s10 + $0x150c] ss:$16 sps:$4 sm:$0xff]   ;;  %v10347_v2 = vld [vmem:[%s11217_s10 + $0x1500] ss:$16 sps:$4 sm:$0xff]  }
 0x2cf   : > { %6955 = vmatpush1.bf16.msra.mxu0 %v10255_v3  ;;  %7611 = vmatpush1.bf16.msra.mxu1 %v10258_v4  ;;  %v10350_v3 = vld [vmem:[%s11217_s10 + $0x1508] ss:$16 sps:$4 sm:$0xff]   ;;  %v10355_v4 = vld [vmem:[%s11217_s10 + $0x1524] ss:$16 sps:$4 sm:$0xff]  }
 0x2d0   : > { %6956 = vmatprep.subr.bf16.mxu0 %v10263_v5  ;;  %7612 = vmatprep.subr.bf16.mxu1 %v10266_v6  ;;  %v10358_v5 = vld [vmem:[%s11217_s10 + $0x152c] ss:$16 sps:$4 sm:$0xff]   ;;  %v10353_v6 = vld [vmem:[%s11217_s10 + $0x1520] ss:$16 sps:$4 sm:$0xff]  }
 0x2d3   : > { %6957 = vmatpush1.bf16.msra.mxu0 %v10261_v7  ;;  %7613 = vmatpush1.bf16.msra.mxu1 %v10264_v8  ;;  %v10356_v7 = vld [vmem:[%s11217_s10 + $0x1528] ss:$16 sps:$4 sm:$0xff]   ;;  %v10361_v8 = vld [vmem:[%s11217_s10 + $0x1544] ss:$16 sps:$4 sm:$0xff]  }
 0x2d4   : > { %6958 = vmatprep.subr.bf16.mxu0 %v10269_v9  ;;  %7614 = vmatprep.subr.bf16.mxu1 %v10272_v10  ;;  %v10364_v9 = vld [vmem:[%s11217_s10 + $0x154c] ss:$16 sps:$4 sm:$0xff]   ;;  %v10359_v10 = vld [vmem:[%s11217_s10 + $0x1540] ss:$16 sps:$4 sm:$0xff]  }
 0x2d7   : > { %6959 = vmatpush1.bf16.msra.mxu0 %v10267_v12  ;;  %7615 = vmatpush1.bf16.msra.mxu1 %v10270_v13  ;;  %v10362_v12 = vld [vmem:[%s11217_s10 + $0x1548] ss:$16 sps:$4 sm:$0xff]   ;;  %v10367_v13 = vld [vmem:[%s11217_s10 + $0x1564] ss:$16 sps:$4 sm:$0xff]  }
 0x2d8   : > { %6960 = vmatprep.subr.bf16.mxu0 %v10275_v15  ;;  %7616 = vmatprep.subr.bf16.mxu1 %v10278_v16  ;;  %v10370_v15 = vld [vmem:[%s11217_s10 + $0x156c] ss:$16 sps:$4 sm:$0xff]   ;;  %v10365_v16 = vld [vmem:[%s11217_s10 + $0x1560] ss:$16 sps:$4 sm:$0xff]  }
 0x2db   : > { %6961 = vmatpush1.bf16.msra.mxu0 %v10273_v11  ;;  %7617 = vmatpush1.bf16.msra.mxu1 %v10276_v19  ;;  %v10368_v11 = vld [vmem:[%s11217_s10 + $0x1568] ss:$16 sps:$4 sm:$0xff]   ;;  %v10373_v19 = vld [vmem:[%s11217_s10 + $0x1584] ss:$16 sps:$4 sm:$0xff]  }
 0x2dc   : > { %6962 = vmatprep.subr.bf16.mxu0 %v10281_v20  ;;  %7618 = vmatprep.subr.bf16.mxu1 %v10284_v14  ;;  %v10376_v20 = vld [vmem:[%s11217_s10 + $0x158c] ss:$16 sps:$4 sm:$0xff]   ;;  %v10371_v14 = vld [vmem:[%s11217_s10 + $0x1580] ss:$16 sps:$4 sm:$0xff]  }
 0x2df   : > { %6963 = vmatpush1.bf16.msra.mxu0 %v10279_v22  ;;  %7619 = vmatpush1.bf16.msra.mxu1 %v10282_v23  ;;  %v10374_v22 = vld [vmem:[%s11217_s10 + $0x1588] ss:$16 sps:$4 sm:$0xff]   ;;  %v10379_v23 = vld [vmem:[%s11217_s10 + $0x15a4] ss:$16 sps:$4 sm:$0xff]  }
 0x2e0   : > { %6964 = vmatprep.subr.bf16.mxu0 %v10287_v17  ;;  %7620 = vmatprep.subr.bf16.mxu1 %v10290_v25  ;;  %v10382_v17 = vld [vmem:[%s11217_s10 + $0x15ac] ss:$16 sps:$4 sm:$0xff]   ;;  %v10377_v25 = vld [vmem:[%s11217_s10 + $0x15a0] ss:$16 sps:$4 sm:$0xff]  }
 0x2e3   : > { %6965 = vmatpush1.bf16.msra.mxu0 %v10285_v26  ;;  %7621 = vmatpush1.bf16.msra.mxu1 %v10288_v18  ;;  %v10380_v26 = vld [vmem:[%s11217_s10 + $0x15a8] ss:$16 sps:$4 sm:$0xff]   ;;  %v10385_v18 = vld [vmem:[%s11217_s10 + $0x15c4] ss:$16 sps:$4 sm:$0xff]  }
 0x2e4   : > { %6966 = vmatprep.subr.bf16.mxu0 %v10293_v28  ;;  %7622 = vmatprep.subr.bf16.mxu1 %v10296_v29  ;;  %v10388_v28 = vld [vmem:[%s11217_s10 + $0x15cc] ss:$16 sps:$4 sm:$0xff]   ;;  %v10383_v29 = vld [vmem:[%s11217_s10 + $0x15c0] ss:$16 sps:$4 sm:$0xff]  }
 0x2e7   : > { %6967 = vmatpush1.bf16.msra.mxu0 %v10291_v21  ;;  %7623 = vmatpush1.bf16.msra.mxu1 %v10294_v31  ;;  %v10386_v21 = vld [vmem:[%s11217_s10 + $0x15c8] ss:$16 sps:$4 sm:$0xff]   ;;  %v10391_v31 = vld [vmem:[%s11217_s10 + $0x15e4] ss:$16 sps:$4 sm:$0xff]  }
 0x2e8   : > { %6977 = vmatprep.subr.bf16.mxu0 %v10301_v32  ;;  %7633 = vmatprep.subr.bf16.mxu1 %v10304_v24  ;;  %v10394_v32 = vld [vmem:[%s11217_s10 + $0x15ec] ss:$16 sps:$4 sm:$0xff]   ;;  %v10389_v24 = vld [vmem:[%s11217_s10 + $0x15e0] ss:$16 sps:$4 sm:$0xff]  }
 0x2ea   : > { %6969 = vmatmul.mubr.bf16.vlgmr.msra.gmra.mrb[0].mxu0 %v8100_v33  ;;  %7625 = vmatmul.mubr.bf16.vlgmr.msra.gmra.mrb[0].mxu1 %v8100_v33  ;;  %v10392_v33 = vld [vmem:[%s11217_s10 + $0x15e8] ss:$16 sps:$4 sm:$0xff]  }
 0x2eb   : > { %6978 = vmatpush1.bf16.msra.mxu0 %v10299_v35  ;;  %7634 = vmatpush1.bf16.msra.mxu1 %v10302_v27  ;;  %v10399_v35 = vld [vmem:[%s11217_s10 + $0x1604] ss:$16 sps:$4 sm:$0xff]   ;;  %v10402_v27 = vld [vmem:[%s11217_s10 + $0x160c] ss:$16 sps:$4 sm:$0xff]  }
 0x2ec   : > { %6979 = vmatprep.subr.bf16.mxu0 %v10307_v36  ;;  %7635 = vmatprep.subr.bf16.mxu1 %v10310_v37  ;;  %v8102_v36 = vcombine.low %v11962_v34, %v11962_v34  ;;  %v12035_v37 = vld [vmem:[%s12415_s0 + $0x58] sm:$0xff] }
 0x2ed   : > { %7009 = vmatprep.mubr.bf16.mxu0 %v8103_v30  ;;  %7665 = vmatprep.mubr.bf16.mxu1 %v8103_v30  ;;  %v10397_v30 = vld [vmem:[%s11217_s10 + $0x1600] ss:$16 sps:$4 sm:$0xff]   ;;  %v8105_v34 = vcombine.high %v12035_v37, %v12035_v37 }
 0x2ef   : > { %6980 = vmatpush1.bf16.msra.mxu0 %v10305_v38  ;;  %7636 = vmatpush1.bf16.msra.mxu1 %v10308_v39  ;;  %v10400_v38 = vld [vmem:[%s11217_s10 + $0x1608] ss:$16 sps:$4 sm:$0xff]   ;;  %v10405_v39 = vld [vmem:[%s11217_s10 + $0x1624] ss:$16 sps:$4 sm:$0xff]  }
 0x2f0   : > { %6981 = vmatprep.subr.bf16.mxu0 %v10313_v40  ;;  %7637 = vmatprep.subr.bf16.mxu1 %v10316_v41  ;;  %v10408_v40 = vld [vmem:[%s11217_s10 + $0x162c] ss:$16 sps:$4 sm:$0xff]   ;;  %v10403_v41 = vld [vmem:[%s11217_s10 + $0x1620] ss:$16 sps:$4 sm:$0xff]  }
 0x2f3   : > { %6982 = vmatpush1.bf16.msra.mxu0 %v10311_v42  ;;  %7638 = vmatpush1.bf16.msra.mxu1 %v10314_v43  ;;  %v10406_v42 = vld [vmem:[%s11217_s10 + $0x1628] ss:$16 sps:$4 sm:$0xff]   ;;  %v10411_v43 = vld [vmem:[%s11217_s10 + $0x1644] ss:$16 sps:$4 sm:$0xff]  }
 0x2f4   : > { %6983 = vmatprep.subr.bf16.mxu0 %v10319_v44  ;;  %7639 = vmatprep.subr.bf16.mxu1 %v10322_v45  ;;  %v10414_v44 = vld [vmem:[%s11217_s10 + $0x164c] ss:$16 sps:$4 sm:$0xff]   ;;  %v10409_v45 = vld [vmem:[%s11217_s10 + $0x1640] ss:$16 sps:$4 sm:$0xff]  }
 0x2f7   : > { %6984 = vmatpush1.bf16.msra.mxu0 %v10317_v46  ;;  %7640 = vmatpush1.bf16.msra.mxu1 %v10320_v47  ;;  %v10412_v46 = vld [vmem:[%s11217_s10 + $0x1648] ss:$16 sps:$4 sm:$0xff]   ;;  %v10417_v47 = vld [vmem:[%s11217_s10 + $0x1664] ss:$16 sps:$4 sm:$0xff]  }
 0x2f8   : > { %6985 = vmatprep.subr.bf16.mxu0 %v10325_v48  ;;  %7641 = vmatprep.subr.bf16.mxu1 %v10328_v49  ;;  %v10420_v48 = vld [vmem:[%s11217_s10 + $0x166c] ss:$16 sps:$4 sm:$0xff]   ;;  %v10415_v49 = vld [vmem:[%s11217_s10 + $0x1660] ss:$16 sps:$4 sm:$0xff]  }
 0x2fb   : > { %6986 = vmatpush1.bf16.msra.mxu0 %v10323_v50  ;;  %7642 = vmatpush1.bf16.msra.mxu1 %v10326_v51  ;;  %v10418_v50 = vld [vmem:[%s11217_s10 + $0x1668] ss:$16 sps:$4 sm:$0xff]   ;;  %v10423_v51 = vld [vmem:[%s11217_s10 + $0x1684] ss:$16 sps:$4 sm:$0xff]  }
 0x2fc   : > { %6987 = vmatprep.subr.bf16.mxu0 %v10331_v52  ;;  %7643 = vmatprep.subr.bf16.mxu1 %v10334_v53  ;;  %v10426_v52 = vld [vmem:[%s11217_s10 + $0x168c] ss:$16 sps:$4 sm:$0xff]   ;;  %v10421_v53 = vld [vmem:[%s11217_s10 + $0x1680] ss:$16 sps:$4 sm:$0xff]  }
 0x2ff   : > { %6988 = vmatpush1.bf16.msra.mxu0 %v10329_v54  ;;  %7644 = vmatpush1.bf16.msra.mxu1 %v10332_v55  ;;  %v10424_v54 = vld [vmem:[%s11217_s10 + $0x1688] ss:$16 sps:$4 sm:$0xff]   ;;  %v10429_v55 = vld [vmem:[%s11217_s10 + $0x16a4] ss:$16 sps:$4 sm:$0xff]  }
 0x300   : > { %6989 = vmatprep.subr.bf16.mxu0 %v10337_v56  ;;  %7645 = vmatprep.subr.bf16.mxu1 %v10340_v57  ;;  %v10432_v56 = vld [vmem:[%s11217_s10 + $0x16ac] ss:$16 sps:$4 sm:$0xff]   ;;  %v10427_v57 = vld [vmem:[%s11217_s10 + $0x16a0] ss:$16 sps:$4 sm:$0xff]  }
 0x303   : > { %6990 = vmatpush1.bf16.msra.mxu0 %v10335_v58  ;;  %7646 = vmatpush1.bf16.msra.mxu1 %v10338_v59  ;;  %v10430_v58 = vld [vmem:[%s11217_s10 + $0x16a8] ss:$16 sps:$4 sm:$0xff]   ;;  %v10435_v59 = vld [vmem:[%s11217_s10 + $0x16c4] ss:$16 sps:$4 sm:$0xff]  }
 0x304   : > { %6991 = vmatprep.subr.bf16.mxu0 %v10343_v60  ;;  %7647 = vmatprep.subr.bf16.mxu1 %v10346_v61  ;;  %v10438_v60 = vld [vmem:[%s11217_s10 + $0x16cc] ss:$16 sps:$4 sm:$0xff]   ;;  %v10433_v61 = vld [vmem:[%s11217_s10 + $0x16c0] ss:$16 sps:$4 sm:$0xff]  }
 0x307   : > { %6992 = vmatpush1.bf16.msra.mxu0 %v10341_v62  ;;  %7648 = vmatpush1.bf16.msra.mxu1 %v10344_v63  ;;  %v10436_v62 = vld [vmem:[%s11217_s10 + $0x16c8] ss:$16 sps:$4 sm:$0xff]   ;;  %v10441_v63 = vld [vmem:[%s11217_s10 + $0x16e4] ss:$16 sps:$4 sm:$0xff]  }
 0x308   : > { %6993 = vmatprep.subr.bf16.mxu0 %v10349_v0  ;;  %7649 = vmatprep.subr.bf16.mxu1 %v10352_v1  ;;  %v10444_v0 = vld [vmem:[%s11217_s10 + $0x16ec] ss:$16 sps:$4 sm:$0xff]   ;;  %v10439_v1 = vld [vmem:[%s11217_s10 + $0x16e0] ss:$16 sps:$4 sm:$0xff]  }
 0x30b   : > { %6994 = vmatpush1.bf16.msra.mxu0 %v10347_v2  ;;  %7650 = vmatpush1.bf16.msra.mxu1 %v10350_v3  ;;  %v10442_v2 = vld [vmem:[%s11217_s10 + $0x16e8] ss:$16 sps:$4 sm:$0xff]   ;;  %v10447_v3 = vld [vmem:[%s11217_s10 + $0x1704] ss:$16 sps:$4 sm:$0xff]  }
 0x30c   : > { %6995 = vmatprep.subr.bf16.mxu0 %v10355_v4  ;;  %7651 = vmatprep.subr.bf16.mxu1 %v10358_v5  ;;  %v10450_v4 = vld [vmem:[%s11217_s10 + $0x170c] ss:$16 sps:$4 sm:$0xff]   ;;  %v10445_v5 = vld [vmem:[%s11217_s10 + $0x1700] ss:$16 sps:$4 sm:$0xff]  }
 0x30f   : > { %6996 = vmatpush1.bf16.msra.mxu0 %v10353_v6  ;;  %7652 = vmatpush1.bf16.msra.mxu1 %v10356_v7  ;;  %v10448_v6 = vld [vmem:[%s11217_s10 + $0x1708] ss:$16 sps:$4 sm:$0xff]   ;;  %v10453_v7 = vld [vmem:[%s11217_s10 + $0x1724] ss:$16 sps:$4 sm:$0xff]  }
 0x310   : > { %6997 = vmatprep.subr.bf16.mxu0 %v10361_v8  ;;  %7653 = vmatprep.subr.bf16.mxu1 %v10364_v9  ;;  %v10456_v8 = vld [vmem:[%s11217_s10 + $0x172c] ss:$16 sps:$4 sm:$0xff]   ;;  %v10451_v9 = vld [vmem:[%s11217_s10 + $0x1720] ss:$16 sps:$4 sm:$0xff]  }
 0x313   : > { %6998 = vmatpush1.bf16.msra.mxu0 %v10359_v10  ;;  %7654 = vmatpush1.bf16.msra.mxu1 %v10362_v12  ;;  %v10454_v10 = vld [vmem:[%s11217_s10 + $0x1728] ss:$16 sps:$4 sm:$0xff]   ;;  %v10459_v12 = vld [vmem:[%s11217_s10 + $0x1744] ss:$16 sps:$4 sm:$0xff]  }
 0x314   : > { %6999 = vmatprep.subr.bf16.mxu0 %v10367_v13  ;;  %7655 = vmatprep.subr.bf16.mxu1 %v10370_v15  ;;  %v10462_v13 = vld [vmem:[%s11217_s10 + $0x174c] ss:$16 sps:$4 sm:$0xff]   ;;  %v10457_v15 = vld [vmem:[%s11217_s10 + $0x1740] ss:$16 sps:$4 sm:$0xff]  }
 0x317   : > { %7000 = vmatpush1.bf16.msra.mxu0 %v10365_v16  ;;  %7656 = vmatpush1.bf16.msra.mxu1 %v10368_v11  ;;  %v10460_v16 = vld [vmem:[%s11217_s10 + $0x1748] ss:$16 sps:$4 sm:$0xff]   ;;  %v10465_v11 = vld [vmem:[%s11217_s10 + $0x1764] ss:$16 sps:$4 sm:$0xff]  }
 0x318   : > { %7001 = vmatprep.subr.bf16.mxu0 %v10373_v19  ;;  %7657 = vmatprep.subr.bf16.mxu1 %v10376_v20  ;;  %v10468_v19 = vld [vmem:[%s11217_s10 + $0x176c] ss:$16 sps:$4 sm:$0xff]   ;;  %v10463_v20 = vld [vmem:[%s11217_s10 + $0x1760] ss:$16 sps:$4 sm:$0xff]  }
 0x31b   : > { %7002 = vmatpush1.bf16.msra.mxu0 %v10371_v14  ;;  %7658 = vmatpush1.bf16.msra.mxu1 %v10374_v22  ;;  %v10466_v14 = vld [vmem:[%s11217_s10 + $0x1768] ss:$16 sps:$4 sm:$0xff]   ;;  %v10471_v22 = vld [vmem:[%s11217_s10 + $0x1784] ss:$16 sps:$4 sm:$0xff]  }
 0x31c   : > { %7003 = vmatprep.subr.bf16.mxu0 %v10379_v23  ;;  %7659 = vmatprep.subr.bf16.mxu1 %v10382_v17  ;;  %v10474_v23 = vld [vmem:[%s11217_s10 + $0x178c] ss:$16 sps:$4 sm:$0xff]   ;;  %v10469_v17 = vld [vmem:[%s11217_s10 + $0x1780] ss:$16 sps:$4 sm:$0xff]  }
 0x31f   : > { %7004 = vmatpush1.bf16.msra.mxu0 %v10377_v25  ;;  %7660 = vmatpush1.bf16.msra.mxu1 %v10380_v26  ;;  %v10472_v25 = vld [vmem:[%s11217_s10 + $0x1788] ss:$16 sps:$4 sm:$0xff]   ;;  %v10477_v26 = vld [vmem:[%s11217_s10 + $0x17a4] ss:$16 sps:$4 sm:$0xff]  }
 0x320   : > { %7005 = vmatprep.subr.bf16.mxu0 %v10385_v18  ;;  %7661 = vmatprep.subr.bf16.mxu1 %v10388_v28  ;;  %v10480_v18 = vld [vmem:[%s11217_s10 + $0x17ac] ss:$16 sps:$4 sm:$0xff]   ;;  %v10475_v28 = vld [vmem:[%s11217_s10 + $0x17a0] ss:$16 sps:$4 sm:$0xff]  }
 0x323   : > { %7006 = vmatpush1.bf16.msra.mxu0 %v10383_v29  ;;  %7662 = vmatpush1.bf16.msra.mxu1 %v10386_v21  ;;  %v10478_v29 = vld [vmem:[%s11217_s10 + $0x17a8] ss:$16 sps:$4 sm:$0xff]   ;;  %v10483_v21 = vld [vmem:[%s11217_s10 + $0x17c4] ss:$16 sps:$4 sm:$0xff]  }
 0x324   : > { %7007 = vmatprep.subr.bf16.mxu0 %v10391_v31  ;;  %7663 = vmatprep.subr.bf16.mxu1 %v10394_v32  ;;  %v10486_v31 = vld [vmem:[%s11217_s10 + $0x17cc] ss:$16 sps:$4 sm:$0xff]   ;;  %v10481_v32 = vld [vmem:[%s11217_s10 + $0x17c0] ss:$16 sps:$4 sm:$0xff]  }
 0x327   : > { %7008 = vmatpush1.bf16.msra.mxu0 %v10389_v24  ;;  %7664 = vmatpush1.bf16.msra.mxu1 %v10392_v33  ;;  %v10484_v24 = vld [vmem:[%s11217_s10 + $0x17c8] ss:$16 sps:$4 sm:$0xff]   ;;  %v10489_v33 = vld [vmem:[%s11217_s10 + $0x17e4] ss:$16 sps:$4 sm:$0xff]  }
 0x328   : > { %7018 = vmatprep.subr.bf16.mxu0 %v10399_v35  ;;  %7674 = vmatprep.subr.bf16.mxu1 %v10402_v27  ;;  %v10492_v35 = vld [vmem:[%s11217_s10 + $0x17ec] ss:$16 sps:$4 sm:$0xff]   ;;  %v10487_v27 = vld [vmem:[%s11217_s10 + $0x17e0] ss:$16 sps:$4 sm:$0xff]  }
 0x32a   : > { %7010 = vmatmul.mubr.bf16.vlgmr.msra.gmra.mrb[0].mxu0 %v8102_v36  ;;  %7666 = vmatmul.mubr.bf16.vlgmr.msra.gmra.mrb[0].mxu1 %v8102_v36  ;;  %v10490_v36 = vld [vmem:[%s11217_s10 + $0x17e8] ss:$16 sps:$4 sm:$0xff]  }
 0x32b   : > { %7019 = vmatpush1.bf16.msra.mxu0 %v10397_v30  ;;  %7675 = vmatpush1.bf16.msra.mxu1 %v10400_v38  ;;  %v10497_v30 = vld [vmem:[%s11217_s10 + $0x1804] ss:$16 sps:$4 sm:$0xff]   ;;  %v10500_v38 = vld [vmem:[%s11217_s10 + $0x180c] ss:$16 sps:$4 sm:$0xff]  }
 0x32c   : > { %7020 = vmatprep.subr.bf16.mxu0 %v10405_v39  ;;  %7676 = vmatprep.subr.bf16.mxu1 %v10408_v40  ;;  %v8104_v39 = vcombine.low %v12035_v37, %v12035_v37  ;;  %v12108_v40 = vld [vmem:[%s12415_s0 + $0x60] sm:$0xff] }
 0x32d   : > { %7050 = vmatprep.mubr.bf16.mxu0 %v8105_v34  ;;  %7706 = vmatprep.mubr.bf16.mxu1 %v8105_v34  ;;  %v10495_v34 = vld [vmem:[%s11217_s10 + $0x1800] ss:$16 sps:$4 sm:$0xff]   ;;  %v8107_v37 = vcombine.high %v12108_v40, %v12108_v40 }
 0x32f   : > { %7021 = vmatpush1.bf16.msra.mxu0 %v10403_v41  ;;  %7677 = vmatpush1.bf16.msra.mxu1 %v10406_v42  ;;  %v10498_v41 = vld [vmem:[%s11217_s10 + $0x1808] ss:$16 sps:$4 sm:$0xff]   ;;  %v10503_v42 = vld [vmem:[%s11217_s10 + $0x1824] ss:$16 sps:$4 sm:$0xff]  }
 0x330   : > { %7022 = vmatprep.subr.bf16.mxu0 %v10411_v43  ;;  %7678 = vmatprep.subr.bf16.mxu1 %v10414_v44  ;;  %v10506_v43 = vld [vmem:[%s11217_s10 + $0x182c] ss:$16 sps:$4 sm:$0xff]   ;;  %v10501_v44 = vld [vmem:[%s11217_s10 + $0x1820] ss:$16 sps:$4 sm:$0xff]  }
 0x333   : > { %7023 = vmatpush1.bf16.msra.mxu0 %v10409_v45  ;;  %7679 = vmatpush1.bf16.msra.mxu1 %v10412_v46  ;;  %v10504_v45 = vld [vmem:[%s11217_s10 + $0x1828] ss:$16 sps:$4 sm:$0xff]   ;;  %v10509_v46 = vld [vmem:[%s11217_s10 + $0x1844] ss:$16 sps:$4 sm:$0xff]  }
 0x334   : > { %7024 = vmatprep.subr.bf16.mxu0 %v10417_v47  ;;  %7680 = vmatprep.subr.bf16.mxu1 %v10420_v48  ;;  %v10512_v47 = vld [vmem:[%s11217_s10 + $0x184c] ss:$16 sps:$4 sm:$0xff]   ;;  %v10507_v48 = vld [vmem:[%s11217_s10 + $0x1840] ss:$16 sps:$4 sm:$0xff]  }
 0x337   : > { %7025 = vmatpush1.bf16.msra.mxu0 %v10415_v49  ;;  %7681 = vmatpush1.bf16.msra.mxu1 %v10418_v50  ;;  %v10510_v49 = vld [vmem:[%s11217_s10 + $0x1848] ss:$16 sps:$4 sm:$0xff]   ;;  %v10515_v50 = vld [vmem:[%s11217_s10 + $0x1864] ss:$16 sps:$4 sm:$0xff]  }
 0x338   : > { %7026 = vmatprep.subr.bf16.mxu0 %v10423_v51  ;;  %7682 = vmatprep.subr.bf16.mxu1 %v10426_v52  ;;  %v10518_v51 = vld [vmem:[%s11217_s10 + $0x186c] ss:$16 sps:$4 sm:$0xff]   ;;  %v10513_v52 = vld [vmem:[%s11217_s10 + $0x1860] ss:$16 sps:$4 sm:$0xff]  }
 0x33b   : > { %7027 = vmatpush1.bf16.msra.mxu0 %v10421_v53  ;;  %7683 = vmatpush1.bf16.msra.mxu1 %v10424_v54  ;;  %v10516_v53 = vld [vmem:[%s11217_s10 + $0x1868] ss:$16 sps:$4 sm:$0xff]   ;;  %v10521_v54 = vld [vmem:[%s11217_s10 + $0x1884] ss:$16 sps:$4 sm:$0xff]  }
 0x33c   : > { %7028 = vmatprep.subr.bf16.mxu0 %v10429_v55  ;;  %7684 = vmatprep.subr.bf16.mxu1 %v10432_v56  ;;  %v10524_v55 = vld [vmem:[%s11217_s10 + $0x188c] ss:$16 sps:$4 sm:$0xff]   ;;  %v10519_v56 = vld [vmem:[%s11217_s10 + $0x1880] ss:$16 sps:$4 sm:$0xff]  }
 0x33f   : > { %7029 = vmatpush1.bf16.msra.mxu0 %v10427_v57  ;;  %7685 = vmatpush1.bf16.msra.mxu1 %v10430_v58  ;;  %v10522_v57 = vld [vmem:[%s11217_s10 + $0x1888] ss:$16 sps:$4 sm:$0xff]   ;;  %v10527_v58 = vld [vmem:[%s11217_s10 + $0x18a4] ss:$16 sps:$4 sm:$0xff]  }
 0x340   : > { %7030 = vmatprep.subr.bf16.mxu0 %v10435_v59  ;;  %7686 = vmatprep.subr.bf16.mxu1 %v10438_v60  ;;  %v10530_v59 = vld [vmem:[%s11217_s10 + $0x18ac] ss:$16 sps:$4 sm:$0xff]   ;;  %v10525_v60 = vld [vmem:[%s11217_s10 + $0x18a0] ss:$16 sps:$4 sm:$0xff]  }
 0x343   : > { %7031 = vmatpush1.bf16.msra.mxu0 %v10433_v61  ;;  %7687 = vmatpush1.bf16.msra.mxu1 %v10436_v62  ;;  %v10528_v61 = vld [vmem:[%s11217_s10 + $0x18a8] ss:$16 sps:$4 sm:$0xff]   ;;  %v10533_v62 = vld [vmem:[%s11217_s10 + $0x18c4] ss:$16 sps:$4 sm:$0xff]  }
 0x344   : > { %7032 = vmatprep.subr.bf16.mxu0 %v10441_v63  ;;  %7688 = vmatprep.subr.bf16.mxu1 %v10444_v0  ;;  %v10536_v63 = vld [vmem:[%s11217_s10 + $0x18cc] ss:$16 sps:$4 sm:$0xff]   ;;  %v10531_v0 = vld [vmem:[%s11217_s10 + $0x18c0] ss:$16 sps:$4 sm:$0xff]  }
 0x347   : > { %7033 = vmatpush1.bf16.msra.mxu0 %v10439_v1  ;;  %7689 = vmatpush1.bf16.msra.mxu1 %v10442_v2  ;;  %v10534_v1 = vld [vmem:[%s11217_s10 + $0x18c8] ss:$16 sps:$4 sm:$0xff]   ;;  %v10539_v2 = vld [vmem:[%s11217_s10 + $0x18e4] ss:$16 sps:$4 sm:$0xff]  }
 0x348   : > { %7034 = vmatprep.subr.bf16.mxu0 %v10447_v3  ;;  %7690 = vmatprep.subr.bf16.mxu1 %v10450_v4  ;;  %v10542_v3 = vld [vmem:[%s11217_s10 + $0x18ec] ss:$16 sps:$4 sm:$0xff]   ;;  %v10537_v4 = vld [vmem:[%s11217_s10 + $0x18e0] ss:$16 sps:$4 sm:$0xff]  }
 0x34b   : > { %7035 = vmatpush1.bf16.msra.mxu0 %v10445_v5  ;;  %7691 = vmatpush1.bf16.msra.mxu1 %v10448_v6  ;;  %v10540_v5 = vld [vmem:[%s11217_s10 + $0x18e8] ss:$16 sps:$4 sm:$0xff]   ;;  %v10545_v6 = vld [vmem:[%s11217_s10 + $0x1904] ss:$16 sps:$4 sm:$0xff]  }
 0x34c   : > { %7036 = vmatprep.subr.bf16.mxu0 %v10453_v7  ;;  %7692 = vmatprep.subr.bf16.mxu1 %v10456_v8  ;;  %v10548_v7 = vld [vmem:[%s11217_s10 + $0x190c] ss:$16 sps:$4 sm:$0xff]   ;;  %v10543_v8 = vld [vmem:[%s11217_s10 + $0x1900] ss:$16 sps:$4 sm:$0xff]  }
 0x34f   : > { %7037 = vmatpush1.bf16.msra.mxu0 %v10451_v9  ;;  %7693 = vmatpush1.bf16.msra.mxu1 %v10454_v10  ;;  %v10546_v9 = vld [vmem:[%s11217_s10 + $0x1908] ss:$16 sps:$4 sm:$0xff]   ;;  %v10551_v10 = vld [vmem:[%s11217_s10 + $0x1924] ss:$16 sps:$4 sm:$0xff]  }
 0x350   : > { %7038 = vmatprep.subr.bf16.mxu0 %v10459_v12  ;;  %7694 = vmatprep.subr.bf16.mxu1 %v10462_v13  ;;  %v10554_v12 = vld [vmem:[%s11217_s10 + $0x192c] ss:$16 sps:$4 sm:$0xff]   ;;  %v10549_v13 = vld [vmem:[%s11217_s10 + $0x1920] ss:$16 sps:$4 sm:$0xff]  }
 0x353   : > { %7039 = vmatpush1.bf16.msra.mxu0 %v10457_v15  ;;  %7695 = vmatpush1.bf16.msra.mxu1 %v10460_v16  ;;  %v10552_v15 = vld [vmem:[%s11217_s10 + $0x1928] ss:$16 sps:$4 sm:$0xff]   ;;  %v10557_v16 = vld [vmem:[%s11217_s10 + $0x1944] ss:$16 sps:$4 sm:$0xff]  }
 0x354   : > { %7040 = vmatprep.subr.bf16.mxu0 %v10465_v11  ;;  %7696 = vmatprep.subr.bf16.mxu1 %v10468_v19  ;;  %v10560_v11 = vld [vmem:[%s11217_s10 + $0x194c] ss:$16 sps:$4 sm:$0xff]   ;;  %v10555_v19 = vld [vmem:[%s11217_s10 + $0x1940] ss:$16 sps:$4 sm:$0xff]  }
 0x357   : > { %7041 = vmatpush1.bf16.msra.mxu0 %v10463_v20  ;;  %7697 = vmatpush1.bf16.msra.mxu1 %v10466_v14  ;;  %v10558_v20 = vld [vmem:[%s11217_s10 + $0x1948] ss:$16 sps:$4 sm:$0xff]   ;;  %v10563_v14 = vld [vmem:[%s11217_s10 + $0x1964] ss:$16 sps:$4 sm:$0xff]  }
 0x358   : > { %7042 = vmatprep.subr.bf16.mxu0 %v10471_v22  ;;  %7698 = vmatprep.subr.bf16.mxu1 %v10474_v23  ;;  %v10566_v22 = vld [vmem:[%s11217_s10 + $0x196c] ss:$16 sps:$4 sm:$0xff]   ;;  %v10561_v23 = vld [vmem:[%s11217_s10 + $0x1960] ss:$16 sps:$4 sm:$0xff]  }
 0x35b   : > { %7043 = vmatpush1.bf16.msra.mxu0 %v10469_v17  ;;  %7699 = vmatpush1.bf16.msra.mxu1 %v10472_v25  ;;  %v10564_v17 = vld [vmem:[%s11217_s10 + $0x1968] ss:$16 sps:$4 sm:$0xff]   ;;  %v10569_v25 = vld [vmem:[%s11217_s10 + $0x1984] ss:$16 sps:$4 sm:$0xff]  }
 0x35c   : > { %7044 = vmatprep.subr.bf16.mxu0 %v10477_v26  ;;  %7700 = vmatprep.subr.bf16.mxu1 %v10480_v18  ;;  %v10572_v26 = vld [vmem:[%s11217_s10 + $0x198c] ss:$16 sps:$4 sm:$0xff]   ;;  %v10567_v18 = vld [vmem:[%s11217_s10 + $0x1980] ss:$16 sps:$4 sm:$0xff]  }
 0x35f   : > { %7045 = vmatpush1.bf16.msra.mxu0 %v10475_v28  ;;  %7701 = vmatpush1.bf16.msra.mxu1 %v10478_v29  ;;  %v10570_v28 = vld [vmem:[%s11217_s10 + $0x1988] ss:$16 sps:$4 sm:$0xff]   ;;  %v10575_v29 = vld [vmem:[%s11217_s10 + $0x19a4] ss:$16 sps:$4 sm:$0xff]  }
 0x360   : > { %7046 = vmatprep.subr.bf16.mxu0 %v10483_v21  ;;  %7702 = vmatprep.subr.bf16.mxu1 %v10486_v31  ;;  %v10578_v21 = vld [vmem:[%s11217_s10 + $0x19ac] ss:$16 sps:$4 sm:$0xff]   ;;  %v10573_v31 = vld [vmem:[%s11217_s10 + $0x19a0] ss:$16 sps:$4 sm:$0xff]  }
 0x363   : > { %7047 = vmatpush1.bf16.msra.mxu0 %v10481_v32  ;;  %7703 = vmatpush1.bf16.msra.mxu1 %v10484_v24  ;;  %v10576_v32 = vld [vmem:[%s11217_s10 + $0x19a8] ss:$16 sps:$4 sm:$0xff]   ;;  %v10581_v24 = vld [vmem:[%s11217_s10 + $0x19c4] ss:$16 sps:$4 sm:$0xff]  }
 0x364   : > { %7048 = vmatprep.subr.bf16.mxu0 %v10489_v33  ;;  %7704 = vmatprep.subr.bf16.mxu1 %v10492_v35  ;;  %v10584_v33 = vld [vmem:[%s11217_s10 + $0x19cc] ss:$16 sps:$4 sm:$0xff]   ;;  %v10579_v35 = vld [vmem:[%s11217_s10 + $0x19c0] ss:$16 sps:$4 sm:$0xff]  }
 0x367   : > { %7049 = vmatpush1.bf16.msra.mxu0 %v10487_v27  ;;  %7705 = vmatpush1.bf16.msra.mxu1 %v10490_v36  ;;  %v10582_v27 = vld [vmem:[%s11217_s10 + $0x19c8] ss:$16 sps:$4 sm:$0xff]   ;;  %v10587_v36 = vld [vmem:[%s11217_s10 + $0x19e4] ss:$16 sps:$4 sm:$0xff]  }
 0x368   : > { %7059 = vmatprep.subr.bf16.mxu0 %v10497_v30  ;;  %7715 = vmatprep.subr.bf16.mxu1 %v10500_v38  ;;  %v10590_v30 = vld [vmem:[%s11217_s10 + $0x19ec] ss:$16 sps:$4 sm:$0xff]   ;;  %v10585_v38 = vld [vmem:[%s11217_s10 + $0x19e0] ss:$16 sps:$4 sm:$0xff]  }
 0x36a   : > { %7051 = vmatmul.mubr.bf16.vlgmr.msra.gmra.mrb[0].mxu0 %v8104_v39  ;;  %7707 = vmatmul.mubr.bf16.vlgmr.msra.gmra.mrb[0].mxu1 %v8104_v39  ;;  %v10588_v39 = vld [vmem:[%s11217_s10 + $0x19e8] ss:$16 sps:$4 sm:$0xff]  }
 0x36b   : > { %7060 = vmatpush1.bf16.msra.mxu0 %v10495_v34  ;;  %7716 = vmatpush1.bf16.msra.mxu1 %v10498_v41  ;;  %v10595_v34 = vld [vmem:[%s11217_s10 + $0x1a04] ss:$16 sps:$4 sm:$0xff]   ;;  %v10598_v41 = vld [vmem:[%s11217_s10 + $0x1a0c] ss:$16 sps:$4 sm:$0xff]  }
 0x36c   : > { %7061 = vmatprep.subr.bf16.mxu0 %v10503_v42  ;;  %7717 = vmatprep.subr.bf16.mxu1 %v10506_v43  ;;  %v8106_v42 = vcombine.low %v12108_v40, %v12108_v40  ;;  %v12181_v43 = vld [vmem:[%s12415_s0 + $0x68] sm:$0xff] }
 0x36d   : > { %7091 = vmatprep.mubr.bf16.mxu0 %v8107_v37  ;;  %7747 = vmatprep.mubr.bf16.mxu1 %v8107_v37  ;;  %v10593_v37 = vld [vmem:[%s11217_s10 + $0x1a00] ss:$16 sps:$4 sm:$0xff]   ;;  %v8109_v40 = vcombine.high %v12181_v43, %v12181_v43 }
 0x36f   : > { %7062 = vmatpush1.bf16.msra.mxu0 %v10501_v44  ;;  %7718 = vmatpush1.bf16.msra.mxu1 %v10504_v45  ;;  %v10596_v44 = vld [vmem:[%s11217_s10 + $0x1a08] ss:$16 sps:$4 sm:$0xff]   ;;  %v10601_v45 = vld [vmem:[%s11217_s10 + $0x1a24] ss:$16 sps:$4 sm:$0xff]  }
 0x370   : > { %7063 = vmatprep.subr.bf16.mxu0 %v10509_v46  ;;  %7719 = vmatprep.subr.bf16.mxu1 %v10512_v47  ;;  %v10604_v46 = vld [vmem:[%s11217_s10 + $0x1a2c] ss:$16 sps:$4 sm:$0xff]   ;;  %v10599_v47 = vld [vmem:[%s11217_s10 + $0x1a20] ss:$16 sps:$4 sm:$0xff]  }
 0x373   : > { %7064 = vmatpush1.bf16.msra.mxu0 %v10507_v48  ;;  %7720 = vmatpush1.bf16.msra.mxu1 %v10510_v49  ;;  %v10602_v48 = vld [vmem:[%s11217_s10 + $0x1a28] ss:$16 sps:$4 sm:$0xff]   ;;  %v10607_v49 = vld [vmem:[%s11217_s10 + $0x1a44] ss:$16 sps:$4 sm:$0xff]  }
 0x374   : > { %7065 = vmatprep.subr.bf16.mxu0 %v10515_v50  ;;  %7721 = vmatprep.subr.bf16.mxu1 %v10518_v51  ;;  %v10610_v50 = vld [vmem:[%s11217_s10 + $0x1a4c] ss:$16 sps:$4 sm:$0xff]   ;;  %v10605_v51 = vld [vmem:[%s11217_s10 + $0x1a40] ss:$16 sps:$4 sm:$0xff]  }
 0x377   : > { %7066 = vmatpush1.bf16.msra.mxu0 %v10513_v52  ;;  %7722 = vmatpush1.bf16.msra.mxu1 %v10516_v53  ;;  %v10608_v52 = vld [vmem:[%s11217_s10 + $0x1a48] ss:$16 sps:$4 sm:$0xff]   ;;  %v10613_v53 = vld [vmem:[%s11217_s10 + $0x1a64] ss:$16 sps:$4 sm:$0xff]  }
 0x378   : > { %7067 = vmatprep.subr.bf16.mxu0 %v10521_v54  ;;  %7723 = vmatprep.subr.bf16.mxu1 %v10524_v55  ;;  %v10616_v54 = vld [vmem:[%s11217_s10 + $0x1a6c] ss:$16 sps:$4 sm:$0xff]   ;;  %v10611_v55 = vld [vmem:[%s11217_s10 + $0x1a60] ss:$16 sps:$4 sm:$0xff]  }
 0x37b   : > { %7068 = vmatpush1.bf16.msra.mxu0 %v10519_v56  ;;  %7724 = vmatpush1.bf16.msra.mxu1 %v10522_v57  ;;  %v10614_v56 = vld [vmem:[%s11217_s10 + $0x1a68] ss:$16 sps:$4 sm:$0xff]   ;;  %v10619_v57 = vld [vmem:[%s11217_s10 + $0x1a84] ss:$16 sps:$4 sm:$0xff]  }
 0x37c   : > { %7069 = vmatprep.subr.bf16.mxu0 %v10527_v58  ;;  %7725 = vmatprep.subr.bf16.mxu1 %v10530_v59  ;;  %v10622_v58 = vld [vmem:[%s11217_s10 + $0x1a8c] ss:$16 sps:$4 sm:$0xff]   ;;  %v10617_v59 = vld [vmem:[%s11217_s10 + $0x1a80] ss:$16 sps:$4 sm:$0xff]  }
 0x37f   : > { %7070 = vmatpush1.bf16.msra.mxu0 %v10525_v60  ;;  %7726 = vmatpush1.bf16.msra.mxu1 %v10528_v61  ;;  %v10620_v60 = vld [vmem:[%s11217_s10 + $0x1a88] ss:$16 sps:$4 sm:$0xff]   ;;  %v10625_v61 = vld [vmem:[%s11217_s10 + $0x1aa4] ss:$16 sps:$4 sm:$0xff]  }
 0x380   : > { %7071 = vmatprep.subr.bf16.mxu0 %v10533_v62  ;;  %7727 = vmatprep.subr.bf16.mxu1 %v10536_v63  ;;  %v10628_v62 = vld [vmem:[%s11217_s10 + $0x1aac] ss:$16 sps:$4 sm:$0xff]   ;;  %v10623_v63 = vld [vmem:[%s11217_s10 + $0x1aa0] ss:$16 sps:$4 sm:$0xff]  }
 0x383   : > { %7072 = vmatpush1.bf16.msra.mxu0 %v10531_v0  ;;  %7728 = vmatpush1.bf16.msra.mxu1 %v10534_v1  ;;  %v10626_v0 = vld [vmem:[%s11217_s10 + $0x1aa8] ss:$16 sps:$4 sm:$0xff]   ;;  %v10631_v1 = vld [vmem:[%s11217_s10 + $0x1ac4] ss:$16 sps:$4 sm:$0xff]  }
 0x384   : > { %7073 = vmatprep.subr.bf16.mxu0 %v10539_v2  ;;  %7729 = vmatprep.subr.bf16.mxu1 %v10542_v3  ;;  %v10634_v2 = vld [vmem:[%s11217_s10 + $0x1acc] ss:$16 sps:$4 sm:$0xff]   ;;  %v10629_v3 = vld [vmem:[%s11217_s10 + $0x1ac0] ss:$16 sps:$4 sm:$0xff]  }
 0x387   : > { %7074 = vmatpush1.bf16.msra.mxu0 %v10537_v4  ;;  %7730 = vmatpush1.bf16.msra.mxu1 %v10540_v5  ;;  %v10632_v4 = vld [vmem:[%s11217_s10 + $0x1ac8] ss:$16 sps:$4 sm:$0xff]   ;;  %v10637_v5 = vld [vmem:[%s11217_s10 + $0x1ae4] ss:$16 sps:$4 sm:$0xff]  }
 0x388   : > { %7075 = vmatprep.subr.bf16.mxu0 %v10545_v6  ;;  %7731 = vmatprep.subr.bf16.mxu1 %v10548_v7  ;;  %v10640_v6 = vld [vmem:[%s11217_s10 + $0x1aec] ss:$16 sps:$4 sm:$0xff]   ;;  %v10635_v7 = vld [vmem:[%s11217_s10 + $0x1ae0] ss:$16 sps:$4 sm:$0xff]  }
 0x38b   : > { %7076 = vmatpush1.bf16.msra.mxu0 %v10543_v8  ;;  %7732 = vmatpush1.bf16.msra.mxu1 %v10546_v9  ;;  %v10638_v8 = vld [vmem:[%s11217_s10 + $0x1ae8] ss:$16 sps:$4 sm:$0xff]   ;;  %v10643_v9 = vld [vmem:[%s11217_s10 + $0x1b04] ss:$16 sps:$4 sm:$0xff]  }
 0x38c   : > { %7077 = vmatprep.subr.bf16.mxu0 %v10551_v10  ;;  %7733 = vmatprep.subr.bf16.mxu1 %v10554_v12  ;;  %v10646_v10 = vld [vmem:[%s11217_s10 + $0x1b0c] ss:$16 sps:$4 sm:$0xff]   ;;  %v10641_v12 = vld [vmem:[%s11217_s10 + $0x1b00] ss:$16 sps:$4 sm:$0xff]  }
 0x38f   : > { %7078 = vmatpush1.bf16.msra.mxu0 %v10549_v13  ;;  %7734 = vmatpush1.bf16.msra.mxu1 %v10552_v15  ;;  %v10644_v13 = vld [vmem:[%s11217_s10 + $0x1b08] ss:$16 sps:$4 sm:$0xff]   ;;  %v10649_v15 = vld [vmem:[%s11217_s10 + $0x1b24] ss:$16 sps:$4 sm:$0xff]  }
 0x390   : > { %7079 = vmatprep.subr.bf16.mxu0 %v10557_v16  ;;  %7735 = vmatprep.subr.bf16.mxu1 %v10560_v11  ;;  %v10652_v16 = vld [vmem:[%s11217_s10 + $0x1b2c] ss:$16 sps:$4 sm:$0xff]   ;;  %v10647_v11 = vld [vmem:[%s11217_s10 + $0x1b20] ss:$16 sps:$4 sm:$0xff]  }
 0x393   : > { %7080 = vmatpush1.bf16.msra.mxu0 %v10555_v19  ;;  %7736 = vmatpush1.bf16.msra.mxu1 %v10558_v20  ;;  %v10650_v19 = vld [vmem:[%s11217_s10 + $0x1b28] ss:$16 sps:$4 sm:$0xff]   ;;  %v10655_v20 = vld [vmem:[%s11217_s10 + $0x1b44] ss:$16 sps:$4 sm:$0xff]  }
 0x394   : > { %7081 = vmatprep.subr.bf16.mxu0 %v10563_v14  ;;  %7737 = vmatprep.subr.bf16.mxu1 %v10566_v22  ;;  %v10658_v14 = vld [vmem:[%s11217_s10 + $0x1b4c] ss:$16 sps:$4 sm:$0xff]   ;;  %v10653_v22 = vld [vmem:[%s11217_s10 + $0x1b40] ss:$16 sps:$4 sm:$0xff]  }
 0x397   : > { %7082 = vmatpush1.bf16.msra.mxu0 %v10561_v23  ;;  %7738 = vmatpush1.bf16.msra.mxu1 %v10564_v17  ;;  %v10656_v23 = vld [vmem:[%s11217_s10 + $0x1b48] ss:$16 sps:$4 sm:$0xff]   ;;  %v10661_v17 = vld [vmem:[%s11217_s10 + $0x1b64] ss:$16 sps:$4 sm:$0xff]  }
 0x398   : > { %7083 = vmatprep.subr.bf16.mxu0 %v10569_v25  ;;  %7739 = vmatprep.subr.bf16.mxu1 %v10572_v26  ;;  %v10664_v25 = vld [vmem:[%s11217_s10 + $0x1b6c] ss:$16 sps:$4 sm:$0xff]   ;;  %v10659_v26 = vld [vmem:[%s11217_s10 + $0x1b60] ss:$16 sps:$4 sm:$0xff]  }
 0x39b   : > { %7084 = vmatpush1.bf16.msra.mxu0 %v10567_v18  ;;  %7740 = vmatpush1.bf16.msra.mxu1 %v10570_v28  ;;  %v10662_v18 = vld [vmem:[%s11217_s10 + $0x1b68] ss:$16 sps:$4 sm:$0xff]   ;;  %v10667_v28 = vld [vmem:[%s11217_s10 + $0x1b84] ss:$16 sps:$4 sm:$0xff]  }
 0x39c   : > { %7085 = vmatprep.subr.bf16.mxu0 %v10575_v29  ;;  %7741 = vmatprep.subr.bf16.mxu1 %v10578_v21  ;;  %v10670_v29 = vld [vmem:[%s11217_s10 + $0x1b8c] ss:$16 sps:$4 sm:$0xff]   ;;  %v10665_v21 = vld [vmem:[%s11217_s10 + $0x1b80] ss:$16 sps:$4 sm:$0xff]  }
 0x39f   : > { %7086 = vmatpush1.bf16.msra.mxu0 %v10573_v31  ;;  %7742 = vmatpush1.bf16.msra.mxu1 %v10576_v32  ;;  %v10668_v31 = vld [vmem:[%s11217_s10 + $0x1b88] ss:$16 sps:$4 sm:$0xff]   ;;  %v10673_v32 = vld [vmem:[%s11217_s10 + $0x1ba4] ss:$16 sps:$4 sm:$0xff]  }
 0x3a0   : > { %7087 = vmatprep.subr.bf16.mxu0 %v10581_v24  ;;  %7743 = vmatprep.subr.bf16.mxu1 %v10584_v33  ;;  %v10676_v24 = vld [vmem:[%s11217_s10 + $0x1bac] ss:$16 sps:$4 sm:$0xff]   ;;  %v10671_v33 = vld [vmem:[%s11217_s10 + $0x1ba0] ss:$16 sps:$4 sm:$0xff]  }
 0x3a3   : > { %7088 = vmatpush1.bf16.msra.mxu0 %v10579_v35  ;;  %7744 = vmatpush1.bf16.msra.mxu1 %v10582_v27  ;;  %v10674_v35 = vld [vmem:[%s11217_s10 + $0x1ba8] ss:$16 sps:$4 sm:$0xff]   ;;  %v10679_v27 = vld [vmem:[%s11217_s10 + $0x1bc4] ss:$16 sps:$4 sm:$0xff]  }
 0x3a4   : > { %7089 = vmatprep.subr.bf16.mxu0 %v10587_v36  ;;  %7745 = vmatprep.subr.bf16.mxu1 %v10590_v30  ;;  %v10682_v36 = vld [vmem:[%s11217_s10 + $0x1bcc] ss:$16 sps:$4 sm:$0xff]   ;;  %v10677_v30 = vld [vmem:[%s11217_s10 + $0x1bc0] ss:$16 sps:$4 sm:$0xff]  }
 0x3a7   : > { %7090 = vmatpush1.bf16.msra.mxu0 %v10585_v38  ;;  %7746 = vmatpush1.bf16.msra.mxu1 %v10588_v39  ;;  %v10680_v38 = vld [vmem:[%s11217_s10 + $0x1bc8] ss:$16 sps:$4 sm:$0xff]   ;;  %v10685_v39 = vld [vmem:[%s11217_s10 + $0x1be4] ss:$16 sps:$4 sm:$0xff]  }
 0x3a8   : > { %7100 = vmatprep.subr.bf16.mxu0 %v10595_v34  ;;  %7756 = vmatprep.subr.bf16.mxu1 %v10598_v41  ;;  %v10688_v34 = vld [vmem:[%s11217_s10 + $0x1bec] ss:$16 sps:$4 sm:$0xff]   ;;  %v10683_v41 = vld [vmem:[%s11217_s10 + $0x1be0] ss:$16 sps:$4 sm:$0xff]  }
 0x3aa   : > { %7092 = vmatmul.mubr.bf16.vlgmr.msra.gmra.mrb[0].mxu0 %v8106_v42  ;;  %7748 = vmatmul.mubr.bf16.vlgmr.msra.gmra.mrb[0].mxu1 %v8106_v42  ;;  %v10686_v42 = vld [vmem:[%s11217_s10 + $0x1be8] ss:$16 sps:$4 sm:$0xff]  }
 0x3ab   : > { %7101 = vmatpush1.bf16.msra.mxu0 %v10593_v37  ;;  %7757 = vmatpush1.bf16.msra.mxu1 %v10596_v44  ;;  %v10693_v37 = vld [vmem:[%s11217_s10 + $0x1c04] ss:$16 sps:$4 sm:$0xff]   ;;  %v10696_v44 = vld [vmem:[%s11217_s10 + $0x1c0c] ss:$16 sps:$4 sm:$0xff]  }
 0x3ac   : > { %7102 = vmatprep.subr.bf16.mxu0 %v10601_v45  ;;  %7758 = vmatprep.subr.bf16.mxu1 %v10604_v46  ;;  %v8108_v45 = vcombine.low %v12181_v43, %v12181_v43  ;;  %v12254_v46 = vld [vmem:[%s12415_s0 + $0x70] sm:$0xff] }
 0x3ad   : > { %7132 = vmatprep.mubr.bf16.mxu0 %v8109_v40  ;;  %7788 = vmatprep.mubr.bf16.mxu1 %v8109_v40  ;;  %v10691_v40 = vld [vmem:[%s11217_s10 + $0x1c00] ss:$16 sps:$4 sm:$0xff]   ;;  %v8111_v43 = vcombine.high %v12254_v46, %v12254_v46 }
 0x3af   : > { %7103 = vmatpush1.bf16.msra.mxu0 %v10599_v47  ;;  %7759 = vmatpush1.bf16.msra.mxu1 %v10602_v48  ;;  %v10694_v47 = vld [vmem:[%s11217_s10 + $0x1c08] ss:$16 sps:$4 sm:$0xff]   ;;  %v10699_v48 = vld [vmem:[%s11217_s10 + $0x1c24] ss:$16 sps:$4 sm:$0xff]  }
 0x3b0   : > { %7104 = vmatprep.subr.bf16.mxu0 %v10607_v49  ;;  %7760 = vmatprep.subr.bf16.mxu1 %v10610_v50  ;;  %v10702_v49 = vld [vmem:[%s11217_s10 + $0x1c2c] ss:$16 sps:$4 sm:$0xff]   ;;  %v10697_v50 = vld [vmem:[%s11217_s10 + $0x1c20] ss:$16 sps:$4 sm:$0xff]  }
 0x3b3   : > { %7105 = vmatpush1.bf16.msra.mxu0 %v10605_v51  ;;  %7761 = vmatpush1.bf16.msra.mxu1 %v10608_v52  ;;  %v10700_v51 = vld [vmem:[%s11217_s10 + $0x1c28] ss:$16 sps:$4 sm:$0xff]   ;;  %v10705_v52 = vld [vmem:[%s11217_s10 + $0x1c44] ss:$16 sps:$4 sm:$0xff]  }
 0x3b4   : > { %7106 = vmatprep.subr.bf16.mxu0 %v10613_v53  ;;  %7762 = vmatprep.subr.bf16.mxu1 %v10616_v54  ;;  %v10708_v53 = vld [vmem:[%s11217_s10 + $0x1c4c] ss:$16 sps:$4 sm:$0xff]   ;;  %v10703_v54 = vld [vmem:[%s11217_s10 + $0x1c40] ss:$16 sps:$4 sm:$0xff]  }
 0x3b7   : > { %7107 = vmatpush1.bf16.msra.mxu0 %v10611_v55  ;;  %7763 = vmatpush1.bf16.msra.mxu1 %v10614_v56  ;;  %v10706_v55 = vld [vmem:[%s11217_s10 + $0x1c48] ss:$16 sps:$4 sm:$0xff]   ;;  %v10711_v56 = vld [vmem:[%s11217_s10 + $0x1c64] ss:$16 sps:$4 sm:$0xff]  }
 0x3b8   : > { %7108 = vmatprep.subr.bf16.mxu0 %v10619_v57  ;;  %7764 = vmatprep.subr.bf16.mxu1 %v10622_v58  ;;  %v10714_v57 = vld [vmem:[%s11217_s10 + $0x1c6c] ss:$16 sps:$4 sm:$0xff]   ;;  %v10709_v58 = vld [vmem:[%s11217_s10 + $0x1c60] ss:$16 sps:$4 sm:$0xff]  }
 0x3bb   : > { %7109 = vmatpush1.bf16.msra.mxu0 %v10617_v59  ;;  %7765 = vmatpush1.bf16.msra.mxu1 %v10620_v60  ;;  %v10712_v59 = vld [vmem:[%s11217_s10 + $0x1c68] ss:$16 sps:$4 sm:$0xff]   ;;  %v10717_v60 = vld [vmem:[%s11217_s10 + $0x1c84] ss:$16 sps:$4 sm:$0xff]  }
 0x3bc   : > { %7110 = vmatprep.subr.bf16.mxu0 %v10625_v61  ;;  %7766 = vmatprep.subr.bf16.mxu1 %v10628_v62  ;;  %v10720_v61 = vld [vmem:[%s11217_s10 + $0x1c8c] ss:$16 sps:$4 sm:$0xff]   ;;  %v10715_v62 = vld [vmem:[%s11217_s10 + $0x1c80] ss:$16 sps:$4 sm:$0xff]  }
 0x3bf   : > { %7111 = vmatpush1.bf16.msra.mxu0 %v10623_v63  ;;  %7767 = vmatpush1.bf16.msra.mxu1 %v10626_v0  ;;  %v10718_v63 = vld [vmem:[%s11217_s10 + $0x1c88] ss:$16 sps:$4 sm:$0xff]   ;;  %v10723_v0 = vld [vmem:[%s11217_s10 + $0x1ca4] ss:$16 sps:$4 sm:$0xff]  }
 0x3c0   : > { %7112 = vmatprep.subr.bf16.mxu0 %v10631_v1  ;;  %7768 = vmatprep.subr.bf16.mxu1 %v10634_v2  ;;  %v10726_v1 = vld [vmem:[%s11217_s10 + $0x1cac] ss:$16 sps:$4 sm:$0xff]   ;;  %v10721_v2 = vld [vmem:[%s11217_s10 + $0x1ca0] ss:$16 sps:$4 sm:$0xff]  }
 0x3c3   : > { %7113 = vmatpush1.bf16.msra.mxu0 %v10629_v3  ;;  %7769 = vmatpush1.bf16.msra.mxu1 %v10632_v4  ;;  %v10724_v3 = vld [vmem:[%s11217_s10 + $0x1ca8] ss:$16 sps:$4 sm:$0xff]   ;;  %v10729_v4 = vld [vmem:[%s11217_s10 + $0x1cc4] ss:$16 sps:$4 sm:$0xff]  }
 0x3c4   : > { %7114 = vmatprep.subr.bf16.mxu0 %v10637_v5  ;;  %7770 = vmatprep.subr.bf16.mxu1 %v10640_v6  ;;  %v10732_v5 = vld [vmem:[%s11217_s10 + $0x1ccc] ss:$16 sps:$4 sm:$0xff]   ;;  %v10727_v6 = vld [vmem:[%s11217_s10 + $0x1cc0] ss:$16 sps:$4 sm:$0xff]  }
 0x3c7   : > { %7115 = vmatpush1.bf16.msra.mxu0 %v10635_v7  ;;  %7771 = vmatpush1.bf16.msra.mxu1 %v10638_v8  ;;  %v10730_v7 = vld [vmem:[%s11217_s10 + $0x1cc8] ss:$16 sps:$4 sm:$0xff]   ;;  %v10735_v8 = vld [vmem:[%s11217_s10 + $0x1ce4] ss:$16 sps:$4 sm:$0xff]  }
 0x3c8   : > { %7116 = vmatprep.subr.bf16.mxu0 %v10643_v9  ;;  %7772 = vmatprep.subr.bf16.mxu1 %v10646_v10  ;;  %v10738_v9 = vld [vmem:[%s11217_s10 + $0x1cec] ss:$16 sps:$4 sm:$0xff]   ;;  %v10733_v10 = vld [vmem:[%s11217_s10 + $0x1ce0] ss:$16 sps:$4 sm:$0xff]  }
 0x3cb   : > { %7117 = vmatpush1.bf16.msra.mxu0 %v10641_v12  ;;  %7773 = vmatpush1.bf16.msra.mxu1 %v10644_v13  ;;  %v10736_v12 = vld [vmem:[%s11217_s10 + $0x1ce8] ss:$16 sps:$4 sm:$0xff]   ;;  %v10741_v13 = vld [vmem:[%s11217_s10 + $0x1d04] ss:$16 sps:$4 sm:$0xff]  }
 0x3cc   : > { %7118 = vmatprep.subr.bf16.mxu0 %v10649_v15  ;;  %7774 = vmatprep.subr.bf16.mxu1 %v10652_v16  ;;  %v10744_v15 = vld [vmem:[%s11217_s10 + $0x1d0c] ss:$16 sps:$4 sm:$0xff]   ;;  %v10739_v16 = vld [vmem:[%s11217_s10 + $0x1d00] ss:$16 sps:$4 sm:$0xff]  }
 0x3cf   : > { %7119 = vmatpush1.bf16.msra.mxu0 %v10647_v11  ;;  %7775 = vmatpush1.bf16.msra.mxu1 %v10650_v19  ;;  %v10742_v11 = vld [vmem:[%s11217_s10 + $0x1d08] ss:$16 sps:$4 sm:$0xff]   ;;  %v10747_v19 = vld [vmem:[%s11217_s10 + $0x1d24] ss:$16 sps:$4 sm:$0xff]  }
 0x3d0   : > { %7120 = vmatprep.subr.bf16.mxu0 %v10655_v20  ;;  %7776 = vmatprep.subr.bf16.mxu1 %v10658_v14  ;;  %v10750_v20 = vld [vmem:[%s11217_s10 + $0x1d2c] ss:$16 sps:$4 sm:$0xff]   ;;  %v10745_v14 = vld [vmem:[%s11217_s10 + $0x1d20] ss:$16 sps:$4 sm:$0xff]  }
 0x3d3   : > { %7121 = vmatpush1.bf16.msra.mxu0 %v10653_v22  ;;  %7777 = vmatpush1.bf16.msra.mxu1 %v10656_v23  ;;  %v10748_v22 = vld [vmem:[%s11217_s10 + $0x1d28] ss:$16 sps:$4 sm:$0xff]   ;;  %v10753_v23 = vld [vmem:[%s11217_s10 + $0x1d44] ss:$16 sps:$4 sm:$0xff]  }
 0x3d4   : > { %7122 = vmatprep.subr.bf16.mxu0 %v10661_v17  ;;  %7778 = vmatprep.subr.bf16.mxu1 %v10664_v25  ;;  %v10756_v17 = vld [vmem:[%s11217_s10 + $0x1d4c] ss:$16 sps:$4 sm:$0xff]   ;;  %v10751_v25 = vld [vmem:[%s11217_s10 + $0x1d40] ss:$16 sps:$4 sm:$0xff]  }
 0x3d7   : > { %7123 = vmatpush1.bf16.msra.mxu0 %v10659_v26  ;;  %7779 = vmatpush1.bf16.msra.mxu1 %v10662_v18  ;;  %v10754_v26 = vld [vmem:[%s11217_s10 + $0x1d48] ss:$16 sps:$4 sm:$0xff]   ;;  %v10759_v18 = vld [vmem:[%s11217_s10 + $0x1d64] ss:$16 sps:$4 sm:$0xff]  }
 0x3d8   : > { %7124 = vmatprep.subr.bf16.mxu0 %v10667_v28  ;;  %7780 = vmatprep.subr.bf16.mxu1 %v10670_v29  ;;  %v10762_v28 = vld [vmem:[%s11217_s10 + $0x1d6c] ss:$16 sps:$4 sm:$0xff]   ;;  %v10757_v29 = vld [vmem:[%s11217_s10 + $0x1d60] ss:$16 sps:$4 sm:$0xff]  }
 0x3db   : > { %7125 = vmatpush1.bf16.msra.mxu0 %v10665_v21  ;;  %7781 = vmatpush1.bf16.msra.mxu1 %v10668_v31  ;;  %v10760_v21 = vld [vmem:[%s11217_s10 + $0x1d68] ss:$16 sps:$4 sm:$0xff]   ;;  %v10765_v31 = vld [vmem:[%s11217_s10 + $0x1d84] ss:$16 sps:$4 sm:$0xff]  }
 0x3dc   : > { %7126 = vmatprep.subr.bf16.mxu0 %v10673_v32  ;;  %7782 = vmatprep.subr.bf16.mxu1 %v10676_v24  ;;  %v10768_v32 = vld [vmem:[%s11217_s10 + $0x1d8c] ss:$16 sps:$4 sm:$0xff]   ;;  %v10763_v24 = vld [vmem:[%s11217_s10 + $0x1d80] ss:$16 sps:$4 sm:$0xff]  }
 0x3df   : > { %7127 = vmatpush1.bf16.msra.mxu0 %v10671_v33  ;;  %7783 = vmatpush1.bf16.msra.mxu1 %v10674_v35  ;;  %v10766_v33 = vld [vmem:[%s11217_s10 + $0x1d88] ss:$16 sps:$4 sm:$0xff]   ;;  %v10771_v35 = vld [vmem:[%s11217_s10 + $0x1da4] ss:$16 sps:$4 sm:$0xff]  }
 0x3e0   : > { %7128 = vmatprep.subr.bf16.mxu0 %v10679_v27  ;;  %7784 = vmatprep.subr.bf16.mxu1 %v10682_v36  ;;  %v10774_v27 = vld [vmem:[%s11217_s10 + $0x1dac] ss:$16 sps:$4 sm:$0xff]   ;;  %v10769_v36 = vld [vmem:[%s11217_s10 + $0x1da0] ss:$16 sps:$4 sm:$0xff]  }
 0x3e3   : > { %7129 = vmatpush1.bf16.msra.mxu0 %v10677_v30  ;;  %7785 = vmatpush1.bf16.msra.mxu1 %v10680_v38  ;;  %v10772_v30 = vld [vmem:[%s11217_s10 + $0x1da8] ss:$16 sps:$4 sm:$0xff]   ;;  %v10777_v38 = vld [vmem:[%s11217_s10 + $0x1dc4] ss:$16 sps:$4 sm:$0xff]  }
 0x3e4   : > { %7130 = vmatprep.subr.bf16.mxu0 %v10685_v39  ;;  %7786 = vmatprep.subr.bf16.mxu1 %v10688_v34  ;;  %v10780_v39 = vld [vmem:[%s11217_s10 + $0x1dcc] ss:$16 sps:$4 sm:$0xff]   ;;  %v10775_v34 = vld [vmem:[%s11217_s10 + $0x1dc0] ss:$16 sps:$4 sm:$0xff]  }
 0x3e7   : > { %7131 = vmatpush1.bf16.msra.mxu0 %v10683_v41  ;;  %7787 = vmatpush1.bf16.msra.mxu1 %v10686_v42  ;;  %v10778_v41 = vld [vmem:[%s11217_s10 + $0x1dc8] ss:$16 sps:$4 sm:$0xff]   ;;  %v10783_v42 = vld [vmem:[%s11217_s10 + $0x1de4] ss:$16 sps:$4 sm:$0xff]  }
 0x3e8   : > { %7141 = vmatprep.subr.bf16.mxu0 %v10693_v37  ;;  %7797 = vmatprep.subr.bf16.mxu1 %v10696_v44  ;;  %v10786_v37 = vld [vmem:[%s11217_s10 + $0x1dec] ss:$16 sps:$4 sm:$0xff]   ;;  %v10781_v44 = vld [vmem:[%s11217_s10 + $0x1de0] ss:$16 sps:$4 sm:$0xff]  }
 0x3ea   : > { %7133 = vmatmul.mubr.bf16.vlgmr.msra.gmra.mrb[0].mxu0 %v8108_v45  ;;  %7789 = vmatmul.mubr.bf16.vlgmr.msra.gmra.mrb[0].mxu1 %v8108_v45  ;;  %v10784_v45 = vld [vmem:[%s11217_s10 + $0x1de8] ss:$16 sps:$4 sm:$0xff]  }
 0x3eb   : > { %7142 = vmatpush1.bf16.msra.mxu0 %v10691_v40  ;;  %7798 = vmatpush1.bf16.msra.mxu1 %v10694_v47  ;;  %v10791_v40 = vld [vmem:[%s11217_s10 + $0x1e04] ss:$16 sps:$4 sm:$0xff]   ;;  %v10794_v47 = vld [vmem:[%s11217_s10 + $0x1e0c] ss:$16 sps:$4 sm:$0xff]  }
 0x3ec   : > { %7143 = vmatprep.subr.bf16.mxu0 %v10699_v48  ;;  %7799 = vmatprep.subr.bf16.mxu1 %v10702_v49  ;;  %v8110_v48 = vcombine.low %v12254_v46, %v12254_v46  ;;  %v12327_v49 = vld [vmem:[%s12415_s0 + $0x78] sm:$0xff] }
 0x3ed   : > { %7173 = vmatprep.mubr.bf16.mxu0 %v8111_v43  ;;  %7829 = vmatprep.mubr.bf16.mxu1 %v8111_v43  ;;  %v10789_v43 = vld [vmem:[%s11217_s10 + $0x1e00] ss:$16 sps:$4 sm:$0xff]   ;;  %v8113_v46 = vcombine.high %v12327_v49, %v12327_v49 }
 0x3ef   : > { %7144 = vmatpush1.bf16.msra.mxu0 %v10697_v50  ;;  %7800 = vmatpush1.bf16.msra.mxu1 %v10700_v51  ;;  %v10792_v50 = vld [vmem:[%s11217_s10 + $0x1e08] ss:$16 sps:$4 sm:$0xff]   ;;  %v10797_v51 = vld [vmem:[%s11217_s10 + $0x1e24] ss:$16 sps:$4 sm:$0xff]  }
 0x3f0   : > { %7145 = vmatprep.subr.bf16.mxu0 %v10705_v52  ;;  %7801 = vmatprep.subr.bf16.mxu1 %v10708_v53  ;;  %v10800_v52 = vld [vmem:[%s11217_s10 + $0x1e2c] ss:$16 sps:$4 sm:$0xff]   ;;  %v10795_v53 = vld [vmem:[%s11217_s10 + $0x1e20] ss:$16 sps:$4 sm:$0xff]  }
 0x3f3   : > { %7146 = vmatpush1.bf16.msra.mxu0 %v10703_v54  ;;  %7802 = vmatpush1.bf16.msra.mxu1 %v10706_v55  ;;  %v10798_v54 = vld [vmem:[%s11217_s10 + $0x1e28] ss:$16 sps:$4 sm:$0xff]   ;;  %v10803_v55 = vld [vmem:[%s11217_s10 + $0x1e44] ss:$16 sps:$4 sm:$0xff]  }
 0x3f4   : > { %7147 = vmatprep.subr.bf16.mxu0 %v10711_v56  ;;  %7803 = vmatprep.subr.bf16.mxu1 %v10714_v57  ;;  %v10806_v56 = vld [vmem:[%s11217_s10 + $0x1e4c] ss:$16 sps:$4 sm:$0xff]   ;;  %v10801_v57 = vld [vmem:[%s11217_s10 + $0x1e40] ss:$16 sps:$4 sm:$0xff]  }
 0x3f7   : > { %7148 = vmatpush1.bf16.msra.mxu0 %v10709_v58  ;;  %7804 = vmatpush1.bf16.msra.mxu1 %v10712_v59  ;;  %v10804_v58 = vld [vmem:[%s11217_s10 + $0x1e48] ss:$16 sps:$4 sm:$0xff]   ;;  %v10809_v59 = vld [vmem:[%s11217_s10 + $0x1e64] ss:$16 sps:$4 sm:$0xff]  }
 0x3f8   : > { %7149 = vmatprep.subr.bf16.mxu0 %v10717_v60  ;;  %7805 = vmatprep.subr.bf16.mxu1 %v10720_v61  ;;  %v10812_v60 = vld [vmem:[%s11217_s10 + $0x1e6c] ss:$16 sps:$4 sm:$0xff]   ;;  %v10807_v61 = vld [vmem:[%s11217_s10 + $0x1e60] ss:$16 sps:$4 sm:$0xff]  }
 0x3fb   : > { %7150 = vmatpush1.bf16.msra.mxu0 %v10715_v62  ;;  %7806 = vmatpush1.bf16.msra.mxu1 %v10718_v63  ;;  %v10810_v62 = vld [vmem:[%s11217_s10 + $0x1e68] ss:$16 sps:$4 sm:$0xff]   ;;  %v10815_v63 = vld [vmem:[%s11217_s10 + $0x1e84] ss:$16 sps:$4 sm:$0xff]  }
 0x3fc   : > { %7151 = vmatprep.subr.bf16.mxu0 %v10723_v0  ;;  %7807 = vmatprep.subr.bf16.mxu1 %v10726_v1  ;;  %v10818_v0 = vld [vmem:[%s11217_s10 + $0x1e8c] ss:$16 sps:$4 sm:$0xff]   ;;  %v10813_v1 = vld [vmem:[%s11217_s10 + $0x1e80] ss:$16 sps:$4 sm:$0xff]  }
 0x3ff   : > { %7152 = vmatpush1.bf16.msra.mxu0 %v10721_v2  ;;  %7808 = vmatpush1.bf16.msra.mxu1 %v10724_v3  ;;  %v10816_v2 = vld [vmem:[%s11217_s10 + $0x1e88] ss:$16 sps:$4 sm:$0xff]   ;;  %v10821_v3 = vld [vmem:[%s11217_s10 + $0x1ea4] ss:$16 sps:$4 sm:$0xff]  }
 0x400   : > { %7153 = vmatprep.subr.bf16.mxu0 %v10729_v4  ;;  %7809 = vmatprep.subr.bf16.mxu1 %v10732_v5  ;;  %v10824_v4 = vld [vmem:[%s11217_s10 + $0x1eac] ss:$16 sps:$4 sm:$0xff]   ;;  %v10819_v5 = vld [vmem:[%s11217_s10 + $0x1ea0] ss:$16 sps:$4 sm:$0xff]  }
 0x403   : > { %7154 = vmatpush1.bf16.msra.mxu0 %v10727_v6  ;;  %7810 = vmatpush1.bf16.msra.mxu1 %v10730_v7  ;;  %v10822_v6 = vld [vmem:[%s11217_s10 + $0x1ea8] ss:$16 sps:$4 sm:$0xff]   ;;  %v10827_v7 = vld [vmem:[%s11217_s10 + $0x1ec4] ss:$16 sps:$4 sm:$0xff]  }
 0x404   : > { %7155 = vmatprep.subr.bf16.mxu0 %v10735_v8  ;;  %7811 = vmatprep.subr.bf16.mxu1 %v10738_v9  ;;  %v10830_v8 = vld [vmem:[%s11217_s10 + $0x1ecc] ss:$16 sps:$4 sm:$0xff]   ;;  %v10825_v9 = vld [vmem:[%s11217_s10 + $0x1ec0] ss:$16 sps:$4 sm:$0xff]  }
 0x407   : > { %7156 = vmatpush1.bf16.msra.mxu0 %v10733_v10  ;;  %7812 = vmatpush1.bf16.msra.mxu1 %v10736_v12  ;;  %v10828_v10 = vld [vmem:[%s11217_s10 + $0x1ec8] ss:$16 sps:$4 sm:$0xff]   ;;  %v10833_v12 = vld [vmem:[%s11217_s10 + $0x1ee4] ss:$16 sps:$4 sm:$0xff]  }
 0x408   : > { %7157 = vmatprep.subr.bf16.mxu0 %v10741_v13  ;;  %7813 = vmatprep.subr.bf16.mxu1 %v10744_v15  ;;  %v10836_v13 = vld [vmem:[%s11217_s10 + $0x1eec] ss:$16 sps:$4 sm:$0xff]   ;;  %v10831_v15 = vld [vmem:[%s11217_s10 + $0x1ee0] ss:$16 sps:$4 sm:$0xff]  }
 0x40b   : > { %7158 = vmatpush1.bf16.msra.mxu0 %v10739_v16  ;;  %7814 = vmatpush1.bf16.msra.mxu1 %v10742_v11  ;;  %v10834_v16 = vld [vmem:[%s11217_s10 + $0x1ee8] ss:$16 sps:$4 sm:$0xff]   ;;  %v10839_v11 = vld [vmem:[%s11217_s10 + $0x1f04] ss:$16 sps:$4 sm:$0xff]  }
 0x40c   : > { %7159 = vmatprep.subr.bf16.mxu0 %v10747_v19  ;;  %7815 = vmatprep.subr.bf16.mxu1 %v10750_v20  ;;  %v10842_v19 = vld [vmem:[%s11217_s10 + $0x1f0c] ss:$16 sps:$4 sm:$0xff]   ;;  %v10837_v20 = vld [vmem:[%s11217_s10 + $0x1f00] ss:$16 sps:$4 sm:$0xff]  }
 0x40f   : > { %7160 = vmatpush1.bf16.msra.mxu0 %v10745_v14  ;;  %7816 = vmatpush1.bf16.msra.mxu1 %v10748_v22  ;;  %v10840_v14 = vld [vmem:[%s11217_s10 + $0x1f08] ss:$16 sps:$4 sm:$0xff]   ;;  %v10845_v22 = vld [vmem:[%s11217_s10 + $0x1f24] ss:$16 sps:$4 sm:$0xff]  }
 0x410   : > { %7161 = vmatprep.subr.bf16.mxu0 %v10753_v23  ;;  %7817 = vmatprep.subr.bf16.mxu1 %v10756_v17  ;;  %v10848_v23 = vld [vmem:[%s11217_s10 + $0x1f2c] ss:$16 sps:$4 sm:$0xff]   ;;  %v10843_v17 = vld [vmem:[%s11217_s10 + $0x1f20] ss:$16 sps:$4 sm:$0xff]  }
 0x413   : > { %7162 = vmatpush1.bf16.msra.mxu0 %v10751_v25  ;;  %7818 = vmatpush1.bf16.msra.mxu1 %v10754_v26  ;;  %v10846_v25 = vld [vmem:[%s11217_s10 + $0x1f28] ss:$16 sps:$4 sm:$0xff]   ;;  %v10851_v26 = vld [vmem:[%s11217_s10 + $0x1f44] ss:$16 sps:$4 sm:$0xff]  }
 0x414   : > { %7163 = vmatprep.subr.bf16.mxu0 %v10759_v18  ;;  %7819 = vmatprep.subr.bf16.mxu1 %v10762_v28  ;;  %v10854_v18 = vld [vmem:[%s11217_s10 + $0x1f4c] ss:$16 sps:$4 sm:$0xff]   ;;  %v10849_v28 = vld [vmem:[%s11217_s10 + $0x1f40] ss:$16 sps:$4 sm:$0xff]  }
 0x417   : > { %7164 = vmatpush1.bf16.msra.mxu0 %v10757_v29  ;;  %7820 = vmatpush1.bf16.msra.mxu1 %v10760_v21  ;;  %v10852_v29 = vld [vmem:[%s11217_s10 + $0x1f48] ss:$16 sps:$4 sm:$0xff]   ;;  %v10857_v21 = vld [vmem:[%s11217_s10 + $0x1f64] ss:$16 sps:$4 sm:$0xff]  }
 0x418   : > { %7165 = vmatprep.subr.bf16.mxu0 %v10765_v31  ;;  %7821 = vmatprep.subr.bf16.mxu1 %v10768_v32  ;;  %v10860_v31 = vld [vmem:[%s11217_s10 + $0x1f6c] ss:$16 sps:$4 sm:$0xff]   ;;  %v10855_v32 = vld [vmem:[%s11217_s10 + $0x1f60] ss:$16 sps:$4 sm:$0xff]  }
 0x41b   : > { %7166 = vmatpush1.bf16.msra.mxu0 %v10763_v24  ;;  %7822 = vmatpush1.bf16.msra.mxu1 %v10766_v33  ;;  %v10858_v24 = vld [vmem:[%s11217_s10 + $0x1f68] ss:$16 sps:$4 sm:$0xff]   ;;  %v10863_v33 = vld [vmem:[%s11217_s10 + $0x1f84] ss:$16 sps:$4 sm:$0xff]  }
 0x41c   : > { %7167 = vmatprep.subr.bf16.mxu0 %v10771_v35  ;;  %7823 = vmatprep.subr.bf16.mxu1 %v10774_v27  ;;  %v10866_v35 = vld [vmem:[%s11217_s10 + $0x1f8c] ss:$16 sps:$4 sm:$0xff]   ;;  %v10861_v27 = vld [vmem:[%s11217_s10 + $0x1f80] ss:$16 sps:$4 sm:$0xff]  }
 0x41f   : > { %7168 = vmatpush1.bf16.msra.mxu0 %v10769_v36  ;;  %7824 = vmatpush1.bf16.msra.mxu1 %v10772_v30  ;;  %v10864_v36 = vld [vmem:[%s11217_s10 + $0x1f88] ss:$16 sps:$4 sm:$0xff]   ;;  %v10869_v30 = vld [vmem:[%s11217_s10 + $0x1fa4] ss:$16 sps:$4 sm:$0xff]  }
 0x420   : > { %7169 = vmatprep.subr.bf16.mxu0 %v10777_v38  ;;  %7825 = vmatprep.subr.bf16.mxu1 %v10780_v39  ;;  %v10872_v38 = vld [vmem:[%s11217_s10 + $0x1fac] ss:$16 sps:$4 sm:$0xff]   ;;  %v10867_v39 = vld [vmem:[%s11217_s10 + $0x1fa0] ss:$16 sps:$4 sm:$0xff]  }
 0x423   : > { %7170 = vmatpush1.bf16.msra.mxu0 %v10775_v34  ;;  %7826 = vmatpush1.bf16.msra.mxu1 %v10778_v41  ;;  %v10870_v34 = vld [vmem:[%s11217_s10 + $0x1fa8] ss:$16 sps:$4 sm:$0xff]   ;;  %v10875_v41 = vld [vmem:[%s11217_s10 + $0x1fc4] ss:$16 sps:$4 sm:$0xff]  }
 0x424   : > { %7171 = vmatprep.subr.bf16.mxu0 %v10783_v42  ;;  %7827 = vmatprep.subr.bf16.mxu1 %v10786_v37  ;;  %v10878_v42 = vld [vmem:[%s11217_s10 + $0x1fcc] ss:$16 sps:$4 sm:$0xff]   ;;  %v10873_v37 = vld [vmem:[%s11217_s10 + $0x1fc0] ss:$16 sps:$4 sm:$0xff]  }
 0x427   : > { %7172 = vmatpush1.bf16.msra.mxu0 %v10781_v44  ;;  %7828 = vmatpush1.bf16.msra.mxu1 %v10784_v45  ;;  %v10876_v44 = vld [vmem:[%s11217_s10 + $0x1fc8] ss:$16 sps:$4 sm:$0xff]   ;;  %v10881_v45 = vld [vmem:[%s11217_s10 + $0x1fe4] ss:$16 sps:$4 sm:$0xff]  }
 0x428   : > { %7182 = vmatprep.subr.bf16.mxu0 %v10791_v40  ;;  %7838 = vmatprep.subr.bf16.mxu1 %v10794_v47  ;;  %v10884_v40 = vld [vmem:[%s11217_s10 + $0x1fec] ss:$16 sps:$4 sm:$0xff]   ;;  %v10879_v47 = vld [vmem:[%s11217_s10 + $0x1fe0] ss:$16 sps:$4 sm:$0xff]  }
 0x42a   : > { %7174 = vmatmul.mubr.bf16.vlgmr.msra.gmra.mrb[0].mxu0 %v8110_v48  ;;  %7830 = vmatmul.mubr.bf16.vlgmr.msra.gmra.mrb[0].mxu1 %v8110_v48  ;;  %v10882_v48 = vld [vmem:[%s11217_s10 + $0x1fe8] ss:$16 sps:$4 sm:$0xff]   ;;  %s251_s10 = scalar_lea.vmem [#allocation6], %s8078_s12 }
 0x42b   : > { %7183 = vmatpush1.bf16.msra.mxu0 %v10789_v43  ;;  %7839 = vmatpush1.bf16.msra.mxu1 %v10792_v50  ;;  %v8112_v43 = vcombine.low %v12327_v49, %v12327_v49  ;;  %v7881_v50 = vlaneseq }
 0x42c   : > { %7184 = vmatprep.subr.bf16.mxu0 %v10797_v51  ;;  %7840 = vmatprep.subr.bf16.mxu1 %v10800_v52 }
 0x42d   : > { %7214 = vmatprep.mubr.bf16.mxu0 %v8113_v46  ;;  %7870 = vmatprep.mubr.bf16.mxu1 %v8113_v46  ;;  %v7882_v51 = vshrl.u32 %v7881_v50, 7 }
 0x42f   : > { %7185 = vmatpush1.bf16.msra.mxu0 %v10795_v53  ;;  %7841 = vmatpush1.bf16.msra.mxu1 %v10798_v54  ;;  %v7883_v52 = vsub.s32 0, %v7882_v51  ;;  %v7891_v46 = vsub.s32 2, %v7882_v51  ;;  %v7879_v53 = vld [vmem:[%s11227_s9] sm:$0xf]  ;;  %v7887_v54 = vsub.s32 1, %v7882_v51  ;;  %s293_s9 = scalar_lea.vmem %s12419_s4, %s8081_s19 }
 0x430   : > { %7186 = vmatprep.subr.bf16.mxu0 %v10803_v55  ;;  %7842 = vmatprep.subr.bf16.mxu1 %v10806_v56  ;;  %v7895_v55 = vsub.s32 3, %v7882_v51  ;;  %v7905_v56 = vld [vmem:[%s251_s10] sm:$0xf] }
 0x432   : > { %v7896_v49 = vrot.slane %v7879_v53, %v7895_v55 }
 0x433   : > { %7187 = vmatpush1.bf16.msra.mxu0 %v10801_v57  ;;  %7843 = vmatpush1.bf16.msra.mxu1 %v10804_v58  ;;  %v7884_v57 = vrot.slane %v7879_v53, %v7883_v52  ;;  %v7892_v58 = vrot.slane %v7879_v53, %v7891_v46 }
 0x434   : > { %7188 = vmatprep.subr.bf16.mxu0 %v10809_v59  ;;  %7844 = vmatprep.subr.bf16.mxu1 %v10812_v60  ;;  %v7888_v59 = vrot.slane %v7879_v53, %v7887_v54  ;;  %v7910_v60 = vrot.slane %v7905_v56, %v7883_v52 }
 0x437   : > { %7189 = vmatpush1.bf16.msra.mxu0 %v10807_v61  ;;  %7845 = vmatpush1.bf16.msra.mxu1 %v10810_v62  ;;  %v7918_v61 = vrot.slane %v7905_v56, %v7891_v46 }
 0x438   : > { %7190 = vmatprep.subr.bf16.mxu0 %v10815_v63  ;;  %7846 = vmatprep.subr.bf16.mxu1 %v10818_v0  ;;  %v7914_v0 = vrot.slane %v7905_v56, %v7887_v54 }
 0x43b   : > { %7191 = vmatpush1.bf16.msra.mxu0 %v10813_v1  ;;  %7847 = vmatpush1.bf16.msra.mxu1 %v10816_v2  ;;  %v7922_v1 = vrot.slane %v7905_v56, %v7895_v55 }
 0x43c   : > { %7192 = vmatprep.subr.bf16.mxu0 %v10821_v3  ;;  %7848 = vmatprep.subr.bf16.mxu1 %v10824_v4 }
 0x43f   : > { %7193 = vmatpush1.bf16.msra.mxu0 %v10819_v5  ;;  %7849 = vmatpush1.bf16.msra.mxu1 %v10822_v6 }
 0x440   : > { %7194 = vmatprep.subr.bf16.mxu0 %v10827_v7  ;;  %7850 = vmatprep.subr.bf16.mxu1 %v10830_v8 }
 0x443   : > { %7195 = vmatpush1.bf16.msra.mxu0 %v10825_v9  ;;  %7851 = vmatpush1.bf16.msra.mxu1 %v10828_v10 }
 0x444   : > { %7196 = vmatprep.subr.bf16.mxu0 %v10833_v12  ;;  %7852 = vmatprep.subr.bf16.mxu1 %v10836_v13 }
 0x447   : > { %7197 = vmatpush1.bf16.msra.mxu0 %v10831_v15  ;;  %7853 = vmatpush1.bf16.msra.mxu1 %v10834_v16 }
 0x448   : > { %7198 = vmatprep.subr.bf16.mxu0 %v10839_v11  ;;  %7854 = vmatprep.subr.bf16.mxu1 %v10842_v19 }
 0x44b   : > { %7199 = vmatpush1.bf16.msra.mxu0 %v10837_v20  ;;  %7855 = vmatpush1.bf16.msra.mxu1 %v10840_v14 }
 0x44c   : > { %7200 = vmatprep.subr.bf16.mxu0 %v10845_v22  ;;  %7856 = vmatprep.subr.bf16.mxu1 %v10848_v23 }
 0x44f   : > { %7201 = vmatpush1.bf16.msra.mxu0 %v10843_v17  ;;  %7857 = vmatpush1.bf16.msra.mxu1 %v10846_v25 }
 0x450   : > { %7202 = vmatprep.subr.bf16.mxu0 %v10851_v26  ;;  %7858 = vmatprep.subr.bf16.mxu1 %v10854_v18 }
 0x453   : > { %7203 = vmatpush1.bf16.msra.mxu0 %v10849_v28  ;;  %7859 = vmatpush1.bf16.msra.mxu1 %v10852_v29 }
 0x454   : > { %7204 = vmatprep.subr.bf16.mxu0 %v10857_v21  ;;  %7860 = vmatprep.subr.bf16.mxu1 %v10860_v31 }
 0x457   : > { %7205 = vmatpush1.bf16.msra.mxu0 %v10855_v32  ;;  %7861 = vmatpush1.bf16.msra.mxu1 %v10858_v24 }
 0x458   : > { %7206 = vmatprep.subr.bf16.mxu0 %v10863_v33  ;;  %7862 = vmatprep.subr.bf16.mxu1 %v10866_v35 }
 0x45b   : > { %7207 = vmatpush1.bf16.msra.mxu0 %v10861_v27  ;;  %7863 = vmatpush1.bf16.msra.mxu1 %v10864_v36 }
 0x45c   : > { %7208 = vmatprep.subr.bf16.mxu0 %v10869_v30  ;;  %7864 = vmatprep.subr.bf16.mxu1 %v10872_v38 }
 0x45f   : > { %7209 = vmatpush1.bf16.msra.mxu0 %v10867_v39  ;;  %7865 = vmatpush1.bf16.msra.mxu1 %v10870_v34 }
 0x460   : > { %7210 = vmatprep.subr.bf16.mxu0 %v10875_v41  ;;  %7866 = vmatprep.subr.bf16.mxu1 %v10878_v42 }
 0x463   : > { %7211 = vmatpush1.bf16.msra.mxu0 %v10873_v37  ;;  %7867 = vmatpush1.bf16.msra.mxu1 %v10876_v44 }
 0x464   : > { %7212 = vmatprep.subr.bf16.mxu0 %v10881_v45  ;;  %7868 = vmatprep.subr.bf16.mxu1 %v10884_v40 }
 0x467   : > { %7213 = vmatpush1.bf16.msra.mxu0 %v10879_v47  ;;  %7869 = vmatpush1.bf16.msra.mxu1 %v10882_v48 }
 0x46a   : > { %7215 = vmatmul.mubr.bf16.vlgmr.msra.gmra.mrb[0].mxu0 %v8112_v43  ;;  %7871 = vmatmul.mubr.bf16.vlgmr.msra.gmra.mrb[0].mxu1 %v8112_v43 }
 0x53d   : > { %v7216_v62 = vpop.f32.mrb[0].mxu0  ;;  %v7872_v63 = vpop.f32.mrb[0].mxu1 }
 0x53e   : > { %v7901_v2 = vmul.f32 %v7884_v57, %v7216_v62  ;;  %v7903_v3 = vmul.f32 %v7892_v58, %v7872_v63  ;;  %v7218_v4 = vpop.f32.mrb[1].mxu0  ;;  %v7874_v5 = vpop.f32.mrb[1].mxu1 }
 0x53f   : > { %v7902_v6 = vmul.f32 %v7888_v59, %v7218_v4  ;;  %v7904_v7 = vmul.f32 %v7896_v49, %v7874_v5  ;;  %v7220_v8 = vpop.f32.mrb[2].mxu0  ;;  %v7876_v9 = vpop.f32.mrb[2].mxu1 }
 0x540   : > { %v7927_v10 = vadd.f32 %v7910_v60, %v7901_v2  ;;  %v7929_v12 = vadd.f32 %v7918_v61, %v7903_v3  ;;  %v7221_v13 = vpop.f32.mrb[3].mxu0  ;;  %v7877_v15 = vpop.f32.mrb[3].mxu1 }
 0x541   : > { %v7928_v16 = vadd.f32 %v7914_v0, %v7902_v6  ;;  %v7930_v11 = vadd.f32 %v7922_v1, %v7904_v7 }
 0x542   : > { %v7931_v19 = vmax.f32 %v7927_v10, 0.0  ;;  %v7933_v20 = vmax.f32 %v7929_v12, 0.0 }
 0x543   : > { %v7932_v14 = vmax.f32 %v7928_v16, 0.0  ;;  %v7934_v22 = vmax.f32 %v7930_v11, 0.0 }
 0x545   : > { %v9145_v23 = vpack.c.bf16 %v7932_v14, %v7931_v19  ;;  %v9146_v17 = vpack.c.bf16 %v7934_v22, %v7933_v20 }
 0x547   : > { %7951 = vst [vmem:[%s293_s9] sm:$0xff] %v9145_v23  ;;  %7952 = vst [vmem:[%s293_s9 + $0x8] sm:$0xff] %v9146_v17 }
 0x548 PF: > { %p17_p0 = scmp.ge.s32.totalorder %s11070_s20, 10   ;;  %s12429_s15 = smov %s11007_s16 }
 0x549   : > { %s12430_s16 = smov %s11011_s17  ;;  %s12431_s17 = smov %s11080_s23 }
 0x54a   : > { %s12432_s18 = smov %s11070_s20  ;;  %19 = sbr.rel (!%p17_p0) target bundleno = 5 (0x5), region = 100 }
 0x551   :  { %7975 = vsyncpa [#allocation3], 1 }
 0x552   :  { %7977 = vsyncpa [#allocation3 + $0x1], 1 }
 0x553   :  { %7978 = vsyncpa [#allocation5], 1 }
 0x554   :  { %7980 = vsyncpa [#allocation5 + $0x1], 1 }

</bundles_post_ra>
